<compile_context>
chip_gen: v6e
topology: v6e:2x2x1
jax: 0.10.0
libtpu: 0.0.40
codegen_flags: <defaults>
</compile_context>

<pallas_src>
import jax
import jax.numpy as jnp
from jax import lax
from jax.experimental import pallas as pl
from jax.experimental.pallas import tpu as pltpu

# Problem size: AttentionAugmentation2d(in_channels, size=16, dk=16, dv=16, n_heads=4)
B = 2                    # batch
S = 16                   # spatial size (H = W = S)
DK = 16                  # total query/key channels
DV = 16                  # total value channels (module's final reshape needs dv == dk)
NH = 4                   # heads
DKPH = DK // NH          # 4
DVPH = DV // NH          # 4
HW = S * S               # 256  (lane axis)
CIN = 2 * DK + DV        # 48 channels in the input tensor X
KREL = 2 * S * DKPH      # 128  (contraction width of the relative-logit matmul)
SCALE = float(DKPH) ** -0.5   # 0.5 (exact in every float format)

_HIGHEST = jax.lax.Precision.HIGHEST   # used only in the pure-JAX reference


# --------------------------------------------------------------------------- #
# Kernel: one batch per grid step, all NH heads resident (unrolled loop).
# --------------------------------------------------------------------------- #
def aa2d_kernel(x_ref, rel_ref, mask_ref, tile_ref, o_ref):
    mask = mask_ref[...]            # (HW, KREL) f32, entries {0,1}
    tile = tile_ref[...]            # (DKPH, KREL) bf16, entries {0,1}

    # ---- build the stacked LHS of the shared-RHS relative-logit matmul ----
    q_heads, qrel_parts = [], []
    for h in range(NH):
        # q is consumed in its native channel-major layout; *SCALE is exact.
        q_h = (x_ref[0, h * DKPH:(h + 1) * DKPH, :] * SCALE).astype(jnp.bfloat16)
        q_heads.append(q_h)                                        # (DKPH, HW)
        # qtile[i, c] = q_h[c % DKPH, i]   (contraction replaces a transpose)
        qtile = lax.dot_general(q_h, tile, (((0,), (0,)), ((), ())),
                                preferred_element_type=jnp.float32)  # (HW, KREL)
        qrel_parts.append((qtile * mask).astype(jnp.bfloat16))       # exact (0/1 mask)

    qrel = jnp.concatenate(qrel_parts, axis=0)                        # (NH*HW, KREL) bf16
    # rel[h*HW + i, j] = sum_c qrel_h[i, c] * rel_mat[c, j]   (single MXU matmul)
    rel = jnp.dot(qrel, rel_ref[...],
                  preferred_element_type=jnp.float32)                 # (NH*HW, HW) f32

    # ---- per-head content logits, softmax, and value matmul ----
    for h in range(NH):
        q_h = q_heads[h]
        k_h = x_ref[0, DK + h * DKPH:DK + (h + 1) * DKPH, :].astype(jnp.bfloat16)
        v_h = x_ref[0, 2 * DK + h * DVPH:2 * DK + (h + 1) * DVPH, :].astype(jnp.bfloat16)

        # content logits[i, j] = sum_d k[d, i] * q[d, j]     -> (HW, HW), lane-dense
        logits = lax.dot_general(k_h, q_h, (((0,), (0,)), ((), ())),
                                 preferred_element_type=jnp.float32)
        logits = logits + rel[h * HW:(h + 1) * HW]

        # softmax over the last (lane) axis, exactly like the reference (dim=-1).
        # Element-wise math kept in f32 (v5e has no bf16 VPU/EUP path).
        m = jnp.max(logits, axis=-1, keepdims=True)
        e = jnp.exp(logits - m)
        denom = jnp.sum(e, axis=-1, keepdims=True)
        w = (e * pl.reciprocal(denom, approx=True)).astype(jnp.bfloat16)

        # attn[d, j] = sum_i v[d, i] * w[i, j]                -> (DVPH, HW)
        attn = lax.dot_general(v_h, w, (((1,), (0,)), ((), ())),
                               preferred_element_type=jnp.float32)
        o_ref[0, h * DVPH:(h + 1) * DVPH, :] = attn


# --------------------------------------------------------------------------- #
# Data-independent constants for the relative-logit matmul (hoisted out of the
# kernel; depend only on rel_w / rel_h parameters and S).
# --------------------------------------------------------------------------- #
def _relative_constants(rel_w, rel_h):
    j = jnp.arange(HW)
    yj, xj = j % S, j // S
    pos = jnp.arange(S)
    # rel_mat[yi*DKPH + d,            j] = rel_w[S-1 + yj - yi, d]
    # rel_mat[S*DKPH + xi*DKPH + d,   j] = rel_h[S-1 + xj - xi, d]
    idx_w = (S - 1) + yj[None, :] - pos[:, None]                      # (S, HW)
    idx_h = (S - 1) + xj[None, :] - pos[:, None]
    rw = jnp.transpose(rel_w[idx_w], (0, 2, 1)).reshape(S * DKPH, HW)
    rh = jnp.transpose(rel_h[idx_h], (0, 2, 1)).reshape(S * DKPH, HW)
    rel_mat = jnp.concatenate([rw, rh], axis=0).astype(jnp.bfloat16)  # (KREL, HW)

    i = jnp.arange(HW)
    grp = jnp.arange(S * DKPH) // DKPH
    mask = jnp.concatenate(
        [i[:, None] % S == grp[None, :],        # select the yi block (rel_w part)
         i[:, None] // S == grp[None, :]],      # select the xi block (rel_h part)
        axis=1).astype(jnp.float32)                                   # (HW, KREL)

    tile = (jnp.arange(KREL)[None, :] % DKPH ==
            jnp.arange(DKPH)[:, None]).astype(jnp.bfloat16)           # (DKPH, KREL)
    return rel_mat, mask, tile


# --------------------------------------------------------------------------- #
# Wrapper: NCHW input in, NCHW output out (same as the torch module).
# --------------------------------------------------------------------------- #
@jax.jit
def attention_augmentation_2d(x, rel_w, rel_h):
    b = x.shape[0]
    xf = x.reshape(b, CIN, HW).astype(jnp.float32)       # pure reshape, HW on lanes
    rel_mat, mask, tile = _relative_constants(rel_w, rel_h)

    attn = pl.pallas_call(
        aa2d_kernel,
        out_shape=jax.ShapeDtypeStruct((b, NH * DVPH, HW), jnp.float32),
        grid=(b,),
        in_specs=[
            pl.BlockSpec((1, CIN, HW), lambda bi: (bi, 0, 0)),   # x (q|k|v stacked)
            pl.BlockSpec((KREL, HW), lambda bi: (0, 0)),          # rel_mat (bf16)
            pl.BlockSpec((HW, KREL), lambda bi: (0, 0)),          # mask (f32)
            pl.BlockSpec((DKPH, KREL), lambda bi: (0, 0)),        # tile (bf16)
        ],
        out_specs=pl.BlockSpec((1, NH * DVPH, HW), lambda bi: (bi, 0, 0)),
        compiler_params=pltpu.CompilerParams(
            dimension_semantics=("parallel",)),
        cost_estimate=pl.CostEstimate(flops=150_000_000,
                                      transcendentals=525_000,
                                      bytes_accessed=400_000),
    )(xf, rel_mat, mask, tile)

    # combine_heads epilogue (exact row-major reinterpretation, tiny tensor)
    attn = attn.reshape(b, NH, S, S, DK // NH)
    attn = jnp.transpose(attn, (0, 1, 4, 2, 3))
    return attn.reshape(b, NH * (DK // NH), S, S)


# --------------------------------------------------------------------------- #
# Pure-JAX transcription of the torch forward() for validation (f32, HIGHEST).
# --------------------------------------------------------------------------- #
def _rel_to_abs(t):
    bb, nh, L, _ = t.shape
    t = jnp.concatenate([t, jnp.zeros((bb, nh, L, 1), t.dtype)], axis=3)
    t = t.reshape(bb, nh, L * 2 * L)
    t = jnp.concatenate([t, jnp.zeros((bb, nh, L - 1), t.dtype)], axis=2)
    t = t.reshape(bb, nh, L + 1, 2 * L - 1)
    return t[:, :, :L, L - 1:]


def _relative_logits_1d(q5, weights, perm):
    rl = jnp.einsum('bhxyd,md->bhxym', q5, weights, precision=_HIGHEST)
    rl = rl.reshape(-1, NH * S, S, 2 * S - 1)
    rl = _rel_to_abs(rl)
    rl = rl.reshape(-1, NH, S, S, S)
    rl = jnp.tile(rl[:, :, :, None, :, :], (1, 1, 1, S, 1, 1))
    rl = jnp.transpose(rl, perm)
    return rl.reshape(-1, NH, S * S, S * S)


def reference(x, rel_w, rel_h):
    b = x.shape[0]
    q, k, v = x[:, :DK], x[:, DK:2 * DK], x[:, 2 * DK:]
    q = q.reshape(b, NH, DKPH, S, S) * SCALE
    k = k.reshape(b, NH, DKPH, S, S)
    v = v.reshape(b, NH, DVPH, S, S)
    fq = q.reshape(b, NH, DKPH, HW)
    fk = k.reshape(b, NH, DKPH, HW)
    fv = v.reshape(b, NH, DVPH, HW)
    logits = jnp.einsum('bhdi,bhdj->bhij', fk, fq, precision=_HIGHEST)
    qp = jnp.transpose(q, (0, 1, 3, 4, 2))
    logits = logits + _relative_logits_1d(qp, rel_w, (0, 1, 2, 4, 3, 5))
    logits = logits + _relative_logits_1d(jnp.transpose(qp, (0, 1, 3, 2, 4)),
                                          rel_h, (0, 1, 4, 2, 5, 3))
    weights = jax.nn.softmax(logits, axis=-1)
    attn = jnp.einsum('bhdi,bhij->bhdj', fv, weights, precision=_HIGHEST)
    attn = attn.reshape(b, NH, S, S, DK // NH)
    attn = jnp.transpose(attn, (0, 1, 4, 2, 3))
    return attn.reshape(b, NH * (DK // NH), S, S)


if __name__ == "__main__":
    key = jax.random.PRNGKey(0)
    kx, kw, kh = jax.random.split(key, 3)
    x = jax.random.normal(kx, (B, CIN, S, S), jnp.float32)           # NCHW, like PyTorch
    rel_w = jax.random.uniform(kw, (2 * S - 1, DKPH), jnp.float32)   # ~ torch.rand
    rel_h = jax.random.uniform(kh, (2 * S - 1, DKPH), jnp.float32)

    out = jax.block_until_ready(attention_augmentation_2d(x, rel_w, rel_h))
    ref = jax.block_until_ready(reference(x, rel_w, rel_h))

    assert out.shape == (B, DK, S, S)
    assert bool(jnp.all(jnp.isfinite(out)))
    # bf16 MXU operands with f32 accumulation: ~1e-3 typical / <1e-2 worst-case error
    assert bool(jnp.allclose(out, ref, rtol=1e-2, atol=1e-2))
    print("KERNEL_OK")
</pallas_src>

<mosaic_0001>
module attributes {stable_mosaic.version = 11 : i64} {
  func.func @aa2d_kernel(%arg0: i32, %arg1: memref<1x48x256xf32, #tpu.memory_space<vmem>>, %arg2: memref<128x256xbf16, #tpu.memory_space<vmem>>, %arg3: memref<256x128xf32, #tpu.memory_space<vmem>>, %arg4: memref<4x128xbf16, #tpu.memory_space<vmem>>, %arg5: memref<1x16x256xf32, #tpu.memory_space<vmem>>) attributes {dimension_semantics = [#tpu.dimension_semantics<parallel>], iteration_bounds = array<i64: 2>, scalar_prefetch = 0 : i64, scratch_operands = 0 : i64, tpu.core_type = #tpu.core_type<tc>, window_params = [{transform_indices = @transform_0, window_bounds = array<i64: 1, 48, 256>}, {pipeline_mode = #tpu.pipeline_mode<synchronous>, transform_indices = @transform_1, window_bounds = array<i64: 128, 256>}, {pipeline_mode = #tpu.pipeline_mode<synchronous>, transform_indices = @transform_2, window_bounds = array<i64: 256, 128>}, {pipeline_mode = #tpu.pipeline_mode<synchronous>, transform_indices = @transform_3, window_bounds = array<i64: 4, 128>}, {transform_indices = @transform_4, window_bounds = array<i64: 1, 16, 256>}]} {
    %c0 = arith.constant 0 : index
    %c0_0 = arith.constant 0 : index
    %0 = vector.load %arg3[%c0, %c0_0] : memref<256x128xf32, #tpu.memory_space<vmem>>, vector<256x128xf32>
    %c0_1 = arith.constant 0 : index
    %c0_2 = arith.constant 0 : index
    %1 = vector.load %arg4[%c0_1, %c0_2] : memref<4x128xbf16, #tpu.memory_space<vmem>>, vector<4x128xbf16>
    %c0_3 = arith.constant 0 : index
    %c0_4 = arith.constant 0 : index
    %c0_5 = arith.constant 0 : index
    %2 = vector.load %arg1[%c0_3, %c0_4, %c0_5] : memref<1x48x256xf32, #tpu.memory_space<vmem>>, vector<1x4x256xf32>
    %3 = vector.shape_cast %2 : vector<1x4x256xf32> to vector<4x256xf32>
    %cst = arith.constant 5.000000e-01 : f32
    %4 = vector.broadcast %cst : f32 to vector<4x256xf32>
    %5 = arith.mulf %3, %4 : vector<4x256xf32>
    %6 = arith.truncf %5 : vector<4x256xf32> to vector<4x256xbf16>
    %cst_6 = arith.constant dense<0.000000e+00> : vector<256x128xf32>
    %7 = tpu.matmul %6, %1, %cst_6 {dimension_numbers = #tpu.dot_dimension_numbers<[0], [0], [1], [1], [0, 1, 1, 1], [], []>} : vector<4x256xbf16>, vector<4x128xbf16>, vector<256x128xf32> -> vector<256x128xf32>
    %8 = arith.mulf %7, %0 : vector<256x128xf32>
    %9 = arith.truncf %8 : vector<256x128xf32> to vector<256x128xbf16>
    %c0_7 = arith.constant 0 : index
    %c4 = arith.constant 4 : index
    %c0_8 = arith.constant 0 : index
    %10 = vector.load %arg1[%c0_7, %c4, %c0_8] : memref<1x48x256xf32, #tpu.memory_space<vmem>>, vector<1x4x256xf32>
    %11 = vector.shape_cast %10 : vector<1x4x256xf32> to vector<4x256xf32>
    %cst_9 = arith.constant 5.000000e-01 : f32
    %12 = vector.broadcast %cst_9 : f32 to vector<4x256xf32>
    %13 = arith.mulf %11, %12 : vector<4x256xf32>
    %14 = arith.truncf %13 : vector<4x256xf32> to vector<4x256xbf16>
    %cst_10 = arith.constant dense<0.000000e+00> : vector<256x128xf32>
    %15 = tpu.matmul %14, %1, %cst_10 {dimension_numbers = #tpu.dot_dimension_numbers<[0], [0], [1], [1], [0, 1, 1, 1], [], []>} : vector<4x256xbf16>, vector<4x128xbf16>, vector<256x128xf32> -> vector<256x128xf32>
    %16 = arith.mulf %15, %0 : vector<256x128xf32>
    %17 = arith.truncf %16 : vector<256x128xf32> to vector<256x128xbf16>
    %c0_11 = arith.constant 0 : index
    %c8 = arith.constant 8 : index
    %c0_12 = arith.constant 0 : index
    %18 = vector.load %arg1[%c0_11, %c8, %c0_12] : memref<1x48x256xf32, #tpu.memory_space<vmem>>, vector<1x4x256xf32>
    %19 = vector.shape_cast %18 : vector<1x4x256xf32> to vector<4x256xf32>
    %cst_13 = arith.constant 5.000000e-01 : f32
    %20 = vector.broadcast %cst_13 : f32 to vector<4x256xf32>
    %21 = arith.mulf %19, %20 : vector<4x256xf32>
    %22 = arith.truncf %21 : vector<4x256xf32> to vector<4x256xbf16>
    %cst_14 = arith.constant dense<0.000000e+00> : vector<256x128xf32>
    %23 = tpu.matmul %22, %1, %cst_14 {dimension_numbers = #tpu.dot_dimension_numbers<[0], [0], [1], [1], [0, 1, 1, 1], [], []>} : vector<4x256xbf16>, vector<4x128xbf16>, vector<256x128xf32> -> vector<256x128xf32>
    %24 = arith.mulf %23, %0 : vector<256x128xf32>
    %25 = arith.truncf %24 : vector<256x128xf32> to vector<256x128xbf16>
    %c0_15 = arith.constant 0 : index
    %c12 = arith.constant 12 : index
    %c0_16 = arith.constant 0 : index
    %26 = vector.load %arg1[%c0_15, %c12, %c0_16] : memref<1x48x256xf32, #tpu.memory_space<vmem>>, vector<1x4x256xf32>
    %27 = vector.shape_cast %26 : vector<1x4x256xf32> to vector<4x256xf32>
    %cst_17 = arith.constant 5.000000e-01 : f32
    %28 = vector.broadcast %cst_17 : f32 to vector<4x256xf32>
    %29 = arith.mulf %27, %28 : vector<4x256xf32>
    %30 = arith.truncf %29 : vector<4x256xf32> to vector<4x256xbf16>
    %cst_18 = arith.constant dense<0.000000e+00> : vector<256x128xf32>
    %31 = tpu.matmul %30, %1, %cst_18 {dimension_numbers = #tpu.dot_dimension_numbers<[0], [0], [1], [1], [0, 1, 1, 1], [], []>} : vector<4x256xbf16>, vector<4x128xbf16>, vector<256x128xf32> -> vector<256x128xf32>
    %32 = arith.mulf %31, %0 : vector<256x128xf32>
    %33 = arith.truncf %32 : vector<256x128xf32> to vector<256x128xbf16>
    %34 = tpu.concatenate %9, %17, %25, %33 in 0 : vector<256x128xbf16>, vector<256x128xbf16>, vector<256x128xbf16>, vector<256x128xbf16> -> vector<1024x128xbf16>
    %c0_19 = arith.constant 0 : index
    %c0_20 = arith.constant 0 : index
    %35 = vector.load %arg2[%c0_19, %c0_20] : memref<128x256xbf16, #tpu.memory_space<vmem>>, vector<128x256xbf16>
    %cst_21 = arith.constant dense<0.000000e+00> : vector<1024x256xf32>
    %36 = tpu.matmul %34, %35, %cst_21 {dimension_numbers = #tpu.dot_dimension_numbers<[1], [0], [0], [1], [0, 0, 1, 1], [], []>} : vector<1024x128xbf16>, vector<128x256xbf16>, vector<1024x256xf32> -> vector<1024x256xf32>
    %c0_22 = arith.constant 0 : index
    %c16 = arith.constant 16 : index
    %c0_23 = arith.constant 0 : index
    %37 = vector.load %arg1[%c0_22, %c16, %c0_23] : memref<1x48x256xf32, #tpu.memory_space<vmem>>, vector<1x4x256xf32>
    %38 = vector.shape_cast %37 : vector<1x4x256xf32> to vector<4x256xf32>
    %39 = arith.truncf %38 : vector<4x256xf32> to vector<4x256xbf16>
    %c0_24 = arith.constant 0 : index
    %c32 = arith.constant 32 : index
    %c0_25 = arith.constant 0 : index
    %40 = vector.load %arg1[%c0_24, %c32, %c0_25] : memref<1x48x256xf32, #tpu.memory_space<vmem>>, vector<1x4x256xf32>
    %41 = vector.shape_cast %40 : vector<1x4x256xf32> to vector<4x256xf32>
    %42 = arith.truncf %41 : vector<4x256xf32> to vector<4x256xbf16>
    %cst_26 = arith.constant dense<0.000000e+00> : vector<256x256xf32>
    %43 = tpu.matmul %39, %6, %cst_26 {dimension_numbers = #tpu.dot_dimension_numbers<[0], [0], [1], [1], [0, 1, 1, 1], [], []>} : vector<4x256xbf16>, vector<4x256xbf16>, vector<256x256xf32> -> vector<256x256xf32>
    %44 = vector.extract_strided_slice %36 {offsets = [0, 0], sizes = [256, 256], strides = [1, 1]} : vector<1024x256xf32> to vector<256x256xf32>
    %45 = arith.addf %43, %44 : vector<256x256xf32>
    %cst_27 = arith.constant dense<0xFF800000> : vector<256xf32>
    %46 = vector.multi_reduction <maximumf>, %45, %cst_27 [1] : vector<256x256xf32> to vector<256xf32>
    %47 = vector.shape_cast %46 : vector<256xf32> to vector<256x1xf32>
    %48 = vector.broadcast %47 : vector<256x1xf32> to vector<256x256xf32>
    %49 = arith.subf %45, %48 : vector<256x256xf32>
    %50 = math.exp %49 : vector<256x256xf32>
    %cst_28 = arith.constant dense<0.000000e+00> : vector<256xf32>
    %51 = vector.multi_reduction <add>, %50, %cst_28 [1] : vector<256x256xf32> to vector<256xf32>
    %52 = vector.shape_cast %51 : vector<256xf32> to vector<256x1xf32>
    %53 = tpu.reciprocal %52 {approx = true} : vector<256x1xf32> -> vector<256x1xf32>
    %54 = vector.broadcast %53 : vector<256x1xf32> to vector<256x256xf32>
    %55 = arith.mulf %50, %54 : vector<256x256xf32>
    %56 = arith.truncf %55 : vector<256x256xf32> to vector<256x256xbf16>
    %cst_29 = arith.constant dense<0.000000e+00> : vector<4x256xf32>
    %57 = tpu.matmul %42, %56, %cst_29 {dimension_numbers = #tpu.dot_dimension_numbers<[1], [0], [0], [1], [0, 0, 1, 1], [], []>} : vector<4x256xbf16>, vector<256x256xbf16>, vector<4x256xf32> -> vector<4x256xf32>
    %c0_30 = arith.constant 0 : index
    %c0_31 = arith.constant 0 : index
    %c0_32 = arith.constant 0 : index
    %58 = vector.load %arg5[%c0_30, %c0_31, %c0_32] : memref<1x16x256xf32, #tpu.memory_space<vmem>>, vector<1x4x256xf32>
    %59 = vector.shape_cast %58 : vector<1x4x256xf32> to vector<4x256xf32>
    %60 = vector.shape_cast %57 : vector<4x256xf32> to vector<1x4x256xf32>
    tpu.vector_store %arg5[%c0_30, %c0_31, %c0_32], %60 {strides = array<i32>} : memref<1x16x256xf32, #tpu.memory_space<vmem>>, vector<1x4x256xf32>,
    %c0_33 = arith.constant 0 : index
    %c20 = arith.constant 20 : index
    %c0_34 = arith.constant 0 : index
    %61 = vector.load %arg1[%c0_33, %c20, %c0_34] : memref<1x48x256xf32, #tpu.memory_space<vmem>>, vector<1x4x256xf32>
    %62 = vector.shape_cast %61 : vector<1x4x256xf32> to vector<4x256xf32>
    %63 = arith.truncf %62 : vector<4x256xf32> to vector<4x256xbf16>
    %c0_35 = arith.constant 0 : index
    %c36 = arith.constant 36 : index
    %c0_36 = arith.constant 0 : index
    %64 = vector.load %arg1[%c0_35, %c36, %c0_36] : memref<1x48x256xf32, #tpu.memory_space<vmem>>, vector<1x4x256xf32>
    %65 = vector.shape_cast %64 : vector<1x4x256xf32> to vector<4x256xf32>
    %66 = arith.truncf %65 : vector<4x256xf32> to vector<4x256xbf16>
    %cst_37 = arith.constant dense<0.000000e+00> : vector<256x256xf32>
    %67 = tpu.matmul %63, %14, %cst_37 {dimension_numbers = #tpu.dot_dimension_numbers<[0], [0], [1], [1], [0, 1, 1, 1], [], []>} : vector<4x256xbf16>, vector<4x256xbf16>, vector<256x256xf32> -> vector<256x256xf32>
    %68 = vector.extract_strided_slice %36 {offsets = [256, 0], sizes = [256, 256], strides = [1, 1]} : vector<1024x256xf32> to vector<256x256xf32>
    %69 = arith.addf %67, %68 : vector<256x256xf32>
    %cst_38 = arith.constant dense<0xFF800000> : vector<256xf32>
    %70 = vector.multi_reduction <maximumf>, %69, %cst_38 [1] : vector<256x256xf32> to vector<256xf32>
    %71 = vector.shape_cast %70 : vector<256xf32> to vector<256x1xf32>
    %72 = vector.broadcast %71 : vector<256x1xf32> to vector<256x256xf32>
    %73 = arith.subf %69, %72 : vector<256x256xf32>
    %74 = math.exp %73 : vector<256x256xf32>
    %cst_39 = arith.constant dense<0.000000e+00> : vector<256xf32>
    %75 = vector.multi_reduction <add>, %74, %cst_39 [1] : vector<256x256xf32> to vector<256xf32>
    %76 = vector.shape_cast %75 : vector<256xf32> to vector<256x1xf32>
    %77 = tpu.reciprocal %76 {approx = true} : vector<256x1xf32> -> vector<256x1xf32>
    %78 = vector.broadcast %77 : vector<256x1xf32> to vector<256x256xf32>
    %79 = arith.mulf %74, %78 : vector<256x256xf32>
    %80 = arith.truncf %79 : vector<256x256xf32> to vector<256x256xbf16>
    %cst_40 = arith.constant dense<0.000000e+00> : vector<4x256xf32>
    %81 = tpu.matmul %66, %80, %cst_40 {dimension_numbers = #tpu.dot_dimension_numbers<[1], [0], [0], [1], [0, 0, 1, 1], [], []>} : vector<4x256xbf16>, vector<256x256xbf16>, vector<4x256xf32> -> vector<4x256xf32>
    %c0_41 = arith.constant 0 : index
    %c4_42 = arith.constant 4 : index
    %c0_43 = arith.constant 0 : index
    %82 = vector.load %arg5[%c0_41, %c4_42, %c0_43] : memref<1x16x256xf32, #tpu.memory_space<vmem>>, vector<1x4x256xf32>
    %83 = vector.shape_cast %82 : vector<1x4x256xf32> to vector<4x256xf32>
    %84 = vector.shape_cast %81 : vector<4x256xf32> to vector<1x4x256xf32>
    tpu.vector_store %arg5[%c0_41, %c4_42, %c0_43], %84 {strides = array<i32>} : memref<1x16x256xf32, #tpu.memory_space<vmem>>, vector<1x4x256xf32>,
    %c0_44 = arith.constant 0 : index
    %c24 = arith.constant 24 : index
    %c0_45 = arith.constant 0 : index
    %85 = vector.load %arg1[%c0_44, %c24, %c0_45] : memref<1x48x256xf32, #tpu.memory_space<vmem>>, vector<1x4x256xf32>
    %86 = vector.shape_cast %85 : vector<1x4x256xf32> to vector<4x256xf32>
    %87 = arith.truncf %86 : vector<4x256xf32> to vector<4x256xbf16>
    %c0_46 = arith.constant 0 : index
    %c40 = arith.constant 40 : index
    %c0_47 = arith.constant 0 : index
    %88 = vector.load %arg1[%c0_46, %c40, %c0_47] : memref<1x48x256xf32, #tpu.memory_space<vmem>>, vector<1x4x256xf32>
    %89 = vector.shape_cast %88 : vector<1x4x256xf32> to vector<4x256xf32>
    %90 = arith.truncf %89 : vector<4x256xf32> to vector<4x256xbf16>
    %cst_48 = arith.constant dense<0.000000e+00> : vector<256x256xf32>
    %91 = tpu.matmul %87, %22, %cst_48 {dimension_numbers = #tpu.dot_dimension_numbers<[0], [0], [1], [1], [0, 1, 1, 1], [], []>} : vector<4x256xbf16>, vector<4x256xbf16>, vector<256x256xf32> -> vector<256x256xf32>
    %92 = vector.extract_strided_slice %36 {offsets = [512, 0], sizes = [256, 256], strides = [1, 1]} : vector<1024x256xf32> to vector<256x256xf32>
    %93 = arith.addf %91, %92 : vector<256x256xf32>
    %cst_49 = arith.constant dense<0xFF800000> : vector<256xf32>
    %94 = vector.multi_reduction <maximumf>, %93, %cst_49 [1] : vector<256x256xf32> to vector<256xf32>
    %95 = vector.shape_cast %94 : vector<256xf32> to vector<256x1xf32>
    %96 = vector.broadcast %95 : vector<256x1xf32> to vector<256x256xf32>
    %97 = arith.subf %93, %96 : vector<256x256xf32>
    %98 = math.exp %97 : vector<256x256xf32>
    %cst_50 = arith.constant dense<0.000000e+00> : vector<256xf32>
    %99 = vector.multi_reduction <add>, %98, %cst_50 [1] : vector<256x256xf32> to vector<256xf32>
    %100 = vector.shape_cast %99 : vector<256xf32> to vector<256x1xf32>
    %101 = tpu.reciprocal %100 {approx = true} : vector<256x1xf32> -> vector<256x1xf32>
    %102 = vector.broadcast %101 : vector<256x1xf32> to vector<256x256xf32>
    %103 = arith.mulf %98, %102 : vector<256x256xf32>
    %104 = arith.truncf %103 : vector<256x256xf32> to vector<256x256xbf16>
    %cst_51 = arith.constant dense<0.000000e+00> : vector<4x256xf32>
    %105 = tpu.matmul %90, %104, %cst_51 {dimension_numbers = #tpu.dot_dimension_numbers<[1], [0], [0], [1], [0, 0, 1, 1], [], []>} : vector<4x256xbf16>, vector<256x256xbf16>, vector<4x256xf32> -> vector<4x256xf32>
    %c0_52 = arith.constant 0 : index
    %c8_53 = arith.constant 8 : index
    %c0_54 = arith.constant 0 : index
    %106 = vector.load %arg5[%c0_52, %c8_53, %c0_54] : memref<1x16x256xf32, #tpu.memory_space<vmem>>, vector<1x4x256xf32>
    %107 = vector.shape_cast %106 : vector<1x4x256xf32> to vector<4x256xf32>
    %108 = vector.shape_cast %105 : vector<4x256xf32> to vector<1x4x256xf32>
    tpu.vector_store %arg5[%c0_52, %c8_53, %c0_54], %108 {strides = array<i32>} : memref<1x16x256xf32, #tpu.memory_space<vmem>>, vector<1x4x256xf32>,
    %c0_55 = arith.constant 0 : index
    %c28 = arith.constant 28 : index
    %c0_56 = arith.constant 0 : index
    %109 = vector.load %arg1[%c0_55, %c28, %c0_56] : memref<1x48x256xf32, #tpu.memory_space<vmem>>, vector<1x4x256xf32>
    %110 = vector.shape_cast %109 : vector<1x4x256xf32> to vector<4x256xf32>
    %111 = arith.truncf %110 : vector<4x256xf32> to vector<4x256xbf16>
    %c0_57 = arith.constant 0 : index
    %c44 = arith.constant 44 : index
    %c0_58 = arith.constant 0 : index
    %112 = vector.load %arg1[%c0_57, %c44, %c0_58] : memref<1x48x256xf32, #tpu.memory_space<vmem>>, vector<1x4x256xf32>
    %113 = vector.shape_cast %112 : vector<1x4x256xf32> to vector<4x256xf32>
    %114 = arith.truncf %113 : vector<4x256xf32> to vector<4x256xbf16>
    %cst_59 = arith.constant dense<0.000000e+00> : vector<256x256xf32>
    %115 = tpu.matmul %111, %30, %cst_59 {dimension_numbers = #tpu.dot_dimension_numbers<[0], [0], [1], [1], [0, 1, 1, 1], [], []>} : vector<4x256xbf16>, vector<4x256xbf16>, vector<256x256xf32> -> vector<256x256xf32>
    %116 = vector.extract_strided_slice %36 {offsets = [768, 0], sizes = [256, 256], strides = [1, 1]} : vector<1024x256xf32> to vector<256x256xf32>
    %117 = arith.addf %115, %116 : vector<256x256xf32>
    %cst_60 = arith.constant dense<0xFF800000> : vector<256xf32>
    %118 = vector.multi_reduction <maximumf>, %117, %cst_60 [1] : vector<256x256xf32> to vector<256xf32>
    %119 = vector.shape_cast %118 : vector<256xf32> to vector<256x1xf32>
    %120 = vector.broadcast %119 : vector<256x1xf32> to vector<256x256xf32>
    %121 = arith.subf %117, %120 : vector<256x256xf32>
    %122 = math.exp %121 : vector<256x256xf32>
    %cst_61 = arith.constant dense<0.000000e+00> : vector<256xf32>
    %123 = vector.multi_reduction <add>, %122, %cst_61 [1] : vector<256x256xf32> to vector<256xf32>
    %124 = vector.shape_cast %123 : vector<256xf32> to vector<256x1xf32>
    %125 = tpu.reciprocal %124 {approx = true} : vector<256x1xf32> -> vector<256x1xf32>
    %126 = vector.broadcast %125 : vector<256x1xf32> to vector<256x256xf32>
    %127 = arith.mulf %122, %126 : vector<256x256xf32>
    %128 = arith.truncf %127 : vector<256x256xf32> to vector<256x256xbf16>
    %cst_62 = arith.constant dense<0.000000e+00> : vector<4x256xf32>
    %129 = tpu.matmul %114, %128, %cst_62 {dimension_numbers = #tpu.dot_dimension_numbers<[1], [0], [0], [1], [0, 0, 1, 1], [], []>} : vector<4x256xbf16>, vector<256x256xbf16>, vector<4x256xf32> -> vector<4x256xf32>
    %c0_63 = arith.constant 0 : index
    %c12_64 = arith.constant 12 : index
    %c0_65 = arith.constant 0 : index
    %130 = vector.load %arg5[%c0_63, %c12_64, %c0_65] : memref<1x16x256xf32, #tpu.memory_space<vmem>>, vector<1x4x256xf32>
    %131 = vector.shape_cast %130 : vector<1x4x256xf32> to vector<4x256xf32>
    %132 = vector.shape_cast %129 : vector<4x256xf32> to vector<1x4x256xf32>
    tpu.vector_store %arg5[%c0_63, %c12_64, %c0_65], %132 {strides = array<i32>} : memref<1x16x256xf32, #tpu.memory_space<vmem>>, vector<1x4x256xf32>,
    return
  }
  func.func @transform_0(%arg0: i32) -> (i32, i32, i32) {
    %c0_i32 = arith.constant 0 : i32
    %c0_i32_0 = arith.constant 0 : i32
    %c0_i32_1 = arith.constant 0 : i32
    return %arg0, %c0_i32, %c0_i32_0 : i32, i32, i32
  }
  func.func @transform_1(%arg0: i32) -> (i32, i32) {
    %c0_i32 = arith.constant 0 : i32
    %c0_i32_0 = arith.constant 0 : i32
    %c0_i32_1 = arith.constant 0 : i32
    return %c0_i32, %c0_i32_0 : i32, i32
  }
  func.func @transform_2(%arg0: i32) -> (i32, i32) {
    %c0_i32 = arith.constant 0 : i32
    %c0_i32_0 = arith.constant 0 : i32
    %c0_i32_1 = arith.constant 0 : i32
    return %c0_i32, %c0_i32_0 : i32, i32
  }
  func.func @transform_3(%arg0: i32) -> (i32, i32) {
    %c0_i32 = arith.constant 0 : i32
    %c0_i32_0 = arith.constant 0 : i32
    %c0_i32_1 = arith.constant 0 : i32
    return %c0_i32, %c0_i32_0 : i32, i32
  }
  func.func @transform_4(%arg0: i32) -> (i32, i32, i32) {
    %c0_i32 = arith.constant 0 : i32
    %c0_i32_0 = arith.constant 0 : i32
    %c0_i32_1 = arith.constant 0 : i32
    return %arg0, %c0_i32, %c0_i32_0 : i32, i32, i32
  }
}

</mosaic_0001>

<bundles_post_ra>
// kernel: attention_augmentation_2d.1
= control target key start
LH: loop header
LB: loop body
LE: loop exit
PB: predicated region body
PF: predicated region fallthrough
CT: control target
= control target key end

     0   :  { %s6879_s15 = smov 0   ;;  %s11112_s0 = inlined_call_operand.vmem [shape: f32[2,48,256], index: 0, kind: input, shape index: {}]   ;;  %s11113_s1 = inlined_call_operand.vmem [shape: bf16[128,256], index: 1, kind: input, shape index: {}]   ;;  %s11114_s2 = inlined_call_operand.vmem [shape: f32[256,128], index: 2, kind: input, shape index: {}]   ;;  %s11115_s3 = inlined_call_operand.vmem [shape: bf16[4,128], index: 3, kind: input, shape index: {}]   ;;  %s11116_s4 = inlined_call_operand.vmem [shape: f32[2,16,256], index: 4, kind: output, shape index: {}]  }
   0x1 LB: > { %s5657_s16 = sadd.s32 4294967295, %s6851_s15   ;;  %p5661_p0 = scmp.ge.s32.totalorder %s6851_s15, 1  ;;  %s6851_s15 = sphi %s6879_s15, %s14_s15  }
   0x2   : > { %p162_p1 = scmp.lt.s32.totalorder %s6851_s15, 3 }
   0x4   : > { %p163_p2 = pnand %p5661_p0, %p162_p1 }
   0x6   : > { %166 = sbr.rel (%p163_p2) target bundleno = 3231 (0xc9f), region = 36 }
   0xb   : > { %p188_p3 = scmp.lt.s32.totalorder %s5657_s16, 1  ;;  %v231_v0 = vld [vmem:[%s11115_s3] sm:$0x3]  ;;  %vm319_vm0 = vcmask 1041408   ;;  %vm270_vm1 = vcmask 31744  }
   0xc   : > { %6022 = vmatprep.subr.msk.bf16.mxu0 %vm319_vm0, %v231_v0  ;;  %v6892_v1 = vsel %vm319_vm0, %v231_v0, 0  ;;  %6024 = vmatprep.subr.msk.bf16.mxu1 %vm319_vm0, %v231_v0 }
   0xd   : > { %s12175_s16 = smov (!%p188_p3, %s5657_s16), 1  ;;  %5885 = vmatpush3.bf16.msra.mxu0 %v6892_v1  ;;  %6021 = vmatpush3.bf16.msra.mxu1 %v6892_v1 }
   0xe   : > { %6023 = vmatprep.subr.msk.bf16.mxu0 %vm319_vm0, %v231_v0  ;;  %6026 = vmatprep.subr.msk.bf16.mxu1 %vm319_vm0, %v231_v0  ;;  %s6027_s19 = smul.u32 96, %s12175_s16  ;;  %s5815_s10 = sshll.u32 %s12175_s16, 5 }
   0xf   : > { %s8912_s13 = scalar_lea.vmem %s11116_s4, %s5815_s10 }
  0x10   : > { %s6905_s22 = scalar_lea.vmem %s11112_s0, %s6027_s19 }
  0x11   : > { %v232_v2 = vld [vmem:[%s6905_s22] sm:$0xf]  ;;  %v532_v3 = vld [vmem:[%s6905_s22] sm:$0xf0]  ;;  %v533_v9 = vld [vmem:[%s6905_s22 + $0x8] sm:$0xf0] }
  0x12   : > { %v234_v4 = vmul.f32 0.5, %v232_v2  ;;  %v534_v5 = vmul.f32 0.5, %v532_v3  ;;  %v233_v10 = vld [vmem:[%s6905_s22 + $0x8] sm:$0xf]  ;;  %v535_v11 = vmul.f32 0.5, %v533_v9 }
  0x13   : > { %v235_v12 = vmul.f32 0.5, %v233_v10  ;;  %v1128_v16 = vld [vmem:[%s6905_s22 + $0x10] sm:$0xf0]  ;;  %v833_v17 = vld [vmem:[%s6905_s22 + $0x10] sm:$0xf] }
  0x14   : > { %v6909_v6 = vpack.c.bf16 %v234_v4, %v234_v4  ;;  %v536_v7 = vpack.c.bf16 %v534_v5, %v534_v5  ;;  %v537_v13 = vpack.c.bf16 %v535_v11, %v535_v11  ;;  %v1130_v18 = vmul.f32 0.5, %v1128_v16  ;;  %v1129_v23 = vld [vmem:[%s6905_s22 + $0x18] sm:$0xf0]  ;;  %v834_v24 = vld [vmem:[%s6905_s22 + $0x18] sm:$0xf] }
  0x15   : > { %v237_v14 = vpack.c.bf16 %v235_v12, %v235_v12  ;;  %v835_v19 = vmul.f32 0.5, %v833_v17  ;;  %v1131_v25 = vmul.f32 0.5, %v1129_v23  ;;  %v836_v26 = vmul.f32 0.5, %v834_v24  ;;  %v2198_v36 = vld [vmem:[%s6905_s22 + $0x20] sm:$0xf] }
  0x16   : > { %238 = vxpose.xlu0.c.b16.start.end [1/1] (short) %v6909_v6, 128  ;;  %v6912_v8 = vrot.slane %v536_v7, 2  ;;  %v6917_v15 = vrot.slane %v537_v13, 2  ;;  %v1132_v20 = vpack.c.bf16 %v1130_v18, %v1130_v18  ;;  %v2199_v38 = vld [vmem:[%s6905_s22 + $0x28] sm:$0xf]  ;;  %v2200_v40 = vpack.c.bf16 %v2198_v36, %v2198_v36  ;;  %v6039_v5 = vld [vmem:[%s11113_s1 + $0x74] ss:$8 sps:$4 sm:$0xff]  }
  0x17   : > { %v6922_v21 = vpack.c.bf16 %v835_v19, %v835_v19  ;;  %v1133_v27 = vpack.c.bf16 %v1131_v25, %v1131_v25  ;;  %v6930_v28 = vpack.c.bf16 %v836_v26, %v836_v26  ;;  %v2201_v42 = vpack.c.bf16 %v2199_v38, %v2199_v38  ;;  %v6037_v13 = vld [vmem:[%s11113_s1 + $0x70] ss:$8 sps:$4 sm:$0xff]   ;;  %v6040_v16 = vld [vmem:[%s11113_s1 + $0x60] ss:$8 sps:$4 sm:$0xff]   ;;  %v6045_v17 = vld [vmem:[%s11113_s1 + $0x54] ss:$8 sps:$4 sm:$0xff]  }
  0x18   : > { %11346 = vst [vmem:[#allocation2_spill] sm:$0xff] %v6912_v8  ;;  %544 = vxpose.xlu1.c.b16.start.end [1/1] (short) %v6912_v8, 128  ;;  %11347 = vst [vmem:[#allocation3_spill] sm:$0xff] %v6917_v15  ;;  %v6924_v22 = vrot.slane %v1132_v20, 2  ;;  %v2287_v10 = vsel %vm319_vm0, %v6909_v6, 0  ;;  %v6043_v20 = vld [vmem:[%s11113_s1 + $0x50] ss:$8 sps:$4 sm:$0xff]  }
  0x19   : > { %11348 = vst [vmem:[#allocation4_spill] sm:$0xff] %v6922_v21  ;;  %11350 = vst [vmem:[#allocation6_spill] sm:$0xff] %v6930_v28  ;;  %v6932_v29 = vrot.slane %v1133_v27, 2  ;;  %v6048_v23 = vld [vmem:[%s11113_s1 + $0x44] ss:$8 sps:$4 sm:$0xff]  }
  0x1a   : > { %11349 = vst [vmem:[#allocation5_spill] sm:$0xff] %v6924_v22  ;;  %v6046_v26 = vld [vmem:[%s11113_s1 + $0x40] ss:$8 sps:$4 sm:$0xff]   ;;  %v6051_v27 = vld [vmem:[%s11113_s1 + $0x34] ss:$8 sps:$4 sm:$0xff]  }
  0x1b   : > { %11351 = vst [vmem:[#allocation7_spill] sm:$0xff] %v6932_v29  ;;  %v6052_v36 = vld [vmem:[%s11113_s1 + $0x20] ss:$8 sps:$4 sm:$0xff]  }
  0x33   : > { %254 = vxpose.xlu0.c.b16.start.end [1/1] (short) %v237_v14, 128 }
  0x35   : > { %560 = vxpose.xlu1.c.b16.start.end [1/1] (short) %v6917_v15, 128 }
  0x50   : > { %839 = vxpose.xlu0.c.b16.start.end [1/1] (short) %v6922_v21, 128 }
  0x52   : > { %1140 = vxpose.xlu1.c.b16.start.end [1/1] (short) %v6924_v22, 128 }
  0x6d   : > { %855 = vxpose.xlu0.c.b16.start.end [1/1] (short) %v6930_v28, 128  ;;  %v11366_v28 = vmov 0  }
  0x6f   : > { %1156 = vxpose.xlu1.c.b16.start.end [1/1] (short) %v6932_v29, 128 }
  0x78   : > { %v246_v30 = vpop.trf.xlu0 }
  0x79   : > { %5886 = vmatprep.mubr.msk.bf16.mxu0 %vm270_vm1, %v246_v30 }
  0x7a   : > { %v6937_v31 = vpop.trf.xlu1 }
  0x7c   : > { %v247_v32 = vpop.trf.xlu0 }
  0x7d   : > { %5887 = vmatmul.mubr.msk.bf16.vlgmr.msra.gmra.mxu0 %vm270_vm1, %v247_v32  ;;  %v6049_v32 = vld [vmem:[%s11113_s1 + $0x30] ss:$8 sps:$4 sm:$0xff]  }
  0x7e   : > { %5919 = vmatpush3.bf16.msra.mxu0 %v6892_v1  ;;  %v6941_v33 = vpop.trf.xlu1 }
  0x7f   : > { %6025 = vmatprep.subr.msk.bf16.mxu0 %vm319_vm0, %v231_v0 }
  0x80   : > { %v248_v34 = vpop.trf.xlu0 }
  0x81   : > { %5890 = vmatprep.mubr.msk.bf16.mxu0 %vm270_vm1, %v248_v34 }
  0x82   : > { %v554_v35 = vpop.trf.xlu1 }
  0x83   : > { %5924 = vmatprep.mubr.msk.bf16.mxu1 %vm270_vm1, %v554_v35 }
  0x84   : > { %v249_v37 = vpop.trf.xlu0 }
  0x85   : > { %5891 = vmatmul.mubr.msk.bf16.gmra.mxu0 %vm270_vm1, %v249_v37  ;;  %v6057_v37 = vld [vmem:[%s11113_s1 + $0x14] ss:$8 sps:$4 sm:$0xff]  }
  0x86   : > { %v555_v39 = vpop.trf.xlu1 }
  0x87   : > { %5925 = vmatmul.mubr.msk.bf16.vlgmr.msra.gmra.mxu1 %vm270_vm1, %v555_v39 }
  0x88   : > { %v250_v41 = vpop.trf.xlu0  ;;  %5987 = vmatpush3.bf16.msra.mxu1 %v6892_v1 }
  0x89   : > { %5894 = vmatprep.mubr.msk.bf16.mxu0 %vm270_vm1, %v250_v41  ;;  %5745 = vmatprep.subr.msk.bf16.mxu1 %vm319_vm0, %v237_v14  ;;  %v6060_v41 = vld [vmem:[%s11113_s1 + $0x4] ss:$8 sps:$4 sm:$0xff]  }
  0x8a   : > { %v556_v43 = vpop.trf.xlu1  ;;  %2206 = vxpose.xlu0.c.b16.start.end [1/1] (short) %v2200_v40, 128  ;;  %v6055_v40 = vld [vmem:[%s11113_s1 + $0x10] ss:$8 sps:$4 sm:$0xff]  }
  0x8b   : > { %5928 = vmatprep.mubr.msk.bf16.mxu1 %vm270_vm1, %v556_v43 }
  0x8c   : > { %v251_v44 = vpop.trf.xlu0  ;;  %2222 = vxpose.xlu1.c.b16.start.end [1/1] (short) %v2201_v42, 128 }
  0x8d   : > { %5895 = vmatmul.mubr.msk.bf16.gmra.mxu0 %vm270_vm1, %v251_v44  ;;  %v6058_v44 = vld [vmem:[%s11113_s1] ss:$8 sps:$4 sm:$0xff]  }
  0x8e   : > { %v557_v45 = vpop.trf.xlu1 }
  0x8f   : > { %5929 = vmatmul.mubr.msk.bf16.gmra.mxu1 %vm270_vm1, %v557_v45 }
  0x90   : > { %v252_v46 = vpop.trf.xlu0 }
  0x91   : > { %5898 = vmatprep.mubr.msk.bf16.mxu0 %vm270_vm1, %v252_v46 }
  0x92   : > { %v558_v47 = vpop.trf.xlu1 }
  0x93   : > { %5932 = vmatprep.mubr.msk.bf16.mxu1 %vm270_vm1, %v558_v47 }
  0x94   : > { %v253_v48 = vpop.trf.xlu0 }
  0x95   : > { %5899 = vmatmul.mubr.msk.bf16.gmra.mxu0 %vm270_vm1, %v253_v48 }
  0x96   : > { %v559_v49 = vpop.trf.xlu1 }
  0x97   : > { %5933 = vmatmul.mubr.msk.bf16.gmra.mxu1 %vm270_vm1, %v559_v49 }
  0x98   : > { %v262_v50 = vpop.trf.xlu0 }
  0x99   : > { %5902 = vmatprep.mubr.msk.bf16.mxu0 %vm270_vm1, %v262_v50 }
  0x9a   : > { %v568_v51 = vpop.trf.xlu1 }
  0x9b   : > { %5936 = vmatprep.mubr.msk.bf16.mxu1 %vm270_vm1, %v568_v51 }
  0x9c   : > { %v263_v52 = vpop.trf.xlu0 }
  0x9d   : > { %5903 = vmatmul.mubr.msk.bf16.gmra.mxu0 %vm270_vm1, %v263_v52 }
  0x9e   : > { %v569_v53 = vpop.trf.xlu1 }
  0x9f   : > { %5937 = vmatmul.mubr.msk.bf16.gmra.mxu1 %vm270_vm1, %v569_v53 }
  0xa0   : > { %v264_v54 = vpop.trf.xlu0 }
  0xa1   : > { %5906 = vmatprep.mubr.msk.bf16.mxu0 %vm270_vm1, %v264_v54 }
  0xa2   : > { %v570_v55 = vpop.trf.xlu1 }
  0xa3   : > { %5940 = vmatprep.mubr.msk.bf16.mxu1 %vm270_vm1, %v570_v55 }
  0xa4   : > { %v265_v56 = vpop.trf.xlu0 }
  0xa5   : > { %5907 = vmatmul.mubr.msk.bf16.gmra.mxu0 %vm270_vm1, %v265_v56 }
  0xa6   : > { %v571_v57 = vpop.trf.xlu1 }
  0xa7   : > { %5941 = vmatmul.mubr.msk.bf16.gmra.mxu1 %vm270_vm1, %v571_v57  ;;  %v11117_v57 = vmov 0  }
  0xa8   : > { %v266_v58 = vpop.trf.xlu0 }
  0xa9   : > { %5910 = vmatprep.mubr.msk.bf16.mxu0 %vm270_vm1, %v266_v58 }
  0xaa   : > { %v572_v59 = vpop.trf.xlu1 }
  0xab   : > { %5944 = vmatprep.mubr.msk.bf16.mxu1 %vm270_vm1, %v572_v59 }
  0xac   : > { %v267_v60 = vpop.trf.xlu0 }
  0xad   : > { %5911 = vmatmul.mubr.msk.bf16.gmra.mxu0 %vm270_vm1, %v267_v60 }
  0xae   : > { %v573_v61 = vpop.trf.xlu1 }
  0xaf   : > { %5945 = vmatmul.mubr.msk.bf16.gmra.mxu1 %vm270_vm1, %v573_v61 }
  0xb0   : > { %v268_v62 = vpop.trf.xlu0 }
  0xb1   : > { %5914 = vmatprep.mubr.msk.bf16.mxu0 %vm270_vm1, %v268_v62 }
  0xb2   : > { %v574_v63 = vpop.trf.xlu1 }
  0xb3   : > { %5948 = vmatprep.mubr.msk.bf16.mxu1 %vm270_vm1, %v574_v63 }
  0xb4   : > { %v269_v0 = vpop.trf.xlu0 }
  0xb5   : > { %5915 = vmatmul.mubr.msk.bf16.gmra.mxu0 %vm270_vm1, %v269_v0 }
  0xb6   : > { %5920 = vmatprep.mubr.msk.bf16.mxu0 %vm270_vm1, %v6937_v31  ;;  %v575_v2 = vpop.trf.xlu1 }
  0xb7   : > { %5949 = vmatmul.mubr.msk.bf16.gmra.mxu1 %vm270_vm1, %v575_v2 }
  0xb8   : > { %v847_v3 = vpop.trf.xlu0 }
  0xba   : > { %v1148_v4 = vpop.trf.xlu1 }
  0xbb   : > { %5988 = vmatprep.mubr.msk.bf16.mxu1 %vm270_vm1, %v1148_v4 }
  0xbc   : > { %v848_v7 = vpop.trf.xlu0 }
  0xbd   : > { %5921 = vmatmul.mubr.msk.bf16.vlgmr.msra.gmra.mxu0 %vm270_vm1, %v6941_v33  ;;  %v6054_v33 = vld [vmem:[%s11113_s1 + $0x24] ss:$8 sps:$4 sm:$0xff]  }
  0xbe   : > { %5953 = vmatpush3.bf16.msra.mxu0 %v6892_v1  ;;  %v1149_v9 = vpop.trf.xlu1  ;;  %5954 = vmatprep.mubr.msk.bf16.mxu0 %vm270_vm1, %v847_v3  ;;  %v6042_v1 = vld [vmem:[%s11113_s1 + $0x64] ss:$8 sps:$4 sm:$0xff]  }
  0xbf   : > { %5989 = vmatmul.mubr.msk.bf16.vlgmr.msra.gmra.mxu1 %vm270_vm1, %v1149_v9  ;;  %1525 = vmatprep.subr.bf16.mxu0 %v6039_v5 }
  0xc0   : > { %v849_v11 = vpop.trf.xlu0  ;;  %2307 = vmatpush1.bf16.msra.mxu1 %v2287_v10  ;;  %v7091_v10 = vld [vmem:[%s11114_s2 + $0x8] sm:$0xff] }
  0xc2   : > { %v1150_v12 = vpop.trf.xlu1 }
  0xc3   : > { %5992 = vmatprep.mubr.msk.bf16.mxu1 %vm270_vm1, %v1150_v12 }
  0xc4   : > { %v850_v14 = vpop.trf.xlu0 }
  0xc5   : > { %5955 = vmatmul.mubr.msk.bf16.vlgmr.msra.gmra.mxu0 %vm270_vm1, %v848_v7  ;;  %v7086_v7 = vld [vmem:[%s11114_s2] sm:$0xff] }
  0xc6   : > { %v1151_v6 = vpop.trf.xlu1  ;;  %5958 = vmatprep.mubr.msk.bf16.mxu0 %vm270_vm1, %v849_v11  ;;  %1526 = vmatpush1.bf16.msra.mxu0 %v6037_v13 }
  0xc7   : > { %5993 = vmatmul.mubr.msk.bf16.gmra.mxu1 %vm270_vm1, %v1151_v6  ;;  %1527 = vmatprep.subr.bf16.mxu0 %v6042_v1 }
  0xc8   : > { %v851_v18 = vpop.trf.xlu0 }
  0xca   : > { %v1152_v19 = vpop.trf.xlu1  ;;  %1528 = vmatpush1.bf16.msra.mxu0 %v6040_v16  ;;  %v7100_v16 = vld [vmem:[%s11114_s2 + $0x18] sm:$0xff] }
  0xcb   : > { %5996 = vmatprep.mubr.msk.bf16.mxu1 %vm270_vm1, %v1152_v19  ;;  %1529 = vmatprep.subr.bf16.mxu0 %v6045_v17  ;;  %v7107_v19 = vld [vmem:[%s11114_s2 + $0x10] sm:$0xff] }
  0xcc   : > { %v852_v24 = vpop.trf.xlu0 }
  0xcd   : > { %5959 = vmatmul.mubr.msk.bf16.gmra.mxu0 %vm270_vm1, %v850_v14 }
  0xce   : > { %v1153_v25 = vpop.trf.xlu1  ;;  %5962 = vmatprep.mubr.msk.bf16.mxu0 %vm270_vm1, %v851_v18  ;;  %1530 = vmatpush1.bf16.msra.mxu0 %v6043_v20  ;;  %v7112_v20 = vld [vmem:[%s11114_s2 + $0x30] sm:$0xff] }
  0xcf   : > { %5997 = vmatmul.mubr.msk.bf16.gmra.mxu1 %vm270_vm1, %v1153_v25  ;;  %1531 = vmatprep.subr.bf16.mxu0 %v6048_v23 }
  0xd0   : > { %v853_v30 = vpop.trf.xlu0 }
  0xd2   : > { %v1154_v31 = vpop.trf.xlu1  ;;  %1532 = vmatpush1.bf16.msra.mxu0 %v6046_v26 }
  0xd3   : > { %6000 = vmatprep.mubr.msk.bf16.mxu1 %vm270_vm1, %v1154_v31  ;;  %1533 = vmatprep.subr.bf16.mxu0 %v6051_v27  ;;  %v7122_v27 = vld [vmem:[%s11114_s2 + $0x20] sm:$0xff] }
  0xd4   : > { %v854_v34 = vpop.trf.xlu0  ;;  %11352 = vst [vmem:[#allocation8_spill] sm:$0xff] %v7122_v27 }
  0xd5   : > { %5963 = vmatmul.mubr.msk.bf16.gmra.mxu0 %vm270_vm1, %v852_v24 }
  0xd6   : > { %v1155_v35 = vpop.trf.xlu1  ;;  %5966 = vmatprep.mubr.msk.bf16.mxu0 %vm270_vm1, %v853_v30  ;;  %1534 = vmatpush1.bf16.msra.mxu0 %v6049_v32  ;;  %v7127_v30 = vld [vmem:[%s11114_s2 + $0x38] sm:$0xff] }
  0xd7   : > { %6001 = vmatmul.mubr.msk.bf16.gmra.mxu1 %vm270_vm1, %v1155_v35  ;;  %1535 = vmatprep.subr.bf16.mxu0 %v6054_v33 }
  0xd8   : > { %v863_v38 = vpop.trf.xlu0 }
  0xda   : > { %v1164_v39 = vpop.trf.xlu1  ;;  %1536 = vmatpush1.bf16.msra.mxu0 %v6052_v36 }
  0xdb   : > { %6004 = vmatprep.mubr.msk.bf16.mxu1 %vm270_vm1, %v1164_v39  ;;  %1537 = vmatprep.subr.bf16.mxu0 %v6057_v37  ;;  %v7139_v37 = vld [vmem:[%s11114_s2 + $0x28] sm:$0xff] }
  0xdc   : > { %v864_v42 = vpop.trf.xlu0  ;;  %11353 = vst [vmem:[#allocation9_spill] sm:$0xff] %v7139_v37 }
  0xdd   : > { %5967 = vmatmul.mubr.msk.bf16.gmra.mxu0 %vm270_vm1, %v854_v34 }
  0xde   : > { %v1165_v43 = vpop.trf.xlu1  ;;  %5970 = vmatprep.mubr.msk.bf16.mxu0 %vm270_vm1, %v863_v38  ;;  %1538 = vmatpush1.bf16.msra.mxu0 %v6055_v40 }
  0xdf   : > { %6005 = vmatmul.mubr.msk.bf16.gmra.mxu1 %vm270_vm1, %v1165_v43  ;;  %1539 = vmatprep.subr.bf16.mxu0 %v6060_v41 }
  0xe0   : > { %v865_v45 = vpop.trf.xlu0 }
  0xe2   : > { %v1166_v46 = vpop.trf.xlu1  ;;  %1540 = vmatpush1.bf16.msra.mxu0 %v6058_v44 }
  0xe3   : > { %6008 = vmatprep.mubr.msk.bf16.mxu1 %vm270_vm1, %v1166_v46  ;;  %v7155_v46 = vld [vmem:[%s11114_s2 + $0x50] sm:$0xff] }
  0xe4   : > { %v866_v47 = vpop.trf.xlu0 }
  0xe5   : > { %5971 = vmatmul.mubr.msk.bf16.gmra.mxu0 %vm270_vm1, %v864_v42 }
  0xe6   : > { %v1167_v48 = vpop.trf.xlu1  ;;  %5974 = vmatprep.mubr.msk.bf16.mxu0 %vm270_vm1, %v865_v45 }
  0xe7   : > { %6009 = vmatmul.mubr.msk.bf16.gmra.mxu1 %vm270_vm1, %v1167_v48 }
  0xe8   : > { %v867_v49 = vpop.trf.xlu0 }
  0xea   : > { %v1168_v50 = vpop.trf.xlu1 }
  0xeb   : > { %6012 = vmatprep.mubr.msk.bf16.mxu1 %vm270_vm1, %v1168_v50 }
  0xec   : > { %v868_v51 = vpop.trf.xlu0 }
  0xed   : > { %5975 = vmatmul.mubr.msk.bf16.gmra.mxu0 %vm270_vm1, %v866_v47 }
  0xee   : > { %v1169_v52 = vpop.trf.xlu1  ;;  %5978 = vmatprep.mubr.msk.bf16.mxu0 %vm270_vm1, %v867_v49 }
  0xef   : > { %6013 = vmatmul.mubr.msk.bf16.gmra.mxu1 %vm270_vm1, %v1169_v52  ;;  %v7168_v52 = vld [vmem:[%s11114_s2 + $0x40] sm:$0xff] }
  0xf0   : > { %v869_v54 = vpop.trf.xlu0  ;;  %11354 = vst [vmem:[#allocation10_spill] sm:$0xff] %v7168_v52 }
  0xf2   : > { %v1170_v53 = vpop.trf.xlu1 }
  0xf3   : > { %6016 = vmatprep.mubr.msk.bf16.mxu1 %vm270_vm1, %v1170_v53  ;;  %v7173_v53 = vld [vmem:[%s11114_s2 + $0x58] sm:$0xff] }
  0xf4   : > { %v870_v56 = vpop.trf.xlu0 }
  0xf5   : > { %5979 = vmatmul.mubr.msk.bf16.gmra.mxu0 %vm270_vm1, %v868_v51 }
  0xf6   : > { %v1171_v55 = vpop.trf.xlu1  ;;  %5982 = vmatprep.mubr.msk.bf16.mxu0 %vm270_vm1, %v869_v54 }
  0xf7   : > { %6017 = vmatmul.mubr.msk.bf16.gmra.mxu1 %vm270_vm1, %v1171_v55 }
  0xf8   : > { %2324 = vmatprep.mubr.bf16.mxu1 %v11117_v57  ;;  %v2214_v58 = vpop.trf.xlu0 }
  0xfa   : > { %v2230_v3 = vpop.trf.xlu1 }
  0xfc   : > { %v2215_v59 = vpop.trf.xlu0 }
  0xfd   : > { %5983 = vmatmul.mubr.msk.bf16.gmra.mxu0 %vm270_vm1, %v870_v56 }
  0xfe   : > { %1557 = vmatprep.mubr.bf16.mxu0 %v11117_v57  ;;  %v2231_v1 = vpop.trf.xlu1 }
  0xff   : > { %5746 = vmatmul.mubr.msk.bf16.vlgmr.msra.gmra.mxu1 %vm270_vm1, %v2214_v58 }
 0x100   : > { %2334 = vmatprep.mubr.bf16.mxu1 %v11117_v57  ;;  %v2216_v60 = vpop.trf.xlu0 }
 0x102   : > { %v2232_v36 = vpop.trf.xlu1 }
 0x104   : > { %v2217_v61 = vpop.trf.xlu0 }
 0x107   : > { %5747 = vmatmul.mubr.msk.bf16.gmra.mxu1 %vm270_vm1, %v2215_v59  ;;  %v2233_v59 = vpop.trf.xlu1 }
 0x108   : > { %2344 = vmatprep.mubr.bf16.mxu1 %v11117_v57  ;;  %v2218_v62 = vpop.trf.xlu0 }
 0x10c   : > { %v2219_v63 = vpop.trf.xlu0 }
 0x10f   : > { %5748 = vmatmul.mubr.msk.bf16.gmra.mxu1 %vm270_vm1, %v2216_v60  ;;  %v7184_v60 = vld [vmem:[%s11114_s2 + $0x48] sm:$0xff] }
 0x110   : > { %2354 = vmatprep.mubr.bf16.mxu1 %v11117_v57  ;;  %v2220_v0 = vpop.trf.xlu0  ;;  %11355 = vst [vmem:[#allocation11_spill] sm:$0xff] %v7184_v60 }
 0x114   : > { %v2221_v2 = vpop.trf.xlu0 }
 0x117   : > { %5749 = vmatmul.mubr.msk.bf16.gmra.mxu1 %vm270_vm1, %v2217_v61 }
 0x118   : > { %2364 = vmatprep.mubr.bf16.mxu1 %v11117_v57 }
 0x11f   : > { %5750 = vmatmul.mubr.msk.bf16.gmra.mxu1 %vm270_vm1, %v2218_v62 }
 0x120   : > { %2374 = vmatprep.mubr.bf16.mxu1 %v11117_v57 }
 0x127   : > { %5751 = vmatmul.mubr.msk.bf16.gmra.mxu1 %vm270_vm1, %v2219_v63 }
 0x128   : > { %2384 = vmatprep.mubr.bf16.mxu1 %v11117_v57 }
 0x12f   : > { %5752 = vmatmul.mubr.msk.bf16.gmra.mxu1 %vm270_vm1, %v2220_v0 }
 0x130   : > { %2394 = vmatprep.mubr.bf16.mxu1 %v11117_v57 }
 0x137   : > { %5753 = vmatmul.mubr.msk.bf16.gmra.mxu1 %vm270_vm1, %v2221_v2 }
 0x138   : > { %2404 = vmatprep.mubr.bf16.mxu1 %v11117_v57 }
 0x13d   : > { %v5888_v4 = vpop.f32.mrf.mxu0 }
 0x13e   : > { %v486_v33 = vmul.f32 %v5888_v4, %v7107_v19 }
 0x13f   : > { %v357_v5 = vpop.f32.mrf.mxu0  ;;  %5754 = vmatmul.mubr.msk.bf16.gmra.mxu1 %vm270_vm1, %v2230_v3 }
 0x140   : > { %2414 = vmatprep.mubr.bf16.mxu1 %v11117_v57  ;;  %v484_v12 = vmul.f32 %v357_v5, %v7086_v7 }
 0x141   : > { %v5889_v9 = vpop.f32.mrf.mxu0 }
 0x142   : > { %v487_v25 = vmul.f32 %v5889_v9, %v7100_v16  ;;  %v7202_v9 = vld [vmem:[%s11114_s2 + $0x70] sm:$0xff] }
 0x143   : > { %v360_v11 = vpop.f32.mrf.mxu0 }
 0x144   : > { %v485_v13 = vmul.f32 %v360_v11, %v7091_v10  ;;  %v517_v40 = vpack.c.bf16 %v487_v25, %v486_v33 }
 0x145   : > { %v7095_v14 = vpop.f32.mrf.mxu0 }
 0x146   : > { %v516_v6 = vpack.c.bf16 %v485_v13, %v484_v12  ;;  %v490_v13 = vmul.f32 %v7095_v14, %v7112_v20 }
 0x147   : > { %v373_v17 = vpop.f32.mrf.mxu0  ;;  %v5926_v18 = vpop.f32.mrf.mxu1  ;;  %5755 = vmatmul.mubr.msk.bf16.gmra.mxu1 %vm270_vm1, %v2231_v1 }
 0x148   : > { %1558 = vmatmul.mubr.bf16.vlgmr.msra.gmra.mxu0 %v516_v6  ;;  %2424 = vmatprep.mubr.bf16.mxu1 %v11117_v57  ;;  %v7117_v26 = vmul.f32 %v5926_v18, %v7112_v20  ;;  %v488_v49 = vmul.f32 %v373_v17, %v7122_v27  ;;  %v7216_v17 = vld [vmem:[%s11114_s2 + $0x60] sm:$0xff]  ;;  %v7221_v18 = vld [vmem:[%s11114_s2 + $0x78] sm:$0xff] }
 0x149   : > { %v5893_v23 = vpop.f32.mrf.mxu0  ;;  %1567 = vmatprep.mubr.bf16.mxu0 %v11117_v57  ;;  %v674_v24 = vpop.f32.mrf.mxu1  ;;  %11356 = vst [vmem:[#allocation12_spill] sm:$0xff] %v7216_v17 }
 0x14a   : > { %v7131_v34 = vmul.f32 %v674_v24, %v7122_v27  ;;  %v491_v1 = vmul.f32 %v5893_v23, %v7127_v30 }
 0x14b   : > { %v376_v31 = vpop.f32.mrf.mxu0  ;;  %v5927_v32 = vpop.f32.mrf.mxu1 }
 0x14c   : > { %v7134_v35 = vmul.f32 %v5927_v32, %v7127_v30  ;;  %v489_v50 = vmul.f32 %v376_v31, %v7139_v37  ;;  %v2234_v31 = vpop.trf.xlu1  ;;  %v7234_v32 = vld [vmem:[%s11114_s2 + $0x68] sm:$0xff] }
 0x14d   : > { %v7141_v38 = vpop.f32.mrf.mxu0  ;;  %v677_v39 = vpop.f32.mrf.mxu1  ;;  %11357 = vst [vmem:[#allocation13_spill] sm:$0xff] %v7234_v32 }
 0x14e   : > { %v7146_v42 = vmul.f32 %v677_v39, %v7139_v37  ;;  %v518_v63 = vpack.c.bf16 %v489_v50, %v488_v49  ;;  %v519_v39 = vpack.c.bf16 %v491_v1, %v490_v13  ;;  %v7267_v13 = vld [vmem:[%s11114_s2 + $0x98] sm:$0xff] }
 0x14f   : > { %v389_v43 = vpop.f32.mrf.mxu0  ;;  %v5930_v44 = vpop.f32.mrf.mxu1  ;;  %5756 = vmatmul.mubr.msk.bf16.gmra.mxu1 %vm270_vm1, %v2232_v36 }
 0x150   : > { %1568 = vmatmul.mubr.bf16.gmra.mxu0 %v517_v40  ;;  %2434 = vmatprep.mubr.bf16.mxu1 %v11117_v57  ;;  %v7163_v51 = vmul.f32 %v5930_v44, %v7155_v46 }
 0x151   : > { %v7157_v47 = vpop.f32.mrf.mxu0  ;;  %1577 = vmatprep.mubr.bf16.mxu0 %v11117_v57  ;;  %v690_v48 = vpop.f32.mrf.mxu1 }
 0x152   : > { %v7176_v56 = vmul.f32 %v690_v48, %v7168_v52 }
 0x153   : > { %v392_v54 = vpop.f32.mrf.mxu0  ;;  %v5931_v55 = vpop.f32.mrf.mxu1 }
 0x154   : > { %v7179_v58 = vmul.f32 %v5931_v55, %v7173_v53  ;;  %v7252_v55 = vld [vmem:[%s11114_s2 + $0x90] sm:$0xff] }
 0x155   : > { %v7186_v61 = vpop.f32.mrf.mxu0  ;;  %v693_v62 = vpop.f32.mrf.mxu1 }
 0x156   : > { %v7191_v2 = vmul.f32 %v693_v62, %v7184_v60 }
 0x157   : > { %v7193_v3 = vpop.f32.mrf.mxu0  ;;  %v5934_v4 = vpop.f32.mrf.mxu1  ;;  %5757 = vmatmul.mubr.msk.bf16.gmra.mxu1 %vm270_vm1, %v2233_v59 }
 0x158   : > { %1578 = vmatmul.mubr.bf16.gmra.mxu0 %v518_v63  ;;  %2444 = vmatprep.mubr.bf16.mxu1 %v11117_v57  ;;  %v7211_v6 = vmul.f32 %v5934_v4, %v7202_v9  ;;  %v492_v63 = vmul.f32 %v389_v43, %v7168_v52  ;;  %v493_v4 = vmul.f32 %v392_v54, %v7184_v60 }
 0x159   : > { %v7204_v11 = vpop.f32.mrf.mxu0  ;;  %1587 = vmatprep.mubr.bf16.mxu0 %v11117_v57  ;;  %v706_v12 = vpop.f32.mrf.mxu1 }
 0x15a   : > { %v7226_v14 = vmul.f32 %v706_v12, %v7216_v17  ;;  %v520_v54 = vpack.c.bf16 %v493_v4, %v492_v63  ;;  %v494_v4 = vmul.f32 %v7141_v38, %v7155_v46 }
 0x15b   : > { %v7223_v24 = vpop.f32.mrf.mxu0  ;;  %v5935_v25 = vpop.f32.mrf.mxu1 }
 0x15c   : > { %v7229_v23 = vmul.f32 %v5935_v25, %v7221_v18 }
 0x15d   : > { %v7236_v33 = vpop.f32.mrf.mxu0  ;;  %v709_v36 = vpop.f32.mrf.mxu1 }
 0x15e   : > { %v7241_v44 = vmul.f32 %v709_v36, %v7234_v32  ;;  %v2235_v36 = vpop.trf.xlu1 }
 0x15f   : > { %v7243_v48 = vpop.f32.mrf.mxu0  ;;  %v5938_v49 = vpop.f32.mrf.mxu1  ;;  %5758 = vmatmul.mubr.msk.bf16.gmra.mxu1 %vm270_vm1, %v2234_v31 }
 0x160   : > { %1588 = vmatmul.mubr.bf16.gmra.mxu0 %v519_v39  ;;  %2454 = vmatprep.mubr.bf16.mxu1 %v11117_v57  ;;  %v7262_v12 = vmul.f32 %v5938_v49, %v7252_v55  ;;  %v7304_v49 = vld [vmem:[%s11114_s2 + $0xb8] sm:$0xff] }
 0x161   : > { %v7254_v59 = vpop.f32.mrf.mxu0  ;;  %1597 = vmatprep.mubr.bf16.mxu0 %v11117_v57  ;;  %v7257_v62 = vpop.f32.mrf.mxu1 }
 0x162   : > { %11358 = vst [vmem:[#allocation14_spill] sm:$0xff] %v7257_v62  ;;  %11359 = vst [vmem:[#allocation15_spill] sm:$0xff] %v7262_v12 }
 0x163   : > { %v7269_v1 = vpop.f32.mrf.mxu0  ;;  %v5939_v25 = vpop.f32.mrf.mxu1 }
 0x164   : > { %v7272_v31 = vmul.f32 %v5939_v25, %v7267_v13  ;;  %v7287_v25 = vld [vmem:[%s11114_s2 + $0xb0] sm:$0xff] }
 0x165   : > { %v7274_v39 = vpop.f32.mrf.mxu0  ;;  %v7276_v43 = vpop.f32.mrf.mxu1 }
 0x166   : > { %11360 = vst [vmem:[#allocation16_spill] sm:$0xff] %v7272_v31  ;;  %11361 = vst [vmem:[#allocation17_spill] sm:$0xff] %v7276_v43 }
 0x167   : > { %v7280_v40 = vpop.f32.mrf.mxu0  ;;  %v5942_v50 = vpop.f32.mrf.mxu1  ;;  %5759 = vmatmul.mubr.msk.bf16.gmra.mxu1 %vm270_vm1, %v2235_v36  ;;  %v495_v36 = vmul.f32 %v7157_v47, %v7173_v53 }
 0x168   : > { %1598 = vmatmul.mubr.bf16.gmra.mxu0 %v520_v54  ;;  %2464 = vmatprep.mubr.bf16.mxu1 %v11117_v57  ;;  %v7299_v54 = vmul.f32 %v5942_v50, %v7287_v25  ;;  %v7341_v50 = vld [vmem:[%s11114_s2 + $0xd8] sm:$0xff] }
 0x169   : > { %v7289_v0 = vpop.f32.mrf.mxu0  ;;  %1607 = vmatprep.mubr.bf16.mxu0 %v11117_v57  ;;  %v7292_v63 = vpop.f32.mrf.mxu1  ;;  %v521_v47 = vpack.c.bf16 %v495_v36, %v494_v4  ;;  %v496_v36 = vmul.f32 %v7193_v3, %v7216_v17 }
 0x16a   : > { %11362 = vst [vmem:[#allocation18_spill] sm:$0xff] %v7292_v63  ;;  %11363 = vst [vmem:[#allocation19_spill] sm:$0xff] %v7299_v54  ;;  %v2236_v57 = vpop.trf.xlu1 }
 0x16b   : > { %v7306_v5 = vpop.f32.mrf.mxu0  ;;  %v5943_v41 = vpop.f32.mrf.mxu1 }
 0x16c   : > { %v7309_v45 = vmul.f32 %v5943_v41, %v7304_v49  ;;  %v7324_v41 = vld [vmem:[%s11114_s2 + $0xd0] sm:$0xff] }
 0x16d   : > { %v7311_v22 = vpop.f32.mrf.mxu0  ;;  %v7313_v38 = vpop.f32.mrf.mxu1 }
 0x16e   : > { %11364 = vst [vmem:[#allocation20_spill] sm:$0xff] %v7309_v45  ;;  %11365 = vst [vmem:[#allocation21_spill] sm:$0xff] %v7313_v38  ;;  %v2237_v37 = vpop.trf.xlu1  ;;  %v7398_v45 = vld [vmem:[%s11114_s2 + $0x88] sm:$0xff] }
 0x16f   : > { %v7317_v29 = vpop.f32.mrf.mxu0  ;;  %v5946_v21 = vpop.f32.mrf.mxu1  ;;  %5760 = vmatmul.mubr.msk.bf16.gmra.mxu1 %vm270_vm1, %v2236_v57  ;;  %v497_v57 = vmul.f32 %v7223_v24, %v7234_v32  ;;  %11376 = vst [vmem:[#allocation31_spill] sm:$0xff] %v7398_v45 }
 0x170   : > { %1608 = vmatmul.mubr.bf16.gmra.mxu0 %v521_v47  ;;  %2474 = vmatprep.mubr.bf16.mxu1 %v11366_v28  ;;  %v7336_v47 = vmul.f32 %v5946_v21, %v7324_v41 }
 0x171   : > { %v7326_v8 = vpop.f32.mrf.mxu0  ;;  %1617 = vmatprep.mubr.bf16.mxu0 %v11366_v28  ;;  %v7329_v4 = vpop.f32.mrf.mxu1  ;;  %v522_v24 = vpack.c.bf16 %v497_v57, %v496_v36  ;;  %v498_v36 = vmul.f32 %v7186_v61, %v7202_v9  ;;  %v499_v57 = vmul.f32 %v7204_v11, %v7221_v18  ;;  %v501_v11 = vmul.f32 %v7269_v1, %v7398_v45 }
 0x172   : > { %11367 = vst [vmem:[#allocation22_spill] sm:$0xff] %v7329_v4  ;;  %11368 = vst [vmem:[#allocation23_spill] sm:$0xff] %v7336_v47 }
 0x173   : > { %v7343_v15 = vpop.f32.mrf.mxu0  ;;  %v5947_v60 = vpop.f32.mrf.mxu1  ;;  %v523_v54 = vpack.c.bf16 %v499_v57, %v498_v36 }
 0x174   : > { %v7346_v52 = vmul.f32 %v5947_v60, %v7341_v50  ;;  %v7360_v60 = vld [vmem:[%s11114_s2 + $0xf0] sm:$0xff] }
 0x175   : > { %v7348_v27 = vpop.f32.mrf.mxu0  ;;  %v7350_v3 = vpop.f32.mrf.mxu1 }
 0x176   : > { %11369 = vst [vmem:[#allocation24_spill] sm:$0xff] %v7346_v52  ;;  %11370 = vst [vmem:[#allocation25_spill] sm:$0xff] %v7350_v3 }
 0x177   : > { %v7354_v32 = vpop.f32.mrf.mxu0  ;;  %v5950_v17 = vpop.f32.mrf.mxu1  ;;  %5761 = vmatmul.mubr.msk.bf16.gmra.mxu1 %vm270_vm1, %v2237_v37 }
 0x178   : > { %1618 = vmatmul.mubr.bf16.gmra.mxu0 %v522_v24  ;;  %v7372_v37 = vmul.f32 %v5950_v17, %v7360_v60  ;;  %v7377_v24 = vld [vmem:[%s11114_s2 + $0xf8] sm:$0xff]  ;;  %v7393_v17 = vld [vmem:[%s11114_s2 + $0x80] sm:$0xff] }
 0x179   : > { %v7362_v4 = vpop.f32.mrf.mxu0  ;;  %1627 = vmatprep.mubr.bf16.mxu0 %v11366_v28  ;;  %v7365_v3 = vpop.f32.mrf.mxu1  ;;  %11375 = vst [vmem:[#allocation30_spill] sm:$0xff] %v7393_v17  ;;  %v500_v57 = vmul.f32 %v7243_v48, %v7393_v17 }
 0x17a   : > { %11371 = vst [vmem:[#allocation26_spill] sm:$0xff] %v7365_v3  ;;  %11372 = vst [vmem:[#allocation27_spill] sm:$0xff] %v7372_v37 }
 0x17b   : > { %v7379_v21 = vpop.f32.mrf.mxu0  ;;  %v5951_v47 = vpop.f32.mrf.mxu1  ;;  %v524_v43 = vpack.c.bf16 %v501_v11, %v500_v57  ;;  %v503_v11 = vmul.f32 %v7254_v59, %v7267_v13 }
 0x17c   : > { %v7382_v52 = vmul.f32 %v5951_v47, %v7377_v24 }
 0x17d   : > { %v7384_v3 = vpop.f32.mrf.mxu0  ;;  %v7386_v61 = vpop.f32.mrf.mxu1 }
 0x17e   : > { %11373 = vst [vmem:[#allocation28_spill] sm:$0xff] %v7382_v52  ;;  %11374 = vst [vmem:[#allocation29_spill] sm:$0xff] %v7386_v61 }
 0x17f   : > { %v7400_v47 = vpop.f32.mrf.mxu0  ;;  %v5990_v38 = vpop.f32.mrf.mxu1 }
 0x180   : > { %1628 = vmatmul.mubr.bf16.gmra.mxu0 %v523_v54  ;;  %v7412_v37 = vmul.f32 %v5990_v38, %v7107_v19 }
 0x181   : > { %v7402_v63 = vpop.f32.mrf.mxu0  ;;  %1637 = vmatprep.mubr.bf16.mxu0 %v11366_v28  ;;  %v7405_v36 = vpop.f32.mrf.mxu1 }
 0x182   : > { %11377 = vst [vmem:[#allocation32_spill] sm:$0xff] %v7405_v36  ;;  %11378 = vst [vmem:[#allocation33_spill] sm:$0xff] %v7412_v37 }
 0x183   : > { %v7414_v52 = vpop.f32.mrf.mxu0  ;;  %v5991_v61 = vpop.f32.mrf.mxu1 }
 0x184   : > { %v7417_v54 = vmul.f32 %v5991_v61, %v7100_v16  ;;  %v502_v61 = vmul.f32 %v7236_v33, %v7252_v55 }
 0x185   : > { %v5956_v12 = vpop.f32.mrf.mxu0  ;;  %v7419_v31 = vpop.f32.mrf.mxu1 }
 0x186   : > { %11379 = vst [vmem:[#allocation34_spill] sm:$0xff] %v7417_v54  ;;  %11380 = vst [vmem:[#allocation35_spill] sm:$0xff] %v7419_v31  ;;  %v7426_v1 = vmul.f32 %v5956_v12, %v7107_v19  ;;  %v525_v31 = vpack.c.bf16 %v503_v11, %v502_v61 }
 0x187   : > { %v7423_v48 = vpop.f32.mrf.mxu0  ;;  %v5994_v62 = vpop.f32.mrf.mxu1 }
 0x188   : > { %1638 = vmatmul.mubr.bf16.gmra.mxu0 %v524_v43  ;;  %11381 = vst [vmem:[#allocation36_spill] sm:$0xff] %v7426_v1  ;;  %v7439_v36 = vmul.f32 %v5994_v62, %v7112_v20  ;;  %v7455_v62 = vld [vmem:[%s11114_s2 + $0xa0] sm:$0xff] }
 0x189   : > { %1647 = vmatprep.mubr.bf16.mxu0 %v11366_v28  ;;  %v5957_v38 = vpop.f32.mrf.mxu0  ;;  %v7429_v45 = vpop.f32.mrf.mxu1  ;;  %11387 = vst [vmem:[#allocation42_spill] sm:$0xff] %v7455_v62  ;;  %v504_v59 = vmul.f32 %v7280_v40, %v7455_v62 }
 0x18a   : > { %11382 = vst [vmem:[#allocation37_spill] sm:$0xff] %v7429_v45  ;;  %v7436_v57 = vmul.f32 %v5957_v38, %v7100_v16  ;;  %11384 = vst [vmem:[#allocation39_spill] sm:$0xff] %v7439_v36  ;;  %v7460_v38 = vld [vmem:[%s11114_s2 + $0xa8] sm:$0xff] }
 0x18b   : > { %v7441_v43 = vpop.f32.mrf.mxu0  ;;  %v5995_v12 = vpop.f32.mrf.mxu1  ;;  %11388 = vst [vmem:[#allocation43_spill] sm:$0xff] %v7460_v38  ;;  %v505_v36 = vmul.f32 %v7306_v5, %v7460_v38 }
 0x18c   : > { %11383 = vst [vmem:[#allocation38_spill] sm:$0xff] %v7436_v57  ;;  %v7446_v45 = vmul.f32 %v5995_v12, %v7127_v30 }
 0x18d   : > { %v5960_v54 = vpop.f32.mrf.mxu0  ;;  %v7448_v33 = vpop.f32.mrf.mxu1  ;;  %v526_v57 = vpack.c.bf16 %v505_v36, %v504_v59  ;;  %v507_v36 = vmul.f32 %v7289_v0, %v7304_v49  ;;  %v7523_v0 = vld [vmem:[%s11114_s2 + $0xc0] sm:$0xff] }
 0x18e   : > { %11385 = vst [vmem:[#allocation40_spill] sm:$0xff] %v7446_v45  ;;  %11386 = vst [vmem:[#allocation41_spill] sm:$0xff] %v7448_v33  ;;  %v7465_v33 = vmul.f32 %v5960_v54, %v7112_v20 }
 0x18f   : > { %v7462_v37 = vpop.f32.mrf.mxu0  ;;  %v5998_v12 = vpop.f32.mrf.mxu1  ;;  %11404 = vst [vmem:[#allocation59_spill] sm:$0xff] %v7523_v0 }
 0x190   : > { %11389 = vst [vmem:[#allocation44_spill] sm:$0xff] %v7462_v37  ;;  %1648 = vmatmul.mubr.bf16.gmra.mxu0 %v525_v31  ;;  %11390 = vst [vmem:[#allocation45_spill] sm:$0xff] %v7465_v33  ;;  %v7478_v37 = vmul.f32 %v5998_v12, %v7155_v46 }
 0x191   : > { %1657 = vmatprep.mubr.bf16.mxu0 %v11366_v28  ;;  %v5961_v61 = vpop.f32.mrf.mxu0  ;;  %v7468_v11 = vpop.f32.mrf.mxu1 }
 0x192   : > { %11391 = vst [vmem:[#allocation46_spill] sm:$0xff] %v7468_v11  ;;  %v7475_v45 = vmul.f32 %v5961_v61, %v7127_v30  ;;  %11393 = vst [vmem:[#allocation48_spill] sm:$0xff] %v7478_v37 }
 0x193   : > { %v7480_v31 = vpop.f32.mrf.mxu0  ;;  %v5999_v20 = vpop.f32.mrf.mxu1 }
 0x194   : > { %11392 = vst [vmem:[#allocation47_spill] sm:$0xff] %v7475_v45  ;;  %v7485_v11 = vmul.f32 %v5999_v20, %v7173_v53  ;;  %v506_v20 = vmul.f32 %v7274_v39, %v7287_v25 }
 0x195   : > { %v5964_v1 = vpop.f32.mrf.mxu0  ;;  %v7487_v40 = vpop.f32.mrf.mxu1 }
 0x196   : > { %11394 = vst [vmem:[#allocation49_spill] sm:$0xff] %v7485_v11  ;;  %11395 = vst [vmem:[#allocation50_spill] sm:$0xff] %v7487_v40  ;;  %v7494_v61 = vmul.f32 %v5964_v1, %v7155_v46  ;;  %v527_v11 = vpack.c.bf16 %v507_v36, %v506_v20 }
 0x197   : > { %v7491_v5 = vpop.f32.mrf.mxu0  ;;  %v6002_v12 = vpop.f32.mrf.mxu1 }
 0x198   : > { %11396 = vst [vmem:[#allocation51_spill] sm:$0xff] %v7491_v5  ;;  %1658 = vmatmul.mubr.bf16.gmra.mxu0 %v526_v57  ;;  %11397 = vst [vmem:[#allocation52_spill] sm:$0xff] %v7494_v61  ;;  %v7507_v30 = vmul.f32 %v6002_v12, %v7202_v9 }
 0x199   : > { %1667 = vmatprep.mubr.bf16.mxu0 %v11366_v28  ;;  %v5965_v54 = vpop.f32.mrf.mxu0  ;;  %v7497_v33 = vpop.f32.mrf.mxu1 }
 0x19a   : > { %11398 = vst [vmem:[#allocation53_spill] sm:$0xff] %v7497_v33  ;;  %v7504_v59 = vmul.f32 %v5965_v54, %v7173_v53  ;;  %11400 = vst [vmem:[#allocation55_spill] sm:$0xff] %v7507_v30  ;;  %v7528_v54 = vld [vmem:[%s11114_s2 + $0xc8] sm:$0xff]  ;;  %v508_v53 = vmul.f32 %v7317_v29, %v7523_v0 }
 0x19b   : > { %v7509_v57 = vpop.f32.mrf.mxu0  ;;  %v6003_v46 = vpop.f32.mrf.mxu1  ;;  %11405 = vst [vmem:[#allocation60_spill] sm:$0xff] %v7528_v54  ;;  %v509_v30 = vmul.f32 %v7343_v15, %v7528_v54 }
 0x19c   : > { %11399 = vst [vmem:[#allocation54_spill] sm:$0xff] %v7504_v59  ;;  %11401 = vst [vmem:[#allocation56_spill] sm:$0xff] %v7509_v57  ;;  %v7514_v33 = vmul.f32 %v6003_v46, %v7221_v18 }
 0x19d   : > { %v5968_v37 = vpop.f32.mrf.mxu0  ;;  %v7516_v39 = vpop.f32.mrf.mxu1 }
 0x19e   : > { %11402 = vst [vmem:[#allocation57_spill] sm:$0xff] %v7514_v33  ;;  %11403 = vst [vmem:[#allocation58_spill] sm:$0xff] %v7516_v39  ;;  %v7533_v1 = vmul.f32 %v5968_v37, %v7202_v9 }
 0x19f   : > { %v7530_v12 = vpop.f32.mrf.mxu0  ;;  %v6006_v46 = vpop.f32.mrf.mxu1 }
 0x1a0   : > { %11406 = vst [vmem:[#allocation61_spill] sm:$0xff] %v7530_v12  ;;  %1668 = vmatmul.mubr.bf16.gmra.mxu0 %v527_v11  ;;  %11407 = vst [vmem:[#allocation62_spill] sm:$0xff] %v7533_v1  ;;  %v7546_v39 = vmul.f32 %v6006_v46, %v7252_v55  ;;  %v528_v12 = vpack.c.bf16 %v509_v30, %v508_v53  ;;  %v511_v30 = vmul.f32 %v7326_v8, %v7341_v50 }
 0x1a1   : > { %1677 = vmatprep.mubr.bf16.mxu0 %v11366_v28  ;;  %v5969_v20 = vpop.f32.mrf.mxu0  ;;  %v7536_v36 = vpop.f32.mrf.mxu1 }
 0x1a2   : > { %11408 = vst [vmem:[#allocation63_spill] sm:$0xff] %v7536_v36  ;;  %v7543_v33 = vmul.f32 %v5969_v20, %v7221_v18  ;;  %11410 = vst [vmem:[#allocation65_spill] sm:$0xff] %v7546_v39 }
 0x1a3   : > { %v7548_v11 = vpop.f32.mrf.mxu0  ;;  %v6007_v9 = vpop.f32.mrf.mxu1 }
 0x1a4   : > { %11409 = vst [vmem:[#allocation64_spill] sm:$0xff] %v7543_v33  ;;  %11411 = vst [vmem:[#allocation66_spill] sm:$0xff] %v7548_v11  ;;  %v7553_v36 = vmul.f32 %v6007_v9, %v7267_v13  ;;  %v510_v9 = vmul.f32 %v7311_v22, %v7324_v41 }
 0x1a5   : > { %v5972_v40 = vpop.f32.mrf.mxu0  ;;  %v7555_v29 = vpop.f32.mrf.mxu1 }
 0x1a6   : > { %11412 = vst [vmem:[#allocation67_spill] sm:$0xff] %v7553_v36  ;;  %11413 = vst [vmem:[#allocation68_spill] sm:$0xff] %v7555_v29  ;;  %v7562_v20 = vmul.f32 %v5972_v40, %v7252_v55  ;;  %v529_v36 = vpack.c.bf16 %v511_v30, %v510_v9 }
 0x1a7   : > { %v7559_v18 = vpop.f32.mrf.mxu0  ;;  %v6010_v46 = vpop.f32.mrf.mxu1 }
 0x1a8   : > { %11414 = vst [vmem:[#allocation69_spill] sm:$0xff] %v7559_v18  ;;  %1678 = vmatmul.mubr.bf16.gmra.mxu0 %v528_v12  ;;  %11415 = vst [vmem:[#allocation70_spill] sm:$0xff] %v7562_v20  ;;  %v7575_v15 = vmul.f32 %v6010_v46, %v7287_v25 }
 0x1a9   : > { %1687 = vmatprep.mubr.bf16.mxu0 %v11366_v28  ;;  %v5973_v37 = vpop.f32.mrf.mxu0  ;;  %v7565_v1 = vpop.f32.mrf.mxu1 }
 0x1aa   : > { %11416 = vst [vmem:[#allocation71_spill] sm:$0xff] %v7565_v1  ;;  %v7572_v53 = vmul.f32 %v5973_v37, %v7267_v13  ;;  %11418 = vst [vmem:[#allocation73_spill] sm:$0xff] %v7575_v15  ;;  %v7591_v13 = vld [vmem:[%s11114_s2 + $0xe0] sm:$0xff]  ;;  %v7596_v37 = vld [vmem:[%s11114_s2 + $0xe8] sm:$0xff] }
 0x1ab   : > { %v7577_v12 = vpop.f32.mrf.mxu0  ;;  %v6011_v55 = vpop.f32.mrf.mxu1  ;;  %11422 = vst [vmem:[#allocation77_spill] sm:$0xff] %v7591_v13  ;;  %11423 = vst [vmem:[#allocation78_spill] sm:$0xff] %v7596_v37  ;;  %v512_v8 = vmul.f32 %v7354_v32, %v7591_v13  ;;  %v513_v15 = vmul.f32 %v7379_v21, %v7596_v37 }
 0x1ac   : > { %11417 = vst [vmem:[#allocation72_spill] sm:$0xff] %v7572_v53  ;;  %11419 = vst [vmem:[#allocation74_spill] sm:$0xff] %v7577_v12  ;;  %v7582_v1 = vmul.f32 %v6011_v55, %v7304_v49 }
 0x1ad   : > { %v5976_v39 = vpop.f32.mrf.mxu0  ;;  %v7584_v22 = vpop.f32.mrf.mxu1 }
 0x1ae   : > { %11420 = vst [vmem:[#allocation75_spill] sm:$0xff] %v7582_v1  ;;  %11421 = vst [vmem:[#allocation76_spill] sm:$0xff] %v7584_v22  ;;  %v7601_v40 = vmul.f32 %v5976_v39, %v7287_v25 }
 0x1af   : > { %v7598_v46 = vpop.f32.mrf.mxu0  ;;  %v6014_v55 = vpop.f32.mrf.mxu1 }
 0x1b0   : > { %11424 = vst [vmem:[#allocation79_spill] sm:$0xff] %v7598_v46  ;;  %1688 = vmatmul.mubr.bf16.gmra.mxu0 %v529_v36  ;;  %11425 = vst [vmem:[#allocation80_spill] sm:$0xff] %v7601_v40  ;;  %v7614_v22 = vmul.f32 %v6014_v55, %v7324_v41  ;;  %v530_v46 = vpack.c.bf16 %v513_v15, %v512_v8  ;;  %v515_v15 = vmul.f32 %v7362_v4, %v7377_v24 }
 0x1b1   : > { %1697 = vmatprep.mubr.bf16.mxu0 %v11366_v28  ;;  %v5977_v9 = vpop.f32.mrf.mxu0  ;;  %v7604_v30 = vpop.f32.mrf.mxu1 }
 0x1b2   : > { %11426 = vst [vmem:[#allocation81_spill] sm:$0xff] %v7604_v30  ;;  %v7611_v1 = vmul.f32 %v5977_v9, %v7304_v49  ;;  %11428 = vst [vmem:[#allocation83_spill] sm:$0xff] %v7614_v22 }
 0x1b3   : > { %v7616_v36 = vpop.f32.mrf.mxu0  ;;  %v6015_v25 = vpop.f32.mrf.mxu1 }
 0x1b4   : > { %11427 = vst [vmem:[#allocation82_spill] sm:$0xff] %v7611_v1  ;;  %11429 = vst [vmem:[#allocation84_spill] sm:$0xff] %v7616_v36  ;;  %v7621_v30 = vmul.f32 %v6015_v25, %v7341_v50  ;;  %v514_v25 = vmul.f32 %v7348_v27, %v7360_v60  ;;  %v11457_v1 = vld [vmem:[#allocation31_spill] sm:$0xff]  ;;  %v11458_v36 = vld [vmem:[#allocation17_spill] sm:$0xff] }
 0x1b5   : > { %v5980_v29 = vpop.f32.mrf.mxu0  ;;  %v7623_v32 = vpop.f32.mrf.mxu1  ;;  %v802_v20 = vmul.f32 %v11458_v36, %v11457_v1 }
 0x1b6   : > { %11430 = vst [vmem:[#allocation85_spill] sm:$0xff] %v7621_v30  ;;  %11431 = vst [vmem:[#allocation86_spill] sm:$0xff] %v7623_v32  ;;  %v7630_v9 = vmul.f32 %v5980_v29, %v7324_v41  ;;  %v531_v30 = vpack.c.bf16 %v515_v15, %v514_v25  ;;  %v786_v25 = vmul.f32 %v7414_v52, %v7091_v10 }
 0x1b7   : > { %v7627_v21 = vpop.f32.mrf.mxu0  ;;  %v6018_v55 = vpop.f32.mrf.mxu1  ;;  %v787_v52 = vmul.f32 %v7384_v3, %v7107_v19 }
 0x1b8   : > { %11432 = vst [vmem:[#allocation87_spill] sm:$0xff] %v7627_v21  ;;  %1698 = vmatmul.mubr.bf16.gmra.mxu0 %v530_v46  ;;  %11433 = vst [vmem:[#allocation88_spill] sm:$0xff] %v7630_v9  ;;  %v7643_v49 = vmul.f32 %v6018_v55, %v7360_v60  ;;  %v11453_v9 = vpack.c.bf16 %v7179_v58, %v7163_v51  ;;  %v11455_v51 = vpack.c.bf16 %v7229_v23, %v7211_v6  ;;  %v11456_v58 = vld [vmem:[#allocation14_spill] sm:$0xff] }
 0x1b9   : > { %1707 = vmatprep.mubr.bf16.mxu0 %v11366_v28  ;;  %v5981_v39 = vpop.f32.mrf.mxu0  ;;  %v7633_v40 = vpop.f32.mrf.mxu1 }
 0x1ba   : > { %11434 = vst [vmem:[#allocation89_spill] sm:$0xff] %v7633_v40  ;;  %v7640_v8 = vmul.f32 %v5981_v39, %v7341_v50  ;;  %11436 = vst [vmem:[#allocation91_spill] sm:$0xff] %v7643_v49 }
 0x1bb   : > { %v7645_v46 = vpop.f32.mrf.mxu0  ;;  %v6019_v41 = vpop.f32.mrf.mxu1 }
 0x1bc   : > { %11435 = vst [vmem:[#allocation90_spill] sm:$0xff] %v7640_v8  ;;  %11437 = vst [vmem:[#allocation92_spill] sm:$0xff] %v7645_v46  ;;  %v7650_v40 = vmul.f32 %v6019_v41, %v7377_v24 }
 0x1bd   : > { %v5984_v22 = vpop.f32.mrf.mxu0  ;;  %v7652_v27 = vpop.f32.mrf.mxu1 }
 0x1be   : > { %11438 = vst [vmem:[#allocation93_spill] sm:$0xff] %v7650_v40  ;;  %11439 = vst [vmem:[#allocation94_spill] sm:$0xff] %v7652_v27  ;;  %v7661_v55 = vmul.f32 %v5984_v22, %v7360_v60  ;;  %v785_v27 = vmul.f32 %v7400_v47, %v7086_v7 }
 0x1bf   : > { %v7656_v4 = vpop.f32.mrf.mxu0  ;;  %v7658_v39 = vpop.f32.mrf.mxu1 }
 0x1c0   : > { %11440 = vst [vmem:[#allocation95_spill] sm:$0xff] %v7656_v4  ;;  %11441 = vst [vmem:[#allocation96_spill] sm:$0xff] %v7658_v39  ;;  %1708 = vmatmul.mubr.bf16.gmra.mxu0 %v531_v30  ;;  %v817_v30 = vpack.c.bf16 %v786_v25, %v785_v27 }
 0x1c1   : > { %11442 = vst [vmem:[#allocation97_spill] sm:$0xff] %v7661_v55  ;;  %1717 = vmatprep.mubr.bf16.mxu0 %v11366_v28  ;;  %v5985_v29 = vpop.f32.mrf.mxu0  ;;  %v7664_v41 = vpop.f32.mrf.mxu1 }
 0x1c2   : > { %11443 = vst [vmem:[#allocation98_spill] sm:$0xff] %v7664_v41  ;;  %v7671_v15 = vmul.f32 %v5985_v29, %v7377_v24  ;;  %v788_v24 = vmul.f32 %v7402_v63, %v7100_v16  ;;  %v11450_v16 = vpack.c.bf16 %v7146_v42, %v7131_v34 }
 0x1c3   : > { %v7673_v50 = vpop.f32.mrf.mxu1 }
 0x1c4   : > { %11444 = vst [vmem:[#allocation99_spill] sm:$0xff] %v7671_v15  ;;  %11445 = vst [vmem:[#allocation100_spill] sm:$0xff] %v7673_v50  ;;  %v818_v60 = vpack.c.bf16 %v788_v24, %v787_v52  ;;  %v11451_v24 = vpack.c.bf16 %v7134_v35, %v7117_v26  ;;  %v11452_v15 = vpack.c.bf16 %v7191_v2, %v7176_v56 }
 0x1c5   : > { %v7677_v22 = vpop.f32.mrf.mxu1 }
 0x1c6   : > { %11446 = vst [vmem:[#allocation101_spill] sm:$0xff] %v7677_v22 }
 0x1c7   : > { %v7679_v49 = vpop.f32.mrf.mxu1 }
 0x1c8   : > { %1718 = vmatmul.mubr.bf16.gmra.mxu0 %v817_v30 }
 0x1c9   : > { %1727 = vmatprep.mubr.bf16.mxu0 %v11366_v28  ;;  %v7682_v47 = vpop.f32.mrf.mxu1 }
 0x1cb   : > { %v7688_v29 = vpop.f32.mrf.mxu1 }
 0x1cc   : > { %11447 = vst [vmem:[#allocation102_spill] sm:$0xff] %v7688_v29  ;;  %v11490_v29 = vld [vmem:[#allocation29_spill] sm:$0xff] }
 0x1cd   : > { %v7690_v40 = vpop.f32.mrf.mxu1 }
 0x1ce   : > { %11448 = vst [vmem:[#allocation103_spill] sm:$0xff] %v7690_v40 }
 0x1cf   : > { %v7692_v32 = vpop.f32.mrf.mxu1 }
 0x1d0   : > { %1728 = vmatmul.mubr.bf16.gmra.mxu0 %v818_v60 }
 0x1d1   : > { %1737 = vmatprep.mubr.bf16.mxu0 %v11366_v28  ;;  %v7695_v27 = vpop.f32.mrf.mxu1 }
 0x1d3   : > { %v7697_v25 = vpop.f32.mrf.mxu1 }
 0x1d4   : > { %11449 = vst [vmem:[#allocation104_spill] sm:$0xff] %v7697_v25 }
 0x1d5   : > { %v7699_v30 = vpop.f32.mrf.mxu1 }
 0x1d7   : > { %v7701_v19 = vpop.f32.mrf.mxu1 }
 0x1d8   : > { %1738 = vmatmul.mubr.bf16.gmra.mxu0 %v11450_v16 }
 0x1d9   : > { %1747 = vmatprep.mubr.bf16.mxu0 %v11366_v28  ;;  %v7707_v63 = vpop.f32.mrf.mxu1 }
 0x1db   : > { %v7709_v3 = vpop.f32.mrf.mxu1 }
 0x1dd   : > { %v7711_v60 = vpop.f32.mrf.mxu1 }
 0x1df   : > { %v7713_v52 = vpop.f32.mrf.mxu1 }
 0x1e0   : > { %1748 = vmatmul.mubr.bf16.gmra.mxu0 %v11451_v24 }
 0x1e1   : > { %1757 = vmatprep.mubr.bf16.mxu0 %v11366_v28  ;;  %v7719_v55 = vpop.f32.mrf.mxu1 }
 0x1e3   : > { %v7721_v34 = vpop.f32.mrf.mxu1 }
 0x1e5   : > { %v7723_v42 = vpop.f32.mrf.mxu1 }
 0x1e7   : > { %v7725_v16 = vpop.f32.mrf.mxu1 }
 0x1e8   : > { %1758 = vmatmul.mubr.bf16.gmra.mxu0 %v11452_v15  ;;  %v11454_v15 = vpack.c.bf16 %v7241_v44, %v7226_v14 }
 0x1e9   : > { %1767 = vmatprep.mubr.bf16.mxu0 %v11366_v28  ;;  %v7731_v4 = vpop.f32.mrf.mxu1 }
 0x1eb   : > { %v7733_v26 = vpop.f32.mrf.mxu1 }
 0x1ed   : > { %v7735_v35 = vpop.f32.mrf.mxu1 }
 0x1ef   : > { %v7737_v24 = vpop.f32.mrf.mxu1 }
 0x1f0   : > { %1768 = vmatmul.mubr.bf16.gmra.mxu0 %v11453_v9  ;;  %v801_v9 = vmul.f32 %v11456_v58, %v7393_v17  ;;  %v11470_v17 = vld [vmem:[#allocation21_spill] sm:$0xff] }
 0x1f1   : > { %1777 = vmatprep.mubr.bf16.mxu0 %v11366_v28  ;;  %v7743_v8 = vpop.f32.mrf.mxu1 }
 0x1f2   : > { %v825_v44 = vpack.c.bf16 %v802_v20, %v801_v9  ;;  %v11466_v9 = vld [vmem:[#allocation16_spill] sm:$0xff] }
 0x1f3   : > { %v7745_v56 = vpop.f32.mrf.mxu1 }
 0x1f5   : > { %v7747_v2 = vpop.f32.mrf.mxu1 }
 0x1f7   : > { %v7753_v46 = vpop.f32.mrf.mxu1 }
 0x1f8   : > { %1778 = vmatmul.mubr.bf16.gmra.mxu0 %v11454_v15  ;;  %v7767_v15 = vpop.f32.mrf.mxu0 }
 0x1f9   : > { %1787 = vmatprep.mubr.bf16.mxu0 %v11366_v28  ;;  %v7755_v21 = vpop.f32.mrf.mxu1  ;;  %11459 = vst [vmem:[#allocation14_spill] sm:$0xff] %v7767_v15  ;;  %v11467_v15 = vld [vmem:[#allocation15_spill] sm:$0xff] }
 0x1fa   : > { %v11468_v1 = vpack.c.bf16 %v11466_v9, %v11467_v15 }
 0x1fb   : > { %v7765_v14 = vpop.f32.mrf.mxu1 }
 0x1fd   : > { %v7769_v53 = vpop.f32.mrf.mxu1 }
 0x1ff   : > { %v7776_v23 = vpop.f32.mrf.mxu1 }
 0x200   : > { %1788 = vmatmul.mubr.bf16.gmra.mxu0 %v11455_v51  ;;  %11462 = vst [vmem:[#allocation106_spill] sm:$0xff] %v7776_v23  ;;  %v806_v23 = vmul.f32 %v11470_v17, %v7460_v38  ;;  %v11478_v38 = vld [vmem:[#allocation19_spill] sm:$0xff] }
 0x201   : > { %1797 = vmatprep.mubr.bf16.mxu0 %v11366_v28  ;;  %v7782_v36 = vpop.f32.mrf.mxu1 }
 0x202   : > { %11465 = vst [vmem:[#allocation109_spill] sm:$0xff] %v7782_v36 }
 0x203   : > { %v7796_v11 = vpop.f32.mrf.mxu1 }
 0x204   : > { %11471 = vst [vmem:[#allocation16_spill] sm:$0xff] %v7796_v11 }
 0x205   : > { %v7802_v50 = vpop.f32.mrf.mxu1 }
 0x206   : > { %11474 = vst [vmem:[#allocation21_spill] sm:$0xff] %v7802_v50 }
 0x207   : > { %v7809_v9 = vpop.f32.mrf.mxu1 }
 0x208   : > { %v7771_v12 = vpop.f32.mrf.mxu0  ;;  %1798 = vmatmul.mubr.bf16.gmra.mxu0 %v825_v44  ;;  %v11469_v44 = vld [vmem:[#allocation18_spill] sm:$0xff]  ;;  %11475 = vst [vmem:[#allocation110_spill] sm:$0xff] %v7809_v9 }
 0x209   : > { %11460 = vst [vmem:[#allocation17_spill] sm:$0xff] %v7771_v12  ;;  %1807 = vmatprep.mubr.bf16.mxu0 %v11366_v28  ;;  %v805_v18 = vmul.f32 %v11469_v44, %v7455_v62  ;;  %v7815_v11 = vpop.f32.mrf.mxu1 }
 0x20a   : > { %v7774_v6 = vpop.f32.mrf.mxu0  ;;  %11476 = vst [vmem:[#allocation111_spill] sm:$0xff] %v7815_v11 }
 0x20b   : > { %11461 = vst [vmem:[#allocation105_spill] sm:$0xff] %v7774_v6  ;;  %v827_v36 = vpack.c.bf16 %v806_v23, %v805_v18  ;;  %v11477_v23 = vld [vmem:[#allocation20_spill] sm:$0xff]  ;;  %v7829_v5 = vpop.f32.mrf.mxu1  ;;  %v11496_v6 = vld [vmem:[#allocation27_spill] sm:$0xff] }
 0x20c   : > { %v7778_v51 = vpop.f32.mrf.mxu0  ;;  %v11479_v50 = vpack.c.bf16 %v11477_v23, %v11478_v38  ;;  %11482 = vst [vmem:[#allocation20_spill] sm:$0xff] %v7829_v5 }
 0x20d   : > { %11463 = vst [vmem:[#allocation107_spill] sm:$0xff] %v7778_v51  ;;  %v11481_v51 = vld [vmem:[#allocation25_spill] sm:$0xff]  ;;  %v7835_v45 = vpop.f32.mrf.mxu1 }
 0x20e   : > { %v7780_v58 = vpop.f32.mrf.mxu0  ;;  %v810_v9 = vmul.f32 %v11481_v51, %v7528_v54  ;;  %11483 = vst [vmem:[#allocation19_spill] sm:$0xff] %v7835_v45 }
 0x20f   : > { %11464 = vst [vmem:[#allocation108_spill] sm:$0xff] %v7780_v58  ;;  %v7840_v23 = vpop.f32.mrf.mxu1 }
 0x210   : > { %v7784_v20 = vpop.f32.mrf.mxu0  ;;  %1808 = vmatmul.mubr.bf16.gmra.mxu0 %v11468_v1 }
 0x211   : > { %1817 = vmatprep.mubr.bf16.mxu0 %v11366_v28  ;;  %v7846_v54 = vpop.f32.mrf.mxu1 }
 0x212   : > { %v7794_v33 = vpop.f32.mrf.mxu0  ;;  %11485 = vst [vmem:[#allocation25_spill] sm:$0xff] %v7846_v54 }
 0x213   : > { %v7856_v39 = vpop.f32.mrf.mxu1 }
 0x214   : > { %v7798_v61 = vpop.f32.mrf.mxu0 }
 0x215   : > { %11472 = vst [vmem:[#allocation15_spill] sm:$0xff] %v7798_v61  ;;  %v814_v61 = vmul.f32 %v11490_v29, %v7596_v37  ;;  %v7858_v54 = vpop.f32.mrf.mxu1  ;;  %v11495_v37 = vld [vmem:[#allocation28_spill] sm:$0xff] }
 0x216   : > { %v7800_v59 = vpop.f32.mrf.mxu0 }
 0x217   : > { %11473 = vst [vmem:[#allocation18_spill] sm:$0xff] %v7800_v59 }
 0x218   : > { %v7804_v1 = vpop.f32.mrf.mxu0  ;;  %1818 = vmatmul.mubr.bf16.gmra.mxu0 %v827_v36  ;;  %v11480_v36 = vld [vmem:[#allocation22_spill] sm:$0xff] }
 0x219   : > { %1827 = vmatprep.mubr.bf16.mxu0 %v11366_v28  ;;  %v809_v62 = vmul.f32 %v11480_v36, %v7523_v0  ;;  %11484 = vst [vmem:[#allocation22_spill] sm:$0xff] %v7840_v23 }
 0x21a   : > { %v7807_v15 = vpop.f32.mrf.mxu0 }
 0x21b   : > { %v829_v11 = vpack.c.bf16 %v810_v9, %v809_v62  ;;  %v11486_v62 = vld [vmem:[#allocation24_spill] sm:$0xff]  ;;  %v11487_v9 = vld [vmem:[#allocation23_spill] sm:$0xff] }
 0x21c   : > { %v7811_v17 = vpop.f32.mrf.mxu0  ;;  %v11488_v5 = vpack.c.bf16 %v11486_v62, %v11487_v9  ;;  %11491 = vst [vmem:[#allocation24_spill] sm:$0xff] %v7856_v39  ;;  %11492 = vst [vmem:[#allocation23_spill] sm:$0xff] %v7858_v54  ;;  %v7861_v62 = vpop.f32.mrf.mxu1  ;;  %v11497_v39 = vpack.c.bf16 %v11495_v37, %v11496_v6 }
 0x21e   : > { %v7813_v44 = vpop.f32.mrf.mxu0 }
 0x220   : > { %v7817_v18 = vpop.f32.mrf.mxu0  ;;  %1828 = vmatmul.mubr.bf16.gmra.mxu0 %v11479_v50 }
 0x221   : > { %1837 = vmatprep.mubr.bf16.mxu0 %v11366_v28 }
 0x222   : > { %v7827_v57 = vpop.f32.mrf.mxu0 }
 0x224   : > { %v7831_v22 = vpop.f32.mrf.mxu0 }
 0x226   : > { %v7833_v58 = vpop.f32.mrf.mxu0 }
 0x228   : > { %v7837_v38 = vpop.f32.mrf.mxu0  ;;  %1838 = vmatmul.mubr.bf16.gmra.mxu0 %v829_v11  ;;  %v11489_v11 = vld [vmem:[#allocation26_spill] sm:$0xff] }
 0x229   : > { %1847 = vmatprep.mubr.bf16.mxu0 %v11366_v28  ;;  %v813_v45 = vmul.f32 %v11489_v11, %v7591_v13  ;;  %11493 = vst [vmem:[#allocation26_spill] sm:$0xff] %v7861_v62  ;;  %v7863_v13 = vpop.f32.mrf.mxu1 }
 0x22a   : > { %v1601_v50 = vpop.f32.mrf.mxu0  ;;  %11494 = vst [vmem:[#allocation29_spill] sm:$0xff] %v7863_v13 }
 0x22b   : > { %v831_v40 = vpack.c.bf16 %v814_v61, %v813_v45  ;;  %v1080_v45 = vmul.f32 %v7423_v48, %v7086_v7  ;;  %v1081_v61 = vmul.f32 %v7441_v43, %v7091_v10  ;;  %v7873_v54 = vpop.f32.mrf.mxu1 }
 0x22c   : > { %v7842_v51 = vpop.f32.mrf.mxu0 }
 0x22d   : > { %v1112_v7 = vpack.c.bf16 %v1081_v61, %v1080_v45  ;;  %v7886_v6 = vpop.f32.mrf.mxu1  ;;  %v7950_v61 = vadd.f32 %v7707_v63, %v7827_v57 }
 0x22e   : > { %v7844_v36 = vpop.f32.mrf.mxu0 }
 0x230   : > { %v1609_v0 = vpop.f32.mrf.mxu0  ;;  %1848 = vmatmul.mubr.bf16.gmra.mxu0 %v11488_v5 }
 0x231   : > { %1857 = vmatprep.mubr.bf16.mxu0 %v11366_v28 }
 0x232   : > { %v1611_v23 = vpop.f32.mrf.mxu0 }
 0x234   : > { %v1613_v12 = vpop.f32.mrf.mxu0 }
 0x236   : > { %v1615_v59 = vpop.f32.mrf.mxu0 }
 0x238   : > { %v1619_v41 = vpop.f32.mrf.mxu0  ;;  %1858 = vmatmul.mubr.bf16.gmra.mxu0 %v831_v40 }
 0x239   : > { %1867 = vmatprep.mubr.bf16.mxu0 %v11366_v28  ;;  %v7889_v10 = vadd.f32 %v7737_v24, %v1619_v41  ;;  %v7912_v24 = vpop.f32.mrf.mxu1 }
 0x23a   : > { %v1621_v5 = vpop.f32.mrf.mxu0 }
 0x23b   : > { %v7882_v37 = vadd.f32 %v7743_v8, %v1621_v5  ;;  %11500 = vst [vmem:[#allocation112_spill] sm:$0xff] %v7889_v10  ;;  %v7900_v8 = vadd.f32 %v7731_v4, %v1611_v23  ;;  %v7923_v23 = vadd.f32 %v7719_v55, %v1601_v50  ;;  %v7941_v55 = vadd.f32 %v7733_v26, %v1613_v12  ;;  %v11512_v50 = vld [vmem:[#allocation36_spill] sm:$0xff] }
 0x23c   : > { %v1623_v9 = vpop.f32.mrf.mxu0  ;;  %v11516_v26 = vld [vmem:[#allocation8_spill] sm:$0xff] }
 0x23d   : > { %11499 = vst [vmem:[#allocation27_spill] sm:$0xff] %v7882_v37  ;;  %11503 = vst [vmem:[#allocation115_spill] sm:$0xff] %v7900_v8  ;;  %v7918_v4 = vadd.f32 %v7745_v56, %v1623_v9  ;;  %v7934_v56 = vpop.f32.mrf.mxu1  ;;  %v7938_v9 = vadd.f32 %v7713_v52, %v7837_v38  ;;  %v11517_v38 = vld [vmem:[#allocation44_spill] sm:$0xff] }
 0x23e   : > { %v1625_v11 = vpop.f32.mrf.mxu0  ;;  %11507 = vst [vmem:[#allocation119_spill] sm:$0xff] %v7923_v23  ;;  %11510 = vst [vmem:[#allocation122_spill] sm:$0xff] %v7941_v55 }
 0x23f   : > { %v7903_v5 = vadd.f32 %v7747_v2, %v1625_v11  ;;  %11506 = vst [vmem:[#allocation118_spill] sm:$0xff] %v7918_v4  ;;  %v7926_v11 = vadd.f32 %v7735_v35, %v1615_v59  ;;  %11509 = vst [vmem:[#allocation121_spill] sm:$0xff] %v7938_v9  ;;  %v11511_v35 = vld [vmem:[#allocation38_spill] sm:$0xff]  ;;  %v2509_v52 = vmax.f32 %v7938_v9, %v7923_v23  ;;  %v7967_v63 = vpop.f32.mrf.mxu1 }
 0x240   : > { %v1629_v29 = vpop.f32.mrf.mxu0  ;;  %1868 = vmatmul.mubr.bf16.gmra.mxu0 %v11497_v39  ;;  %v11513_v45 = vpack.c.bf16 %v11511_v35, %v11512_v50  ;;  %11514 = vst [vmem:[#allocation38_spill] sm:$0xff] %v7950_v61  ;;  %v11530_v35 = vld [vmem:[#allocation105_spill] sm:$0xff]  ;;  %v11531_v50 = vld [vmem:[#allocation98_spill] sm:$0xff] }
 0x241   : > { %1877 = vmatprep.mubr.bf16.mxu0 %v11366_v28  ;;  %v7876_v62 = vadd.f32 %v7753_v46, %v1629_v29  ;;  %11504 = vst [vmem:[#allocation116_spill] sm:$0xff] %v7903_v5  ;;  %11508 = vst [vmem:[#allocation120_spill] sm:$0xff] %v7926_v11  ;;  %v2524_v29 = vmax.f32 %v7918_v4, %v7903_v5  ;;  %v2518_v12 = vmax.f32 %v7941_v55, %v7926_v11 }
 0x242   : > { %v1631_v40 = vpop.f32.mrf.mxu0 }
 0x243   : > { %v7879_v13 = vadd.f32 %v7755_v21, %v1631_v40  ;;  %v7954_v40 = vadd.f32 %v7723_v42, %v7844_v36  ;;  %v7971_v42 = vadd.f32 %v7701_v19, %v7817_v18  ;;  %v7975_v36 = vadd.f32 %v7721_v34, %v7842_v51 }
 0x244   : > { %v1633_v25 = vpop.f32.mrf.mxu0 }
 0x245   : > { %11498 = vst [vmem:[#allocation28_spill] sm:$0xff] %v7879_v13  ;;  %v2527_v39 = vmax.f32 %v7876_v62, %v7879_v13  ;;  %v7892_v43 = vadd.f32 %v7765_v14, %v1633_v25  ;;  %v2521_v25 = vmax.f32 %v7889_v10, %v7882_v37  ;;  %v7915_v14 = vadd.f32 %v7725_v16, %v1609_v0 }
 0x246   : > { %v1635_v48 = vpop.f32.mrf.mxu0  ;;  %11515 = vst [vmem:[#allocation36_spill] sm:$0xff] %v7954_v40  ;;  %11519 = vst [vmem:[#allocation8_spill] sm:$0xff] %v7971_v42  ;;  %v2512_v19 = vmax.f32 %v7975_v36, %v7954_v40  ;;  %v2503_v18 = vmax.f32 %v7971_v42, %v7950_v61 }
 0x247   : > { %11501 = vst [vmem:[#allocation113_spill] sm:$0xff] %v7892_v43  ;;  %v7895_v21 = vadd.f32 %v7769_v53, %v1635_v48  ;;  %2528 = vmax.xlane.f32.xlu0 %v2527_v39  ;;  %11505 = vst [vmem:[#allocation117_spill] sm:$0xff] %v7915_v14  ;;  %v2515_v0 = vmax.f32 %v7915_v14, %v7900_v8  ;;  %v1084_v39 = vmul.f32 %v11517_v38, %v11516_v26  ;;  %v11568_v8 = vld [vmem:[#allocation74_spill] sm:$0xff] }
 0x248   : > { %v7897_v46 = vpop.f32.mrf.mxu0  ;;  %1878 = vmatmul.mubr.bf16.gmra.mxu0 %v1112_v7  ;;  %v11518_v7 = vld [vmem:[#allocation9_spill] sm:$0xff]  ;;  %11520 = vst [vmem:[#allocation44_spill] sm:$0xff] %v7975_v36 }
 0x249   : > { %11502 = vst [vmem:[#allocation114_spill] sm:$0xff] %v7895_v21  ;;  %v2530_v41 = vmax.f32 %v7892_v43, %v7895_v21  ;;  %1887 = vmatprep.mubr.bf16.mxu0 %v11366_v28  ;;  %v1085_v48 = vmul.f32 %v7480_v31, %v11518_v7  ;;  %v7985_v31 = vadd.f32 %v7711_v60, %v7833_v58  ;;  %v11537_v7 = vld [vmem:[#allocation96_spill] sm:$0xff] }
 0x24a   : > { %v7910_v53 = vpop.f32.mrf.mxu0  ;;  %v8007_v58 = vadd.f32 %v7682_v47, %v7794_v33  ;;  %v8024_v33 = vadd.f32 %v7679_v49, %v7784_v20  ;;  %v11528_v47 = vld [vmem:[#allocation104_spill] sm:$0xff] }
 0x24b   : > { %2531 = vmax.xlane.f32.xlu1 %v2530_v41  ;;  %2522 = vmax.xlane.f32.xlu0 %v2521_v25  ;;  %v7981_v25 = vadd.f32 %v7695_v27, %v7807_v15  ;;  %11522 = vst [vmem:[#allocation123_spill] sm:$0xff] %v7985_v31  ;;  %v1114_v34 = vpack.c.bf16 %v1085_v48, %v1084_v39  ;;  %v11536_v39 = vld [vmem:[#allocation17_spill] sm:$0xff] }
 0x24c   : > { %v7920_v2 = vpop.f32.mrf.mxu0  ;;  %v8001_v27 = vadd.f32 %v7709_v3, %v7831_v22  ;;  %11525 = vst [vmem:[#allocation126_spill] sm:$0xff] %v8007_v58  ;;  %v8011_v15 = vadd.f32 %v7699_v30, %v7813_v44  ;;  %11527 = vst [vmem:[#allocation128_spill] sm:$0xff] %v8024_v33  ;;  %v8028_v30 = vadd.f32 %v11528_v47, %v7811_v17  ;;  %v11543_v47 = vld [vmem:[#allocation45_spill] sm:$0xff] }
 0x24d   : > { %11521 = vst [vmem:[#allocation9_spill] sm:$0xff] %v7981_v25  ;;  %v2491_v20 = vmax.f32 %v8024_v33, %v8007_v58  ;;  %v8050_v48 = vadd.f32 %v11537_v7, %v11536_v39  ;;  %v11551_v58 = vld [vmem:[#allocation56_spill] sm:$0xff] }
 0x24e   : > { %v7932_v16 = vpop.f32.mrf.mxu0  ;;  %11524 = vst [vmem:[#allocation125_spill] sm:$0xff] %v8001_v27  ;;  %11526 = vst [vmem:[#allocation127_spill] sm:$0xff] %v8011_v15  ;;  %v2500_v49 = vmax.f32 %v8028_v30, %v8011_v15 }
 0x24f   : > { %2525 = vmax.xlane.f32.xlu1 %v2524_v29  ;;  %2516 = vmax.xlane.f32.xlu0 %v2515_v0  ;;  %v7993_v29 = vpop.f32.mrf.mxu1  ;;  %v7997_v0 = vadd.f32 %v7692_v32, %v7804_v1  ;;  %v2506_v32 = vmax.f32 %v8001_v27, %v7985_v31  ;;  %11529 = vst [vmem:[#allocation104_spill] sm:$0xff] %v8028_v30  ;;  %v11561_v30 = vld [vmem:[#allocation66_spill] sm:$0xff] }
 0x250   : > { %v7943_v59 = vpop.f32.mrf.mxu0  ;;  %1888 = vmatmul.mubr.bf16.gmra.mxu0 %v11513_v45  ;;  %v8034_v45 = vadd.f32 %v11531_v50, %v11530_v35  ;;  %v11545_v50 = vld [vmem:[#allocation108_spill] sm:$0xff] }
 0x251   : > { %1897 = vmatprep.mubr.bf16.mxu0 %v11366_v28  ;;  %11523 = vst [vmem:[#allocation124_spill] sm:$0xff] %v7997_v0  ;;  %v2497_v22 = vmax.f32 %v7997_v0, %v7981_v25  ;;  %v8020_v1 = vpop.f32.mrf.mxu1 }
 0x252   : > { %v7965_v57 = vpop.f32.mrf.mxu0  ;;  %11532 = vst [vmem:[#allocation105_spill] sm:$0xff] %v8034_v45  ;;  %v2485_v7 = vmax.f32 %v8050_v48, %v8034_v45 }
 0x253   : > { %2519 = vmax.xlane.f32.xlu1 %v2518_v12  ;;  %2510 = vmax.xlane.f32.xlu0 %v2509_v52  ;;  %v11533_v12 = vld [vmem:[#allocation18_spill] sm:$0xff]  ;;  %v11534_v52 = vld [vmem:[#allocation103_spill] sm:$0xff]  ;;  %v8046_v38 = vpop.f32.mrf.mxu1 }
 0x254   : > { %v7977_v41 = vpop.f32.mrf.mxu0  ;;  %v8038_v26 = vadd.f32 %v11534_v52, %v11533_v12  ;;  %11538 = vst [vmem:[#allocation18_spill] sm:$0xff] %v8050_v48  ;;  %v11546_v12 = vld [vmem:[#allocation101_spill] sm:$0xff] }
 0x255   : > { %v8063_v52 = vadd.f32 %v11546_v12, %v11545_v50  ;;  %v11553_v50 = vld [vmem:[#allocation100_spill] sm:$0xff] }
 0x256   : > { %v7991_v51 = vpop.f32.mrf.mxu0  ;;  %11535 = vst [vmem:[#allocation98_spill] sm:$0xff] %v8038_v26 }
 0x257   : > { %2513 = vmax.xlane.f32.xlu1 %v2512_v19  ;;  %2504 = vmax.xlane.f32.xlu0 %v2503_v18  ;;  %v11539_v19 = vld [vmem:[#allocation15_spill] sm:$0xff]  ;;  %v11540_v18 = vld [vmem:[#allocation102_spill] sm:$0xff]  ;;  %11547 = vst [vmem:[#allocation17_spill] sm:$0xff] %v8063_v52 }
 0x258   : > { %v8003_v60 = vpop.f32.mrf.mxu0  ;;  %1898 = vmatmul.mubr.bf16.gmra.mxu0 %v1114_v34  ;;  %v8054_v34 = vadd.f32 %v11540_v18, %v11539_v19  ;;  %v11550_v18 = vld [vmem:[#allocation11_spill] sm:$0xff] }
 0x259   : > { %1907 = vmatprep.mubr.bf16.mxu0 %v11366_v28  ;;  %v1089_v33 = vmul.f32 %v11551_v58, %v11550_v18 }
 0x25a   : > { %v8018_v3 = vpop.f32.mrf.mxu0  ;;  %11541 = vst [vmem:[#allocation103_spill] sm:$0xff] %v8054_v34  ;;  %v2494_v39 = vmax.f32 %v8054_v34, %v8038_v26 }
 0x25b   : > { %2507 = vmax.xlane.f32.xlu1 %v2506_v32  ;;  %2498 = vmax.xlane.f32.xlu0 %v2497_v22  ;;  %v11542_v22 = vld [vmem:[#allocation47_spill] sm:$0xff] }
 0x25c   : > { %v8030_v44 = vpop.f32.mrf.mxu0  ;;  %v11544_v35 = vpack.c.bf16 %v11542_v22, %v11543_v47  ;;  %v8076_v47 = vpop.f32.mrf.mxu1 }
 0x25e   : > { %v8044_v17 = vpop.f32.mrf.mxu0 }
 0x25f   : > { %2501 = vmax.xlane.f32.xlu1 %v2500_v49  ;;  %2492 = vmax.xlane.f32.xlu0 %v2491_v20  ;;  %v11548_v49 = vld [vmem:[#allocation10_spill] sm:$0xff]  ;;  %v11549_v20 = vld [vmem:[#allocation51_spill] sm:$0xff] }
 0x260   : > { %v8056_v32 = vpop.f32.mrf.mxu0  ;;  %1908 = vmatmul.mubr.bf16.gmra.mxu0 %v11544_v35  ;;  %v1088_v19 = vmul.f32 %v11549_v20, %v11548_v49  ;;  %v11552_v35 = vld [vmem:[#allocation107_spill] sm:$0xff]  ;;  %v8088_v20 = vpop.f32.mrf.mxu1 }
 0x261   : > { %1917 = vmatprep.mubr.bf16.mxu0 %v11366_v28  ;;  %v8080_v12 = vadd.f32 %v11553_v50, %v11552_v35 }
 0x262   : > { %v8074_v22 = vpop.f32.mrf.mxu0  ;;  %v1116_v48 = vpack.c.bf16 %v1089_v33, %v1088_v19  ;;  %v2466_v35 = vpop.f32.mrf.mxu1  ;;  %v11556_v33 = vld [vmem:[#allocation52_spill] sm:$0xff] }
 0x263   : > { %11554 = vst [vmem:[#allocation96_spill] sm:$0xff] %v8080_v12  ;;  %2495 = vmax.xlane.f32.xlu1 %v2494_v39  ;;  %2486 = vmax.xlane.f32.xlu0 %v2485_v7  ;;  %v2488_v45 = vmax.f32 %v8080_v12, %v8063_v52  ;;  %v11555_v52 = vld [vmem:[#allocation54_spill] sm:$0xff]  ;;  %v11559_v12 = vld [vmem:[#allocation61_spill] sm:$0xff] }
 0x264   : > { %v8082_v26 = vpop.f32.mrf.mxu0  ;;  %v2468_v50 = vpop.f32.mrf.mxu1  ;;  %v11557_v19 = vpack.c.bf16 %v11555_v52, %v11556_v33 }
 0x266   : > { %v8086_v49 = vpop.f32.mrf.mxu0  ;;  %v2470_v31 = vpop.f32.mrf.mxu1 }
 0x267   : > { %2489 = vmax.xlane.f32.xlu1 %v2488_v45  ;;  %v11558_v45 = vld [vmem:[#allocation12_spill] sm:$0xff] }
 0x268   : > { %v8090_v58 = vpop.f32.mrf.mxu0  ;;  %1918 = vmatmul.mubr.bf16.gmra.mxu0 %v1116_v48  ;;  %v1092_v15 = vmul.f32 %v11559_v12, %v11558_v45  ;;  %v11560_v48 = vld [vmem:[#allocation13_spill] sm:$0xff]  ;;  %v2472_v40 = vpop.f32.mrf.mxu1  ;;  %v11562_v12 = vld [vmem:[#allocation64_spill] sm:$0xff]  ;;  %v11563_v45 = vld [vmem:[#allocation62_spill] sm:$0xff] }
 0x269   : > { %1927 = vmatprep.mubr.bf16.mxu0 %v11366_v28  ;;  %v1093_v25 = vmul.f32 %v11561_v30, %v11560_v48  ;;  %v11564_v55 = vpack.c.bf16 %v11562_v12, %v11563_v45  ;;  %v11565_v30 = vld [vmem:[#allocation30_spill] sm:$0xff]  ;;  %v11567_v48 = vld [vmem:[#allocation31_spill] sm:$0xff] }
 0x26a   : > { %v1681_v18 = vpop.f32.mrf.mxu0  ;;  %v2476_v33 = vpop.f32.mrf.mxu1 }
 0x26b   : > { %v1118_v61 = vpack.c.bf16 %v1093_v25, %v1092_v15  ;;  %v11566_v25 = vld [vmem:[#allocation69_spill] sm:$0xff] }
 0x26c   : > { %v8093_v39 = vpop.f32.mrf.mxu0  ;;  %v2478_v23 = vpop.f32.mrf.mxu1  ;;  %v1096_v15 = vmul.f32 %v11566_v25, %v11565_v30 }
 0x26e   : > { %v8095_v7 = vpop.f32.mrf.mxu0  ;;  %v2480_v14 = vpop.f32.mrf.mxu1 }
 0x270   : > { %v1689_v34 = vpop.f32.mrf.mxu0  ;;  %1928 = vmatmul.mubr.bf16.gmra.mxu0 %v11557_v19  ;;  %v2482_v45 = vpop.f32.mrf.mxu1 }
 0x271   : > { %1937 = vmatprep.mubr.bf16.mxu0 %v11366_v28 }
 0x272   : > { %v1691_v0 = vpop.f32.mrf.mxu0 }
 0x274   : > { %v1693_v27 = vpop.f32.mrf.mxu0 }
 0x276   : > { %v1695_v42 = vpop.f32.mrf.mxu0 }
 0x278   : > { %v1699_v36 = vpop.f32.mrf.mxu0  ;;  %1938 = vmatmul.mubr.bf16.gmra.mxu0 %v1118_v61  ;;  %v1097_v61 = vmul.f32 %v11568_v8, %v11567_v48  ;;  %v11581_v48 = vld [vmem:[#allocation84_spill] sm:$0xff] }
 0x279   : > { %1947 = vmatprep.mubr.bf16.mxu0 %v11366_v28  ;;  %v8122_v13 = vadd.f32 %v2466_v35, %v1699_v36 }
 0x27a   : > { %v1701_v52 = vpop.f32.mrf.mxu0  ;;  %v1120_v12 = vpack.c.bf16 %v1097_v61, %v1096_v15  ;;  %v11580_v15 = vld [vmem:[#allocation43_spill] sm:$0xff] }
 0x27b   : > { %v8118_v21 = vadd.f32 %v2468_v50, %v1701_v52  ;;  %v11575_v52 = vld [vmem:[#allocation70_spill] sm:$0xff]  ;;  %v1101_v61 = vmul.f32 %v11581_v48, %v11580_v15  ;;  %v11596_v48 = vld [vmem:[#allocation19_spill] sm:$0xff] }
 0x27c   : > { %v1703_v19 = vpop.f32.mrf.mxu0 }
 0x27e   : > { %v1705_v9 = vpop.f32.mrf.mxu0 }
 0x27f   : > { %v8135_v50 = vadd.f32 %v2472_v40, %v1705_v9  ;;  %v8155_v40 = vadd.f32 %v8088_v20, %v1695_v42  ;;  %v11577_v20 = vld [vmem:[#allocation29_spill] sm:$0xff] }
 0x280   : > { %v1709_v11 = vpop.f32.mrf.mxu0  ;;  %1948 = vmatmul.mubr.bf16.gmra.mxu0 %v11564_v55 }
 0x281   : > { %1957 = vmatprep.mubr.bf16.mxu0 %v11366_v28  ;;  %v8114_v4 = vadd.f32 %v2476_v33, %v1709_v11  ;;  %v8175_v33 = vadd.f32 %v11577_v20, %v8074_v22  ;;  %v11590_v20 = vld [vmem:[#allocation23_spill] sm:$0xff] }
 0x282   : > { %v1711_v5 = vpop.f32.mrf.mxu0 }
 0x283   : > { %v8116_v37 = vadd.f32 %v2478_v23, %v1711_v5  ;;  %v8131_v5 = vadd.f32 %v8046_v38, %v1691_v0  ;;  %v2569_v23 = vmax.f32 %v8122_v13, %v8118_v21  ;;  %v8150_v38 = vadd.f32 %v7934_v56, %v1681_v18  ;;  %v11574_v18 = vld [vmem:[#allocation72_spill] sm:$0xff] }
 0x284   : > { %v1713_v10 = vpop.f32.mrf.mxu0  ;;  %v11576_v42 = vpack.c.bf16 %v11574_v18, %v11575_v52 }
 0x285   : > { %v2575_v55 = vmax.f32 %v8114_v4, %v8116_v37  ;;  %v8124_v30 = vadd.f32 %v2480_v14, %v1713_v10  ;;  %v8145_v14 = vadd.f32 %v2470_v31, %v1703_v19  ;;  %v8163_v31 = vadd.f32 %v7912_v24, %v8090_v58  ;;  %v11579_v58 = vld [vmem:[#allocation79_spill] sm:$0xff] }
 0x286   : > { %v1715_v43 = vpop.f32.mrf.mxu0  ;;  %v8181_v24 = vadd.f32 %v7993_v29, %v8095_v7  ;;  %v8198_v29 = vadd.f32 %v7967_v63, %v8093_v39 }
 0x287   : > { %v8126_v8 = vadd.f32 %v2482_v45, %v1715_v43  ;;  %2576 = vmax.xlane.f32.xlu0 %v2575_v55  ;;  %v8143_v43 = vadd.f32 %v8020_v1, %v1689_v34  ;;  %v2572_v35 = vmax.f32 %v8145_v14, %v8135_v50  ;;  %v8166_v34 = vadd.f32 %v8076_v47, %v1693_v27  ;;  %v11578_v47 = vld [vmem:[#allocation42_spill] sm:$0xff]  ;;  %v11585_v45 = vld [vmem:[#allocation25_spill] sm:$0xff] }
 0x288   : > { %v8128_v11 = vpop.f32.mrf.mxu0  ;;  %1958 = vmatmul.mubr.bf16.gmra.mxu0 %v1120_v12  ;;  %v2557_v19 = vmax.f32 %v8163_v31, %v8150_v38  ;;  %v1100_v25 = vmul.f32 %v11579_v58, %v11578_v47  ;;  %v11583_v55 = vld [vmem:[#allocation26_spill] sm:$0xff] }
 0x289   : > { %11569 = vst [vmem:[#allocation15_spill] sm:$0xff] %v8128_v11  ;;  %v2578_v36 = vmax.f32 %v8124_v30, %v8126_v8  ;;  %1967 = vmatprep.mubr.bf16.mxu0 %v11366_v28  ;;  %v2563_v9 = vmax.f32 %v8143_v43, %v8131_v5  ;;  %v2566_v27 = vmax.f32 %v8166_v34, %v8155_v40 }
 0x28a   : > { %v8140_v10 = vpop.f32.mrf.mxu0  ;;  %v8194_v12 = vadd.f32 %v11583_v55, %v8056_v32  ;;  %v2560_v32 = vmax.f32 %v8198_v29, %v8181_v24  ;;  %v1122_v63 = vpack.c.bf16 %v1101_v61, %v1100_v25  ;;  %v8259_v61 = vadd.f32 %v11596_v48, %v7991_v51  ;;  %v11598_v55 = vld [vmem:[#allocation106_spill] sm:$0xff]  ;;  %v11602_v51 = vld [vmem:[#allocation80_spill] sm:$0xff] }
 0x28b   : > { %11570 = vst [vmem:[#allocation102_spill] sm:$0xff] %v8140_v10  ;;  %2579 = vmax.xlane.f32.xlu1 %v2578_v36  ;;  %2570 = vmax.xlane.f32.xlu0 %v2569_v23  ;;  %v8204_v23 = vadd.f32 %v11585_v45, %v8018_v3  ;;  %v8222_v3 = vadd.f32 %v7873_v54, %v8082_v26  ;;  %v6830_v10 = vld [vmem:[%s11114_s2 + $0x8] sm:$0xff] }
 0x28c   : > { %v8147_v0 = vpop.f32.mrf.mxu0  ;;  %v2551_v36 = vmax.f32 %v8194_v12, %v8175_v33  ;;  %v8267_v45 = vadd.f32 %v11598_v55, %v7897_v46 }
 0x28d   : > { %11571 = vst [vmem:[#allocation47_spill] sm:$0xff] %v8147_v0 }
 0x28e   : > { %v8159_v1 = vpop.f32.mrf.mxu0 }
 0x28f   : > { %11572 = vst [vmem:[#allocation45_spill] sm:$0xff] %v8159_v1  ;;  %2573 = vmax.xlane.f32.xlu1 %v2572_v35  ;;  %2564 = vmax.xlane.f32.xlu0 %v2563_v9  ;;  %v8210_v9 = vadd.f32 %v7886_v6, %v8086_v49  ;;  %v11587_v35 = vld [vmem:[#allocation22_spill] sm:$0xff]  ;;  %v11589_v6 = vld [vmem:[#allocation111_spill] sm:$0xff] }
 0x290   : > { %v8168_v56 = vpop.f32.mrf.mxu0  ;;  %1968 = vmatmul.mubr.bf16.gmra.mxu0 %v11576_v42  ;;  %v8218_v18 = vadd.f32 %v11587_v35, %v8003_v60  ;;  %v8228_v49 = vadd.f32 %v11589_v6, %v7965_v57  ;;  %v8234_v60 = vadd.f32 %v11590_v20, %v8044_v17  ;;  %v11593_v57 = vld [vmem:[#allocation24_spill] sm:$0xff]  ;;  %v11595_v17 = vld [vmem:[#allocation109_spill] sm:$0xff] }
 0x291   : > { %11573 = vst [vmem:[#allocation108_spill] sm:$0xff] %v8168_v56  ;;  %1977 = vmatprep.mubr.bf16.mxu0 %v11366_v28  ;;  %v2554_v54 = vmax.f32 %v8222_v3, %v8210_v9  ;;  %v8247_v47 = vadd.f32 %v11593_v57, %v8030_v44  ;;  %v8253_v25 = vadd.f32 %v11595_v17, %v7910_v53  ;;  %v11607_v57 = vld [vmem:[#allocation60_spill] sm:$0xff] }
 0x292   : > { %v8190_v22 = vpop.f32.mrf.mxu0  ;;  %v2545_v42 = vmax.f32 %v8218_v18, %v8204_v23  ;;  %v11608_v17 = vld [vmem:[#allocation92_spill] sm:$0xff] }
 0x293   : > { %11582 = vst [vmem:[#allocation101_spill] sm:$0xff] %v8190_v22  ;;  %2567 = vmax.xlane.f32.xlu1 %v2566_v27  ;;  %2558 = vmax.xlane.f32.xlu0 %v2557_v19  ;;  %v11592_v19 = vld [vmem:[#allocation110_spill] sm:$0xff]  ;;  %v2533_v6 = vmax.f32 %v8267_v45, %v8253_v25 }
 0x294   : > { %v8200_v7 = vpop.f32.mrf.mxu0  ;;  %v8243_v27 = vadd.f32 %v11592_v19, %v7943_v59  ;;  %v2548_v59 = vmax.f32 %v8247_v47, %v8234_v60 }
 0x295   : > { %11584 = vst [vmem:[#allocation10_spill] sm:$0xff] %v8200_v7 }
 0x296   : > { %v8214_v39 = vpop.f32.mrf.mxu0  ;;  %v2539_v15 = vmax.f32 %v8243_v27, %v8228_v49 }
 0x297   : > { %11586 = vst [vmem:[#allocation51_spill] sm:$0xff] %v8214_v39  ;;  %2561 = vmax.xlane.f32.xlu1 %v2560_v32  ;;  %2552 = vmax.xlane.f32.xlu0 %v2551_v36  ;;  %v11599_v36 = vld [vmem:[#allocation20_spill] sm:$0xff] }
 0x298   : > { %v8224_v52 = vpop.f32.mrf.mxu0  ;;  %1978 = vmatmul.mubr.bf16.gmra.mxu0 %v1122_v63  ;;  %v8271_v53 = vadd.f32 %v11599_v36, %v7977_v41  ;;  %v11601_v63 = vld [vmem:[#allocation82_spill] sm:$0xff]  ;;  %v11605_v41 = vld [vmem:[#allocation59_spill] sm:$0xff] }
 0x299   : > { %11588 = vst [vmem:[#allocation11_spill] sm:$0xff] %v8224_v52  ;;  %1987 = vmatprep.mubr.bf16.mxu0 %v11366_v28  ;;  %v11603_v35 = vpack.c.bf16 %v11601_v63, %v11602_v51 }
 0x29a   : > { %v8239_v26 = vpop.f32.mrf.mxu0  ;;  %v2542_v46 = vmax.f32 %v8271_v53, %v8259_v61 }
 0x29b   : > { %11591 = vst [vmem:[#allocation56_spill] sm:$0xff] %v8239_v26  ;;  %2555 = vmax.xlane.f32.xlu1 %v2554_v54  ;;  %2546 = vmax.xlane.f32.xlu0 %v2545_v42  ;;  %v11604_v42 = vld [vmem:[#allocation21_spill] sm:$0xff]  ;;  %v11606_v54 = vld [vmem:[#allocation87_spill] sm:$0xff]  ;;  %v11649_v26 = vld [vmem:[#allocation28_spill] sm:$0xff] }
 0x29c   : > { %v8249_v58 = vpop.f32.mrf.mxu0  ;;  %v8282_v20 = vadd.f32 %v11604_v42, %v7932_v16  ;;  %v1104_v19 = vmul.f32 %v11606_v54, %v11605_v41  ;;  %v11618_v41 = vld [vmem:[#allocation90_spill] sm:$0xff]  ;;  %v11619_v54 = vld [vmem:[#allocation88_spill] sm:$0xff] }
 0x29d   : > { %11594 = vst [vmem:[#allocation107_spill] sm:$0xff] %v8249_v58  ;;  %v11637_v58 = vld [vmem:[#allocation35_spill] sm:$0xff] }
 0x29e   : > { %v8263_v44 = vpop.f32.mrf.mxu0  ;;  %v1382_v56 = vmul.f32 %v6830_v10, %v11637_v58  ;;  %v11646_v10 = vld [vmem:[#allocation34_spill] sm:$0xff]  ;;  %v11647_v58 = vld [vmem:[#allocation33_spill] sm:$0xff] }
 0x29f   : > { %11597 = vst [vmem:[#allocation100_spill] sm:$0xff] %v8263_v44  ;;  %2549 = vmax.xlane.f32.xlu1 %v2548_v59  ;;  %2540 = vmax.xlane.f32.xlu0 %v2539_v15  ;;  %v1105_v15 = vmul.f32 %v11608_v17, %v11607_v57  ;;  %v11610_v59 = vld [vmem:[#allocation16_spill] sm:$0xff]  ;;  %v11620_v57 = vpack.c.bf16 %v11618_v41, %v11619_v54  ;;  %v11622_v17 = vld [vmem:[#allocation95_spill] sm:$0xff] }
 0x2a0   : > { %v8273_v32 = vpop.f32.mrf.mxu0  ;;  %1988 = vmatmul.mubr.bf16.gmra.mxu0 %v11603_v35  ;;  %v8295_v55 = vadd.f32 %v11610_v59, %v7920_v2  ;;  %v11623_v59 = vld [vmem:[#allocation78_spill] sm:$0xff] }
 0x2a1   : > { %11600 = vst [vmem:[#allocation54_spill] sm:$0xff] %v8273_v32  ;;  %1997 = vmatprep.mubr.bf16.mxu0 %v11366_v28  ;;  %v1124_v63 = vpack.c.bf16 %v1105_v15, %v1104_v19  ;;  %v11621_v19 = vld [vmem:[#allocation77_spill] sm:$0xff] }
 0x2a2   : > { %v8291_v48 = vpop.f32.mrf.mxu0  ;;  %v2536_v36 = vmax.f32 %v8295_v55, %v8282_v20  ;;  %v1108_v15 = vmul.f32 %v11622_v17, %v11621_v19  ;;  %v11633_v17 = vld [vmem:[#allocation99_spill] sm:$0xff] }
 0x2a3   : > { %11609 = vst [vmem:[#allocation52_spill] sm:$0xff] %v8291_v48  ;;  %2543 = vmax.xlane.f32.xlu1 %v2542_v46  ;;  %2534 = vmax.xlane.f32.xlu0 %v2533_v6 }
 0x2a4   : > { %v8297_v16 = vpop.f32.mrf.mxu0 }
 0x2a5   : > { %11611 = vst [vmem:[#allocation12_spill] sm:$0xff] %v8297_v16 }
 0x2a6   : > { %v8301_v51 = vpop.f32.mrf.mxu0 }
 0x2a7   : > { %11612 = vst [vmem:[#allocation61_spill] sm:$0xff] %v8301_v51  ;;  %2537 = vmax.xlane.f32.xlu1 %v2536_v36  ;;  %v11624_v36 = vld [vmem:[#allocation14_spill] sm:$0xff]  ;;  %v11648_v51 = vpack.c.bf16 %v11646_v10, %v11647_v58 }
 0x2a8   : > { %v8303_v35 = vpop.f32.mrf.mxu0  ;;  %1998 = vmatmul.mubr.bf16.gmra.mxu0 %v1124_v63  ;;  %v1109_v63 = vmul.f32 %v11624_v36, %v11623_v59  ;;  %v11634_v59 = vld [vmem:[#allocation97_spill] sm:$0xff] }
 0x2a9   : > { %11613 = vst [vmem:[#allocation13_spill] sm:$0xff] %v8303_v35  ;;  %2007 = vmatprep.mubr.bf16.mxu0 %v11366_v28  ;;  %v11635_v36 = vpack.c.bf16 %v11633_v17, %v11634_v59 }
 0x2aa   : > { %v8306_v42 = vpop.f32.mrf.mxu0  ;;  %v1126_v7 = vpack.c.bf16 %v1109_v63, %v1108_v15  ;;  %v11636_v15 = vld [vmem:[#allocation32_spill] sm:$0xff] }
 0x2ab   : > { %11614 = vst [vmem:[#allocation66_spill] sm:$0xff] %v8306_v42 }
 0x2ac   : > { %v8308_v2 = vpop.f32.mrf.mxu0 }
 0x2ad   : > { %11615 = vst [vmem:[#allocation64_spill] sm:$0xff] %v8308_v2 }
 0x2ae   : > { %v8310_v46 = vpop.f32.mrf.mxu0 }
 0x2af   : > { %11616 = vst [vmem:[#allocation62_spill] sm:$0xff] %v8310_v46  ;;  %v11655_v46 = vld [vmem:[#allocation114_spill] sm:$0xff] }
 0x2b0   : > { %v8312_v6 = vpop.f32.mrf.mxu0  ;;  %2008 = vmatmul.mubr.bf16.gmra.mxu0 %v11620_v57 }
 0x2b1   : > { %11617 = vst [vmem:[#allocation30_spill] sm:$0xff] %v8312_v6  ;;  %2017 = vmatprep.mubr.bf16.mxu0 %v11366_v28 }
 0x2b2   : > { %v8322_v0 = vpop.f32.mrf.mxu0 }
 0x2b3   : > { %11625 = vst [vmem:[#allocation69_spill] sm:$0xff] %v8322_v0 }
 0x2b4   : > { %v8324_v1 = vpop.f32.mrf.mxu0 }
 0x2b5   : > { %11626 = vst [vmem:[#allocation31_spill] sm:$0xff] %v8324_v1 }
 0x2b6   : > { %v8326_v11 = vpop.f32.mrf.mxu0 }
 0x2b7   : > { %11627 = vst [vmem:[#allocation74_spill] sm:$0xff] %v8326_v11  ;;  %v11657_v11 = vld [vmem:[#allocation27_spill] sm:$0xff] }
 0x2b8   : > { %v8328_v39 = vpop.f32.mrf.mxu0  ;;  %2018 = vmatmul.mubr.bf16.gmra.mxu0 %v1126_v7  ;;  %v6829_v7 = vld [vmem:[%s11114_s2] sm:$0xff] }
 0x2b9   : > { %11628 = vst [vmem:[#allocation72_spill] sm:$0xff] %v8328_v39  ;;  %2027 = vmatprep.mubr.bf16.mxu0 %v11366_v28  ;;  %v1381_v63 = vmul.f32 %v6829_v7, %v11636_v15 }
 0x2ba   : > { %v8331_v41 = vpop.f32.mrf.mxu0 }
 0x2bb   : > { %11629 = vst [vmem:[#allocation70_spill] sm:$0xff] %v8331_v41  ;;  %v1413_v17 = vpack.c.bf16 %v1382_v56, %v1381_v63 }
 0x2bc   : > { %v8333_v54 = vpop.f32.mrf.mxu0 }
 0x2bd   : > { %11630 = vst [vmem:[#allocation29_spill] sm:$0xff] %v8333_v54 }
 0x2be   : > { %v8335_v57 = vpop.f32.mrf.mxu0 }
 0x2bf   : > { %11631 = vst [vmem:[#allocation42_spill] sm:$0xff] %v8335_v57 }
 0x2c0   : > { %v8337_v19 = vpop.f32.mrf.mxu0  ;;  %2028 = vmatmul.mubr.bf16.gmra.mxu0 %v11635_v36 }
 0x2c1   : > { %11632 = vst [vmem:[#allocation79_spill] sm:$0xff] %v8337_v19  ;;  %2037 = vmatprep.mubr.bf16.mxu0 %v11366_v28 }
 0x2c2   : > { %v8351_v44 = vpop.f32.mrf.mxu0 }
 0x2c3   : > { %11638 = vst [vmem:[#allocation43_spill] sm:$0xff] %v8351_v44 }
 0x2c4   : > { %v8353_v22 = vpop.f32.mrf.mxu0 }
 0x2c5   : > { %11639 = vst [vmem:[#allocation84_spill] sm:$0xff] %v8353_v22 }
 0x2c6   : > { %v8355_v59 = vpop.f32.mrf.mxu0 }
 0x2c7   : > { %11640 = vst [vmem:[#allocation26_spill] sm:$0xff] %v8355_v59 }
 0x2c8   : > { %v8357_v36 = vpop.f32.mrf.mxu0  ;;  %2038 = vmatmul.mubr.bf16.gmra.mxu0 %v1413_v17  ;;  %v6831_v17 = vld [vmem:[%s11114_s2 + $0x20] sm:$0xff] }
 0x2c9   : > { %11641 = vst [vmem:[#allocation25_spill] sm:$0xff] %v8357_v36  ;;  %2047 = vmatprep.mubr.bf16.mxu0 %v11366_v28 }
 0x2ca   : > { %v8360_v16 = vpop.f32.mrf.mxu0 }
 0x2cb   : > { %11642 = vst [vmem:[#allocation22_spill] sm:$0xff] %v8360_v16 }
 0x2cc   : > { %v8362_v7 = vpop.f32.mrf.mxu0 }
 0x2cd   : > { %11643 = vst [vmem:[#allocation111_spill] sm:$0xff] %v8362_v7  ;;  %v11650_v7 = vld [vmem:[#allocation37_spill] sm:$0xff] }
 0x2ce   : > { %v8364_v15 = vpop.f32.mrf.mxu0  ;;  %v1385_v16 = vmul.f32 %v6831_v17, %v11650_v7  ;;  %v11656_v17 = vld [vmem:[#allocation112_spill] sm:$0xff] }
 0x2cf   : > { %11644 = vst [vmem:[#allocation23_spill] sm:$0xff] %v8364_v15  ;;  %v6832_v15 = vld [vmem:[%s11114_s2 + $0x28] sm:$0xff] }
 0x2d0   : > { %v8366_v52 = vpop.f32.mrf.mxu0  ;;  %2048 = vmatmul.mubr.bf16.gmra.mxu0 %v11648_v51  ;;  %v2529_v56 = vpop.xlane.xlu0 %2528 }
 0x2d1   : > { %11645 = vst [vmem:[#allocation110_spill] sm:$0xff] %v8366_v52  ;;  %v2609_v63 = vsub.f32 %v7876_v62, %v2529_v56  ;;  %v2610_v36 = vsub.f32 %v11649_v26, %v2529_v56  ;;  %2057 = vmatprep.mubr.bf16.mxu0 %v11366_v28  ;;  %v11651_v52 = vld [vmem:[#allocation41_spill] sm:$0xff] }
 0x2d2   : > { %v1386_v10 = vmul.f32 %v6832_v15, %v11651_v52  ;;  %v8382_v51 = vpop.f32.mrf.mxu0  ;;  %v11654_v56 = vld [vmem:[#allocation113_spill] sm:$0xff] }
 0x2d3   : > { %11652 = vst [vmem:[#allocation24_spill] sm:$0xff] %v8382_v51  ;;  %v2701_v58 = vmul.f32 1.442695, %v2609_v63  ;;  %v2703_v62 = vmul.f32 1.442695, %v2610_v36 }
 0x2d4   : > { %v8384_v2 = vpop.f32.mrf.mxu0  ;;  %v2532_v26 = vpop.xlane.xlu1 %2531  ;;  %v1415_v7 = vpack.c.bf16 %v1386_v10, %v1385_v16 }
 0x2d5   : > { %11653 = vst [vmem:[#allocation109_spill] sm:$0xff] %v8384_v2  ;;  %6061 = vpow2.f32 %v2701_v58  ;;  %v2611_v32 = vsub.f32 %v11654_v56, %v2532_v26  ;;  %v2612_v48 = vsub.f32 %v11655_v46, %v2532_v26  ;;  %v2523_v1 = vpop.xlane.xlu0 %2522  ;;  %v11660_v56 = vld [vmem:[#allocation118_spill] sm:$0xff]  ;;  %v11661_v26 = vld [vmem:[#allocation116_spill] sm:$0xff] }
 0x2d6   : > { %6063 = vpow2.f32 %v2703_v62  ;;  %v2605_v35 = vsub.f32 %v11656_v17, %v2523_v1  ;;  %v2606_v42 = vsub.f32 %v11657_v11, %v2523_v1  ;;  %v8390_v52 = vpop.f32.mrf.mxu0  ;;  %v11662_v11 = vld [vmem:[#allocation117_spill] sm:$0xff]  ;;  %v11663_v62 = vld [vmem:[#allocation115_spill] sm:$0xff] }
 0x2d7   : > { %11658 = vst [vmem:[#allocation19_spill] sm:$0xff] %v8390_v52  ;;  %v2705_v15 = vmul.f32 1.442695, %v2611_v32  ;;  %v2707_v63 = vmul.f32 1.442695, %v2612_v48  ;;  %v11667_v52 = vld [vmem:[#allocation120_spill] sm:$0xff] }
 0x2d8   : > { %v2693_v36 = vmul.f32 1.442695, %v2605_v35  ;;  %v2695_v51 = vmul.f32 1.442695, %v2606_v42  ;;  %v8392_v2 = vpop.f32.mrf.mxu0  ;;  %2058 = vmatmul.mubr.bf16.gmra.mxu0 %v1415_v7  ;;  %v2526_v58 = vpop.xlane.xlu1 %2525 }
 0x2d9   : > { %11659 = vst [vmem:[#allocation106_spill] sm:$0xff] %v8392_v2  ;;  %6065 = vpow2.f32 %v2705_v15  ;;  %v2607_v46 = vsub.f32 %v11660_v56, %v2526_v58  ;;  %v2608_v16 = vsub.f32 %v11661_v26, %v2526_v58  ;;  %v2517_v10 = vpop.xlane.xlu0 %2516  ;;  %2067 = vmatprep.mubr.bf16.mxu0 %v11366_v28  ;;  %v11666_v58 = vld [vmem:[#allocation122_spill] sm:$0xff] }
 0x2da   : > { %6067 = vpow2.f32 %v2707_v63  ;;  %v2601_v1 = vsub.f32 %v11662_v11, %v2517_v10  ;;  %v2602_v32 = vsub.f32 %v11663_v62, %v2517_v10  ;;  %v8399_v48 = vpop.f32.mrf.mxu0  ;;  %v11668_v11 = vld [vmem:[#allocation121_spill] sm:$0xff]  ;;  %v11669_v62 = vld [vmem:[#allocation119_spill] sm:$0xff] }
 0x2db   : > { %11664 = vst [vmem:[#allocation20_spill] sm:$0xff] %v8399_v48  ;;  %6069 = vpow2.f32 %v2693_v36  ;;  %v2697_v35 = vmul.f32 1.442695, %v2607_v46  ;;  %v2699_v42 = vmul.f32 1.442695, %v2608_v16 }
 0x2dc   : > { %6071 = vpow2.f32 %v2695_v51  ;;  %v2685_v7 = vmul.f32 1.442695, %v2601_v1  ;;  %v2687_v17 = vmul.f32 1.442695, %v2602_v32  ;;  %v8401_v15 = vpop.f32.mrf.mxu0  ;;  %v2520_v56 = vpop.xlane.xlu1 %2519 }
 0x2dd   : > { %11665 = vst [vmem:[#allocation82_spill] sm:$0xff] %v8401_v15  ;;  %6073 = vpow2.f32 %v2697_v35  ;;  %v2603_v26 = vsub.f32 %v11666_v58, %v2520_v56  ;;  %v2604_v63 = vsub.f32 %v11667_v52, %v2520_v56  ;;  %v2511_v2 = vpop.xlane.xlu0 %2510  ;;  %v11672_v35 = vld [vmem:[#allocation40_spill] sm:$0xff]  ;;  %v11673_v58 = vld [vmem:[#allocation39_spill] sm:$0xff] }
 0x2de   : > { %6075 = vpow2.f32 %v2699_v42  ;;  %v2597_v10 = vsub.f32 %v11668_v11, %v2511_v2  ;;  %v2598_v48 = vsub.f32 %v11669_v62, %v2511_v2  ;;  %v8407_v36 = vpop.f32.mrf.mxu0  ;;  %v11674_v15 = vpack.c.bf16 %v11672_v35, %v11673_v58  ;;  %v6833_v42 = vld [vmem:[%s11114_s2 + $0x40] sm:$0xff]  ;;  %v11679_v35 = vld [vmem:[#allocation8_spill] sm:$0xff] }
 0x2df   : > { %11670 = vst [vmem:[#allocation80_spill] sm:$0xff] %v8407_v36  ;;  %6077 = vpow2.f32 %v2685_v7  ;;  %v2689_v51 = vmul.f32 1.442695, %v2603_v26  ;;  %v2691_v46 = vmul.f32 1.442695, %v2604_v63  ;;  %v11675_v2 = vld [vmem:[#allocation46_spill] sm:$0xff] }
 0x2e0   : > { %6079 = vpow2.f32 %v2687_v17  ;;  %v2677_v16 = vmul.f32 1.442695, %v2597_v10  ;;  %v2679_v1 = vmul.f32 1.442695, %v2598_v48  ;;  %v8409_v32 = vpop.f32.mrf.mxu0  ;;  %2068 = vmatmul.mubr.bf16.gmra.mxu0 %v11674_v15  ;;  %v2514_v52 = vpop.xlane.xlu1 %2513  ;;  %v1389_v56 = vmul.f32 %v6833_v42, %v11675_v2  ;;  %v11676_v7 = vld [vmem:[#allocation44_spill] sm:$0xff]  ;;  %v6834_v15 = vld [vmem:[%s11114_s2 + $0x48] sm:$0xff] }
 0x2e1   : > { %11671 = vst [vmem:[#allocation21_spill] sm:$0xff] %v8409_v32  ;;  %6081 = vpow2.f32 %v2689_v51  ;;  %v2599_v26 = vsub.f32 %v11676_v7, %v2514_v52  ;;  %v11677_v63 = vld [vmem:[#allocation36_spill] sm:$0xff]  ;;  %v2505_v11 = vpop.xlane.xlu0 %2504  ;;  %2077 = vmatprep.mubr.bf16.mxu0 %v11366_v28  ;;  %v11678_v10 = vld [vmem:[#allocation50_spill] sm:$0xff] }
 0x2e2   : > { %v2600_v17 = vsub.f32 %v11677_v63, %v2514_v52  ;;  %v8421_v48 = vpop.eup %6061  ;;  %v1390_v62 = vmul.f32 %v6834_v15, %v11678_v10  ;;  %6083 = vpow2.f32 %v2691_v46  ;;  %v2593_v58 = vsub.f32 %v11679_v35, %v2505_v11  ;;  %v11680_v42 = vld [vmem:[#allocation38_spill] sm:$0xff]  ;;  %v8429_v2 = vpop.f32.mrf.mxu0  ;;  %v11683_v15 = vld [vmem:[#allocation125_spill] sm:$0xff] }
 0x2e3   : > { %v2594_v51 = vsub.f32 %v11680_v42, %v2505_v11  ;;  %11681 = vst [vmem:[#allocation59_spill] sm:$0xff] %v8429_v2  ;;  %v8431_v7 = vpop.eup %6063  ;;  %6085 = vpow2.f32 %v2677_v16  ;;  %v2681_v52 = vmul.f32 1.442695, %v2599_v26  ;;  %v11684_v11 = vld [vmem:[#allocation123_spill] sm:$0xff]  ;;  %v11685_v26 = vld [vmem:[#allocation124_spill] sm:$0xff] }
 0x2e4   : > { %v2683_v63 = vmul.f32 1.442695, %v2600_v17  ;;  %6087 = vpow2.f32 %v2679_v1  ;;  %v2669_v36 = vmul.f32 1.442695, %v2593_v58  ;;  %v8433_v54 = vpop.f32.mrf.mxu0  ;;  %v2508_v6 = vpop.xlane.xlu1 %2507  ;;  %v2815_v46 = vadd.f32 %v8431_v7, %v8421_v48  ;;  %v11686_v17 = vld [vmem:[#allocation9_spill] sm:$0xff] }
 0x2e5   : > { %v2671_v32 = vmul.f32 1.442695, %v2594_v51  ;;  %11682 = vst [vmem:[#allocation87_spill] sm:$0xff] %v8433_v54  ;;  %6089 = vpow2.f32 %v2681_v52  ;;  %v2595_v10 = vsub.f32 %v11683_v15, %v2508_v6  ;;  %v2596_v35 = vsub.f32 %v11684_v11, %v2508_v6  ;;  %v2499_v42 = vpop.xlane.xlu0 %2498 }
 0x2e6   : > { %v8439_v2 = vpop.eup %6065  ;;  %v1417_v16 = vpack.c.bf16 %v1390_v62, %v1389_v56  ;;  %6091 = vpow2.f32 %v2683_v63  ;;  %v2589_v1 = vsub.f32 %v11685_v26, %v2499_v42  ;;  %v2590_v58 = vsub.f32 %v11686_v17, %v2499_v42  ;;  %2816 = vadd.xlane.f32.xlu0 %v2815_v46  ;;  %v8443_v51 = vpop.f32.mrf.mxu0  ;;  %v11689_v46 = vld [vmem:[#allocation104_spill] sm:$0xff] }
 0x2e7   : > { %11687 = vst [vmem:[#allocation60_spill] sm:$0xff] %v8443_v51  ;;  %v8445_v54 = vpop.eup %6067  ;;  %6093 = vpow2.f32 %v2669_v36  ;;  %v2673_v52 = vmul.f32 1.442695, %v2595_v10  ;;  %v2675_v57 = vmul.f32 1.442695, %v2596_v35  ;;  %v11690_v36 = vld [vmem:[#allocation127_spill] sm:$0xff] }
 0x2e8   : > { %v8447_v15 = vpop.eup %6069  ;;  %6095 = vpow2.f32 %v2671_v32  ;;  %v2661_v6 = vmul.f32 1.442695, %v2589_v1  ;;  %v2663_v11 = vmul.f32 1.442695, %v2590_v58  ;;  %v8449_v0 = vpop.f32.mrf.mxu0  ;;  %2078 = vmatmul.mubr.bf16.gmra.mxu0 %v1417_v16  ;;  %v2818_v62 = vadd.f32 %v8445_v54, %v8439_v2  ;;  %v11691_v26 = vld [vmem:[#allocation128_spill] sm:$0xff]  ;;  %v11692_v16 = vld [vmem:[#allocation126_spill] sm:$0xff] }
 0x2e9   : > { %11688 = vst [vmem:[#allocation92_spill] sm:$0xff] %v8449_v0  ;;  %v2502_v56 = vpop.xlane.xlu1 %2501  ;;  %v8453_v63 = vpop.eup %6071  ;;  %6097 = vpow2.f32 %v2673_v52  ;;  %2087 = vmatprep.mubr.bf16.mxu0 %v11366_v28 }
 0x2ea   : > { %v2591_v42 = vsub.f32 %v11689_v46, %v2502_v56  ;;  %v2592_v10 = vsub.f32 %v11690_v36, %v2502_v56  ;;  %v2493_v35 = vpop.xlane.xlu0 %2492  ;;  %v8458_v32 = vpop.eup %6073  ;;  %6099 = vpow2.f32 %v2675_v57  ;;  %2819 = vadd.xlane.f32.xlu1 %v2818_v62  ;;  %v2809_v58 = vadd.f32 %v8453_v63, %v8447_v15 }
 0x2eb   : > { %v2585_v1 = vsub.f32 %v11691_v26, %v2493_v35  ;;  %v2586_v17 = vsub.f32 %v11692_v16, %v2493_v35  ;;  %v8464_v51 = vpop.f32.mrf.mxu0  ;;  %v8466_v52 = vpop.eup %6075  ;;  %6101 = vpow2.f32 %v2661_v6  ;;  %v11697_v6 = vld [vmem:[#allocation98_spill] sm:$0xff] }
 0x2ec   : > { %11693 = vst [vmem:[#allocation16_spill] sm:$0xff] %v8464_v51  ;;  %v2665_v56 = vmul.f32 1.442695, %v2591_v42  ;;  %v2667_v46 = vmul.f32 1.442695, %v2592_v10  ;;  %v8468_v36 = vpop.eup %6077  ;;  %6103 = vpow2.f32 %v2663_v11  ;;  %2810 = vadd.xlane.f32.xlu0 %v2809_v58  ;;  %v2812_v62 = vadd.f32 %v8466_v52, %v8458_v32  ;;  %v11696_v51 = vld [vmem:[#allocation103_spill] sm:$0xff] }
 0x2ed   : > { %11694 = vst [vmem:[#allocation90_spill] sm:$0xff] %v8468_v36  ;;  %v2653_v0 = vmul.f32 1.442695, %v2585_v1  ;;  %v2655_v57 = vmul.f32 1.442695, %v2586_v17  ;;  %v8470_v26 = vpop.f32.mrf.mxu0  ;;  %v2496_v35 = vpop.xlane.xlu1 %2495  ;;  %v11699_v11 = vld [vmem:[#allocation18_spill] sm:$0xff] }
 0x2ee   : > { %11695 = vst [vmem:[#allocation88_spill] sm:$0xff] %v8470_v26  ;;  %v8474_v16 = vpop.eup %6079  ;;  %6105 = vpow2.f32 %v2665_v56  ;;  %v2587_v59 = vsub.f32 %v11696_v51, %v2496_v35  ;;  %v2588_v42 = vsub.f32 %v11697_v6, %v2496_v35  ;;  %v2487_v10 = vpop.xlane.xlu0 %2486  ;;  %v11700_v17 = vld [vmem:[#allocation105_spill] sm:$0xff]  ;;  %2813 = vadd.xlane.f32.xlu1 %v2812_v62  ;;  %v11704_v62 = vld [vmem:[#allocation48_spill] sm:$0xff] }
 0x2ef   : > { %v8478_v22 = vpop.eup %6081  ;;  %6107 = vpow2.f32 %v2667_v46  ;;  %v2581_v1 = vsub.f32 %v11699_v11, %v2487_v10  ;;  %v2582_v58 = vsub.f32 %v11700_v17, %v2487_v10  ;;  %v2803_v26 = vadd.f32 %v8474_v16, %v8468_v36  ;;  %v8484_v39 = vpop.f32.mrf.mxu0  ;;  %v11703_v10 = vld [vmem:[#allocation49_spill] sm:$0xff] }
 0x2f0   : > { %11698 = vst [vmem:[#allocation77_spill] sm:$0xff] %v8478_v22  ;;  %11701 = vst [vmem:[#allocation95_spill] sm:$0xff] %v8484_v39  ;;  %v8486_v41 = vpop.eup %6083  ;;  %6109 = vpow2.f32 %v2653_v0  ;;  %v2657_v51 = vmul.f32 1.442695, %v2587_v59  ;;  %v2659_v56 = vmul.f32 1.442695, %v2588_v42  ;;  %v11705_v17 = vpack.c.bf16 %v11703_v10, %v11704_v62 }
 0x2f1   : > { %v8488_v35 = vpop.eup %6085  ;;  %6111 = vpow2.f32 %v2655_v57  ;;  %v2645_v6 = vmul.f32 1.442695, %v2581_v1  ;;  %v2647_v46 = vmul.f32 1.442695, %v2582_v58  ;;  %2804 = vadd.xlane.f32.xlu0 %v2803_v26  ;;  %v8490_v11 = vpop.f32.mrf.mxu0  ;;  %v2806_v39 = vadd.f32 %v8486_v41, %v8478_v22  ;;  %v11706_v0 = vld [vmem:[#allocation96_spill] sm:$0xff]  ;;  %v11707_v42 = vld [vmem:[#allocation17_spill] sm:$0xff] }
 0x2f2   : > { %11702 = vst [vmem:[#allocation78_spill] sm:$0xff] %v8490_v11  ;;  %2088 = vmatmul.mubr.bf16.gmra.mxu0 %v11705_v17  ;;  %v2490_v44 = vpop.xlane.xlu1 %2489  ;;  %v8497_v19 = vpop.eup %6087  ;;  %6113 = vpow2.f32 %v2657_v51  ;;  %v6835_v1 = vld [vmem:[%s11114_s2 + $0x60] sm:$0xff]  ;;  %v11708_v58 = vld [vmem:[#allocation53_spill] sm:$0xff]  ;;  %v6836_v62 = vld [vmem:[%s11114_s2 + $0x68] sm:$0xff] }
 0x2f3   : > { %v2583_v59 = vsub.f32 %v11706_v0, %v2490_v44  ;;  %v2584_v57 = vsub.f32 %v11707_v42, %v2490_v44  ;;  %2097 = vmatprep.mubr.bf16.mxu0 %v11366_v28  ;;  %v8502_v26 = vpop.eup %6089  ;;  %v1393_v10 = vmul.f32 %v6835_v1, %v11708_v58  ;;  %v11709_v17 = vld [vmem:[#allocation58_spill] sm:$0xff]  ;;  %6115 = vpow2.f32 %v2659_v56  ;;  %2807 = vadd.xlane.f32.xlu1 %v2806_v39  ;;  %v8514_v0 = vpop.f32.mrf.mxu0 }
 0x2f4   : > { %v1394_v51 = vmul.f32 %v6836_v62, %v11709_v17  ;;  %v2797_v44 = vadd.f32 %v8497_v19, %v8488_v35  ;;  %11710 = vst [vmem:[#allocation14_spill] sm:$0xff] %v8514_v0  ;;  %v8516_v42 = vpop.eup %6091  ;;  %6117 = vpow2.f32 %v2645_v6 }
 0x2f5   : > { %v2649_v11 = vmul.f32 1.442695, %v2583_v59  ;;  %v2651_v22 = vmul.f32 1.442695, %v2584_v57  ;;  %v8518_v36 = vpop.eup %6093  ;;  %6119 = vpow2.f32 %v2647_v46  ;;  %v8520_v1 = vpop.f32.mrf.mxu0  ;;  %v2800_v56 = vadd.f32 %v8516_v42, %v8502_v26 }
 0x2f6   : > { %11711 = vst [vmem:[#allocation99_spill] sm:$0xff] %v8518_v36  ;;  %2798 = vadd.xlane.f32.xlu0 %v2797_v44  ;;  %11712 = vst [vmem:[#allocation97_spill] sm:$0xff] %v8520_v1  ;;  %v8524_v39 = vpop.eup %6095  ;;  %v1419_v62 = vpack.c.bf16 %v1394_v51, %v1393_v10 }
 0x2f7   : > { %6121 = vpow2.f32 %v2649_v11  ;;  %v8526_v58 = vpop.eup %6097  ;;  %2801 = vadd.xlane.f32.xlu1 %v2800_v56  ;;  %v2791_v6 = vadd.f32 %v8524_v39, %v8518_v36  ;;  %v8530_v59 = vpop.f32.mrf.mxu0 }
 0x2f8   : > { %11713 = vst [vmem:[#allocation32_spill] sm:$0xff] %v8526_v58  ;;  %6123 = vpow2.f32 %v2651_v22  ;;  %11714 = vst [vmem:[#allocation35_spill] sm:$0xff] %v8530_v59  ;;  %v8532_v46 = vpop.eup %6099 }
 0x2f9   : > { %11715 = vst [vmem:[#allocation34_spill] sm:$0xff] %v8532_v46  ;;  %v8534_v57 = vpop.eup %6101  ;;  %v8536_v17 = vpop.f32.mrf.mxu0  ;;  %v2794_v11 = vadd.f32 %v8532_v46, %v8526_v58 }
 0x2fa   : > { %11716 = vst [vmem:[#allocation33_spill] sm:$0xff] %v8534_v57  ;;  %2792 = vadd.xlane.f32.xlu0 %v2791_v6  ;;  %11717 = vst [vmem:[#allocation28_spill] sm:$0xff] %v8536_v17  ;;  %2098 = vmatmul.mubr.bf16.gmra.mxu0 %v1419_v62  ;;  %v8540_v44 = vpop.eup %6103 }
 0x2fb   : > { %11718 = vst [vmem:[#allocation37_spill] sm:$0xff] %v8540_v44  ;;  %2107 = vmatprep.mubr.bf16.mxu0 %v11366_v28  ;;  %v8543_v22 = vpop.eup %6105  ;;  %2795 = vadd.xlane.f32.xlu1 %v2794_v11  ;;  %v2785_v10 = vadd.f32 %v8540_v44, %v8534_v57  ;;  %v8547_v51 = vpop.f32.mrf.mxu0  ;;  %v11731_v44 = vld [vmem:[#allocation55_spill] sm:$0xff] }
 0x2fc   : > { %11719 = vst [vmem:[#allocation41_spill] sm:$0xff] %v8543_v22  ;;  %11720 = vst [vmem:[#allocation113_spill] sm:$0xff] %v8547_v51  ;;  %v8549_v56 = vpop.eup %6107 }
 0x2fd   : > { %11721 = vst [vmem:[#allocation114_spill] sm:$0xff] %v8549_v56  ;;  %v8551_v6 = vpop.eup %6109  ;;  %v8553_v62 = vpop.f32.mrf.mxu0  ;;  %v2788_v1 = vadd.f32 %v8549_v56, %v8543_v22 }
 0x2fe   : > { %11722 = vst [vmem:[#allocation112_spill] sm:$0xff] %v8551_v6  ;;  %2786 = vadd.xlane.f32.xlu0 %v2785_v10  ;;  %11723 = vst [vmem:[#allocation27_spill] sm:$0xff] %v8553_v62  ;;  %v8557_v59 = vpop.eup %6111  ;;  %v11730_v62 = vld [vmem:[#allocation57_spill] sm:$0xff] }
 0x2ff   : > { %11724 = vst [vmem:[#allocation118_spill] sm:$0xff] %v8557_v59  ;;  %v8559_v0 = vpop.eup %6113  ;;  %2789 = vadd.xlane.f32.xlu1 %v2788_v1  ;;  %v2779_v11 = vadd.f32 %v8557_v59, %v8551_v6  ;;  %v8563_v17 = vpop.f32.mrf.mxu0  ;;  %v11732_v22 = vpack.c.bf16 %v11730_v62, %v11731_v44  ;;  %v6838_v44 = vld [vmem:[%s11114_s2 + $0x88] sm:$0xff] }
 0x300   : > { %11725 = vst [vmem:[#allocation116_spill] sm:$0xff] %v8559_v0  ;;  %11726 = vst [vmem:[#allocation117_spill] sm:$0xff] %v8563_v17  ;;  %v8565_v51 = vpop.eup %6115  ;;  %v6837_v17 = vld [vmem:[%s11114_s2 + $0x80] sm:$0xff] }
 0x301   : > { %11727 = vst [vmem:[#allocation115_spill] sm:$0xff] %v8565_v51  ;;  %v8567_v57 = vpop.eup %6117  ;;  %v8569_v10 = vpop.f32.mrf.mxu0  ;;  %v2782_v56 = vadd.f32 %v8565_v51, %v8559_v0 }
 0x302   : > { %11728 = vst [vmem:[#allocation122_spill] sm:$0xff] %v8567_v57  ;;  %2780 = vadd.xlane.f32.xlu0 %v2779_v11  ;;  %11729 = vst [vmem:[#allocation120_spill] sm:$0xff] %v8569_v10  ;;  %2108 = vmatmul.mubr.bf16.gmra.mxu0 %v11732_v22  ;;  %v8576_v1 = vpop.eup %6119  ;;  %v11735_v11 = vld [vmem:[#allocation63_spill] sm:$0xff]  ;;  %v11736_v22 = vld [vmem:[#allocation68_spill] sm:$0xff] }
 0x303   : > { %11733 = vst [vmem:[#allocation121_spill] sm:$0xff] %v8576_v1  ;;  %2117 = vmatprep.mubr.bf16.mxu0 %v11366_v28  ;;  %v1397_v59 = vmul.f32 %v6837_v17, %v11735_v11  ;;  %v1398_v62 = vmul.f32 %v6838_v44, %v11736_v22  ;;  %2783 = vadd.xlane.f32.xlu1 %v2782_v56  ;;  %v8591_v0 = vpop.f32.mrf.mxu0 }
 0x304   : > { %v8579_v6 = vpop.eup %6121  ;;  %v2773_v10 = vadd.f32 %v8576_v1, %v8567_v57  ;;  %11737 = vst [vmem:[#allocation40_spill] sm:$0xff] %v8591_v0 }
 0x305   : > { %11734 = vst [vmem:[#allocation119_spill] sm:$0xff] %v8579_v6  ;;  %v8593_v51 = vpop.eup %6123  ;;  %v8595_v58 = vpop.f32.mrf.mxu0  ;;  %v1421_v11 = vpack.c.bf16 %v1398_v62, %v1397_v59 }
 0x306   : > { %11738 = vst [vmem:[#allocation39_spill] sm:$0xff] %v8593_v51  ;;  %2774 = vadd.xlane.f32.xlu0 %v2773_v10  ;;  %11739 = vst [vmem:[#allocation46_spill] sm:$0xff] %v8595_v58  ;;  %v2776_v17 = vadd.f32 %v8593_v51, %v8579_v6  ;;  %v11745_v10 = vld [vmem:[#allocation67_spill] sm:$0xff]  ;;  %v11746_v58 = vld [vmem:[#allocation65_spill] sm:$0xff] }
 0x307   : > { %v8599_v36 = vpop.f32.mrf.mxu0  ;;  %v11747_v0 = vpack.c.bf16 %v11745_v10, %v11746_v58 }
 0x308   : > { %2777 = vadd.xlane.f32.xlu1 %v2776_v17  ;;  %11740 = vst [vmem:[#allocation44_spill] sm:$0xff] %v8599_v36  ;;  %v6839_v17 = vld [vmem:[%s11114_s2 + $0xa0] sm:$0xff] }
 0x309   : > { %v8601_v46 = vpop.f32.mrf.mxu0 }
 0x30a   : > { %11741 = vst [vmem:[#allocation36_spill] sm:$0xff] %v8601_v46  ;;  %2118 = vmatmul.mubr.bf16.gmra.mxu0 %v1421_v11  ;;  %v11748_v11 = vld [vmem:[#allocation71_spill] sm:$0xff] }
 0x30b   : > { %2127 = vmatprep.mubr.bf16.mxu0 %v11366_v28  ;;  %v8604_v56 = vpop.f32.mrf.mxu0  ;;  %v1401_v46 = vmul.f32 %v6839_v17, %v11748_v11 }
 0x30c   : > { %11742 = vst [vmem:[#allocation50_spill] sm:$0xff] %v8604_v56 }
 0x30d   : > { %v8606_v44 = vpop.f32.mrf.mxu0 }
 0x30e   : > { %11743 = vst [vmem:[#allocation8_spill] sm:$0xff] %v8606_v44  ;;  %v6840_v44 = vld [vmem:[%s11114_s2 + $0xa8] sm:$0xff] }
 0x30f   : > { %v8608_v22 = vpop.f32.mrf.mxu0 }
 0x310   : > { %11744 = vst [vmem:[#allocation38_spill] sm:$0xff] %v8608_v22  ;;  %v2577_v6 = vpop.xlane.xlu0 %2576  ;;  %v11749_v22 = vld [vmem:[#allocation76_spill] sm:$0xff] }
 0x311   : > { %v2641_v59 = vsub.f32 %v8114_v4, %v2577_v6  ;;  %v2642_v62 = vsub.f32 %v8116_v37, %v2577_v6  ;;  %v1402_v58 = vmul.f32 %v6840_v44, %v11749_v22  ;;  %v8624_v56 = vpop.f32.mrf.mxu0 }
 0x312   : > { %2128 = vmatmul.mubr.bf16.gmra.mxu0 %v11747_v0  ;;  %11750 = vst [vmem:[#allocation125_spill] sm:$0xff] %v8624_v56 }
 0x313   : > { %2137 = vmatprep.mubr.bf16.mxu0 %v11366_v28  ;;  %v2765_v0 = vmul.f32 1.442695, %v2641_v59  ;;  %v2767_v10 = vmul.f32 1.442695, %v2642_v62  ;;  %v1423_v57 = vpack.c.bf16 %v1402_v58, %v1401_v46  ;;  %v8630_v44 = vpop.f32.mrf.mxu0 }
 0x314   : > { %v2580_v4 = vpop.xlane.xlu1 %2579  ;;  %v2571_v36 = vpop.xlane.xlu0 %2570  ;;  %11751 = vst [vmem:[#allocation123_spill] sm:$0xff] %v8630_v44 }
 0x315   : > { %6125 = vpow2.f32 %v2765_v0  ;;  %v2643_v37 = vsub.f32 %v8124_v30, %v2580_v4  ;;  %v2644_v6 = vsub.f32 %v8126_v8, %v2580_v4  ;;  %v2637_v17 = vsub.f32 %v8122_v13, %v2571_v36  ;;  %v8637_v58 = vpop.f32.mrf.mxu0 }
 0x316   : > { %6127 = vpow2.f32 %v2767_v10  ;;  %v2638_v11 = vsub.f32 %v8118_v21, %v2571_v36  ;;  %11752 = vst [vmem:[#allocation124_spill] sm:$0xff] %v8637_v58 }
 0x317   : > { %v2769_v51 = vmul.f32 1.442695, %v2643_v37  ;;  %v2771_v1 = vmul.f32 1.442695, %v2644_v6  ;;  %v2757_v22 = vmul.f32 1.442695, %v2637_v17  ;;  %v8643_v6 = vpop.f32.mrf.mxu0 }
 0x318   : > { %v2759_v59 = vmul.f32 1.442695, %v2638_v11  ;;  %v2574_v62 = vpop.xlane.xlu1 %2573  ;;  %v2565_v0 = vpop.xlane.xlu0 %2564  ;;  %11753 = vst [vmem:[#allocation9_spill] sm:$0xff] %v8643_v6 }
 0x319   : > { %6129 = vpow2.f32 %v2769_v51  ;;  %v2639_v30 = vsub.f32 %v8145_v14, %v2574_v62  ;;  %v2640_v8 = vsub.f32 %v8135_v50, %v2574_v62  ;;  %v2633_v13 = vsub.f32 %v8143_v43, %v2565_v0 }
 0x31a   : > { %2138 = vmatmul.mubr.bf16.gmra.mxu0 %v1423_v57  ;;  %6131 = vpow2.f32 %v2771_v1  ;;  %v2634_v21 = vsub.f32 %v8131_v5, %v2565_v0 }
 0x31b   : > { %2147 = vmatprep.mubr.bf16.mxu0 %v11366_v28  ;;  %6133 = vpow2.f32 %v2757_v22  ;;  %v2761_v36 = vmul.f32 1.442695, %v2639_v30  ;;  %v2763_v46 = vmul.f32 1.442695, %v2640_v8  ;;  %v2749_v57 = vmul.f32 1.442695, %v2633_v13 }
 0x31c   : > { %6135 = vpow2.f32 %v2759_v59  ;;  %v2751_v51 = vmul.f32 1.442695, %v2634_v21  ;;  %v2568_v10 = vpop.xlane.xlu1 %2567  ;;  %v2559_v4 = vpop.xlane.xlu0 %2558  ;;  %v11754_v22 = vld [vmem:[#allocation75_spill] sm:$0xff]  ;;  %v11755_v59 = vld [vmem:[#allocation73_spill] sm:$0xff] }
 0x31d   : > { %6137 = vpow2.f32 %v2761_v36  ;;  %v2635_v50 = vsub.f32 %v8166_v34, %v2568_v10  ;;  %v2636_v14 = vsub.f32 %v8155_v40, %v2568_v10  ;;  %v2629_v43 = vsub.f32 %v8163_v31, %v2559_v4  ;;  %v6841_v40 = vld [vmem:[%s11114_s2 + $0xc0] sm:$0xff]  ;;  %v11757_v31 = vld [vmem:[#allocation81_spill] sm:$0xff]  ;;  %v6842_v21 = vld [vmem:[%s11114_s2 + $0xc8] sm:$0xff] }
 0x31e   : > { %6139 = vpow2.f32 %v2763_v46  ;;  %v2630_v5 = vsub.f32 %v8150_v38, %v2559_v4  ;;  %v11756_v62 = vpack.c.bf16 %v11754_v22, %v11755_v59  ;;  %v1405_v30 = vmul.f32 %v6841_v40, %v11757_v31  ;;  %v11758_v36 = vld [vmem:[#allocation86_spill] sm:$0xff] }
 0x31f   : > { %6141 = vpow2.f32 %v2749_v57  ;;  %v2753_v1 = vmul.f32 1.442695, %v2635_v50  ;;  %v2755_v37 = vmul.f32 1.442695, %v2636_v14  ;;  %v2741_v17 = vmul.f32 1.442695, %v2629_v43  ;;  %v8665_v50 = vpop.f32.mrf.mxu0 }
 0x320   : > { %6143 = vpow2.f32 %v2751_v51  ;;  %v2743_v11 = vmul.f32 1.442695, %v2630_v5  ;;  %v2562_v34 = vpop.xlane.xlu1 %2561  ;;  %v2553_v0 = vpop.xlane.xlu0 %2552  ;;  %v1406_v46 = vmul.f32 %v6842_v21, %v11758_v36  ;;  %11759 = vst [vmem:[#allocation104_spill] sm:$0xff] %v8665_v50 }
 0x321   : > { %6145 = vpow2.f32 %v2753_v1  ;;  %v2631_v38 = vsub.f32 %v8198_v29, %v2562_v34  ;;  %v2632_v8 = vsub.f32 %v8181_v24, %v2562_v34  ;;  %v2625_v57 = vsub.f32 %v8194_v12, %v2553_v0 }
 0x322   : > { %2148 = vmatmul.mubr.bf16.gmra.mxu0 %v11756_v62  ;;  %v8655_v13 = vpop.eup %6125  ;;  %6147 = vpow2.f32 %v2755_v37  ;;  %v2626_v51 = vsub.f32 %v8175_v33, %v2553_v0 }
 0x323   : > { %2157 = vmatprep.mubr.bf16.mxu0 %v11366_v28  ;;  %v8663_v10 = vpop.eup %6127  ;;  %6149 = vpow2.f32 %v2741_v17  ;;  %v2745_v24 = vmul.f32 1.442695, %v2631_v38  ;;  %v2747_v29 = vmul.f32 1.442695, %v2632_v8  ;;  %v2733_v14 = vmul.f32 1.442695, %v2625_v57 }
 0x324   : > { %6151 = vpow2.f32 %v2743_v11  ;;  %v2735_v4 = vmul.f32 1.442695, %v2626_v51  ;;  %v2556_v43 = vpop.xlane.xlu1 %2555  ;;  %v2863_v5 = vadd.f32 %v8663_v10, %v8655_v13  ;;  %v2547_v33 = vpop.xlane.xlu0 %2546  ;;  %v1425_v17 = vpack.c.bf16 %v1406_v46, %v1405_v30 }
 0x325   : > { %6153 = vpow2.f32 %v2745_v24  ;;  %v2627_v1 = vsub.f32 %v8222_v3, %v2556_v43  ;;  %v2628_v12 = vsub.f32 %v8210_v9, %v2556_v43  ;;  %v2621_v22 = vsub.f32 %v8218_v18, %v2547_v33  ;;  %v8679_v3 = vpop.f32.mrf.mxu0 }
 0x326   : > { %v8671_v37 = vpop.eup %6129  ;;  %6155 = vpow2.f32 %v2747_v29  ;;  %v2622_v11 = vsub.f32 %v8204_v23, %v2547_v33  ;;  %2864 = vadd.xlane.f32.xlu0 %v2863_v5  ;;  %11760 = vst [vmem:[#allocation127_spill] sm:$0xff] %v8679_v3 }
 0x327   : > { %v8675_v59 = vpop.eup %6131  ;;  %6157 = vpow2.f32 %v2733_v14  ;;  %v2737_v62 = vmul.f32 1.442695, %v2627_v1  ;;  %v2739_v34 = vmul.f32 1.442695, %v2628_v12  ;;  %v2725_v9 = vmul.f32 1.442695, %v2621_v22  ;;  %v8698_v29 = vpop.f32.mrf.mxu0 }
 0x328   : > { %v8677_v40 = vpop.eup %6133  ;;  %6159 = vpow2.f32 %v2735_v4  ;;  %v2727_v31 = vmul.f32 1.442695, %v2622_v11  ;;  %v2550_v30 = vpop.xlane.xlu1 %2549  ;;  %v2866_v18 = vadd.f32 %v8675_v59, %v8671_v37  ;;  %11761 = vst [vmem:[#allocation128_spill] sm:$0xff] %v8698_v29  ;;  %v3041_v29 = vld [vmem:[%s6905_s22 + $0x28] sm:$0xf0] }
 0x329   : > { %v8683_v38 = vpop.eup %6135  ;;  %6161 = vpow2.f32 %v2737_v62  ;;  %v2623_v23 = vsub.f32 %v8247_v47, %v2550_v30  ;;  %v2624_v8 = vsub.f32 %v8234_v60, %v2550_v30  ;;  %v2541_v0 = vpop.xlane.xlu0 %2540 }
 0x32a   : > { %2158 = vmatmul.mubr.bf16.gmra.mxu0 %v1425_v17  ;;  %v8688_v21 = vpop.eup %6137  ;;  %6163 = vpow2.f32 %v2739_v34  ;;  %v2617_v36 = vsub.f32 %v8243_v27, %v2541_v0  ;;  %v2618_v46 = vsub.f32 %v8228_v49, %v2541_v0  ;;  %2867 = vadd.xlane.f32.xlu1 %v2866_v18  ;;  %v2857_v57 = vadd.f32 %v8683_v38, %v8677_v40  ;;  %v11764_v18 = vld [vmem:[#allocation83_spill] sm:$0xff] }
 0x32b   : > { %2167 = vmatprep.mubr.bf16.mxu0 %v11366_v28  ;;  %v8694_v51 = vpop.eup %6139  ;;  %6165 = vpow2.f32 %v2725_v9  ;;  %v2729_v47 = vmul.f32 1.442695, %v2623_v23  ;;  %v2731_v24 = vmul.f32 1.442695, %v2624_v8 }
 0x32c   : > { %v8696_v60 = vpop.eup %6141  ;;  %6167 = vpow2.f32 %v2727_v31  ;;  %v2717_v14 = vmul.f32 1.442695, %v2617_v36  ;;  %v2719_v4 = vmul.f32 1.442695, %v2618_v46  ;;  %2858 = vadd.xlane.f32.xlu0 %v2857_v57  ;;  %v2544_v27 = vpop.xlane.xlu1 %2543  ;;  %v2860_v49 = vadd.f32 %v8694_v51, %v8688_v21 }
 0x32d   : > { %v8702_v43 = vpop.eup %6143  ;;  %6169 = vpow2.f32 %v2729_v47  ;;  %v2619_v5 = vsub.f32 %v8271_v53, %v2544_v27  ;;  %v2620_v1 = vsub.f32 %v8259_v61, %v2544_v27  ;;  %v2535_v12 = vpop.xlane.xlu0 %2534  ;;  %v6843_v47 = vld [vmem:[%s11114_s2 + $0xe0] sm:$0xff] }
 0x32e   : > { %v8706_v33 = vpop.eup %6145  ;;  %6171 = vpow2.f32 %v2731_v24  ;;  %v2613_v17 = vsub.f32 %v8267_v45, %v2535_v12  ;;  %v2614_v22 = vsub.f32 %v8253_v25, %v2535_v12  ;;  %2861 = vadd.xlane.f32.xlu1 %v2860_v49  ;;  %v2851_v11 = vadd.f32 %v8702_v43, %v8696_v60  ;;  %v8716_v61 = vpop.f32.mrf.mxu0  ;;  %v11763_v45 = vld [vmem:[#allocation85_spill] sm:$0xff]  ;;  %v11767_v27 = vld [vmem:[#allocation94_spill] sm:$0xff] }
 0x32f   : > { %v8712_v62 = vpop.eup %6147  ;;  %6173 = vpow2.f32 %v2717_v14  ;;  %v2721_v34 = vmul.f32 1.442695, %v2619_v5  ;;  %v2723_v9 = vmul.f32 1.442695, %v2620_v1  ;;  %11762 = vst [vmem:[#allocation126_spill] sm:$0xff] %v8716_v61  ;;  %v11765_v25 = vpack.c.bf16 %v11763_v45, %v11764_v18  ;;  %v11766_v24 = vld [vmem:[#allocation89_spill] sm:$0xff] }
 0x330   : > { %v8714_v53 = vpop.eup %6149  ;;  %6175 = vpow2.f32 %v2719_v4  ;;  %v2709_v31 = vmul.f32 1.442695, %v2613_v17  ;;  %v2711_v30 = vmul.f32 1.442695, %v2614_v22  ;;  %2852 = vadd.xlane.f32.xlu0 %v2851_v11  ;;  %v2538_v23 = vpop.xlane.xlu1 %2537  ;;  %v2854_v8 = vadd.f32 %v8712_v62, %v8706_v33  ;;  %v6844_v4 = vld [vmem:[%s11114_s2 + $0xe8] sm:$0xff] }
 0x331   : > { %v8723_v0 = vpop.eup %6151  ;;  %6177 = vpow2.f32 %v2721_v34  ;;  %v2615_v36 = vsub.f32 %v8295_v55, %v2538_v23  ;;  %v2616_v46 = vsub.f32 %v8282_v20, %v2538_v23  ;;  %v1409_v14 = vmul.f32 %v6843_v47, %v11766_v24  ;;  %v8744_v17 = vpop.f32.mrf.mxu0 }
 0x332   : > { %2168 = vmatmul.mubr.bf16.gmra.mxu0 %v11765_v25  ;;  %v8728_v57 = vpop.eup %6153  ;;  %v1410_v49 = vmul.f32 %v6844_v4, %v11767_v27  ;;  %6179 = vpow2.f32 %v2723_v9  ;;  %2855 = vadd.xlane.f32.xlu1 %v2854_v8  ;;  %v2845_v20 = vadd.f32 %v8723_v0, %v8714_v53  ;;  %11768 = vst [vmem:[#allocation103_spill] sm:$0xff] %v8744_v17 }
 0x333   : > { %2177 = vmatprep.mubr.bf16.mxu0 %v11366_v28  ;;  %v8740_v55 = vpop.eup %6155  ;;  %6181 = vpow2.f32 %v2709_v31  ;;  %v2713_v5 = vmul.f32 1.442695, %v2615_v36  ;;  %v2715_v1 = vmul.f32 1.442695, %v2616_v46  ;;  %v3043_v61 = vpack.c.bf16 %v3041_v29, %v3041_v29 }
 0x334   : > { %v8742_v12 = vpop.eup %6157  ;;  %6183 = vpow2.f32 %v2711_v30  ;;  %2846 = vadd.xlane.f32.xlu0 %v2845_v20  ;;  %v2848_v22 = vadd.f32 %v8740_v55, %v8728_v57  ;;  %v1427_v9 = vpack.c.bf16 %v1410_v49, %v1409_v14  ;;  %v8758_v30 = vpop.f32.mrf.mxu0 }
 0x335   : > { %v8748_v11 = vpop.eup %6159  ;;  %6185 = vpow2.f32 %v2713_v5  ;;  %11769 = vst [vmem:[#allocation98_spill] sm:$0xff] %v8758_v30 }
 0x336   : > { %v8750_v34 = vpop.eup %6161  ;;  %6187 = vpow2.f32 %v2715_v1  ;;  %2849 = vadd.xlane.f32.xlu1 %v2848_v22  ;;  %v2839_v31 = vadd.f32 %v8748_v11, %v8742_v12  ;;  %v8773_v24 = vpop.f32.mrf.mxu0  ;;  %v11772_v22 = vld [vmem:[#allocation93_spill] sm:$0xff] }
 0x337   : > { %v8754_v45 = vpop.eup %6163  ;;  %11770 = vst [vmem:[#allocation18_spill] sm:$0xff] %v8773_v24 }
 0x338   : > { %v8756_v18 = vpop.eup %6165  ;;  %2840 = vadd.xlane.f32.xlu0 %v2839_v31  ;;  %v2842_v25 = vadd.f32 %v8754_v45, %v8750_v34  ;;  %v8787_v1 = vpop.f32.mrf.mxu0 }
 0x339   : > { %v8762_v23 = vpop.eup %6167  ;;  %11771 = vst [vmem:[#allocation105_spill] sm:$0xff] %v8787_v1 }
 0x33a   : > { %2178 = vmatmul.mubr.bf16.gmra.mxu0 %v1427_v9  ;;  %v8765_v8 = vpop.eup %6169  ;;  %2843 = vadd.xlane.f32.xlu1 %v2842_v25  ;;  %v2833_v36 = vadd.f32 %v8762_v23, %v8756_v18  ;;  %v11773_v9 = vld [vmem:[#allocation91_spill] sm:$0xff] }
 0x33b   : > { %2187 = vmatprep.mubr.bf16.mxu0 %v11366_v28  ;;  %v8769_v46 = vpop.eup %6171  ;;  %v11774_v31 = vpack.c.bf16 %v11772_v22, %v11773_v9  ;;  %v2203_v22 = vld [vmem:[%s6905_s22 + $0x48] sm:$0xf] }
 0x33c   : > { %v8771_v47 = vpop.eup %6173  ;;  %2834 = vadd.xlane.f32.xlu0 %v2833_v36  ;;  %v2836_v14 = vadd.f32 %v8769_v46, %v8765_v8  ;;  %v2205_v9 = vpack.c.bf16 %v2203_v22, %v2203_v22 }
 0x33d   : > { %v8777_v4 = vpop.eup %6175 }
 0x33e   : > { %v8779_v27 = vpop.eup %6177  ;;  %2837 = vadd.xlane.f32.xlu1 %v2836_v14  ;;  %v2827_v49 = vadd.f32 %v8777_v4, %v8771_v47  ;;  %3029 = vmatprep.mubr.bf16.mxu1 %v2205_v9 }
 0x33f   : > { %v8783_v20 = vpop.eup %6179 }
 0x340   : > { %v8785_v5 = vpop.eup %6181  ;;  %2828 = vadd.xlane.f32.xlu0 %v2827_v49  ;;  %v2830_v25 = vadd.f32 %v8783_v20, %v8779_v27 }
 0x341   : > { %v8794_v36 = vpop.eup %6183 }
 0x342   : > { %2188 = vmatmul.mubr.bf16.gmra.mxu0 %v11774_v31  ;;  %v8796_v14 = vpop.eup %6185  ;;  %2831 = vadd.xlane.f32.xlu1 %v2830_v25  ;;  %v2821_v58 = vadd.f32 %v8794_v36, %v8785_v5  ;;  %v3040_v31 = vld [vmem:[%s6905_s22 + $0x20] sm:$0xf0]  ;;  %v3051_v25 = vrot.slane %v3043_v61, 2 }
 0x343   : > { %v8800_v6 = vpop.eup %6187  ;;  %v3042_v56 = vpack.c.bf16 %v3040_v31, %v3040_v31 }
 0x344   : > { %2822 = vadd.xlane.f32.xlu0 %v2821_v58  ;;  %v2824_v49 = vadd.f32 %v8800_v6, %v8796_v14 }
 0x345   : > { %v3050_v44 = vrot.slane %v3042_v56, 2 }
 0x346   : > { %2825 = vadd.xlane.f32.xlu1 %v2824_v49 }
 0x36f   : > { %v2817_v24 = vpop.xlane.xlu0 %2816 }
 0x370   : > { %6189 = vrcp.f32 %v2817_v24 }
 0x371   : > { %3054 = vxpose.xlu0.c.b16.start.end [1/1] (short) %v3050_v44, 128 }
 0x373   : > { %v2820_v50 = vpop.xlane.xlu1 %2819  ;;  %3070 = vxpose.xlu1.c.b16.start.end [1/1] (short) %v3051_v25, 128 }
 0x374   : > { %6191 = vrcp.f32 %v2820_v50 }
 0x375   : > { %v2811_v58 = vpop.xlane.xlu0 %2810 }
 0x376   : > { %6193 = vrcp.f32 %v2811_v58 }
 0x377   : > { %v2814_v1 = vpop.xlane.xlu1 %2813 }
 0x378   : > { %6195 = vrcp.f32 %v2814_v1 }
 0x37a   : > { %v2805_v49 = vpop.xlane.xlu0 %2804 }
 0x37b   : > { %6197 = vrcp.f32 %v2805_v49 }
 0x37c   : > { %v2808_v22 = vpop.xlane.xlu1 %2807 }
 0x37d   : > { %6199 = vrcp.f32 %v2808_v22  ;;  %v6190_v3 = vpop.eup %6189 }
 0x37e   : > { %v2930_v44 = vmul.f32 %v6190_v3, %v8431_v7  ;;  %v2929_v24 = vmul.f32 %v6190_v3, %v8421_v48 }
 0x37f   : > { %v2799_v9 = vpop.xlane.xlu0 %2798 }
 0x380   : > { %6201 = vrcp.f32 %v2799_v9  ;;  %v2802_v29 = vpop.xlane.xlu1 %2801 }
 0x381   : > { %6203 = vrcp.f32 %v2802_v29  ;;  %v6192_v56 = vpop.eup %6191 }
 0x382   : > { %v2932_v50 = vmul.f32 %v6192_v56, %v8445_v54  ;;  %v2931_v1 = vmul.f32 %v6192_v56, %v8439_v2 }
 0x383   : > { %v2793_v61 = vpop.xlane.xlu0 %2792  ;;  %v6194_v31 = vpop.eup %6193 }
 0x384   : > { %6205 = vrcp.f32 %v2793_v61  ;;  %v2796_v25 = vpop.xlane.xlu1 %2795  ;;  %v2980_v58 = vpack.c.bf16 %v2932_v50, %v2930_v44  ;;  %v2979_v49 = vpack.c.bf16 %v2931_v1, %v2929_v24  ;;  %v2926_v29 = vmul.f32 %v6194_v31, %v8453_v63  ;;  %v11775_v1 = vld [vmem:[#allocation90_spill] sm:$0xff] }
 0x385   : > { %6207 = vrcp.f32 %v2796_v25  ;;  %v6196_v22 = vpop.eup %6195  ;;  %v2925_v61 = vmul.f32 %v6194_v31, %v8447_v15  ;;  %v11776_v25 = vld [vmem:[#allocation77_spill] sm:$0xff] }
 0x386   : > { %2997 = vmatprep.subr.bf16.mxu1 %v2980_v58  ;;  %v2928_v7 = vmul.f32 %v6196_v22, %v8466_v52  ;;  %v2927_v54 = vmul.f32 %v6196_v22, %v8458_v32 }
 0x387   : > { %v2787_v9 = vpop.xlane.xlu0 %2786  ;;  %2998 = vmatpush1.bf16.msra.mxu1 %v2979_v49 }
 0x388   : > { %6209 = vrcp.f32 %v2787_v9  ;;  %v6198_v48 = vpop.eup %6197  ;;  %v2790_v3 = vpop.xlane.xlu1 %2789  ;;  %v2978_v2 = vpack.c.bf16 %v2928_v7, %v2926_v29  ;;  %v2977_v56 = vpack.c.bf16 %v2927_v54, %v2925_v61 }
 0x389   : > { %6211 = vrcp.f32 %v2790_v3  ;;  %v2922_v24 = vmul.f32 %v6198_v48, %v8474_v16  ;;  %v2921_v52 = vmul.f32 %v6198_v48, %v11775_v1 }
 0x38a   : > { %v6200_v44 = vpop.eup %6199  ;;  %2999 = vmatprep.subr.bf16.mxu1 %v2978_v2 }
 0x38b   : > { %v2781_v50 = vpop.xlane.xlu0 %2780  ;;  %v2924_v63 = vmul.f32 %v6200_v44, %v8486_v41  ;;  %v2923_v15 = vmul.f32 %v6200_v44, %v11776_v25  ;;  %3000 = vmatpush1.bf16.msra.mxu1 %v2977_v56  ;;  %v11777_v44 = vld [vmem:[#allocation34_spill] sm:$0xff]  ;;  %v11780_v25 = vld [vmem:[#allocation37_spill] sm:$0xff] }
 0x38c   : > { %6213 = vrcp.f32 %v2781_v50  ;;  %v2784_v32 = vpop.xlane.xlu1 %2783  ;;  %v11778_v50 = vld [vmem:[#allocation99_spill] sm:$0xff] }
 0x38d   : > { %v6202_v31 = vpop.eup %6201  ;;  %6215 = vrcp.f32 %v2784_v32  ;;  %v2976_v58 = vpack.c.bf16 %v2924_v63, %v2922_v24  ;;  %v2975_v49 = vpack.c.bf16 %v2923_v15, %v2921_v52  ;;  %v11779_v63 = vld [vmem:[#allocation32_spill] sm:$0xff] }
 0x38e   : > { %v6204_v22 = vpop.eup %6203  ;;  %v2918_v29 = vmul.f32 %v6202_v31, %v8497_v19  ;;  %v2917_v41 = vmul.f32 %v6202_v31, %v8488_v35  ;;  %v11781_v31 = vld [vmem:[#allocation114_spill] sm:$0xff] }
 0x38f   : > { %v2775_v9 = vpop.xlane.xlu0 %2774  ;;  %3001 = vmatprep.subr.bf16.mxu1 %v2976_v58  ;;  %v2920_v16 = vmul.f32 %v6204_v22, %v8516_v42  ;;  %v2919_v7 = vmul.f32 %v6204_v22, %v8502_v26  ;;  %v11782_v58 = vld [vmem:[#allocation33_spill] sm:$0xff] }
 0x390   : > { %6217 = vrcp.f32 %v2775_v9  ;;  %3002 = vmatpush1.bf16.msra.mxu1 %v2975_v49  ;;  %v11783_v22 = vld [vmem:[#allocation41_spill] sm:$0xff] }
 0x391   : > { %v6206_v61 = vpop.eup %6205  ;;  %v2778_v54 = vpop.xlane.xlu1 %2777  ;;  %v2974_v48 = vpack.c.bf16 %v2920_v16, %v2918_v29  ;;  %v2973_v3 = vpack.c.bf16 %v2919_v7, %v2917_v41  ;;  %v11784_v7 = vld [vmem:[#allocation118_spill] sm:$0xff] }
 0x392   : > { %6219 = vrcp.f32 %v2778_v54  ;;  %v6208_v2 = vpop.eup %6207  ;;  %v2914_v56 = vmul.f32 %v6206_v61, %v8524_v39  ;;  %v2913_v24 = vmul.f32 %v6206_v61, %v11778_v50  ;;  %v11785_v54 = vld [vmem:[#allocation115_spill] sm:$0xff] }
 0x393   : > { %3003 = vmatprep.subr.bf16.mxu1 %v2974_v48  ;;  %v2916_v19 = vmul.f32 %v6208_v2, %v11777_v44  ;;  %v2915_v42 = vmul.f32 %v6208_v2, %v11779_v63 }
 0x394   : > { %3004 = vmatpush1.bf16.msra.mxu1 %v2973_v3  ;;  %v11786_v3 = vld [vmem:[#allocation112_spill] sm:$0xff] }
 0x395   : > { %v6210_v1 = vpop.eup %6209  ;;  %v2972_v35 = vpack.c.bf16 %v2916_v19, %v2914_v56  ;;  %v2971_v26 = vpack.c.bf16 %v2915_v42, %v2913_v24  ;;  %v11787_v56 = vld [vmem:[#allocation116_spill] sm:$0xff]  ;;  %v11788_v42 = vld [vmem:[#allocation121_spill] sm:$0xff] }
 0x396   : > { %v6212_v52 = vpop.eup %6211  ;;  %v2910_v15 = vmul.f32 %v6210_v1, %v11780_v25  ;;  %v2909_v49 = vmul.f32 %v6210_v1, %v11782_v58 }
 0x397   : > { %3005 = vmatprep.subr.bf16.mxu1 %v2972_v35  ;;  %v2912_v32 = vmul.f32 %v6212_v52, %v11781_v31  ;;  %v2911_v39 = vmul.f32 %v6212_v52, %v11783_v22  ;;  %v11789_v35 = vld [vmem:[#allocation39_spill] sm:$0xff]  ;;  %v11790_v52 = vld [vmem:[#allocation122_spill] sm:$0xff] }
 0x398   : > { %3006 = vmatpush1.bf16.msra.mxu1 %v2971_v26 }
 0x399   : > { %v6214_v9 = vpop.eup %6213  ;;  %v2970_v29 = vpack.c.bf16 %v2912_v32, %v2910_v15  ;;  %v2969_v16 = vpack.c.bf16 %v2911_v39, %v2909_v49  ;;  %v11791_v15 = vld [vmem:[#allocation119_spill] sm:$0xff] }
 0x39a   : > { %v6216_v41 = vpop.eup %6215  ;;  %v2906_v61 = vmul.f32 %v6214_v9, %v11784_v7  ;;  %v2905_v2 = vmul.f32 %v6214_v9, %v11786_v3 }
 0x39b   : > { %3007 = vmatprep.subr.bf16.mxu1 %v2970_v29  ;;  %v2908_v48 = vmul.f32 %v6216_v41, %v11785_v54  ;;  %v2907_v44 = vmul.f32 %v6216_v41, %v11787_v56 }
 0x39c   : > { %3008 = vmatpush1.bf16.msra.mxu1 %v2969_v16 }
 0x39d   : > { %v6218_v19 = vpop.eup %6217  ;;  %v2968_v50 = vpack.c.bf16 %v2908_v48, %v2906_v61  ;;  %v2967_v24 = vpack.c.bf16 %v2907_v44, %v2905_v2 }
 0x39e   : > { %v2902_v1 = vmul.f32 %v6218_v19, %v11788_v42  ;;  %v2901_v25 = vmul.f32 %v6218_v19, %v11790_v52 }
 0x39f   : > { %v6220_v63 = vpop.eup %6219  ;;  %3009 = vmatprep.subr.bf16.mxu1 %v2968_v50 }
 0x3a0   : > { %v2904_v26 = vmul.f32 %v6220_v63, %v11789_v35  ;;  %v2903_v31 = vmul.f32 %v6220_v63, %v11791_v15  ;;  %3010 = vmatpush1.bf16.msra.mxu1 %v2967_v24 }
 0x3a2   : > { %v2966_v32 = vpack.c.bf16 %v2904_v26, %v2902_v1  ;;  %v2965_v58 = vpack.c.bf16 %v2903_v31, %v2901_v25 }
 0x3a4   : > { %3011 = vmatprep.subr.bf16.mxu1 %v2966_v32 }
 0x3a5   : > { %3012 = vmatpush1.bf16.msra.mxu1 %v2965_v58 }
 0x3af   : > { %v2865_v49 = vpop.xlane.xlu0 %2864 }
 0x3b0   : > { %6221 = vrcp.f32 %v2865_v49 }
 0x3b3   : > { %v2868_v22 = vpop.xlane.xlu1 %2867 }
 0x3b4   : > { %6223 = vrcp.f32 %v2868_v22 }
 0x3b5   : > { %v2859_v39 = vpop.xlane.xlu0 %2858 }
 0x3b6   : > { %6225 = vrcp.f32 %v2859_v39 }
 0x3b7   : > { %v2862_v9 = vpop.xlane.xlu1 %2861 }
 0x3b8   : > { %6227 = vrcp.f32 %v2862_v9 }
 0x3b9   : > { %v2853_v29 = vpop.xlane.xlu0 %2852 }
 0x3ba   : > { %6229 = vrcp.f32 %v2853_v29 }
 0x3bb   : > { %v2856_v16 = vpop.xlane.xlu1 %2855 }
 0x3bc   : > { %6231 = vrcp.f32 %v2856_v16 }
 0x3bd   : > { %v2847_v41 = vpop.xlane.xlu0 %2846  ;;  %v6222_v7 = vpop.eup %6221 }
 0x3be   : > { %6233 = vrcp.f32 %v2847_v41  ;;  %v2962_v3 = vmul.f32 %v6222_v7, %v8663_v10  ;;  %v2961_v56 = vmul.f32 %v6222_v7, %v8655_v13 }
 0x3bf   : > { %v2850_v61 = vpop.xlane.xlu1 %2849 }
 0x3c0   : > { %6235 = vrcp.f32 %v2850_v61 }
 0x3c1   : > { %v6224_v54 = vpop.eup %6223  ;;  %v2841_v48 = vpop.xlane.xlu0 %2840 }
 0x3c2   : > { %6237 = vrcp.f32 %v2841_v48  ;;  %v2964_v2 = vmul.f32 %v6224_v54, %v8675_v59  ;;  %v2963_v44 = vmul.f32 %v6224_v54, %v8671_v37 }
 0x3c3   : > { %v6226_v19 = vpop.eup %6225  ;;  %v2844_v50 = vpop.xlane.xlu1 %2843 }
 0x3c4   : > { %6239 = vrcp.f32 %v2844_v50  ;;  %v2996_v24 = vpack.c.bf16 %v2964_v2, %v2962_v3  ;;  %v2995_v63 = vpack.c.bf16 %v2963_v44, %v2961_v56  ;;  %v2958_v35 = vmul.f32 %v6226_v19, %v8683_v38 }
 0x3c5   : > { %v6228_v42 = vpop.eup %6227  ;;  %v2835_v1 = vpop.xlane.xlu0 %2834  ;;  %v2957_v26 = vmul.f32 %v6226_v19, %v8677_v40 }
 0x3c6   : > { %6241 = vrcp.f32 %v2835_v1  ;;  %3013 = vmatprep.subr.bf16.mxu1 %v2996_v24  ;;  %v2960_v10 = vmul.f32 %v6228_v42, %v8694_v51  ;;  %v2959_v59 = vmul.f32 %v6228_v42, %v8688_v21 }
 0x3c7   : > { %v6230_v13 = vpop.eup %6229  ;;  %v2838_v52 = vpop.xlane.xlu1 %2837  ;;  %3014 = vmatpush2.bf16.msra.mxu1 %v2995_v63 }
 0x3c8   : > { %6243 = vrcp.f32 %v2838_v52  ;;  %v2994_v37 = vpack.c.bf16 %v2960_v10, %v2958_v35  ;;  %v2993_v25 = vpack.c.bf16 %v2959_v59, %v2957_v26  ;;  %v2954_v32 = vmul.f32 %v6230_v13, %v8702_v43  ;;  %v11793_v52 = vld [vmem:[#allocation2_spill] sm:$0xff] }
 0x3c9   : > { %v6232_v15 = vpop.eup %6231  ;;  %v2829_v31 = vpop.xlane.xlu0 %2828  ;;  %v2953_v51 = vmul.f32 %v6230_v13, %v8696_v60  ;;  %v11792_v13 = vld [vmem:[#allocation3_spill] sm:$0xff] }
 0x3ca   : > { %6245 = vrcp.f32 %v2829_v31  ;;  %3015 = vmatprep.subr.bf16.mxu1 %v2994_v37  ;;  %v2956_v38 = vmul.f32 %v6232_v15, %v8712_v62  ;;  %v2955_v40 = vmul.f32 %v6232_v15, %v8706_v33  ;;  %v3135_v37 = vsel %vm319_vm0, %v11793_v52, 0  ;;  %v11797_v52 = vld [vmem:[#allocation72_spill] sm:$0xff] }
 0x3cb   : > { %v6234_v58 = vpop.eup %6233  ;;  %v2832_v21 = vpop.xlane.xlu1 %2831  ;;  %3016 = vmatpush2.bf16.msra.mxu1 %v2993_v25 }
 0x3cc   : > { %6247 = vrcp.f32 %v2832_v21  ;;  %v2992_v49 = vpack.c.bf16 %v2956_v38, %v2954_v32  ;;  %v2991_v22 = vpack.c.bf16 %v2955_v40, %v2953_v51  ;;  %v2950_v29 = vmul.f32 %v6234_v58, %v8723_v0 }
 0x3cd   : > { %v6236_v39 = vpop.eup %6235  ;;  %v2823_v9 = vpop.xlane.xlu0 %2822  ;;  %v2949_v62 = vmul.f32 %v6234_v58, %v8714_v53 }
 0x3ce   : > { %6249 = vrcp.f32 %v2823_v9  ;;  %3017 = vmatprep.subr.bf16.mxu1 %v2992_v49  ;;  %v2952_v43 = vmul.f32 %v6236_v39, %v8740_v55  ;;  %v2951_v60 = vmul.f32 %v6236_v39, %v8728_v57 }
 0x3cf   : > { %v6238_v16 = vpop.eup %6237  ;;  %v2826_v33 = vpop.xlane.xlu1 %2825  ;;  %3018 = vmatpush2.bf16.msra.mxu1 %v2991_v22 }
 0x3d0   : > { %6251 = vrcp.f32 %v2826_v33  ;;  %v2990_v41 = vpack.c.bf16 %v2952_v43, %v2950_v29  ;;  %v2989_v7 = vpack.c.bf16 %v2951_v60, %v2949_v62  ;;  %v2946_v54 = vmul.f32 %v6238_v16, %v8748_v11 }
 0x3d1   : > { %v6240_v61 = vpop.eup %6239  ;;  %v2945_v48 = vmul.f32 %v6238_v16, %v8742_v12 }
 0x3d2   : > { %3019 = vmatprep.subr.bf16.mxu1 %v2990_v41  ;;  %v2948_v0 = vmul.f32 %v6240_v61, %v8754_v45  ;;  %v2947_v55 = vmul.f32 %v6240_v61, %v8750_v34 }
 0x3d3   : > { %v6242_v3 = vpop.eup %6241  ;;  %3020 = vmatpush2.bf16.msra.mxu1 %v2989_v7 }
 0x3d4   : > { %v2988_v53 = vpack.c.bf16 %v2948_v0, %v2946_v54  ;;  %v2987_v57 = vpack.c.bf16 %v2947_v55, %v2945_v48  ;;  %v2942_v56 = vmul.f32 %v6242_v3, %v8762_v23  ;;  %v2941_v19 = vmul.f32 %v6242_v3, %v8756_v18 }
 0x3d5   : > { %v6244_v2 = vpop.eup %6243  ;;  %v3078_v38 = vpop.trf.xlu1 }
 0x3d6   : > { %3021 = vmatprep.subr.bf16.mxu1 %v2988_v53  ;;  %v2944_v44 = vmul.f32 %v6244_v2, %v8769_v46  ;;  %v2943_v11 = vmul.f32 %v6244_v2, %v8765_v8 }
 0x3d7   : > { %v6246_v50 = vpop.eup %6245  ;;  %3022 = vmatpush2.bf16.msra.mxu1 %v2987_v57 }
 0x3d8   : > { %v2986_v45 = vpack.c.bf16 %v2944_v44, %v2942_v56  ;;  %v2985_v12 = vpack.c.bf16 %v2943_v11, %v2941_v19  ;;  %v2938_v34 = vmul.f32 %v6246_v50, %v8777_v4  ;;  %v2937_v42 = vmul.f32 %v6246_v50, %v8771_v47 }
 0x3d9   : > { %v6248_v24 = vpop.eup %6247  ;;  %v3079_v51 = vpop.trf.xlu1 }
 0x3da   : > { %3023 = vmatprep.subr.bf16.mxu1 %v2986_v45  ;;  %v2940_v63 = vmul.f32 %v6248_v24, %v8783_v20  ;;  %v2939_v23 = vmul.f32 %v6248_v24, %v8779_v27  ;;  %v2202_v20 = vld [vmem:[%s6905_s22 + $0x40] sm:$0xf] }
 0x3db   : > { %v6250_v46 = vpop.eup %6249  ;;  %3024 = vmatpush2.bf16.msra.mxu1 %v2985_v12  ;;  %v2204_v27 = vpack.c.bf16 %v2202_v20, %v2202_v20 }
 0x3dc   : > { %v2984_v18 = vpack.c.bf16 %v2940_v63, %v2938_v34  ;;  %v2983_v1 = vpack.c.bf16 %v2939_v23, %v2937_v42  ;;  %v2934_v35 = vmul.f32 %v6250_v46, %v8794_v36  ;;  %v2933_v26 = vmul.f32 %v6250_v46, %v8785_v5 }
 0x3dd   : > { %v6252_v8 = vpop.eup %6251  ;;  %v3080_v40 = vpop.trf.xlu1 }
 0x3de   : > { %3025 = vmatprep.subr.bf16.mxu1 %v2984_v18  ;;  %v2936_v10 = vmul.f32 %v6252_v8, %v8800_v6  ;;  %v2935_v4 = vmul.f32 %v6252_v8, %v8796_v14  ;;  %v3062_v6 = vpop.trf.xlu0 }
 0x3df   : > { %3026 = vmatpush2.bf16.msra.mxu1 %v2983_v1 }
 0x3e0   : > { %v2982_v59 = vpack.c.bf16 %v2936_v10, %v2934_v35  ;;  %v2981_v47 = vpack.c.bf16 %v2935_v4, %v2933_v26  ;;  %v11794_v35 = vld [vmem:[#allocation79_spill] sm:$0xff] }
 0x3e1   : > { %v3081_v58 = vpop.trf.xlu1  ;;  %v11795_v26 = vld [vmem:[#allocation43_spill] sm:$0xff] }
 0x3e2   : > { %3027 = vmatprep.subr.bf16.mxu1 %v2982_v59  ;;  %v3063_v5 = vpop.trf.xlu0  ;;  %v11796_v59 = vld [vmem:[#allocation70_spill] sm:$0xff] }
 0x3e3   : > { %3028 = vmatpush2.bf16.msra.mxu1 %v2981_v47 }
 0x3e4   : > { %5762 = vmatprep.subr.msk.bf16.mxu1 %vm319_vm0, %v11792_v13 }
 0x3e5   : > { %v3082_v21 = vpop.trf.xlu1 }
 0x3e6   : > { %3030 = vmatmul.mubr.bf16.vlgmr.msra.gmra.mxu1 %v2204_v27  ;;  %v3064_v36 = vpop.trf.xlu0 }
 0x3e7   : > { %3155 = vmatpush1.bf16.msra.mxu1 %v3135_v37  ;;  %3172 = vmatprep.mubr.bf16.mxu1 %v11366_v28 }
 0x3e9   : > { %v3083_v49 = vpop.trf.xlu1 }
 0x3ea   : > { %v3065_v14 = vpop.trf.xlu0 }
 0x3ed   : > { %v3084_v22 = vpop.trf.xlu1 }
 0x3ee   : > { %5763 = vmatmul.mubr.msk.bf16.vlgmr.msra.gmra.mxu1 %vm270_vm1, %v3062_v6  ;;  %v3066_v25 = vpop.trf.xlu0  ;;  %v11798_v6 = vld [vmem:[#allocation84_spill] sm:$0xff] }
 0x3ef   : > { %3182 = vmatprep.mubr.bf16.mxu1 %v11366_v28 }
 0x3f1   : > { %v3085_v39 = vpop.trf.xlu1 }
 0x3f2   : > { %v3067_v15 = vpop.trf.xlu0 }
 0x3f6   : > { %5764 = vmatmul.mubr.msk.bf16.gmra.mxu1 %vm270_vm1, %v3063_v5  ;;  %v3068_v31 = vpop.trf.xlu0 }
 0x3f7   : > { %3192 = vmatprep.mubr.bf16.mxu1 %v11366_v28 }
 0x3fa   : > { %v3069_v32 = vpop.trf.xlu0 }
 0x3fe   : > { %5765 = vmatmul.mubr.msk.bf16.gmra.mxu1 %vm270_vm1, %v3064_v36  ;;  %v11799_v36 = vld [vmem:[#allocation26_spill] sm:$0xff] }
 0x3ff   : > { %3202 = vmatprep.mubr.bf16.mxu1 %v11366_v28 }
 0x406   : > { %5766 = vmatmul.mubr.msk.bf16.gmra.mxu1 %vm270_vm1, %v3065_v14 }
 0x407   : > { %3212 = vmatprep.mubr.bf16.mxu1 %v11366_v28 }
 0x40e   : > { %5767 = vmatmul.mubr.msk.bf16.gmra.mxu1 %vm270_vm1, %v3066_v25 }
 0x40f   : > { %3222 = vmatprep.mubr.bf16.mxu1 %v11366_v28 }
 0x416   : > { %5768 = vmatmul.mubr.msk.bf16.gmra.mxu1 %vm270_vm1, %v3067_v15  ;;  %v11800_v15 = vld [vmem:[#allocation69_spill] sm:$0xff] }
 0x417   : > { %3232 = vmatprep.mubr.bf16.mxu1 %v11366_v28 }
 0x41e   : > { %5769 = vmatmul.mubr.msk.bf16.gmra.mxu1 %vm270_vm1, %v3068_v31 }
 0x41f   : > { %3242 = vmatprep.mubr.bf16.mxu1 %v11366_v28 }
 0x426   : > { %5770 = vmatmul.mubr.msk.bf16.gmra.mxu1 %vm270_vm1, %v3069_v32 }
 0x427   : > { %3252 = vmatprep.mubr.bf16.mxu1 %v11366_v28 }
 0x42e   : > { %5771 = vmatmul.mubr.msk.bf16.gmra.mxu1 %vm270_vm1, %v3078_v38  ;;  %v11801_v38 = vld [vmem:[#allocation42_spill] sm:$0xff] }
 0x42f   : > { %3262 = vmatprep.mubr.bf16.mxu1 %v11366_v28 }
 0x436   : > { %5772 = vmatmul.mubr.msk.bf16.gmra.mxu1 %vm270_vm1, %v3079_v51 }
 0x437   : > { %3272 = vmatprep.mubr.bf16.mxu1 %v11366_v28 }
 0x43e   : > { %5773 = vmatmul.mubr.msk.bf16.gmra.mxu1 %vm270_vm1, %v3080_v40 }
 0x43f   : > { %3282 = vmatprep.mubr.bf16.mxu1 %v11366_v28 }
 0x446   : > { %5774 = vmatmul.mubr.msk.bf16.gmra.mxu1 %vm270_vm1, %v3081_v58 }
 0x447   : > { %3292 = vmatprep.mubr.bf16.mxu1 %v11366_v28 }
 0x44e   : > { %5775 = vmatmul.mubr.msk.bf16.gmra.mxu1 %vm270_vm1, %v3082_v21  ;;  %v11802_v21 = vld [vmem:[#allocation30_spill] sm:$0xff] }
 0x44f   : > { %3302 = vmatprep.mubr.bf16.mxu1 %v11366_v28 }
 0x456   : > { %5776 = vmatmul.mubr.msk.bf16.gmra.mxu1 %vm270_vm1, %v3083_v49 }
 0x457   : > { %3312 = vmatprep.mubr.bf16.mxu1 %v11366_v28 }
 0x45e   : > { %5777 = vmatmul.mubr.msk.bf16.gmra.mxu1 %vm270_vm1, %v3084_v22  ;;  %v11803_v22 = vld [vmem:[#allocation29_spill] sm:$0xff] }
 0x45f   : > { %3322 = vmatprep.mubr.bf16.mxu1 %v11366_v28  ;;  %v11838_v28 = vld [vmem:[#allocation120_spill] sm:$0xff] }
 0x466   : > { %5778 = vmatmul.mubr.msk.bf16.gmra.mxu1 %vm270_vm1, %v3085_v39 }
 0x4a6   : > { %v3031_v9 = vpop.f32.mrf.mxu1 }
 0x4a7   : > { %3038 = vst [vmem:[%s8912_s13] sm:$0xf] %v3031_v9 }
 0x4a8   : > { %v3033_v29 = vpop.f32.mrf.mxu1 }
 0x4a9   : > { %3039 = vst [vmem:[%s8912_s13 + $0x8] sm:$0xf] %v3033_v29  ;;  %v11804_v29 = vld [vmem:[#allocation66_spill] sm:$0xff] }
 0x4aa   : > { %v3035_v43 = vpop.f32.mrf.mxu1 }
 0x4ac   : > { %v3036_v62 = vpop.f32.mrf.mxu1 }
 0x4ae   : > { %v8916_v60 = vpop.f32.mrf.mxu1 }
 0x4b0   : > { %v8918_v16 = vpop.f32.mrf.mxu1 }
 0x4b2   : > { %v8920_v33 = vpop.f32.mrf.mxu1 }
 0x4b4   : > { %v8922_v41 = vpop.f32.mrf.mxu1 }
 0x4b6   : > { %v8924_v7 = vpop.f32.mrf.mxu1 }
 0x4b8   : > { %v8926_v61 = vpop.f32.mrf.mxu1 }
 0x4ba   : > { %v8928_v54 = vpop.f32.mrf.mxu1 }
 0x4bc   : > { %v8930_v0 = vpop.f32.mrf.mxu1 }
 0x4be   : > { %v8932_v48 = vpop.f32.mrf.mxu1 }
 0x4c0   : > { %v3196_v55 = vpop.f32.mrf.mxu1 }
 0x4c2   : > { %v8934_v3 = vpop.f32.mrf.mxu1 }
 0x4c4   : > { %v8936_v53 = vpop.f32.mrf.mxu1 }
 0x4c6   : > { %v3204_v57 = vpop.f32.mrf.mxu1 }
 0x4c8   : > { %v3206_v2 = vpop.f32.mrf.mxu1 }
 0x4ca   : > { %v8938_v56 = vpop.f32.mrf.mxu1 }
 0x4cc   : > { %v3210_v44 = vpop.f32.mrf.mxu1 }
 0x4ce   : > { %v3214_v19 = vpop.f32.mrf.mxu1 }
 0x4d0   : > { %v3216_v11 = vpop.f32.mrf.mxu1 }
 0x4d1   : > { %v8983_v43 = vadd.f32 %v3216_v11, %v11804_v29 }
 0x4d2   : > { %v3218_v50 = vpop.f32.mrf.mxu1 }
 0x4d4   : > { %v3220_v45 = vpop.f32.mrf.mxu1 }
 0x4d6   : > { %v3224_v12 = vpop.f32.mrf.mxu1 }
 0x4d7   : > { %v8975_v49 = vadd.f32 %v3224_v12, %v11802_v21 }
 0x4d8   : > { %v3226_v24 = vpop.f32.mrf.mxu1 }
 0x4d9   : > { %v8963_v31 = vadd.f32 %v3226_v24, %v11800_v15  ;;  %v11805_v24 = vld [vmem:[#allocation74_spill] sm:$0xff] }
 0x4da   : > { %v3228_v34 = vpop.f32.mrf.mxu1 }
 0x4db   : > { %v3363_v62 = vmax.f32 %v8975_v49, %v8963_v31 }
 0x4dc   : > { %v3230_v63 = vpop.f32.mrf.mxu1 }
 0x4de   : > { %v3234_v42 = vpop.f32.mrf.mxu1 }
 0x4df   : > { %v8952_v37 = vadd.f32 %v3234_v42, %v11797_v52  ;;  %v8988_v42 = vadd.f32 %v3230_v63, %v11805_v24  ;;  %v11811_v52 = vld [vmem:[#allocation64_spill] sm:$0xff] }
 0x4e0   : > { %v3236_v23 = vpop.f32.mrf.mxu1 }
 0x4e1   : > { %v8947_v47 = vadd.f32 %v3236_v23, %v11796_v59 }
 0x4e2   : > { %v3238_v46 = vpop.f32.mrf.mxu1 }
 0x4e3   : > { %v3369_v32 = vmax.f32 %v8952_v37, %v8947_v47  ;;  %v8978_v39 = vadd.f32 %v3238_v46, %v11803_v22  ;;  %v11806_v46 = vld [vmem:[#allocation13_spill] sm:$0xff]  ;;  %v11817_v22 = vld [vmem:[#allocation12_spill] sm:$0xff] }
 0x4e4   : > { %v3240_v18 = vpop.f32.mrf.mxu1  ;;  %v9040_v29 = vadd.f32 %v8938_v56, %v11817_v22  ;;  %v11834_v22 = vld [vmem:[#allocation45_spill] sm:$0xff] }
 0x4e5   : > { %v8968_v51 = vadd.f32 %v3240_v18, %v11801_v38  ;;  %v8995_v18 = vadd.f32 %v3214_v19, %v11806_v46 }
 0x4e6   : > { %v3244_v1 = vpop.f32.mrf.mxu1 }
 0x4e7   : > { %v8941_v10 = vadd.f32 %v3244_v1, %v11794_v35  ;;  %v3372_v12 = vmax.f32 %v8978_v39, %v8968_v51  ;;  %v11807_v1 = vld [vmem:[#allocation31_spill] sm:$0xff]  ;;  %v11808_v35 = vld [vmem:[#allocation52_spill] sm:$0xff]  ;;  %v3357_v63 = vmax.f32 %v8995_v18, %v8983_v43 }
 0x4e8   : > { %v3246_v8 = vpop.f32.mrf.mxu1 }
 0x4e9   : > { %v8944_v4 = vadd.f32 %v3246_v8, %v11795_v26  ;;  %v8998_v8 = vadd.f32 %v3228_v34, %v11807_v1  ;;  %v9003_v26 = vadd.f32 %v3206_v2, %v11808_v35  ;;  %v11810_v34 = vld [vmem:[#allocation54_spill] sm:$0xff]  ;;  %v11822_v1 = vld [vmem:[#allocation108_spill] sm:$0xff] }
 0x4ea   : > { %v3248_v20 = vpop.f32.mrf.mxu1  ;;  %v9060_v35 = vadd.f32 %v8924_v7, %v11822_v1 }
 0x4eb   : > { %v3375_v27 = vmax.f32 %v8941_v10, %v8944_v4  ;;  %v8955_v5 = vadd.f32 %v3248_v20, %v11798_v6  ;;  %v11809_v20 = vld [vmem:[#allocation62_spill] sm:$0xff]  ;;  %v3366_v19 = vmax.f32 %v8998_v8, %v8988_v42  ;;  %v9018_v6 = vadd.f32 %v3218_v50, %v11811_v52  ;;  %v11815_v50 = vld [vmem:[#allocation11_spill] sm:$0xff] }
 0x4ec   : > { %v3250_v13 = vpop.f32.mrf.mxu1  ;;  %v9008_v59 = vadd.f32 %v3220_v45, %v11809_v20  ;;  %v9036_v21 = vadd.f32 %v8932_v48, %v11815_v50  ;;  %11823 = vst [vmem:[#allocation53_spill] sm:$0xff] %v9060_v35  ;;  %v11828_v52 = vld [vmem:[#allocation51_spill] sm:$0xff] }
 0x4ed   : > { %v8958_v14 = vadd.f32 %v3250_v13, %v11799_v36  ;;  %3376 = vmax.xlane.f32.xlu0 %v3375_v27  ;;  %v9015_v13 = vadd.f32 %v3204_v57, %v11810_v34  ;;  %v11812_v36 = vld [vmem:[#allocation56_spill] sm:$0xff] }
 0x4ee   : > { %v8960_v25 = vpop.f32.mrf.mxu1  ;;  %v9023_v15 = vadd.f32 %v3196_v55, %v11812_v36  ;;  %v3360_v57 = vmax.f32 %v9018_v6, %v9008_v59  ;;  %11816 = vst [vmem:[#allocation48_spill] sm:$0xff] %v9036_v21  ;;  %v9076_v36 = vadd.f32 %v8930_v0, %v11828_v52 }
 0x4ef   : > { %v3378_v40 = vmax.f32 %v8955_v5, %v8958_v14  ;;  %v3351_v45 = vmax.f32 %v9015_v13, %v9003_v26 }
 0x4f0   : > { %v8972_v58 = vpop.f32.mrf.mxu1  ;;  %11813 = vst [vmem:[#allocation49_spill] sm:$0xff] %v9023_v15  ;;  %v3345_v24 = vmax.f32 %v9036_v21, %v9023_v15  ;;  %11829 = vst [vmem:[#allocation55_spill] sm:$0xff] %v9076_v36  ;;  %v11844_v21 = vld [vmem:[#allocation44_spill] sm:$0xff] }
 0x4f1   : > { %3379 = vmax.xlane.f32.xlu1 %v3378_v40  ;;  %3370 = vmax.xlane.f32.xlu0 %v3369_v32  ;;  %v11814_v32 = vld [vmem:[#allocation61_spill] sm:$0xff] }
 0x4f2   : > { %v8980_v9 = vpop.f32.mrf.mxu1  ;;  %v9028_v38 = vadd.f32 %v3210_v44, %v11814_v32 }
 0x4f4   : > { %v8992_v23 = vpop.f32.mrf.mxu1  ;;  %v3354_v48 = vmax.f32 %v9040_v29, %v9028_v38 }
 0x4f5   : > { %3373 = vmax.xlane.f32.xlu1 %v3372_v12  ;;  %3364 = vmax.xlane.f32.xlu0 %v3363_v62  ;;  %v11818_v62 = vld [vmem:[#allocation101_spill] sm:$0xff]  ;;  %v11820_v12 = vld [vmem:[#allocation100_spill] sm:$0xff] }
 0x4f6   : > { %v9000_v11 = vpop.f32.mrf.mxu1  ;;  %v9046_v44 = vadd.f32 %v8926_v61, %v11818_v62  ;;  %v9052_v46 = vadd.f32 %v8936_v53, %v11820_v12  ;;  %v9094_v62 = vadd.f32 %v8922_v41, %v11834_v22 }
 0x4f8   : > { %v9012_v27 = vpop.f32.mrf.mxu1  ;;  %11819 = vst [vmem:[#allocation96_spill] sm:$0xff] %v9046_v44  ;;  %11821 = vst [vmem:[#allocation17_spill] sm:$0xff] %v9052_v46  ;;  %v3339_v34 = vmax.f32 %v9060_v35, %v9046_v44  ;;  %v11842_v35 = vld [vmem:[#allocation28_spill] sm:$0xff] }
 0x4f9   : > { %3367 = vmax.xlane.f32.xlu1 %v3366_v19  ;;  %3358 = vmax.xlane.f32.xlu0 %v3357_v63  ;;  %v11824_v63 = vld [vmem:[#allocation107_spill] sm:$0xff]  ;;  %v11826_v19 = vld [vmem:[#allocation102_spill] sm:$0xff]  ;;  %11835 = vst [vmem:[#allocation67_spill] sm:$0xff] %v9094_v62 }
 0x4fa   : > { %v9020_v2 = vpop.f32.mrf.mxu1  ;;  %v9064_v61 = vadd.f32 %v8934_v3, %v11824_v63  ;;  %v9070_v53 = vadd.f32 %v8918_v16, %v11826_v19 }
 0x4fc   : > { %v9032_v40 = vpop.f32.mrf.mxu1  ;;  %11825 = vst [vmem:[#allocation58_spill] sm:$0xff] %v9064_v61  ;;  %11827 = vst [vmem:[#allocation57_spill] sm:$0xff] %v9070_v53  ;;  %v3348_v7 = vmax.f32 %v9064_v61, %v9052_v46  ;;  %v11843_v61 = vld [vmem:[#allocation46_spill] sm:$0xff] }
 0x4fd   : > { %3361 = vmax.xlane.f32.xlu1 %v3360_v57  ;;  %3352 = vmax.xlane.f32.xlu0 %v3351_v45  ;;  %v11830_v45 = vld [vmem:[#allocation15_spill] sm:$0xff]  ;;  %v11832_v57 = vld [vmem:[#allocation10_spill] sm:$0xff] }
 0x4fe   : > { %v9042_v55 = vpop.f32.mrf.mxu1  ;;  %v9084_v32 = vadd.f32 %v8916_v60, %v11830_v45  ;;  %v9088_v16 = vadd.f32 %v8928_v54, %v11832_v57  ;;  %v11836_v60 = vld [vmem:[#allocation47_spill] sm:$0xff] }
 0x500   : > { %v9056_v56 = vpop.f32.mrf.mxu1  ;;  %11831 = vst [vmem:[#allocation63_spill] sm:$0xff] %v9084_v32  ;;  %11833 = vst [vmem:[#allocation68_spill] sm:$0xff] %v9088_v16  ;;  %v3333_v0 = vmax.f32 %v9084_v32, %v9070_v53  ;;  %v11841_v32 = vld [vmem:[#allocation113_spill] sm:$0xff] }
 0x501   : > { %3355 = vmax.xlane.f32.xlu1 %v3354_v48  ;;  %3346 = vmax.xlane.f32.xlu0 %v3345_v24  ;;  %v3342_v24 = vmax.f32 %v9088_v16, %v9076_v36  ;;  %v9100_v48 = vadd.f32 %v8920_v33, %v11836_v60 }
 0x502   : > { %v9066_v20 = vpop.f32.mrf.mxu1 }
 0x503   : > { %11837 = vst [vmem:[#allocation65_spill] sm:$0xff] %v9100_v48  ;;  %v3336_v1 = vmax.f32 %v9100_v48, %v9094_v62  ;;  %v11839_v62 = vld [vmem:[#allocation40_spill] sm:$0xff] }
 0x504   : > { %v9080_v3 = vpop.f32.mrf.mxu1 }
 0x505   : > { %3349 = vmax.xlane.f32.xlu1 %v3348_v7  ;;  %3340 = vmax.xlane.f32.xlu0 %v3339_v34 }
 0x506   : > { %v3284_v50 = vpop.f32.mrf.mxu1 }
 0x508   : > { %v3286_v12 = vpop.f32.mrf.mxu1 }
 0x509   : > { %3343 = vmax.xlane.f32.xlu1 %v3342_v24  ;;  %3334 = vmax.xlane.f32.xlu0 %v3333_v0 }
 0x50a   : > { %v3288_v54 = vpop.f32.mrf.mxu1 }
 0x50c   : > { %v3290_v63 = vpop.f32.mrf.mxu1 }
 0x50d   : > { %3337 = vmax.xlane.f32.xlu1 %v3336_v1 }
 0x50e   : > { %v3294_v19 = vpop.f32.mrf.mxu1 }
 0x510   : > { %v3296_v34 = vpop.f32.mrf.mxu1 }
 0x512   : > { %v3298_v41 = vpop.f32.mrf.mxu1 }
 0x514   : > { %v3300_v52 = vpop.f32.mrf.mxu1 }
 0x516   : > { %v3304_v7 = vpop.f32.mrf.mxu1 }
 0x518   : > { %v3306_v45 = vpop.f32.mrf.mxu1 }
 0x51a   : > { %v3308_v57 = vpop.f32.mrf.mxu1 }
 0x51c   : > { %v3310_v22 = vpop.f32.mrf.mxu1 }
 0x51e   : > { %v3314_v17 = vpop.f32.mrf.mxu1 }
 0x51f   : > { %v9116_v46 = vadd.f32 %v3314_v17, %v11842_v35  ;;  %v11847_v35 = vld [vmem:[#allocation78_spill] sm:$0xff] }
 0x520   : > { %v3316_v30 = vpop.f32.mrf.mxu1 }
 0x521   : > { %v9111_v36 = vadd.f32 %v3316_v30, %v11841_v32  ;;  %v11846_v32 = vld [vmem:[#allocation117_spill] sm:$0xff] }
 0x522   : > { %v3318_v33 = vpop.f32.mrf.mxu1 }
 0x523   : > { %v3417_v30 = vmax.f32 %v9116_v46, %v9111_v36 }
 0x524   : > { %v3320_v60 = vpop.f32.mrf.mxu1 }
 0x526   : > { %v3324_v24 = vpop.f32.mrf.mxu1 }
 0x527   : > { %v9105_v53 = vadd.f32 %v3324_v24, %v11838_v28 }
 0x528   : > { %v3326_v0 = vpop.f32.mrf.mxu1 }
 0x529   : > { %v9108_v48 = vadd.f32 %v3326_v0, %v11839_v62  ;;  %v11845_v62 = vld [vmem:[#allocation14_spill] sm:$0xff]  ;;  %v9130_v0 = vadd.f32 %v3320_v60, %v11846_v32  ;;  %v11851_v32 = vld [vmem:[#allocation92_spill] sm:$0xff] }
 0x52a   : > { %v3328_v1 = vpop.f32.mrf.mxu1  ;;  %v9125_v24 = vadd.f32 %v3306_v45, %v11845_v62  ;;  %v11850_v45 = vld [vmem:[#allocation35_spill] sm:$0xff] }
 0x52b   : > { %11840 = vst [vmem:[#allocation71_spill] sm:$0xff] %v9108_v48  ;;  %v3423_v16 = vmax.f32 %v9105_v53, %v9108_v48  ;;  %v9119_v15 = vadd.f32 %v3328_v1, %v11843_v61  ;;  %v9135_v48 = vadd.f32 %v3304_v7, %v11847_v35  ;;  %v11848_v61 = vld [vmem:[#allocation27_spill] sm:$0xff]  ;;  %v9146_v60 = vadd.f32 %v3310_v22, %v11850_v45  ;;  %v11852_v35 = vld [vmem:[#allocation97_spill] sm:$0xff] }
 0x52c   : > { %v3330_v44 = vpop.f32.mrf.mxu1  ;;  %v9138_v1 = vadd.f32 %v3318_v33, %v11848_v61  ;;  %v9151_v7 = vadd.f32 %v3294_v19, %v11851_v32  ;;  %v9154_v33 = vadd.f32 %v3308_v57, %v11852_v35  ;;  %v11854_v61 = vld [vmem:[#allocation95_spill] sm:$0xff]  ;;  %v11855_v45 = vld [vmem:[#allocation21_spill] sm:$0xff]  ;;  %v11856_v32 = vld [vmem:[#allocation88_spill] sm:$0xff] }
 0x52d   : > { %v9122_v28 = vadd.f32 %v3330_v44, %v11844_v21  ;;  %3424 = vmax.xlane.f32.xlu0 %v3423_v16  ;;  %v11849_v21 = vld [vmem:[#allocation16_spill] sm:$0xff]  ;;  %v3411_v16 = vmax.f32 %v9135_v48, %v9125_v24  ;;  %v9162_v22 = vadd.f32 %v3300_v52, %v11854_v61  ;;  %v9167_v19 = vadd.f32 %v3284_v50, %v11855_v45  ;;  %v11859_v50 = vld [vmem:[#allocation106_spill] sm:$0xff] }
 0x52e   : > { %v9141_v44 = vadd.f32 %v3296_v34, %v11849_v21  ;;  %v3420_v62 = vmax.f32 %v9138_v1, %v9130_v0  ;;  %v3414_v21 = vmax.f32 %v9154_v33, %v9146_v60  ;;  %v9170_v57 = vadd.f32 %v3298_v41, %v11856_v32  ;;  %v11858_v52 = vld [vmem:[#allocation60_spill] sm:$0xff]  ;;  %v11860_v41 = vld [vmem:[#allocation87_spill] sm:$0xff] }
 0x52f   : > { %v3426_v17 = vmax.f32 %v9119_v15, %v9122_v28  ;;  %v9179_v35 = vadd.f32 %v3290_v63, %v11858_v52  ;;  %v9185_v61 = vadd.f32 %v9042_v55, %v11859_v50  ;;  %v11862_v45 = vld [vmem:[#allocation80_spill] sm:$0xff]  ;;  %v11864_v52 = vld [vmem:[#allocation82_spill] sm:$0xff]  ;;  %v11866_v50 = vld [vmem:[#allocation19_spill] sm:$0xff] }
 0x530   : > { %v9198_v32 = vadd.f32 %v9080_v3, %v11862_v45  ;;  %v11868_v45 = vld [vmem:[#allocation109_spill] sm:$0xff] }
 0x531   : > { %3427 = vmax.xlane.f32.xlu1 %v3426_v17  ;;  %3418 = vmax.xlane.f32.xlu0 %v3417_v30  ;;  %v11853_v30 = vld [vmem:[#allocation59_spill] sm:$0xff]  ;;  %v3405_v17 = vmax.f32 %v9151_v7, %v9141_v44 }
 0x532   : > { %v9157_v34 = vadd.f32 %v3286_v12, %v11853_v30  ;;  %v3408_v30 = vmax.f32 %v9170_v57, %v9162_v22 }
 0x535   : > { %3421 = vmax.xlane.f32.xlu1 %v3420_v62  ;;  %3412 = vmax.xlane.f32.xlu0 %v3411_v16  ;;  %v11857_v16 = vld [vmem:[#allocation20_spill] sm:$0xff]  ;;  %v3399_v62 = vmax.f32 %v9167_v19, %v9157_v34 }
 0x536   : > { %v9174_v12 = vadd.f32 %v9056_v56, %v11857_v16  ;;  %v11861_v56 = vld [vmem:[#allocation24_spill] sm:$0xff]  ;;  %v11863_v16 = vld [vmem:[#allocation110_spill] sm:$0xff] }
 0x538   : > { %v3393_v63 = vmax.f32 %v9185_v61, %v9174_v12 }
 0x539   : > { %3415 = vmax.xlane.f32.xlu1 %v3414_v21  ;;  %3406 = vmax.xlane.f32.xlu0 %v3405_v17  ;;  %v9188_v21 = vadd.f32 %v3288_v54, %v11860_v41  ;;  %v9192_v17 = vadd.f32 %v9012_v27, %v11861_v56  ;;  %v9204_v54 = vadd.f32 %v9000_v11, %v11863_v16  ;;  %v11865_v27 = vld [vmem:[#allocation22_spill] sm:$0xff]  ;;  %v11867_v56 = vld [vmem:[#allocation25_spill] sm:$0xff] }
 0x53a   : > { %v9218_v41 = vadd.f32 %v9032_v40, %v11866_v50 }
 0x53b   : > { %v3402_v55 = vmax.f32 %v9188_v21, %v9179_v35  ;;  %v3387_v3 = vmax.f32 %v9204_v54, %v9192_v17 }
 0x53d   : > { %3409 = vmax.xlane.f32.xlu1 %v3408_v30  ;;  %3400 = vmax.xlane.f32.xlu0 %v3399_v62  ;;  %v9208_v62 = vadd.f32 %v9066_v20, %v11864_v52  ;;  %v9212_v30 = vadd.f32 %v8972_v58, %v11865_v27  ;;  %v9224_v20 = vadd.f32 %v8960_v25, %v11867_v56  ;;  %v11871_v52 = vld [vmem:[#allocation111_spill] sm:$0xff] }
 0x53e   : > { %v9240_v25 = vadd.f32 %v8980_v9, %v11871_v52 }
 0x53f   : > { %v3396_v11 = vmax.f32 %v9208_v62, %v9198_v32  ;;  %v3381_v58 = vmax.f32 %v9224_v20, %v9212_v30 }
 0x540   : > { %11872 = vst [vmem:[#allocation75_spill] sm:$0xff] %v9240_v25 }
 0x541   : > { %3403 = vmax.xlane.f32.xlu1 %v3402_v55  ;;  %3394 = vmax.xlane.f32.xlu0 %v3393_v63  ;;  %v9228_v63 = vadd.f32 %v9020_v2, %v11868_v45  ;;  %v11869_v55 = vld [vmem:[#allocation23_spill] sm:$0xff] }
 0x542   : > { %v9234_v40 = vadd.f32 %v8992_v23, %v11869_v55 }
 0x543   : > { %v3390_v16 = vmax.f32 %v9228_v63, %v9218_v41 }
 0x544   : > { %11870 = vst [vmem:[#allocation76_spill] sm:$0xff] %v9234_v40  ;;  %v3384_v2 = vmax.f32 %v9240_v25, %v9234_v40 }
 0x545   : > { %3397 = vmax.xlane.f32.xlu1 %v3396_v11  ;;  %3388 = vmax.xlane.f32.xlu0 %v3387_v3 }
 0x549   : > { %3391 = vmax.xlane.f32.xlu1 %v3390_v16  ;;  %3382 = vmax.xlane.f32.xlu0 %v3381_v58 }
 0x54d   : > { %3385 = vmax.xlane.f32.xlu1 %v3384_v2 }
 0x576   : > { %v3377_v27 = vpop.xlane.xlu0 %3376 }
 0x577   : > { %v3457_v3 = vsub.f32 %v8941_v10, %v3377_v27  ;;  %v3458_v50 = vsub.f32 %v8944_v4, %v3377_v27 }
 0x579   : > { %v3549_v23 = vmul.f32 1.442695, %v3457_v3  ;;  %v3551_v11 = vmul.f32 1.442695, %v3458_v50 }
 0x57a   : > { %v3380_v56 = vpop.xlane.xlu1 %3379  ;;  %v3371_v45 = vpop.xlane.xlu0 %3370 }
 0x57b   : > { %6253 = vpow2.f32 %v3549_v23  ;;  %v3459_v55 = vsub.f32 %v8955_v5, %v3380_v56  ;;  %v3460_v9 = vsub.f32 %v8958_v14, %v3380_v56  ;;  %v3453_v58 = vsub.f32 %v8952_v37, %v3371_v45 }
 0x57c   : > { %6255 = vpow2.f32 %v3551_v11  ;;  %v3454_v16 = vsub.f32 %v8947_v47, %v3371_v45 }
 0x57d   : > { %v3553_v52 = vmul.f32 1.442695, %v3459_v55  ;;  %v3555_v2 = vmul.f32 1.442695, %v3460_v9  ;;  %v3541_v40 = vmul.f32 1.442695, %v3453_v58 }
 0x57e   : > { %v3543_v10 = vmul.f32 1.442695, %v3454_v16  ;;  %v3374_v25 = vpop.xlane.xlu1 %3373  ;;  %v3365_v4 = vpop.xlane.xlu0 %3364 }
 0x57f   : > { %6257 = vpow2.f32 %v3553_v52  ;;  %v3455_v27 = vsub.f32 %v8978_v39, %v3374_v25  ;;  %v3456_v3 = vsub.f32 %v8968_v51, %v3374_v25  ;;  %v3449_v5 = vsub.f32 %v8975_v49, %v3365_v4 }
 0x580   : > { %6259 = vpow2.f32 %v3555_v2  ;;  %v3450_v14 = vsub.f32 %v8963_v31, %v3365_v4 }
 0x581   : > { %6261 = vpow2.f32 %v3541_v40  ;;  %v3545_v37 = vmul.f32 1.442695, %v3455_v27  ;;  %v3547_v50 = vmul.f32 1.442695, %v3456_v3  ;;  %v3533_v47 = vmul.f32 1.442695, %v3449_v5 }
 0x582   : > { %6263 = vpow2.f32 %v3543_v10  ;;  %v3535_v23 = vmul.f32 1.442695, %v3450_v14  ;;  %v3368_v11 = vpop.xlane.xlu1 %3367  ;;  %v3359_v56 = vpop.xlane.xlu0 %3358  ;;  %v11873_v14 = vld [vmem:[#allocation48_spill] sm:$0xff] }
 0x583   : > { %6265 = vpow2.f32 %v3545_v37  ;;  %v3451_v45 = vsub.f32 %v8998_v8, %v3368_v11  ;;  %v3452_v39 = vsub.f32 %v8988_v42, %v3368_v11  ;;  %v3445_v51 = vsub.f32 %v8995_v18, %v3359_v56 }
 0x584   : > { %6267 = vpow2.f32 %v3547_v50  ;;  %v3446_v49 = vsub.f32 %v8983_v43, %v3359_v56  ;;  %v11874_v50 = vld [vmem:[#allocation49_spill] sm:$0xff] }
 0x585   : > { %6269 = vpow2.f32 %v3533_v47  ;;  %v3537_v31 = vmul.f32 1.442695, %v3451_v45  ;;  %v3539_v40 = vmul.f32 1.442695, %v3452_v39  ;;  %v3525_v25 = vmul.f32 1.442695, %v3445_v51 }
 0x586   : > { %6271 = vpow2.f32 %v3535_v23  ;;  %v3527_v55 = vmul.f32 1.442695, %v3446_v49  ;;  %v3362_v9 = vpop.xlane.xlu1 %3361  ;;  %v3353_v58 = vpop.xlane.xlu0 %3352 }
 0x587   : > { %6273 = vpow2.f32 %v3537_v31  ;;  %v3447_v16 = vsub.f32 %v9018_v6, %v3362_v9  ;;  %v3448_v8 = vsub.f32 %v9008_v59, %v3362_v9  ;;  %v3441_v42 = vsub.f32 %v9015_v13, %v3353_v58 }
 0x588   : > { %v9261_v52 = vpop.eup %6253  ;;  %6275 = vpow2.f32 %v3539_v40  ;;  %v3442_v43 = vsub.f32 %v9003_v26, %v3353_v58  ;;  %v11875_v40 = vld [vmem:[#allocation58_spill] sm:$0xff]  ;;  %v11877_v58 = vld [vmem:[#allocation53_spill] sm:$0xff] }
 0x589   : > { %v9264_v18 = vpop.eup %6255  ;;  %6277 = vpow2.f32 %v3525_v25  ;;  %v3529_v2 = vmul.f32 1.442695, %v3447_v16  ;;  %v3531_v10 = vmul.f32 1.442695, %v3448_v8  ;;  %v3517_v4 = vmul.f32 1.442695, %v3441_v42 }
 0x58a   : > { %6279 = vpow2.f32 %v3527_v55  ;;  %v3519_v27 = vmul.f32 1.442695, %v3442_v43  ;;  %v3356_v3 = vpop.xlane.xlu1 %3355  ;;  %v3347_v5 = vpop.xlane.xlu0 %3346  ;;  %v3663_v59 = vadd.f32 %v9264_v18, %v9261_v52  ;;  %v11876_v55 = vld [vmem:[#allocation17_spill] sm:$0xff]  ;;  %v11878_v42 = vld [vmem:[#allocation96_spill] sm:$0xff] }
 0x58b   : > { %6281 = vpow2.f32 %v3529_v2  ;;  %v3443_v13 = vsub.f32 %v9040_v29, %v3356_v3  ;;  %v3444_v6 = vsub.f32 %v9028_v38, %v3356_v3  ;;  %v3437_v26 = vsub.f32 %v11873_v14, %v3347_v5 }
 0x58c   : > { %v9271_v37 = vpop.eup %6257  ;;  %6283 = vpow2.f32 %v3531_v10  ;;  %v3438_v47 = vsub.f32 %v11874_v50, %v3347_v5  ;;  %3664 = vadd.xlane.f32.xlu0 %v3663_v59  ;;  %v11879_v50 = vld [vmem:[#allocation68_spill] sm:$0xff] }
 0x58d   : > { %v9274_v23 = vpop.eup %6259  ;;  %6285 = vpow2.f32 %v3517_v4  ;;  %v3521_v11 = vmul.f32 1.442695, %v3443_v13  ;;  %v3523_v56 = vmul.f32 1.442695, %v3444_v6  ;;  %v3509_v45 = vmul.f32 1.442695, %v3437_v26 }
 0x58e   : > { %v9276_v39 = vpop.eup %6261  ;;  %6287 = vpow2.f32 %v3519_v27  ;;  %v3511_v29 = vmul.f32 1.442695, %v3438_v47  ;;  %v3350_v51 = vpop.xlane.xlu1 %3349  ;;  %v3666_v49 = vadd.f32 %v9274_v23, %v9271_v37 }
 0x58f   : > { %v3341_v38 = vpop.xlane.xlu0 %3340  ;;  %v9280_v31 = vpop.eup %6263  ;;  %6289 = vpow2.f32 %v3521_v11  ;;  %v3439_v25 = vsub.f32 %v11875_v40, %v3350_v51  ;;  %v3440_v9 = vsub.f32 %v11876_v55, %v3350_v51  ;;  %v11880_v11 = vld [vmem:[#allocation55_spill] sm:$0xff] }
 0x590   : > { %v3433_v16 = vsub.f32 %v11877_v58, %v3341_v38  ;;  %v9285_v8 = vpop.eup %6265  ;;  %6291 = vpow2.f32 %v3523_v56  ;;  %v3434_v43 = vsub.f32 %v11878_v42, %v3341_v38  ;;  %3667 = vadd.xlane.f32.xlu1 %v3666_v49  ;;  %v3657_v2 = vadd.f32 %v9280_v31, %v9276_v39 }
 0x591   : > { %v9290_v10 = vpop.eup %6267  ;;  %6293 = vpow2.f32 %v3509_v45  ;;  %v3513_v4 = vmul.f32 1.442695, %v3439_v25  ;;  %v3515_v27 = vmul.f32 1.442695, %v3440_v9  ;;  %v11881_v45 = vld [vmem:[#allocation63_spill] sm:$0xff] }
 0x592   : > { %v3501_v3 = vmul.f32 1.442695, %v3433_v16  ;;  %v9292_v5 = vpop.eup %6269  ;;  %6295 = vpow2.f32 %v3511_v29  ;;  %v3503_v59 = vmul.f32 1.442695, %v3434_v43  ;;  %3658 = vadd.xlane.f32.xlu0 %v3657_v2  ;;  %v3344_v13 = vpop.xlane.xlu1 %3343  ;;  %v3660_v14 = vadd.f32 %v9290_v10, %v9285_v8  ;;  %v11882_v29 = vld [vmem:[#allocation57_spill] sm:$0xff] }
 0x593   : > { %v3335_v6 = vpop.xlane.xlu0 %3334  ;;  %v9296_v26 = vpop.eup %6271  ;;  %6297 = vpow2.f32 %v3513_v4  ;;  %v3435_v47 = vsub.f32 %v11879_v50, %v3344_v13  ;;  %v3436_v56 = vsub.f32 %v11880_v11, %v3344_v13 }
 0x594   : > { %v3429_v51 = vsub.f32 %v11881_v45, %v3335_v6  ;;  %v9301_v38 = vpop.eup %6273  ;;  %6299 = vpow2.f32 %v3515_v27  ;;  %v3430_v49 = vsub.f32 %v11882_v29, %v3335_v6  ;;  %3661 = vadd.xlane.f32.xlu1 %v3660_v14  ;;  %v3651_v40 = vadd.f32 %v9296_v26, %v9292_v5  ;;  %v11883_v27 = vld [vmem:[#allocation65_spill] sm:$0xff]  ;;  %v11884_v6 = vld [vmem:[#allocation67_spill] sm:$0xff] }
 0x595   : > { %v9306_v25 = vpop.eup %6275  ;;  %6301 = vpow2.f32 %v3501_v3  ;;  %v3505_v55 = vmul.f32 1.442695, %v3435_v47  ;;  %v3507_v9 = vmul.f32 1.442695, %v3436_v56 }
 0x596   : > { %v3493_v58 = vmul.f32 1.442695, %v3429_v51  ;;  %v9308_v16 = vpop.eup %6277  ;;  %6303 = vpow2.f32 %v3503_v59  ;;  %v3495_v42 = vmul.f32 1.442695, %v3430_v49  ;;  %3652 = vadd.xlane.f32.xlu0 %v3651_v40  ;;  %v3338_v43 = vpop.xlane.xlu1 %3337  ;;  %v3654_v2 = vadd.f32 %v9306_v25, %v9301_v38 }
 0x597   : > { %v9312_v4 = vpop.eup %6279  ;;  %6305 = vpow2.f32 %v3505_v55  ;;  %v3431_v13 = vsub.f32 %v11883_v27, %v3338_v43  ;;  %v3432_v14 = vsub.f32 %v11884_v6, %v3338_v43 }
 0x598   : > { %v9316_v3 = vpop.eup %6281  ;;  %6307 = vpow2.f32 %v3507_v9  ;;  %3655 = vadd.xlane.f32.xlu1 %v3654_v2  ;;  %v3645_v59 = vadd.f32 %v9312_v4, %v9308_v16 }
 0x599   : > { %v9320_v50 = vpop.eup %6283  ;;  %6309 = vpow2.f32 %v3493_v58  ;;  %v3497_v47 = vmul.f32 1.442695, %v3431_v13  ;;  %v3499_v11 = vmul.f32 1.442695, %v3432_v14 }
 0x59a   : > { %v9322_v56 = vpop.eup %6285  ;;  %6311 = vpow2.f32 %v3495_v42  ;;  %3646 = vadd.xlane.f32.xlu0 %v3645_v59  ;;  %v3648_v45 = vadd.f32 %v9320_v50, %v9316_v3 }
 0x59b   : > { %v9326_v51 = vpop.eup %6287  ;;  %6313 = vpow2.f32 %v3497_v47 }
 0x59c   : > { %v9328_v29 = vpop.eup %6289  ;;  %6315 = vpow2.f32 %v3499_v11  ;;  %3649 = vadd.xlane.f32.xlu1 %v3648_v45  ;;  %v3639_v49 = vadd.f32 %v9326_v51, %v9322_v56 }
 0x59d   : > { %11885 = vst [vmem:[#allocation73_spill] sm:$0xff] %v9328_v29  ;;  %v9332_v40 = vpop.eup %6291 }
 0x59e   : > { %v9334_v55 = vpop.eup %6293  ;;  %3640 = vadd.xlane.f32.xlu0 %v3639_v49  ;;  %v3642_v9 = vadd.f32 %v9332_v40, %v9328_v29 }
 0x59f   : > { %11886 = vst [vmem:[#allocation81_spill] sm:$0xff] %v9334_v55  ;;  %v9338_v58 = vpop.eup %6295 }
 0x5a0   : > { %11887 = vst [vmem:[#allocation86_spill] sm:$0xff] %v9338_v58  ;;  %v9340_v42 = vpop.eup %6297  ;;  %3643 = vadd.xlane.f32.xlu1 %v3642_v9  ;;  %v3633_v43 = vadd.f32 %v9338_v58, %v9334_v55 }
 0x5a1   : > { %11888 = vst [vmem:[#allocation85_spill] sm:$0xff] %v9340_v42  ;;  %v9344_v2 = vpop.eup %6299 }
 0x5a2   : > { %11889 = vst [vmem:[#allocation83_spill] sm:$0xff] %v9344_v2  ;;  %v9346_v27 = vpop.eup %6301  ;;  %3634 = vadd.xlane.f32.xlu0 %v3633_v43  ;;  %v3636_v13 = vadd.f32 %v9344_v2, %v9340_v42  ;;  %v11898_v42 = vld [vmem:[#allocation71_spill] sm:$0xff] }
 0x5a3   : > { %11890 = vst [vmem:[#allocation89_spill] sm:$0xff] %v9346_v27  ;;  %v9350_v6 = vpop.eup %6303 }
 0x5a4   : > { %11891 = vst [vmem:[#allocation94_spill] sm:$0xff] %v9350_v6  ;;  %v9352_v14 = vpop.eup %6305  ;;  %3637 = vadd.xlane.f32.xlu1 %v3636_v13  ;;  %v3627_v59 = vadd.f32 %v9350_v6, %v9346_v27 }
 0x5a5   : > { %11892 = vst [vmem:[#allocation93_spill] sm:$0xff] %v9352_v14  ;;  %v9356_v47 = vpop.eup %6307 }
 0x5a6   : > { %11893 = vst [vmem:[#allocation91_spill] sm:$0xff] %v9356_v47  ;;  %v9358_v11 = vpop.eup %6309  ;;  %3628 = vadd.xlane.f32.xlu0 %v3627_v59  ;;  %v3630_v45 = vadd.f32 %v9356_v47, %v9352_v14 }
 0x5a7   : > { %11894 = vst [vmem:[#allocation90_spill] sm:$0xff] %v9358_v11  ;;  %v9362_v49 = vpop.eup %6311 }
 0x5a8   : > { %11895 = vst [vmem:[#allocation77_spill] sm:$0xff] %v9362_v49  ;;  %v9364_v9 = vpop.eup %6313  ;;  %3631 = vadd.xlane.f32.xlu1 %v3630_v45  ;;  %v3621_v43 = vadd.f32 %v9362_v49, %v9358_v11 }
 0x5a9   : > { %11896 = vst [vmem:[#allocation34_spill] sm:$0xff] %v9364_v9  ;;  %v9368_v13 = vpop.eup %6315 }
 0x5aa   : > { %11897 = vst [vmem:[#allocation99_spill] sm:$0xff] %v9368_v13  ;;  %3622 = vadd.xlane.f32.xlu0 %v3621_v43  ;;  %v3624_v27 = vadd.f32 %v9368_v13, %v9364_v9 }
 0x5ac   : > { %3625 = vadd.xlane.f32.xlu1 %v3624_v27 }
 0x5b6   : > { %v3425_v6 = vpop.xlane.xlu0 %3424 }
 0x5b7   : > { %v3489_v59 = vsub.f32 %v9105_v53, %v3425_v6  ;;  %v3490_v14 = vsub.f32 %v11898_v42, %v3425_v6 }
 0x5b9   : > { %v3613_v47 = vmul.f32 1.442695, %v3489_v59  ;;  %v3615_v55 = vmul.f32 1.442695, %v3490_v14 }
 0x5ba   : > { %v3428_v2 = vpop.xlane.xlu1 %3427  ;;  %v3419_v58 = vpop.xlane.xlu0 %3418 }
 0x5bb   : > { %6317 = vpow2.f32 %v3613_v47  ;;  %v3491_v45 = vsub.f32 %v9119_v15, %v3428_v2  ;;  %v3492_v11 = vsub.f32 %v9122_v28, %v3428_v2  ;;  %v3485_v43 = vsub.f32 %v9116_v46, %v3419_v58 }
 0x5bc   : > { %6319 = vpow2.f32 %v3615_v55  ;;  %v3486_v9 = vsub.f32 %v9111_v36, %v3419_v58 }
 0x5bd   : > { %v3617_v27 = vmul.f32 1.442695, %v3491_v45  ;;  %v3619_v13 = vmul.f32 1.442695, %v3492_v11  ;;  %v3605_v49 = vmul.f32 1.442695, %v3485_v43 }
 0x5be   : > { %v3607_v53 = vmul.f32 1.442695, %v3486_v9  ;;  %v3422_v29 = vpop.xlane.xlu1 %3421  ;;  %v3413_v42 = vpop.xlane.xlu0 %3412 }
 0x5bf   : > { %6321 = vpow2.f32 %v3617_v27  ;;  %v3487_v6 = vsub.f32 %v9138_v1, %v3422_v29  ;;  %v3488_v14 = vsub.f32 %v9130_v0, %v3422_v29  ;;  %v3481_v15 = vsub.f32 %v9135_v48, %v3413_v42 }
 0x5c0   : > { %6323 = vpow2.f32 %v3619_v13  ;;  %v3482_v28 = vsub.f32 %v9125_v24, %v3413_v42 }
 0x5c1   : > { %6325 = vpow2.f32 %v3605_v49  ;;  %v3609_v46 = vmul.f32 1.442695, %v3487_v6  ;;  %v3611_v55 = vmul.f32 1.442695, %v3488_v14  ;;  %v3597_v36 = vmul.f32 1.442695, %v3481_v15 }
 0x5c2   : > { %6327 = vpow2.f32 %v3607_v53  ;;  %v3599_v58 = vmul.f32 1.442695, %v3482_v28  ;;  %v3416_v2 = vpop.xlane.xlu1 %3415  ;;  %v3407_v47 = vpop.xlane.xlu0 %3406 }
 0x5c3   : > { %6329 = vpow2.f32 %v3609_v46  ;;  %v3483_v11 = vsub.f32 %v9154_v33, %v3416_v2  ;;  %v3484_v1 = vsub.f32 %v9146_v60, %v3416_v2  ;;  %v3477_v0 = vsub.f32 %v9151_v7, %v3407_v47 }
 0x5c4   : > { %6331 = vpow2.f32 %v3611_v55  ;;  %v3478_v48 = vsub.f32 %v9141_v44, %v3407_v47 }
 0x5c5   : > { %6333 = vpow2.f32 %v3597_v36  ;;  %v3601_v24 = vmul.f32 1.442695, %v3483_v11  ;;  %v3603_v29 = vmul.f32 1.442695, %v3484_v1  ;;  %v3589_v49 = vmul.f32 1.442695, %v3477_v0 }
 0x5c6   : > { %6335 = vpow2.f32 %v3599_v58  ;;  %v3591_v9 = vmul.f32 1.442695, %v3478_v48  ;;  %v3410_v13 = vpop.xlane.xlu1 %3409  ;;  %v3401_v59 = vpop.xlane.xlu0 %3400 }
 0x5c7   : > { %6337 = vpow2.f32 %v3601_v24  ;;  %v3479_v45 = vsub.f32 %v9170_v57, %v3410_v13  ;;  %v3480_v33 = vsub.f32 %v9162_v22, %v3410_v13  ;;  %v3473_v60 = vsub.f32 %v9167_v19, %v3401_v59 }
 0x5c8   : > { %v9389_v43 = vpop.eup %6317  ;;  %6339 = vpow2.f32 %v3603_v29  ;;  %v3474_v44 = vsub.f32 %v9157_v34, %v3401_v59 }
 0x5c9   : > { %v9392_v7 = vpop.eup %6319  ;;  %6341 = vpow2.f32 %v3589_v49  ;;  %v3593_v27 = vmul.f32 1.442695, %v3479_v45  ;;  %v3595_v53 = vmul.f32 1.442695, %v3480_v33  ;;  %v3581_v42 = vmul.f32 1.442695, %v3473_v60 }
 0x5ca   : > { %6343 = vpow2.f32 %v3591_v9  ;;  %v3583_v6 = vmul.f32 1.442695, %v3474_v44  ;;  %v3404_v14 = vpop.xlane.xlu1 %3403  ;;  %v3395_v15 = vpop.xlane.xlu0 %3394  ;;  %v3711_v22 = vadd.f32 %v9392_v7, %v9389_v43 }
 0x5cb   : > { %6345 = vpow2.f32 %v3593_v27  ;;  %v3475_v19 = vsub.f32 %v9188_v21, %v3404_v14  ;;  %v3476_v57 = vsub.f32 %v9179_v35, %v3404_v14  ;;  %v3469_v34 = vsub.f32 %v9185_v61, %v3395_v15 }
 0x5cc   : > { %v9399_v28 = vpop.eup %6321  ;;  %6347 = vpow2.f32 %v3595_v53  ;;  %v3470_v46 = vsub.f32 %v9174_v12, %v3395_v15  ;;  %3712 = vadd.xlane.f32.xlu0 %v3711_v22 }
 0x5cd   : > { %v9402_v55 = vpop.eup %6323  ;;  %6349 = vpow2.f32 %v3581_v42  ;;  %v3585_v36 = vmul.f32 1.442695, %v3475_v19  ;;  %v3587_v58 = vmul.f32 1.442695, %v3476_v57  ;;  %v3573_v2 = vmul.f32 1.442695, %v3469_v34 }
 0x5ce   : > { %v9404_v47 = vpop.eup %6325  ;;  %6351 = vpow2.f32 %v3583_v6  ;;  %v3575_v21 = vmul.f32 1.442695, %v3470_v46  ;;  %v3398_v11 = vpop.xlane.xlu1 %3397  ;;  %v3714_v61 = vadd.f32 %v9402_v55, %v9399_v28  ;;  %v11899_v46 = vld [vmem:[#allocation75_spill] sm:$0xff] }
 0x5cf   : > { %v3389_v35 = vpop.xlane.xlu0 %3388  ;;  %v9408_v1 = vpop.eup %6327  ;;  %6353 = vpow2.f32 %v3585_v36  ;;  %v3471_v12 = vsub.f32 %v9208_v62, %v3398_v11  ;;  %v3472_v0 = vsub.f32 %v9198_v32, %v3398_v11 }
 0x5d0   : > { %v3465_v48 = vsub.f32 %v9204_v54, %v3389_v35  ;;  %v9413_v24 = vpop.eup %6329  ;;  %6355 = vpow2.f32 %v3587_v58  ;;  %v3466_v29 = vsub.f32 %v9192_v17, %v3389_v35  ;;  %3715 = vadd.xlane.f32.xlu1 %v3714_v61  ;;  %v3705_v49 = vadd.f32 %v9408_v1, %v9404_v47  ;;  %v11900_v58 = vld [vmem:[#allocation76_spill] sm:$0xff] }
 0x5d1   : > { %v9418_v9 = vpop.eup %6331  ;;  %6357 = vpow2.f32 %v3573_v2  ;;  %v3577_v13 = vmul.f32 1.442695, %v3471_v12  ;;  %v3579_v59 = vmul.f32 1.442695, %v3472_v0 }
 0x5d2   : > { %v3565_v45 = vmul.f32 1.442695, %v3465_v48  ;;  %v9420_v62 = vpop.eup %6333  ;;  %6359 = vpow2.f32 %v3575_v21  ;;  %v3567_v32 = vmul.f32 1.442695, %v3466_v29  ;;  %3706 = vadd.xlane.f32.xlu0 %v3705_v49  ;;  %v3392_v54 = vpop.xlane.xlu1 %3391  ;;  %v3708_v17 = vadd.f32 %v9418_v9, %v9413_v24 }
 0x5d3   : > { %v3383_v33 = vpop.xlane.xlu0 %3382  ;;  %v9424_v60 = vpop.eup %6335  ;;  %6361 = vpow2.f32 %v3577_v13  ;;  %v3467_v44 = vsub.f32 %v9228_v63, %v3392_v54  ;;  %v3468_v27 = vsub.f32 %v9218_v41, %v3392_v54 }
 0x5d4   : > { %v3461_v53 = vsub.f32 %v9224_v20, %v3383_v33  ;;  %v9429_v42 = vpop.eup %6337  ;;  %6363 = vpow2.f32 %v3579_v59  ;;  %v3462_v6 = vsub.f32 %v9212_v30, %v3383_v33  ;;  %3709 = vadd.xlane.f32.xlu1 %v3708_v17  ;;  %v3699_v14 = vadd.f32 %v9424_v60, %v9420_v62 }
 0x5d5   : > { %v9434_v15 = vpop.eup %6339  ;;  %6365 = vpow2.f32 %v3565_v45  ;;  %v3569_v22 = vmul.f32 1.442695, %v3467_v44  ;;  %v3571_v19 = vmul.f32 1.442695, %v3468_v27 }
 0x5d6   : > { %v3557_v57 = vmul.f32 1.442695, %v3461_v53  ;;  %v9436_v63 = vpop.eup %6341  ;;  %6367 = vpow2.f32 %v3567_v32  ;;  %v3559_v41 = vmul.f32 1.442695, %v3462_v6  ;;  %3700 = vadd.xlane.f32.xlu0 %v3699_v14  ;;  %v3386_v20 = vpop.xlane.xlu1 %3385  ;;  %v3702_v34 = vadd.f32 %v9434_v15, %v9429_v42 }
 0x5d7   : > { %v9440_v30 = vpop.eup %6343  ;;  %6369 = vpow2.f32 %v3569_v22  ;;  %v3463_v36 = vsub.f32 %v11899_v46, %v3386_v20  ;;  %v3464_v2 = vsub.f32 %v11900_v58, %v3386_v20 }
 0x5d8   : > { %v9444_v21 = vpop.eup %6345  ;;  %6371 = vpow2.f32 %v3571_v19  ;;  %3703 = vadd.xlane.f32.xlu1 %v3702_v34  ;;  %v3693_v11 = vadd.f32 %v9440_v30, %v9436_v63 }
 0x5d9   : > { %v9448_v35 = vpop.eup %6347  ;;  %6373 = vpow2.f32 %v3557_v57  ;;  %v3561_v61 = vmul.f32 1.442695, %v3463_v36  ;;  %v3563_v12 = vmul.f32 1.442695, %v3464_v2  ;;  %v3045_v2 = vld [vmem:[%s6905_s22 + $0x48] sm:$0xf0] }
 0x5da   : > { %v9450_v0 = vpop.eup %6349  ;;  %6375 = vpow2.f32 %v3559_v41  ;;  %3694 = vadd.xlane.f32.xlu0 %v3693_v11  ;;  %v3696_v48 = vadd.f32 %v9448_v35, %v9444_v21  ;;  %v3047_v11 = vpack.c.bf16 %v3045_v2, %v3045_v2 }
 0x5db   : > { %v9454_v29 = vpop.eup %6351  ;;  %6377 = vpow2.f32 %v3561_v61 }
 0x5dc   : > { %v9456_v49 = vpop.eup %6353  ;;  %6379 = vpow2.f32 %v3563_v12  ;;  %3697 = vadd.xlane.f32.xlu1 %v3696_v48  ;;  %v3687_v13 = vadd.f32 %v9454_v29, %v9450_v0  ;;  %v3848_v61 = vrot.slane %v3047_v11, 2  ;;  %v3900_v12 = vld [vmem:[%s6905_s22 + $0x30] sm:$0xf]  ;;  %v3901_v48 = vld [vmem:[%s6905_s22 + $0x38] sm:$0xf] }
 0x5dd   : > { %v9460_v59 = vpop.eup %6355 }
 0x5de   : > { %v9462_v45 = vpop.eup %6357  ;;  %3688 = vadd.xlane.f32.xlu0 %v3687_v13  ;;  %v3690_v32 = vadd.f32 %v9460_v59, %v9456_v49  ;;  %3883 = vmatprep.mubr.bf16.mxu1 %v3848_v61  ;;  %v3902_v13 = vpack.c.bf16 %v3900_v12, %v3900_v12 }
 0x5df   : > { %v9466_v54 = vpop.eup %6359 }
 0x5e0   : > { %v9468_v33 = vpop.eup %6361  ;;  %3691 = vadd.xlane.f32.xlu1 %v3690_v32  ;;  %v3681_v17 = vadd.f32 %v9466_v54, %v9462_v45 }
 0x5e1   : > { %v9472_v44 = vpop.eup %6363 }
 0x5e2   : > { %v9474_v27 = vpop.eup %6365  ;;  %3682 = vadd.xlane.f32.xlu0 %v3681_v17  ;;  %v3684_v53 = vadd.f32 %v9472_v44, %v9468_v33  ;;  %v3903_v17 = vpack.c.bf16 %v3901_v48, %v3901_v48 }
 0x5e3   : > { %v9478_v6 = vpop.eup %6367 }
 0x5e4   : > { %v9480_v14 = vpop.eup %6369  ;;  %3685 = vadd.xlane.f32.xlu1 %v3684_v53  ;;  %v3675_v22 = vadd.f32 %v9478_v6, %v9474_v27 }
 0x5e5   : > { %v9484_v19 = vpop.eup %6371 }
 0x5e6   : > { %v9486_v57 = vpop.eup %6373  ;;  %3676 = vadd.xlane.f32.xlu0 %v3675_v22  ;;  %v3678_v41 = vadd.f32 %v9484_v19, %v9480_v14 }
 0x5e7   : > { %v9490_v20 = vpop.eup %6375 }
 0x5e8   : > { %v9492_v34 = vpop.eup %6377  ;;  %3679 = vadd.xlane.f32.xlu1 %v3678_v41  ;;  %v3669_v46 = vadd.f32 %v9490_v20, %v9486_v57 }
 0x5e9   : > { %11901 = vst [vmem:[#allocation32_spill] sm:$0xff] %v9492_v34  ;;  %v9496_v36 = vpop.eup %6379 }
 0x5ea   : > { %3670 = vadd.xlane.f32.xlu0 %v3669_v46  ;;  %v3672_v58 = vadd.f32 %v9496_v36, %v9492_v34 }
 0x5ec   : > { %3673 = vadd.xlane.f32.xlu1 %v3672_v58 }
 0x615   : > { %v3665_v32 = vpop.xlane.xlu0 %3664 }
 0x616   : > { %6381 = vrcp.f32 %v3665_v32 }
 0x617   : > { %3908 = vxpose.xlu0.c.b16.start.end [1/1] (short) %v3902_v13, 128 }
 0x619   : > { %v3668_v53 = vpop.xlane.xlu1 %3667  ;;  %3924 = vxpose.xlu1.c.b16.start.end [1/1] (short) %v3903_v17, 128 }
 0x61a   : > { %6383 = vrcp.f32 %v3668_v53 }
 0x61b   : > { %v3659_v22 = vpop.xlane.xlu0 %3658 }
 0x61c   : > { %6385 = vrcp.f32 %v3659_v22 }
 0x61d   : > { %v3662_v41 = vpop.xlane.xlu1 %3661 }
 0x61e   : > { %6387 = vrcp.f32 %v3662_v41 }
 0x61f   : > { %v3653_v46 = vpop.xlane.xlu0 %3652 }
 0x620   : > { %6389 = vrcp.f32 %v3653_v46 }
 0x621   : > { %v3656_v58 = vpop.xlane.xlu1 %3655 }
 0x622   : > { %6391 = vrcp.f32 %v3656_v58 }
 0x623   : > { %v3647_v2 = vpop.xlane.xlu0 %3646  ;;  %v6382_v11 = vpop.eup %6381 }
 0x624   : > { %6393 = vrcp.f32 %v3647_v2  ;;  %v3778_v13 = vmul.f32 %v6382_v11, %v9264_v18  ;;  %v3777_v17 = vmul.f32 %v6382_v11, %v9261_v52 }
 0x625   : > { %v3650_v61 = vpop.xlane.xlu1 %3649 }
 0x626   : > { %6395 = vrcp.f32 %v3650_v61 }
 0x627   : > { %v6384_v12 = vpop.eup %6383  ;;  %v3641_v48 = vpop.xlane.xlu0 %3640 }
 0x628   : > { %6397 = vrcp.f32 %v3641_v48  ;;  %v3780_v32 = vmul.f32 %v6384_v12, %v9274_v23  ;;  %v3779_v53 = vmul.f32 %v6384_v12, %v9271_v37 }
 0x629   : > { %v6386_v22 = vpop.eup %6385  ;;  %v3644_v41 = vpop.xlane.xlu1 %3643 }
 0x62a   : > { %6399 = vrcp.f32 %v3644_v41  ;;  %v3828_v46 = vpack.c.bf16 %v3780_v32, %v3778_v13  ;;  %v3827_v58 = vpack.c.bf16 %v3779_v53, %v3777_v17  ;;  %v3774_v61 = vmul.f32 %v6386_v22, %v9280_v31 }
 0x62b   : > { %v6388_v34 = vpop.eup %6387  ;;  %v3635_v2 = vpop.xlane.xlu0 %3634  ;;  %v3773_v48 = vmul.f32 %v6386_v22, %v9276_v39 }
 0x62c   : > { %6401 = vrcp.f32 %v3635_v2  ;;  %3851 = vmatprep.subr.bf16.mxu1 %v3828_v46  ;;  %v3776_v18 = vmul.f32 %v6388_v34, %v9290_v10  ;;  %v3775_v23 = vmul.f32 %v6388_v34, %v9285_v8 }
 0x62d   : > { %v6390_v52 = vpop.eup %6389  ;;  %v3638_v11 = vpop.xlane.xlu1 %3637  ;;  %3852 = vmatpush1.bf16.msra.mxu1 %v3827_v58 }
 0x62e   : > { %6403 = vrcp.f32 %v3638_v11  ;;  %v3826_v37 = vpack.c.bf16 %v3776_v18, %v3774_v61  ;;  %v3825_v12 = vpack.c.bf16 %v3775_v23, %v3773_v48  ;;  %v3770_v17 = vmul.f32 %v6390_v52, %v9296_v26  ;;  %v11902_v11 = vld [vmem:[#allocation73_spill] sm:$0xff] }
 0x62f   : > { %v6392_v13 = vpop.eup %6391  ;;  %v3629_v32 = vpop.xlane.xlu0 %3628  ;;  %v3769_v10 = vmul.f32 %v6390_v52, %v9292_v5 }
 0x630   : > { %6405 = vrcp.f32 %v3629_v32  ;;  %3853 = vmatprep.subr.bf16.mxu1 %v3826_v37  ;;  %v3772_v31 = vmul.f32 %v6392_v13, %v9306_v25  ;;  %v3771_v39 = vmul.f32 %v6392_v13, %v9301_v38  ;;  %v11903_v13 = vld [vmem:[#allocation86_spill] sm:$0xff] }
 0x631   : > { %v6394_v53 = vpop.eup %6393  ;;  %v3632_v8 = vpop.xlane.xlu1 %3631  ;;  %3854 = vmatpush1.bf16.msra.mxu1 %v3825_v12 }
 0x632   : > { %6407 = vrcp.f32 %v3632_v8  ;;  %v3824_v34 = vpack.c.bf16 %v3772_v31, %v3770_v17  ;;  %v3823_v22 = vpack.c.bf16 %v3771_v39, %v3769_v10  ;;  %v3766_v58 = vmul.f32 %v6394_v53, %v9312_v4  ;;  %v11904_v17 = vld [vmem:[#allocation83_spill] sm:$0xff]  ;;  %v11905_v10 = vld [vmem:[#allocation81_spill] sm:$0xff] }
 0x633   : > { %v6396_v41 = vpop.eup %6395  ;;  %v3623_v46 = vpop.xlane.xlu0 %3622  ;;  %v3765_v25 = vmul.f32 %v6394_v53, %v9308_v16  ;;  %v11906_v53 = vld [vmem:[#allocation85_spill] sm:$0xff] }
 0x634   : > { %6409 = vrcp.f32 %v3623_v46  ;;  %3855 = vmatprep.subr.bf16.mxu1 %v3824_v34  ;;  %v3768_v26 = vmul.f32 %v6396_v41, %v9320_v50  ;;  %v3767_v5 = vmul.f32 %v6396_v41, %v9316_v3  ;;  %v11908_v46 = vld [vmem:[#allocation91_spill] sm:$0xff] }
 0x635   : > { %v6398_v2 = vpop.eup %6397  ;;  %v3626_v38 = vpop.xlane.xlu1 %3625  ;;  %3856 = vmatpush1.bf16.msra.mxu1 %v3823_v22  ;;  %v11907_v22 = vld [vmem:[#allocation94_spill] sm:$0xff] }
 0x636   : > { %6411 = vrcp.f32 %v3626_v38  ;;  %v3822_v61 = vpack.c.bf16 %v3768_v26, %v3766_v58  ;;  %v3821_v18 = vpack.c.bf16 %v3767_v5, %v3765_v25  ;;  %v3762_v23 = vmul.f32 %v6398_v2, %v9326_v51  ;;  %v11909_v26 = vld [vmem:[#allocation89_spill] sm:$0xff] }
 0x637   : > { %v6400_v48 = vpop.eup %6399  ;;  %v3761_v52 = vmul.f32 %v6398_v2, %v9322_v56  ;;  %v11910_v5 = vld [vmem:[#allocation93_spill] sm:$0xff] }
 0x638   : > { %3857 = vmatprep.subr.bf16.mxu1 %v3822_v61  ;;  %v3764_v4 = vmul.f32 %v6400_v48, %v9332_v40  ;;  %v3763_v50 = vmul.f32 %v6400_v48, %v11902_v11 }
 0x639   : > { %v6402_v37 = vpop.eup %6401  ;;  %3858 = vmatpush1.bf16.msra.mxu1 %v3821_v18 }
 0x63a   : > { %v3820_v16 = vpack.c.bf16 %v3764_v4, %v3762_v23  ;;  %v3819_v3 = vpack.c.bf16 %v3763_v50, %v3761_v52  ;;  %v3758_v32 = vmul.f32 %v6402_v37, %v11903_v13  ;;  %v3757_v39 = vmul.f32 %v6402_v37, %v11905_v10  ;;  %v11911_v23 = vld [vmem:[#allocation77_spill] sm:$0xff]  ;;  %v11912_v52 = vld [vmem:[#allocation99_spill] sm:$0xff]  ;;  %v11913_v50 = vld [vmem:[#allocation90_spill] sm:$0xff] }
 0x63b   : > { %v6404_v12 = vpop.eup %6403 }
 0x63c   : > { %3859 = vmatprep.subr.bf16.mxu1 %v3820_v16  ;;  %v3760_v31 = vmul.f32 %v6404_v12, %v11904_v17  ;;  %v3759_v51 = vmul.f32 %v6404_v12, %v11906_v53  ;;  %v11914_v16 = vld [vmem:[#allocation34_spill] sm:$0xff] }
 0x63d   : > { %v6406_v8 = vpop.eup %6405  ;;  %3860 = vmatpush1.bf16.msra.mxu1 %v3819_v3 }
 0x63e   : > { %v3818_v40 = vpack.c.bf16 %v3760_v31, %v3758_v32  ;;  %v3817_v56 = vpack.c.bf16 %v3759_v51, %v3757_v39  ;;  %v3754_v41 = vmul.f32 %v6406_v8, %v11907_v22  ;;  %v3753_v25 = vmul.f32 %v6406_v8, %v11909_v26 }
 0x63f   : > { %v6408_v34 = vpop.eup %6407 }
 0x640   : > { %3861 = vmatprep.subr.bf16.mxu1 %v3818_v40  ;;  %v3756_v58 = vmul.f32 %v6408_v34, %v11908_v46  ;;  %v3755_v2 = vmul.f32 %v6408_v34, %v11910_v5 }
 0x641   : > { %v6410_v38 = vpop.eup %6409  ;;  %3862 = vmatpush1.bf16.msra.mxu1 %v3817_v56 }
 0x642   : > { %v3816_v61 = vpack.c.bf16 %v3756_v58, %v3754_v41  ;;  %v3815_v18 = vpack.c.bf16 %v3755_v2, %v3753_v25  ;;  %v3750_v4 = vmul.f32 %v6410_v38, %v11911_v23  ;;  %v3749_v37 = vmul.f32 %v6410_v38, %v11913_v50 }
 0x643   : > { %v6412_v48 = vpop.eup %6411 }
 0x644   : > { %3863 = vmatprep.subr.bf16.mxu1 %v3816_v61  ;;  %v3752_v11 = vmul.f32 %v6412_v48, %v11912_v52  ;;  %v3751_v3 = vmul.f32 %v6412_v48, %v11914_v16 }
 0x645   : > { %3864 = vmatpush1.bf16.msra.mxu1 %v3815_v18 }
 0x646   : > { %v3814_v12 = vpack.c.bf16 %v3752_v11, %v3750_v4  ;;  %v3813_v13 = vpack.c.bf16 %v3751_v3, %v3749_v37 }
 0x648   : > { %3865 = vmatprep.subr.bf16.mxu1 %v3814_v12 }
 0x649   : > { %3866 = vmatpush1.bf16.msra.mxu1 %v3813_v13 }
 0x655   : > { %v3713_v32 = vpop.xlane.xlu0 %3712 }
 0x656   : > { %6413 = vrcp.f32 %v3713_v32 }
 0x659   : > { %v3716_v17 = vpop.xlane.xlu1 %3715 }
 0x65a   : > { %6415 = vrcp.f32 %v3716_v17 }
 0x65b   : > { %v3707_v31 = vpop.xlane.xlu0 %3706 }
 0x65c   : > { %6417 = vrcp.f32 %v3707_v31 }
 0x65d   : > { %v3710_v10 = vpop.xlane.xlu1 %3709 }
 0x65e   : > { %6419 = vrcp.f32 %v3710_v10 }
 0x65f   : > { %v3701_v39 = vpop.xlane.xlu0 %3700 }
 0x660   : > { %6421 = vrcp.f32 %v3701_v39 }
 0x661   : > { %v3704_v53 = vpop.xlane.xlu1 %3703 }
 0x662   : > { %6423 = vrcp.f32 %v3704_v53 }
 0x663   : > { %v3695_v51 = vpop.xlane.xlu0 %3694  ;;  %v6414_v8 = vpop.eup %6413 }
 0x664   : > { %6425 = vrcp.f32 %v3695_v51  ;;  %v3810_v22 = vmul.f32 %v6414_v8, %v9392_v7  ;;  %v3809_v46 = vmul.f32 %v6414_v8, %v9389_v43 }
 0x665   : > { %v3698_v40 = vpop.xlane.xlu1 %3697 }
 0x666   : > { %6427 = vrcp.f32 %v3698_v40 }
 0x667   : > { %v6416_v56 = vpop.eup %6415  ;;  %v3689_v34 = vpop.xlane.xlu0 %3688 }
 0x668   : > { %6429 = vrcp.f32 %v3689_v34  ;;  %v3812_v41 = vmul.f32 %v6416_v56, %v9402_v55  ;;  %v3811_v58 = vmul.f32 %v6416_v56, %v9399_v28 }
 0x669   : > { %v6418_v26 = vpop.eup %6417  ;;  %v3692_v25 = vpop.xlane.xlu1 %3691 }
 0x66a   : > { %6431 = vrcp.f32 %v3692_v25  ;;  %v3844_v5 = vpack.c.bf16 %v3812_v41, %v3810_v22  ;;  %v3843_v2 = vpack.c.bf16 %v3811_v58, %v3809_v46  ;;  %v3806_v18 = vmul.f32 %v6418_v26, %v9408_v1  ;;  %v3044_v25 = vld [vmem:[%s6905_s22 + $0x40] sm:$0xf0] }
 0x66b   : > { %v6420_v38 = vpop.eup %6419  ;;  %v3683_v61 = vpop.xlane.xlu0 %3682  ;;  %v3805_v48 = vmul.f32 %v6418_v26, %v9404_v47 }
 0x66c   : > { %6433 = vrcp.f32 %v3683_v61  ;;  %3867 = vmatprep.subr.bf16.mxu1 %v3844_v5  ;;  %v3808_v7 = vmul.f32 %v6420_v38, %v9418_v9  ;;  %v3807_v55 = vmul.f32 %v6420_v38, %v9413_v24 }
 0x66d   : > { %v6422_v43 = vpop.eup %6421  ;;  %v3686_v23 = vpop.xlane.xlu1 %3685  ;;  %3868 = vmatpush2.bf16.msra.mxu1 %v3843_v2  ;;  %v3046_v2 = vpack.c.bf16 %v3044_v25, %v3044_v25 }
 0x66e   : > { %6435 = vrcp.f32 %v3686_v23  ;;  %v3842_v28 = vpack.c.bf16 %v3808_v7, %v3806_v18  ;;  %v3841_v4 = vpack.c.bf16 %v3807_v55, %v3805_v48  ;;  %v3802_v50 = vmul.f32 %v6422_v43, %v9424_v60  ;;  %v11915_v18 = vld [vmem:[#allocation32_spill] sm:$0xff]  ;;  %v11916_v48 = vld [vmem:[#allocation6_spill] sm:$0xff] }
 0x66f   : > { %v6424_v52 = vpop.eup %6423  ;;  %v3677_v11 = vpop.xlane.xlu0 %3676  ;;  %v3801_v9 = vmul.f32 %v6422_v43, %v9420_v62  ;;  %v11917_v55 = vld [vmem:[#allocation4_spill] sm:$0xff] }
 0x670   : > { %6437 = vrcp.f32 %v3677_v11  ;;  %3869 = vmatprep.subr.bf16.mxu1 %v3842_v28  ;;  %v3804_v1 = vmul.f32 %v6424_v52, %v9434_v15  ;;  %v3803_v47 = vmul.f32 %v6424_v52, %v9429_v42  ;;  %v3989_v43 = vsel %vm319_vm0, %v11917_v55, 0 }
 0x671   : > { %v6426_v37 = vpop.eup %6425  ;;  %v3680_v24 = vpop.xlane.xlu1 %3679  ;;  %3870 = vmatpush2.bf16.msra.mxu1 %v3841_v4 }
 0x672   : > { %6439 = vrcp.f32 %v3680_v24  ;;  %v3840_v16 = vpack.c.bf16 %v3804_v1, %v3802_v50  ;;  %v3839_v3 = vpack.c.bf16 %v3803_v47, %v3801_v9  ;;  %v3798_v32 = vmul.f32 %v6426_v37, %v9440_v30 }
 0x673   : > { %v6428_v12 = vpop.eup %6427  ;;  %v3671_v13 = vpop.xlane.xlu0 %3670  ;;  %v3797_v15 = vmul.f32 %v6426_v37, %v9436_v63 }
 0x674   : > { %6441 = vrcp.f32 %v3671_v13  ;;  %3871 = vmatprep.subr.bf16.mxu1 %v3840_v16  ;;  %v3800_v60 = vmul.f32 %v6428_v12, %v9448_v35  ;;  %v3799_v62 = vmul.f32 %v6428_v12, %v9444_v21  ;;  %v9604_v13 = vpop.f32.mrf.mxu0 }
 0x675   : > { %v6430_v17 = vpop.eup %6429  ;;  %v3674_v42 = vpop.xlane.xlu1 %3673  ;;  %3872 = vmatpush2.bf16.msra.mxu1 %v3839_v3 }
 0x676   : > { %6443 = vrcp.f32 %v3674_v42  ;;  %v3838_v31 = vpack.c.bf16 %v3800_v60, %v3798_v32  ;;  %v3837_v10 = vpack.c.bf16 %v3799_v62, %v3797_v15  ;;  %v3794_v53 = vmul.f32 %v6430_v17, %v9454_v29  ;;  %v9606_v32 = vpop.f32.mrf.mxu0 }
 0x677   : > { %v6432_v39 = vpop.eup %6431  ;;  %v3793_v51 = vmul.f32 %v6430_v17, %v9450_v0 }
 0x678   : > { %3873 = vmatprep.subr.bf16.mxu1 %v3838_v31  ;;  %v3796_v30 = vmul.f32 %v6432_v39, %v9460_v59  ;;  %v3795_v35 = vmul.f32 %v6432_v39, %v9456_v49  ;;  %v9608_v60 = vpop.f32.mrf.mxu0 }
 0x679   : > { %v6434_v8 = vpop.eup %6433  ;;  %3874 = vmatpush2.bf16.msra.mxu1 %v3837_v10 }
 0x67a   : > { %v3836_v63 = vpack.c.bf16 %v3796_v30, %v3794_v53  ;;  %v3835_v21 = vpack.c.bf16 %v3795_v35, %v3793_v51  ;;  %v3790_v56 = vmul.f32 %v6434_v8, %v9466_v54  ;;  %v3789_v22 = vmul.f32 %v6434_v8, %v9462_v45  ;;  %v9610_v15 = vpop.f32.mrf.mxu0 }
 0x67b   : > { %v6436_v40 = vpop.eup %6435  ;;  %v3932_v1 = vpop.trf.xlu1 }
 0x67c   : > { %3875 = vmatprep.subr.bf16.mxu1 %v3836_v63  ;;  %v3792_v34 = vmul.f32 %v6436_v40, %v9472_v44  ;;  %v3791_v29 = vmul.f32 %v6436_v40, %v9468_v33  ;;  %v9612_v62 = vpop.f32.mrf.mxu0 }
 0x67d   : > { %v6438_v59 = vpop.eup %6437  ;;  %3876 = vmatpush2.bf16.msra.mxu1 %v3835_v21 }
 0x67e   : > { %v3834_v0 = vpack.c.bf16 %v3792_v34, %v3790_v56  ;;  %v3833_v41 = vpack.c.bf16 %v3791_v29, %v3789_v22  ;;  %v3786_v46 = vmul.f32 %v6438_v59, %v9478_v6  ;;  %v3785_v26 = vmul.f32 %v6438_v59, %v9474_v27  ;;  %v9614_v17 = vpop.f32.mrf.mxu0 }
 0x67f   : > { %v6440_v49 = vpop.eup %6439  ;;  %v3933_v9 = vpop.trf.xlu1 }
 0x680   : > { %3877 = vmatprep.subr.bf16.mxu1 %v3834_v0  ;;  %v3788_v58 = vmul.f32 %v6440_v49, %v9484_v19  ;;  %v3787_v54 = vmul.f32 %v6440_v49, %v9480_v14  ;;  %v3847_v14 = vrot.slane %v3046_v2, 2  ;;  %v9616_v42 = vpop.f32.mrf.mxu0 }
 0x681   : > { %v6442_v44 = vpop.eup %6441  ;;  %3878 = vmatpush2.bf16.msra.mxu1 %v3833_v41 }
 0x682   : > { %v3832_v45 = vpack.c.bf16 %v3788_v58, %v3786_v46  ;;  %v3831_v5 = vpack.c.bf16 %v3787_v54, %v3785_v26  ;;  %v3782_v38 = vmul.f32 %v6442_v44, %v9490_v20  ;;  %v3781_v6 = vmul.f32 %v6442_v44, %v9486_v57  ;;  %v9618_v31 = vpop.f32.mrf.mxu0 }
 0x683   : > { %v6444_v33 = vpop.eup %6443  ;;  %v11918_v20 = vmov 0   ;;  %v3934_v47 = vpop.trf.xlu1 }
 0x684   : > { %3879 = vmatprep.subr.bf16.mxu1 %v3832_v45  ;;  %v3784_v61 = vmul.f32 %v6444_v33, %v9496_v36  ;;  %v3783_v19 = vmul.f32 %v6444_v33, %v11915_v18  ;;  %v3916_v36 = vpop.trf.xlu0  ;;  %v9620_v10 = vpop.f32.mrf.mxu0 }
 0x685   : > { %3880 = vmatpush2.bf16.msra.mxu1 %v3831_v5 }
 0x686   : > { %v3830_v27 = vpack.c.bf16 %v3784_v61, %v3782_v38  ;;  %v3829_v7 = vpack.c.bf16 %v3783_v19, %v3781_v6  ;;  %v9622_v39 = vpop.f32.mrf.mxu0 }
 0x687   : > { %v3935_v37 = vpop.trf.xlu1 }
 0x688   : > { %3881 = vmatprep.subr.bf16.mxu1 %v3830_v27  ;;  %v3917_v57 = vpop.trf.xlu0  ;;  %v9624_v53 = vpop.f32.mrf.mxu0 }
 0x689   : > { %3882 = vmatpush2.bf16.msra.mxu1 %v3829_v7 }
 0x68a   : > { %5779 = vmatprep.subr.msk.bf16.mxu1 %vm319_vm0, %v11916_v48  ;;  %v9626_v30 = vpop.f32.mrf.mxu0 }
 0x68b   : > { %v3936_v24 = vpop.trf.xlu1 }
 0x68c   : > { %3884 = vmatmul.mubr.bf16.vlgmr.msra.gmra.mxu1 %v3847_v14  ;;  %v3918_v23 = vpop.trf.xlu0  ;;  %v1949_v51 = vpop.f32.mrf.mxu0 }
 0x68d   : > { %4009 = vmatpush1.bf16.msra.mxu1 %v3989_v43  ;;  %4026 = vmatprep.mubr.bf16.mxu1 %v11918_v20 }
 0x68e   : > { %v1951_v35 = vpop.f32.mrf.mxu0 }
 0x68f   : > { %v3937_v16 = vpop.trf.xlu1 }
 0x690   : > { %v3919_v28 = vpop.trf.xlu0  ;;  %v1953_v21 = vpop.f32.mrf.mxu0 }
 0x692   : > { %v1955_v22 = vpop.f32.mrf.mxu0 }
 0x693   : > { %v3938_v3 = vpop.trf.xlu1 }
 0x694   : > { %5780 = vmatmul.mubr.msk.bf16.vlgmr.msra.gmra.mxu1 %vm270_vm1, %v3916_v36  ;;  %v3920_v4 = vpop.trf.xlu0  ;;  %v9632_v0 = vpop.f32.mrf.mxu0 }
 0x695   : > { %4036 = vmatprep.mubr.bf16.mxu1 %v11918_v20  ;;  %11919 = vst [vmem:[#allocation37_spill] sm:$0xff] %v9632_v0 }
 0x696   : > { %v9638_v46 = vpop.f32.mrf.mxu0 }
 0x697   : > { %v3939_v12 = vpop.trf.xlu1  ;;  %11920 = vst [vmem:[#allocation114_spill] sm:$0xff] %v9638_v46 }
 0x698   : > { %v3921_v52 = vpop.trf.xlu0  ;;  %v9644_v54 = vpop.f32.mrf.mxu0 }
 0x699   : > { %11921 = vst [vmem:[#allocation33_spill] sm:$0xff] %v9644_v54 }
 0x69a   : > { %v9650_v45 = vpop.f32.mrf.mxu0 }
 0x69b   : > { %11922 = vst [vmem:[#allocation41_spill] sm:$0xff] %v9650_v45 }
 0x69c   : > { %5781 = vmatmul.mubr.msk.bf16.gmra.mxu1 %vm270_vm1, %v3917_v57  ;;  %v3922_v11 = vpop.trf.xlu0  ;;  %v9656_v2 = vpop.f32.mrf.mxu0 }
 0x69d   : > { %4046 = vmatprep.mubr.bf16.mxu1 %v11918_v20 }
 0x69e   : > { %v9662_v6 = vpop.f32.mrf.mxu0 }
 0x6a0   : > { %v3923_v50 = vpop.trf.xlu0  ;;  %v9668_v27 = vpop.f32.mrf.mxu0 }
 0x6a1   : > { %11923 = vst [vmem:[#allocation118_spill] sm:$0xff] %v9668_v27 }
 0x6a2   : > { %v9672_v48 = vpop.f32.mrf.mxu0 }
 0x6a3   : > { %11924 = vst [vmem:[#allocation115_spill] sm:$0xff] %v9672_v48 }
 0x6a4   : > { %5782 = vmatmul.mubr.msk.bf16.gmra.mxu1 %vm270_vm1, %v3918_v23  ;;  %v9676_v36 = vpop.f32.mrf.mxu0 }
 0x6a5   : > { %4056 = vmatprep.mubr.bf16.mxu1 %v11918_v20 }
 0x6ac   : > { %5783 = vmatmul.mubr.msk.bf16.gmra.mxu1 %vm270_vm1, %v3919_v28  ;;  %v9678_v28 = vpop.f32.mrf.mxu0 }
 0x6ad   : > { %4066 = vmatprep.mubr.bf16.mxu1 %v11918_v20 }
 0x6b4   : > { %5784 = vmatmul.mubr.msk.bf16.gmra.mxu1 %vm270_vm1, %v3920_v4 }
 0x6b5   : > { %4076 = vmatprep.mubr.bf16.mxu1 %v11918_v20 }
 0x6bc   : > { %5785 = vmatmul.mubr.msk.bf16.gmra.mxu1 %vm270_vm1, %v3921_v52 }
 0x6bd   : > { %4086 = vmatprep.mubr.bf16.mxu1 %v11918_v20 }
 0x6c4   : > { %5786 = vmatmul.mubr.msk.bf16.gmra.mxu1 %vm270_vm1, %v3922_v11  ;;  %v9680_v11 = vpop.f32.mrf.mxu0 }
 0x6c5   : > { %4096 = vmatprep.mubr.bf16.mxu1 %v11918_v20  ;;  %11925 = vst [vmem:[#allocation112_spill] sm:$0xff] %v9680_v11 }
 0x6cc   : > { %5787 = vmatmul.mubr.msk.bf16.gmra.mxu1 %vm270_vm1, %v3923_v50 }
 0x6cd   : > { %4106 = vmatprep.mubr.bf16.mxu1 %v11918_v20 }
 0x6d4   : > { %5788 = vmatmul.mubr.msk.bf16.gmra.mxu1 %vm270_vm1, %v3932_v1 }
 0x6d5   : > { %4116 = vmatprep.mubr.bf16.mxu1 %v11918_v20 }
 0x6dc   : > { %5789 = vmatmul.mubr.msk.bf16.gmra.mxu1 %vm270_vm1, %v3933_v9  ;;  %v9682_v9 = vpop.f32.mrf.mxu0 }
 0x6dd   : > { %4126 = vmatprep.mubr.bf16.mxu1 %v11918_v20 }
 0x6e4   : > { %5790 = vmatmul.mubr.msk.bf16.gmra.mxu1 %vm270_vm1, %v3934_v47 }
 0x6e5   : > { %4136 = vmatprep.mubr.bf16.mxu1 %v11918_v20 }
 0x6ec   : > { %5791 = vmatmul.mubr.msk.bf16.gmra.mxu1 %vm270_vm1, %v3935_v37 }
 0x6ed   : > { %4146 = vmatprep.mubr.bf16.mxu1 %v11918_v20 }
 0x6f4   : > { %5792 = vmatmul.mubr.msk.bf16.gmra.mxu1 %vm270_vm1, %v3936_v24  ;;  %v9684_v24 = vpop.f32.mrf.mxu0 }
 0x6f5   : > { %4156 = vmatprep.mubr.bf16.mxu1 %v11918_v20 }
 0x6fc   : > { %5793 = vmatmul.mubr.msk.bf16.gmra.mxu1 %vm270_vm1, %v3937_v16 }
 0x6fd   : > { %4166 = vmatprep.mubr.bf16.mxu1 %v11918_v20 }
 0x704   : > { %5794 = vmatmul.mubr.msk.bf16.gmra.mxu1 %vm270_vm1, %v3938_v3 }
 0x705   : > { %4176 = vmatprep.mubr.bf16.mxu1 %v11918_v20 }
 0x70c   : > { %5795 = vmatmul.mubr.msk.bf16.gmra.mxu1 %vm270_vm1, %v3939_v12  ;;  %v9686_v12 = vpop.f32.mrf.mxu0 }
 0x74c   : > { %v3885_v8 = vpop.f32.mrf.mxu1 }
 0x74d   : > { %v3894_v63 = vrot.slane %v3885_v8, 4 }
 0x74e   : > { %v3887_v40 = vpop.f32.mrf.mxu1 }
 0x74f   : > { %3898 = vst [vmem:[%s8912_s13] sm:$0xf0] %v3894_v63  ;;  %v3895_v56 = vrot.slane %v3887_v40, 4  ;;  %v9688_v40 = vpop.f32.mrf.mxu0 }
 0x750   : > { %v3889_v34 = vpop.f32.mrf.mxu1 }
 0x751   : > { %3899 = vst [vmem:[%s8912_s13 + $0x8] sm:$0xf0] %v3895_v56  ;;  %v9699_v27 = vpop.f32.mrf.mxu0 }
 0x752   : > { %v3890_v29 = vpop.f32.mrf.mxu1 }
 0x754   : > { %v9630_v59 = vpop.f32.mrf.mxu1 }
 0x756   : > { %v9634_v41 = vpop.f32.mrf.mxu1 }
 0x758   : > { %v9636_v49 = vpop.f32.mrf.mxu1 }
 0x75a   : > { %v9640_v58 = vpop.f32.mrf.mxu1 }
 0x75c   : > { %v9642_v26 = vpop.f32.mrf.mxu1 }
 0x75e   : > { %v9646_v25 = vpop.f32.mrf.mxu1 }
 0x760   : > { %v9648_v44 = vpop.f32.mrf.mxu1 }
 0x762   : > { %v9652_v5 = vpop.f32.mrf.mxu1 }
 0x764   : > { %v9654_v33 = vpop.f32.mrf.mxu1 }
 0x766   : > { %v9658_v38 = vpop.f32.mrf.mxu1 }
 0x768   : > { %v9660_v61 = vpop.f32.mrf.mxu1 }
 0x76a   : > { %v9664_v18 = vpop.f32.mrf.mxu1 }
 0x76c   : > { %v9666_v19 = vpop.f32.mrf.mxu1 }
 0x76e   : > { %v4060_v7 = vpop.f32.mrf.mxu1 }
 0x770   : > { %v9670_v14 = vpop.f32.mrf.mxu1 }
 0x772   : > { %v9674_v55 = vpop.f32.mrf.mxu1 }
 0x774   : > { %v4068_v43 = vpop.f32.mrf.mxu1 }
 0x776   : > { %v4070_v57 = vpop.f32.mrf.mxu1 }
 0x778   : > { %v4072_v23 = vpop.f32.mrf.mxu1 }
 0x77a   : > { %v4074_v4 = vpop.f32.mrf.mxu1 }
 0x77c   : > { %v4078_v52 = vpop.f32.mrf.mxu1 }
 0x77e   : > { %v4080_v50 = vpop.f32.mrf.mxu1 }
 0x780   : > { %v4082_v1 = vpop.f32.mrf.mxu1 }
 0x782   : > { %v4084_v47 = vpop.f32.mrf.mxu1 }
 0x784   : > { %v4088_v37 = vpop.f32.mrf.mxu1 }
 0x785   : > { %v9702_v48 = vadd.f32 %v4088_v37, %v9620_v10  ;;  %v9720_v37 = vpop.f32.mrf.mxu0 }
 0x786   : > { %v4090_v16 = vpop.f32.mrf.mxu1 }
 0x787   : > { %v9695_v54 = vadd.f32 %v4090_v16, %v9622_v39  ;;  %11929 = vst [vmem:[#allocation122_spill] sm:$0xff] %v9702_v48 }
 0x788   : > { %v4092_v3 = vpop.f32.mrf.mxu1 }
 0x789   : > { %11928 = vst [vmem:[#allocation39_spill] sm:$0xff] %v9695_v54  ;;  %v4223_v39 = vmax.f32 %v9702_v48, %v9695_v54 }
 0x78a   : > { %v4094_v8 = vpop.f32.mrf.mxu1 }
 0x78b   : > { %v9716_v16 = vadd.f32 %v4094_v8, %v9626_v30  ;;  %v9733_v30 = vadd.f32 %v4070_v57, %v9606_v32  ;;  %v11941_v57 = vld [vmem:[#allocation98_spill] sm:$0xff]  ;;  %v9760_v8 = vadd.f32 %v4074_v4, %v9610_v15  ;;  %v11947_v15 = vld [vmem:[#allocation127_spill] sm:$0xff] }
 0x78c   : > { %v4098_v63 = vpop.f32.mrf.mxu1  ;;  %v9779_v4 = vadd.f32 %v9658_v38, %v11947_v15  ;;  %v11953_v38 = vld [vmem:[#allocation18_spill] sm:$0xff] }
 0x78d   : > { %v9690_v34 = vadd.f32 %v4098_v63, %v1949_v51  ;;  %11933 = vst [vmem:[#allocation79_spill] sm:$0xff] %v9716_v16  ;;  %11937 = vst [vmem:[#allocation84_spill] sm:$0xff] %v9733_v30 }
 0x78e   : > { %v4100_v56 = vpop.f32.mrf.mxu1  ;;  %11943 = vst [vmem:[#allocation29_spill] sm:$0xff] %v9760_v8  ;;  %11948 = vst [vmem:[#allocation13_spill] sm:$0xff] %v9779_v4 }
 0x78f   : > { %11926 = vst [vmem:[#allocation116_spill] sm:$0xff] %v9690_v34  ;;  %v9692_v29 = vadd.f32 %v4100_v56, %v1951_v35  ;;  %v9711_v35 = vadd.f32 %v4080_v50, %v9614_v17  ;;  %v9747_v50 = vadd.f32 %v4068_v43, %v9604_v13 }
 0x790   : > { %v4102_v20 = vpop.f32.mrf.mxu1 }
 0x791   : > { %11927 = vst [vmem:[#allocation121_spill] sm:$0xff] %v9692_v29  ;;  %v4229_v45 = vmax.f32 %v9690_v34, %v9692_v29  ;;  %v9704_v46 = vadd.f32 %v4102_v20, %v1953_v21  ;;  %11932 = vst [vmem:[#allocation2_spill] sm:$0xff] %v9711_v35  ;;  %v9725_v21 = vadd.f32 %v4078_v52, %v9612_v62  ;;  %v9742_v52 = vpop.f32.mrf.mxu0 }
 0x792   : > { %v4104_v0 = vpop.f32.mrf.mxu1  ;;  %11939 = vst [vmem:[#allocation69_spill] sm:$0xff] %v9747_v50 }
 0x793   : > { %11930 = vst [vmem:[#allocation119_spill] sm:$0xff] %v9704_v46  ;;  %v9706_v11 = vadd.f32 %v4104_v0, %v1955_v22  ;;  %4230 = vmax.xlane.f32.xlu0 %v4229_v45  ;;  %11934 = vst [vmem:[#allocation43_spill] sm:$0xff] %v9725_v21  ;;  %v9728_v22 = vadd.f32 %v4092_v3, %v9624_v53  ;;  %v4217_v0 = vmax.f32 %v9725_v21, %v9711_v35  ;;  %v9764_v43 = vpop.f32.mrf.mxu0 }
 0x794   : > { %v9708_v51 = vpop.f32.mrf.mxu1  ;;  %v9738_v45 = vadd.f32 %v4084_v47, %v9618_v31  ;;  %v9750_v3 = vadd.f32 %v4082_v1, %v9616_v42  ;;  %v9755_v31 = vadd.f32 %v4060_v7, %v11941_v57  ;;  %v4211_v47 = vmax.f32 %v9747_v50, %v9733_v30  ;;  %v11944_v1 = vld [vmem:[#allocation103_spill] sm:$0xff] }
 0x795   : > { %11931 = vst [vmem:[#allocation3_spill] sm:$0xff] %v9706_v11  ;;  %v4232_v10 = vmax.f32 %v9704_v46, %v9706_v11  ;;  %11935 = vst [vmem:[#allocation70_spill] sm:$0xff] %v9728_v22  ;;  %v4226_v62 = vmax.f32 %v9728_v22, %v9716_v16  ;;  %v9770_v63 = vadd.f32 %v9666_v19, %v11944_v1 }
 0x796   : > { %v9722_v20 = vpop.f32.mrf.mxu1  ;;  %11938 = vst [vmem:[#allocation26_spill] sm:$0xff] %v9738_v45  ;;  %11940 = vst [vmem:[#allocation42_spill] sm:$0xff] %v9750_v3  ;;  %v4220_v13 = vmax.f32 %v9750_v3, %v9738_v45  ;;  %v9773_v7 = vadd.f32 %v4072_v23, %v9608_v60  ;;  %v9789_v60 = vpop.f32.mrf.mxu0 }
 0x797   : > { %4233 = vmax.xlane.f32.xlu1 %v4232_v10  ;;  %4224 = vmax.xlane.f32.xlu0 %v4223_v39  ;;  %11942 = vst [vmem:[#allocation30_spill] sm:$0xff] %v9755_v31  ;;  %11945 = vst [vmem:[#allocation66_spill] sm:$0xff] %v9770_v63  ;;  %v4205_v39 = vmax.f32 %v9770_v63, %v9755_v31  ;;  %v11949_v10 = vld [vmem:[#allocation105_spill] sm:$0xff] }
 0x798   : > { %v9730_v17 = vpop.f32.mrf.mxu1  ;;  %11946 = vst [vmem:[#allocation74_spill] sm:$0xff] %v9773_v7  ;;  %v4214_v19 = vmax.f32 %v9773_v7, %v9760_v8 }
 0x799   : > { %11936 = vst [vmem:[#allocation72_spill] sm:$0xff] %v9730_v17 }
 0x79a   : > { %v9744_v53 = vpop.f32.mrf.mxu1 }
 0x79b   : > { %4227 = vmax.xlane.f32.xlu1 %v4226_v62  ;;  %4218 = vmax.xlane.f32.xlu0 %v4217_v0  ;;  %v9785_v0 = vadd.f32 %v9674_v55, %v11949_v10  ;;  %v11951_v62 = vld [vmem:[#allocation104_spill] sm:$0xff]  ;;  %v11955_v55 = vld [vmem:[#allocation123_spill] sm:$0xff]  ;;  %v11957_v10 = vld [vmem:[#allocation126_spill] sm:$0xff] }
 0x79c   : > { %v9752_v32 = vpop.f32.mrf.mxu1  ;;  %v9795_v57 = vadd.f32 %v9654_v33, %v11951_v62  ;;  %v9805_v1 = vadd.f32 %v9646_v25, %v11955_v55  ;;  %v9811_v31 = vadd.f32 %v9664_v18, %v11957_v10  ;;  %v11961_v25 = vld [vmem:[#allocation128_spill] sm:$0xff]  ;;  %v11963_v18 = vld [vmem:[#allocation50_spill] sm:$0xff] }
 0x79d   : > { %11950 = vst [vmem:[#allocation31_spill] sm:$0xff] %v9785_v0  ;;  %v9831_v10 = vadd.f32 %v9634_v41, %v11963_v18 }
 0x79e   : > { %v9766_v42 = vpop.f32.mrf.mxu1  ;;  %11952 = vst [vmem:[#allocation52_spill] sm:$0xff] %v9795_v57  ;;  %11956 = vst [vmem:[#allocation54_spill] sm:$0xff] %v9805_v1  ;;  %v4199_v15 = vmax.f32 %v9795_v57, %v9779_v4  ;;  %v11965_v57 = vld [vmem:[#allocation9_spill] sm:$0xff] }
 0x79f   : > { %4221 = vmax.xlane.f32.xlu1 %v4220_v13  ;;  %4212 = vmax.xlane.f32.xlu0 %v4211_v47  ;;  %v9799_v47 = vadd.f32 %v9670_v14, %v11953_v38  ;;  %11958 = vst [vmem:[#allocation64_spill] sm:$0xff] %v9811_v31  ;;  %v9815_v14 = vpop.f32.mrf.mxu0  ;;  %v9825_v38 = vadd.f32 %v9660_v61, %v11961_v25  ;;  %11964 = vst [vmem:[#allocation11_spill] sm:$0xff] %v9831_v10  ;;  %v11969_v25 = vld [vmem:[#allocation124_spill] sm:$0xff] }
 0x7a0   : > { %v9775_v56 = vpop.f32.mrf.mxu1  ;;  %v9849_v41 = vadd.f32 %v9648_v44, %v11969_v25 }
 0x7a1   : > { %11954 = vst [vmem:[#allocation62_spill] sm:$0xff] %v9799_v47  ;;  %v4208_v33 = vmax.f32 %v9799_v47, %v9785_v0  ;;  %11962 = vst [vmem:[#allocation61_spill] sm:$0xff] %v9825_v38  ;;  %v9837_v0 = vadd.f32 %v9652_v5, %v11965_v57  ;;  %v2011_v61 = vpop.f32.mrf.mxu0  ;;  %v11971_v57 = vld [vmem:[#allocation38_spill] sm:$0xff] }
 0x7a2   : > { %v9791_v23 = vpop.f32.mrf.mxu1  ;;  %11970 = vst [vmem:[#allocation100_spill] sm:$0xff] %v9849_v41 }
 0x7a3   : > { %4215 = vmax.xlane.f32.xlu1 %v4214_v19  ;;  %4206 = vmax.xlane.f32.xlu0 %v4205_v39  ;;  %v11959_v39 = vld [vmem:[#allocation125_spill] sm:$0xff]  ;;  %11966 = vst [vmem:[#allocation12_spill] sm:$0xff] %v9837_v0 }
 0x7a4   : > { %v9801_v13 = vpop.f32.mrf.mxu1  ;;  %v9821_v62 = vadd.f32 %v9642_v26, %v11959_v39  ;;  %v4202_v26 = vmax.f32 %v9825_v38, %v9811_v31  ;;  %v11973_v31 = vld [vmem:[#allocation8_spill] sm:$0xff] }
 0x7a5   : > { %v9863_v44 = vadd.f32 %v9636_v49, %v11973_v31 }
 0x7a6   : > { %v9817_v19 = vpop.f32.mrf.mxu1  ;;  %11960 = vst [vmem:[#allocation56_spill] sm:$0xff] %v9821_v62  ;;  %v4193_v4 = vmax.f32 %v9821_v62, %v9805_v1  ;;  %v9857_v1 = vadd.f32 %v9640_v58, %v11971_v57  ;;  %v4196_v62 = vmax.f32 %v9849_v41, %v9837_v0 }
 0x7a7   : > { %4209 = vmax.xlane.f32.xlu1 %v4208_v33  ;;  %4200 = vmax.xlane.f32.xlu0 %v4199_v15  ;;  %v11967_v15 = vld [vmem:[#allocation36_spill] sm:$0xff]  ;;  %11974 = vst [vmem:[#allocation107_spill] sm:$0xff] %v9863_v44 }
 0x7a8   : > { %v9827_v55 = vpop.f32.mrf.mxu1  ;;  %v9845_v33 = vadd.f32 %v9630_v59, %v11967_v15  ;;  %11972 = vst [vmem:[#allocation108_spill] sm:$0xff] %v9857_v1  ;;  %v2013_v59 = vpop.f32.mrf.mxu0 }
 0x7aa   : > { %v9841_v39 = vpop.f32.mrf.mxu1  ;;  %11968 = vst [vmem:[#allocation101_spill] sm:$0xff] %v9845_v33  ;;  %v4187_v5 = vmax.f32 %v9845_v33, %v9831_v10  ;;  %v2015_v25 = vpop.f32.mrf.mxu0 }
 0x7ab   : > { %4203 = vmax.xlane.f32.xlu1 %v4202_v26  ;;  %4194 = vmax.xlane.f32.xlu0 %v4193_v4  ;;  %v4190_v26 = vmax.f32 %v9863_v44, %v9857_v1 }
 0x7ac   : > { %v9851_v18 = vpop.f32.mrf.mxu1  ;;  %v2019_v57 = vpop.f32.mrf.mxu0 }
 0x7ae   : > { %v4140_v15 = vpop.f32.mrf.mxu1  ;;  %v2021_v41 = vpop.f32.mrf.mxu0 }
 0x7af   : > { %4197 = vmax.xlane.f32.xlu1 %v4196_v62  ;;  %4188 = vmax.xlane.f32.xlu0 %v4187_v5 }
 0x7b0   : > { %v9865_v4 = vpop.f32.mrf.mxu1  ;;  %v2023_v63 = vpop.f32.mrf.mxu0 }
 0x7b2   : > { %v4144_v10 = vpop.f32.mrf.mxu1  ;;  %v2025_v62 = vpop.f32.mrf.mxu0 }
 0x7b3   : > { %4191 = vmax.xlane.f32.xlu1 %v4190_v26 }
 0x7b4   : > { %v4148_v58 = vpop.f32.mrf.mxu1  ;;  %v2029_v7 = vpop.f32.mrf.mxu0 }
 0x7b6   : > { %v4150_v33 = vpop.f32.mrf.mxu1  ;;  %v2031_v1 = vpop.f32.mrf.mxu0 }
 0x7b8   : > { %v4152_v0 = vpop.f32.mrf.mxu1  ;;  %v2033_v26 = vpop.f32.mrf.mxu0 }
 0x7ba   : > { %v4154_v38 = vpop.f32.mrf.mxu1  ;;  %v2035_v48 = vpop.f32.mrf.mxu0 }
 0x7bc   : > { %v4158_v47 = vpop.f32.mrf.mxu1 }
 0x7be   : > { %v4160_v49 = vpop.f32.mrf.mxu1 }
 0x7bf   : > { %v9883_v17 = vadd.f32 %v4160_v49, %v2011_v61  ;;  %v9925_v61 = vadd.f32 %v4152_v0, %v9764_v43  ;;  %v9944_v43 = vadd.f32 %v9865_v4, %v9688_v40  ;;  %v9954_v0 = vadd.f32 %v9841_v39, %v9682_v9  ;;  %v11982_v4 = vld [vmem:[#allocation72_spill] sm:$0xff]  ;;  %v11984_v49 = vld [vmem:[#allocation121_spill] sm:$0xff] }
 0x7c0   : > { %v4162_v31 = vpop.f32.mrf.mxu1  ;;  %v9960_v40 = vadd.f32 %v9752_v32, %v9656_v2  ;;  %v11978_v32 = vld [vmem:[#allocation37_spill] sm:$0xff] }
 0x7c2   : > { %v4164_v5 = vpop.f32.mrf.mxu1 }
 0x7c4   : > { %v4168_v8 = vpop.f32.mrf.mxu1 }
 0x7c5   : > { %v9877_v46 = vadd.f32 %v4168_v8, %v2019_v57 }
 0x7c6   : > { %v4170_v30 = vpop.f32.mrf.mxu1 }
 0x7c7   : > { %v9873_v22 = vadd.f32 %v4170_v30, %v2021_v41  ;;  %v11979_v41 = vld [vmem:[#allocation118_spill] sm:$0xff] }
 0x7c8   : > { %v4172_v50 = vpop.f32.mrf.mxu1 }
 0x7c9   : > { %v9894_v8 = vadd.f32 %v4172_v50, %v2023_v63  ;;  %v9911_v50 = vadd.f32 %v4140_v15, %v9686_v12  ;;  %v9916_v63 = vadd.f32 %v4154_v38, %v9789_v60  ;;  %v9929_v12 = vadd.f32 %v9817_v19, %v9678_v28 }
 0x7ca   : > { %v4174_v44 = vpop.f32.mrf.mxu1  ;;  %v9934_v38 = vadd.f32 %v4144_v10, %v9699_v27  ;;  %v9948_v28 = vadd.f32 %v9766_v42, %v9662_v6  ;;  %v11976_v6 = vld [vmem:[#allocation114_spill] sm:$0xff]  ;;  %v11977_v10 = vld [vmem:[#allocation115_spill] sm:$0xff] }
 0x7cb   : > { %v9968_v42 = vadd.f32 %v9722_v20, %v11976_v6  ;;  %v9974_v39 = vadd.f32 %v9791_v23, %v11977_v10 }
 0x7cc   : > { %v4178_v45 = vpop.f32.mrf.mxu1  ;;  %v4241_v9 = vmax.f32 %v9960_v40, %v9948_v28 }
 0x7cd   : > { %v9869_v35 = vadd.f32 %v4178_v45, %v2029_v7  ;;  %v4271_v45 = vmax.f32 %v9877_v46, %v9873_v22  ;;  %v9892_v7 = vadd.f32 %v4158_v47, %v9815_v14  ;;  %v9908_v47 = vadd.f32 %v4162_v31, %v2013_v59  ;;  %v11980_v59 = vld [vmem:[#allocation41_spill] sm:$0xff] }
 0x7ce   : > { %v4180_v3 = vpop.f32.mrf.mxu1  ;;  %v9990_v23 = vadd.f32 %v9744_v53, %v11980_v59  ;;  %v11991_v59 = vld [vmem:[#allocation43_spill] sm:$0xff] }
 0x7cf   : > { %v9871_v21 = vadd.f32 %v4180_v3, %v2031_v1  ;;  %v9887_v3 = vadd.f32 %v4174_v44, %v2025_v62  ;;  %v9906_v1 = vadd.f32 %v4148_v58, %v9720_v37  ;;  %v9922_v37 = vadd.f32 %v9851_v18, %v9684_v24  ;;  %v11981_v44 = vld [vmem:[#allocation33_spill] sm:$0xff]  ;;  %v11983_v58 = vld [vmem:[#allocation116_spill] sm:$0xff] }
 0x7d0   : > { %v4182_v16 = vpop.f32.mrf.mxu1  ;;  %v9940_v24 = vadd.f32 %v9801_v13, %v9676_v36  ;;  %v4256_v36 = vmax.f32 %v9944_v43, %v9934_v38  ;;  %v11975_v13 = vld [vmem:[#allocation112_spill] sm:$0xff]  ;;  %v9984_v18 = vadd.f32 %v9775_v56, %v11979_v41  ;;  %v11990_v41 = vld [vmem:[#allocation79_spill] sm:$0xff] }
 0x7d1   : > { %v4277_v54 = vmax.f32 %v9869_v35, %v9871_v21  ;;  %v9879_v29 = vadd.f32 %v4182_v16, %v2033_v26  ;;  %v4274_v16 = vmax.f32 %v9894_v8, %v9887_v3  ;;  %v4253_v60 = vmax.f32 %v9922_v37, %v9911_v50 }
 0x7d2   : > { %v4184_v11 = vpop.f32.mrf.mxu1  ;;  %v4247_v27 = vmax.f32 %v9940_v24, %v9929_v12  ;;  %v9964_v19 = vadd.f32 %v9827_v55, %v11975_v13  ;;  %v9980_v55 = vadd.f32 %v9708_v51, %v11978_v32  ;;  %v4244_v15 = vmax.f32 %v9984_v18, %v9974_v39 }
 0x7d3   : > { %v9881_v34 = vadd.f32 %v4184_v11, %v2035_v48  ;;  %4278 = vmax.xlane.f32.xlu0 %v4277_v54  ;;  %v9897_v48 = vadd.f32 %v4150_v33, %v9742_v52  ;;  %v4265_v54 = vmax.f32 %v9892_v7, %v9883_v17  ;;  %v9901_v11 = vadd.f32 %v4164_v5, %v2015_v25 }
 0x7d4   : > { %v4262_v33 = vmax.f32 %v9925_v61, %v9916_v63  ;;  %v4250_v2 = vmax.f32 %v9964_v19, %v9954_v0  ;;  %v4235_v20 = vmax.f32 %v9980_v55, %v9968_v42  ;;  %v9996_v51 = vadd.f32 %v11982_v4, %v11981_v44  ;;  %v11992_v44 = vld [vmem:[#allocation2_spill] sm:$0xff] }
 0x7d5   : > { %v4280_v30 = vmax.f32 %v9879_v29, %v9881_v34  ;;  %v4259_v52 = vmax.f32 %v9906_v1, %v9897_v48  ;;  %v4268_v14 = vmax.f32 %v9908_v47, %v9901_v11 }
 0x7d6   : > { %v4238_v56 = vmax.f32 %v9996_v51, %v9990_v23 }
 0x7d7   : > { %4281 = vmax.xlane.f32.xlu1 %v4280_v30  ;;  %4272 = vmax.xlane.f32.xlu0 %v4271_v45  ;;  %v11985_v45 = vld [vmem:[#allocation119_spill] sm:$0xff] }
 0x7db   : > { %4275 = vmax.xlane.f32.xlu1 %v4274_v16  ;;  %4266 = vmax.xlane.f32.xlu0 %v4265_v54  ;;  %v11986_v54 = vld [vmem:[#allocation3_spill] sm:$0xff] }
 0x7df   : > { %4269 = vmax.xlane.f32.xlu1 %v4268_v14  ;;  %4260 = vmax.xlane.f32.xlu0 %v4259_v52  ;;  %v11987_v52 = vld [vmem:[#allocation122_spill] sm:$0xff] }
 0x7e3   : > { %4263 = vmax.xlane.f32.xlu1 %v4262_v33  ;;  %4254 = vmax.xlane.f32.xlu0 %v4253_v60  ;;  %v11988_v60 = vld [vmem:[#allocation39_spill] sm:$0xff] }
 0x7e7   : > { %4257 = vmax.xlane.f32.xlu1 %v4256_v36  ;;  %4248 = vmax.xlane.f32.xlu0 %v4247_v27 }
 0x7eb   : > { %4251 = vmax.xlane.f32.xlu1 %v4250_v2  ;;  %4242 = vmax.xlane.f32.xlu0 %v4241_v9  ;;  %v11989_v2 = vld [vmem:[#allocation70_spill] sm:$0xff] }
 0x7ef   : > { %4245 = vmax.xlane.f32.xlu1 %v4244_v15  ;;  %4236 = vmax.xlane.f32.xlu0 %v4235_v20 }
 0x7f3   : > { %4239 = vmax.xlane.f32.xlu1 %v4238_v56 }
 0x81c   : > { %v4231_v25 = vpop.xlane.xlu0 %4230 }
 0x81d   : > { %v4311_v57 = vsub.f32 %v11983_v58, %v4231_v25  ;;  %v4312_v31 = vsub.f32 %v11984_v49, %v4231_v25 }
 0x81f   : > { %v4403_v53 = vmul.f32 1.442695, %v4311_v57  ;;  %v4405_v62 = vmul.f32 1.442695, %v4312_v31 }
 0x820   : > { %v4234_v5 = vpop.xlane.xlu1 %4233  ;;  %v4225_v26 = vpop.xlane.xlu0 %4224 }
 0x821   : > { %6445 = vpow2.f32 %v4403_v53  ;;  %v4313_v30 = vsub.f32 %v11985_v45, %v4234_v5  ;;  %v4314_v16 = vsub.f32 %v11986_v54, %v4234_v5  ;;  %v4307_v14 = vsub.f32 %v11987_v52, %v4225_v26  ;;  %v11993_v53 = vld [vmem:[#allocation42_spill] sm:$0xff]  ;;  %v11995_v45 = vld [vmem:[#allocation69_spill] sm:$0xff]  ;;  %v11996_v54 = vld [vmem:[#allocation84_spill] sm:$0xff] }
 0x822   : > { %6447 = vpow2.f32 %v4405_v62  ;;  %v4308_v33 = vsub.f32 %v11988_v60, %v4225_v26  ;;  %v11994_v5 = vld [vmem:[#allocation26_spill] sm:$0xff] }
 0x823   : > { %v4407_v27 = vmul.f32 1.442695, %v4313_v30  ;;  %v4409_v36 = vmul.f32 1.442695, %v4314_v16  ;;  %v4395_v13 = vmul.f32 1.442695, %v4307_v14 }
 0x824   : > { %v4397_v6 = vmul.f32 1.442695, %v4308_v33  ;;  %v4228_v9 = vpop.xlane.xlu1 %4227  ;;  %v4219_v10 = vpop.xlane.xlu0 %4218 }
 0x825   : > { %6449 = vpow2.f32 %v4407_v27  ;;  %v4309_v32 = vsub.f32 %v11989_v2, %v4228_v9  ;;  %v4310_v20 = vsub.f32 %v11990_v41, %v4228_v9  ;;  %v4303_v15 = vsub.f32 %v11991_v59, %v4219_v10  ;;  %v11998_v9 = vld [vmem:[#allocation29_spill] sm:$0xff]  ;;  %v11999_v2 = vld [vmem:[#allocation66_spill] sm:$0xff] }
 0x826   : > { %6451 = vpow2.f32 %v4409_v36  ;;  %v4304_v4 = vsub.f32 %v11992_v44, %v4219_v10 }
 0x827   : > { %6453 = vpow2.f32 %v4395_v13  ;;  %v4399_v56 = vmul.f32 1.442695, %v4309_v32  ;;  %v4401_v25 = vmul.f32 1.442695, %v4310_v20  ;;  %v4387_v58 = vmul.f32 1.442695, %v4303_v15 }
 0x828   : > { %6455 = vpow2.f32 %v4397_v6  ;;  %v4389_v57 = vmul.f32 1.442695, %v4304_v4  ;;  %v4222_v49 = vpop.xlane.xlu1 %4221  ;;  %v4213_v31 = vpop.xlane.xlu0 %4212  ;;  %v11997_v13 = vld [vmem:[#allocation74_spill] sm:$0xff] }
 0x829   : > { %6457 = vpow2.f32 %v4399_v56  ;;  %v4305_v62 = vsub.f32 %v11993_v53, %v4222_v49  ;;  %v4306_v26 = vsub.f32 %v11994_v5, %v4222_v49  ;;  %v4299_v30 = vsub.f32 %v11995_v45, %v4213_v31  ;;  %v12000_v20 = vld [vmem:[#allocation30_spill] sm:$0xff] }
 0x82a   : > { %6459 = vpow2.f32 %v4401_v25  ;;  %v4300_v16 = vsub.f32 %v11996_v54, %v4213_v31  ;;  %v12001_v31 = vld [vmem:[#allocation62_spill] sm:$0xff]  ;;  %v12004_v54 = vld [vmem:[#allocation13_spill] sm:$0xff] }
 0x82b   : > { %6461 = vpow2.f32 %v4387_v58  ;;  %v4391_v52 = vmul.f32 1.442695, %v4305_v62  ;;  %v4393_v14 = vmul.f32 1.442695, %v4306_v26  ;;  %v4379_v60 = vmul.f32 1.442695, %v4299_v30 }
 0x82c   : > { %6463 = vpow2.f32 %v4389_v57  ;;  %v4381_v33 = vmul.f32 1.442695, %v4300_v16  ;;  %v4216_v27 = vpop.xlane.xlu1 %4215  ;;  %v4207_v36 = vpop.xlane.xlu0 %4206  ;;  %v12002_v62 = vld [vmem:[#allocation31_spill] sm:$0xff]  ;;  %v12003_v26 = vld [vmem:[#allocation52_spill] sm:$0xff] }
 0x82d   : > { %6465 = vpow2.f32 %v4391_v52  ;;  %v4301_v6 = vsub.f32 %v11997_v13, %v4216_v27  ;;  %v4302_v10 = vsub.f32 %v11998_v9, %v4216_v27  ;;  %v4295_v32 = vsub.f32 %v11999_v2, %v4207_v36  ;;  %v12005_v2 = vld [vmem:[#allocation61_spill] sm:$0xff] }
 0x82e   : > { %v10017_v41 = vpop.eup %6445  ;;  %6467 = vpow2.f32 %v4393_v14  ;;  %v4296_v59 = vsub.f32 %v12000_v20, %v4207_v36  ;;  %v12006_v20 = vld [vmem:[#allocation64_spill] sm:$0xff] }
 0x82f   : > { %v10020_v15 = vpop.eup %6447  ;;  %6469 = vpow2.f32 %v4379_v60  ;;  %v4383_v44 = vmul.f32 1.442695, %v4301_v6  ;;  %v4385_v4 = vmul.f32 1.442695, %v4302_v10  ;;  %v4371_v56 = vmul.f32 1.442695, %v4295_v32 }
 0x830   : > { %6471 = vpow2.f32 %v4381_v33  ;;  %v4373_v25 = vmul.f32 1.442695, %v4296_v59  ;;  %v4210_v58 = vpop.xlane.xlu1 %4209  ;;  %v4201_v57 = vpop.xlane.xlu0 %4200  ;;  %v4517_v49 = vadd.f32 %v10020_v15, %v10017_v41 }
 0x831   : > { %6473 = vpow2.f32 %v4383_v44  ;;  %v4297_v53 = vsub.f32 %v12001_v31, %v4210_v58  ;;  %v4298_v5 = vsub.f32 %v12002_v62, %v4210_v58  ;;  %v4291_v45 = vsub.f32 %v12003_v26, %v4201_v57  ;;  %v12007_v44 = vld [vmem:[#allocation56_spill] sm:$0xff]  ;;  %v12008_v58 = vld [vmem:[#allocation54_spill] sm:$0xff] }
 0x832   : > { %v10027_v30 = vpop.eup %6449  ;;  %6475 = vpow2.f32 %v4385_v4  ;;  %v4292_v16 = vsub.f32 %v12004_v54, %v4201_v57  ;;  %4518 = vadd.xlane.f32.xlu0 %v4517_v49 }
 0x833   : > { %v10030_v52 = vpop.eup %6451  ;;  %6477 = vpow2.f32 %v4371_v56  ;;  %v4375_v14 = vmul.f32 1.442695, %v4297_v53  ;;  %v4377_v60 = vmul.f32 1.442695, %v4298_v5  ;;  %v4363_v33 = vmul.f32 1.442695, %v4291_v45 }
 0x834   : > { %v10032_v27 = vpop.eup %6453  ;;  %6479 = vpow2.f32 %v4373_v25  ;;  %v4365_v36 = vmul.f32 1.442695, %v4292_v16  ;;  %v4204_v13 = vpop.xlane.xlu1 %4203  ;;  %v4520_v9 = vadd.f32 %v10030_v52, %v10027_v30 }
 0x835   : > { %v4195_v6 = vpop.xlane.xlu0 %4194  ;;  %v10036_v10 = vpop.eup %6455  ;;  %6481 = vpow2.f32 %v4375_v14  ;;  %v4293_v32 = vsub.f32 %v12005_v2, %v4204_v13  ;;  %v4294_v59 = vsub.f32 %v12006_v20, %v4204_v13 }
 0x836   : > { %v4287_v4 = vsub.f32 %v12007_v44, %v4195_v6  ;;  %v10041_v56 = vpop.eup %6457  ;;  %6483 = vpow2.f32 %v4377_v60  ;;  %v4288_v25 = vsub.f32 %v12008_v58, %v4195_v6  ;;  %4521 = vadd.xlane.f32.xlu1 %v4520_v9  ;;  %v4511_v57 = vadd.f32 %v10036_v10, %v10032_v27  ;;  %v12009_v60 = vld [vmem:[#allocation100_spill] sm:$0xff]  ;;  %v12011_v9 = vld [vmem:[#allocation101_spill] sm:$0xff] }
 0x837   : > { %v10046_v49 = vpop.eup %6459  ;;  %6485 = vpow2.f32 %v4363_v33  ;;  %v4367_v31 = vmul.f32 1.442695, %v4293_v32  ;;  %v4369_v53 = vmul.f32 1.442695, %v4294_v59  ;;  %v12010_v6 = vld [vmem:[#allocation12_spill] sm:$0xff] }
 0x838   : > { %v4355_v62 = vmul.f32 1.442695, %v4287_v4  ;;  %v10048_v5 = vpop.eup %6461  ;;  %6487 = vpow2.f32 %v4365_v36  ;;  %v4357_v26 = vmul.f32 1.442695, %v4288_v25  ;;  %4512 = vadd.xlane.f32.xlu0 %v4511_v57  ;;  %v4198_v45 = vpop.xlane.xlu1 %4197  ;;  %v4514_v16 = vadd.f32 %v10046_v49, %v10041_v56  ;;  %v12012_v36 = vld [vmem:[#allocation11_spill] sm:$0xff] }
 0x839   : > { %v4189_v54 = vpop.xlane.xlu0 %4188  ;;  %v10052_v14 = vpop.eup %6463  ;;  %6489 = vpow2.f32 %v4367_v31  ;;  %v4289_v13 = vsub.f32 %v12009_v60, %v4198_v45  ;;  %v4290_v33 = vsub.f32 %v12010_v6, %v4198_v45  ;;  %v12014_v6 = vld [vmem:[#allocation108_spill] sm:$0xff] }
 0x83a   : > { %v4283_v2 = vsub.f32 %v12011_v9, %v4189_v54  ;;  %v10057_v32 = vpop.eup %6465  ;;  %6491 = vpow2.f32 %v4369_v53  ;;  %v4284_v20 = vsub.f32 %v12012_v36, %v4189_v54  ;;  %4515 = vadd.xlane.f32.xlu1 %v4514_v16  ;;  %v4505_v59 = vadd.f32 %v10052_v14, %v10048_v5  ;;  %v12013_v16 = vld [vmem:[#allocation107_spill] sm:$0xff] }
 0x83b   : > { %v10062_v44 = vpop.eup %6467  ;;  %6493 = vpow2.f32 %v4355_v62  ;;  %v4359_v4 = vmul.f32 1.442695, %v4289_v13  ;;  %v4361_v58 = vmul.f32 1.442695, %v4290_v33 }
 0x83c   : > { %v4347_v25 = vmul.f32 1.442695, %v4283_v2  ;;  %v10064_v57 = vpop.eup %6469  ;;  %6495 = vpow2.f32 %v4357_v26  ;;  %v4349_v31 = vmul.f32 1.442695, %v4284_v20  ;;  %4506 = vadd.xlane.f32.xlu0 %v4505_v59  ;;  %v4192_v45 = vpop.xlane.xlu1 %4191  ;;  %v4508_v53 = vadd.f32 %v10062_v44, %v10057_v32 }
 0x83d   : > { %v10068_v54 = vpop.eup %6471  ;;  %6497 = vpow2.f32 %v4359_v4  ;;  %v4285_v60 = vsub.f32 %v12013_v16, %v4192_v45  ;;  %v4286_v9 = vsub.f32 %v12014_v6, %v4192_v45 }
 0x83e   : > { %v10072_v62 = vpop.eup %6473  ;;  %6499 = vpow2.f32 %v4361_v58  ;;  %4509 = vadd.xlane.f32.xlu1 %v4508_v53  ;;  %v4499_v26 = vadd.f32 %v10068_v54, %v10064_v57 }
 0x83f   : > { %v10076_v13 = vpop.eup %6475  ;;  %6501 = vpow2.f32 %v4347_v25  ;;  %v4351_v33 = vmul.f32 1.442695, %v4285_v60  ;;  %v4353_v2 = vmul.f32 1.442695, %v4286_v9 }
 0x840   : > { %v10078_v36 = vpop.eup %6477  ;;  %6503 = vpow2.f32 %v4349_v31  ;;  %4500 = vadd.xlane.f32.xlu0 %v4499_v26  ;;  %v4502_v20 = vadd.f32 %v10076_v13, %v10072_v62 }
 0x841   : > { %12015 = vst [vmem:[#allocation102_spill] sm:$0xff] %v10078_v36  ;;  %v10082_v59 = vpop.eup %6479  ;;  %6505 = vpow2.f32 %v4351_v33 }
 0x842   : > { %v10084_v4 = vpop.eup %6481  ;;  %6507 = vpow2.f32 %v4353_v2  ;;  %4503 = vadd.xlane.f32.xlu1 %v4502_v20  ;;  %v4493_v58 = vadd.f32 %v10082_v59, %v10078_v36 }
 0x843   : > { %12016 = vst [vmem:[#allocation51_spill] sm:$0xff] %v10084_v4  ;;  %v10088_v25 = vpop.eup %6483 }
 0x844   : > { %12017 = vst [vmem:[#allocation15_spill] sm:$0xff] %v10088_v25  ;;  %v10090_v45 = vpop.eup %6485  ;;  %4494 = vadd.xlane.f32.xlu0 %v4493_v58  ;;  %v4496_v31 = vadd.f32 %v10088_v25, %v10084_v4 }
 0x845   : > { %12018 = vst [vmem:[#allocation10_spill] sm:$0xff] %v10090_v45  ;;  %v10094_v53 = vpop.eup %6487 }
 0x846   : > { %12019 = vst [vmem:[#allocation45_spill] sm:$0xff] %v10094_v53  ;;  %v10096_v16 = vpop.eup %6489  ;;  %4497 = vadd.xlane.f32.xlu1 %v4496_v31  ;;  %v4487_v60 = vadd.f32 %v10094_v53, %v10090_v45 }
 0x847   : > { %12020 = vst [vmem:[#allocation47_spill] sm:$0xff] %v10096_v16  ;;  %v10100_v6 = vpop.eup %6491 }
 0x848   : > { %12021 = vst [vmem:[#allocation120_spill] sm:$0xff] %v10100_v6  ;;  %v10102_v9 = vpop.eup %6493  ;;  %4488 = vadd.xlane.f32.xlu0 %v4487_v60  ;;  %v4490_v26 = vadd.f32 %v10100_v6, %v10096_v16 }
 0x849   : > { %12022 = vst [vmem:[#allocation40_spill] sm:$0xff] %v10102_v9  ;;  %v10106_v33 = vpop.eup %6495 }
 0x84a   : > { %12023 = vst [vmem:[#allocation113_spill] sm:$0xff] %v10106_v33  ;;  %v10108_v2 = vpop.eup %6497  ;;  %4491 = vadd.xlane.f32.xlu1 %v4490_v26  ;;  %v4481_v20 = vadd.f32 %v10106_v33, %v10102_v9 }
 0x84b   : > { %12024 = vst [vmem:[#allocation28_spill] sm:$0xff] %v10108_v2  ;;  %v10112_v58 = vpop.eup %6499 }
 0x84c   : > { %12025 = vst [vmem:[#allocation46_spill] sm:$0xff] %v10112_v58  ;;  %v10114_v31 = vpop.eup %6501  ;;  %4482 = vadd.xlane.f32.xlu0 %v4481_v20  ;;  %v4484_v45 = vadd.f32 %v10112_v58, %v10108_v2 }
 0x84d   : > { %12026 = vst [vmem:[#allocation44_spill] sm:$0xff] %v10114_v31  ;;  %v10118_v60 = vpop.eup %6503 }
 0x84e   : > { %12027 = vst [vmem:[#allocation14_spill] sm:$0xff] %v10118_v60  ;;  %v10120_v53 = vpop.eup %6505  ;;  %4485 = vadd.xlane.f32.xlu1 %v4484_v45  ;;  %v4475_v16 = vadd.f32 %v10118_v60, %v10114_v31 }
 0x84f   : > { %12028 = vst [vmem:[#allocation117_spill] sm:$0xff] %v10120_v53  ;;  %v10124_v26 = vpop.eup %6507 }
 0x850   : > { %12029 = vst [vmem:[#allocation78_spill] sm:$0xff] %v10124_v26  ;;  %4476 = vadd.xlane.f32.xlu0 %v4475_v16  ;;  %v4478_v9 = vadd.f32 %v10124_v26, %v10120_v53 }
 0x852   : > { %4479 = vadd.xlane.f32.xlu1 %v4478_v9 }
 0x85c   : > { %v4279_v33 = vpop.xlane.xlu0 %4278 }
 0x85d   : > { %v4343_v20 = vsub.f32 %v9869_v35, %v4279_v33  ;;  %v4344_v2 = vsub.f32 %v9871_v21, %v4279_v33 }
 0x85f   : > { %v4467_v58 = vmul.f32 1.442695, %v4343_v20  ;;  %v4469_v6 = vmul.f32 1.442695, %v4344_v2 }
 0x860   : > { %v4282_v4 = vpop.xlane.xlu1 %4281  ;;  %v4273_v36 = vpop.xlane.xlu0 %4272 }
 0x861   : > { %6509 = vpow2.f32 %v4467_v58  ;;  %v4345_v45 = vsub.f32 %v9879_v29, %v4282_v4  ;;  %v4346_v31 = vsub.f32 %v9881_v34, %v4282_v4  ;;  %v4339_v16 = vsub.f32 %v9877_v46, %v4273_v36 }
 0x862   : > { %6511 = vpow2.f32 %v4469_v6  ;;  %v4340_v53 = vsub.f32 %v9873_v22, %v4273_v36 }
 0x863   : > { %v4471_v9 = vmul.f32 1.442695, %v4345_v45  ;;  %v4473_v26 = vmul.f32 1.442695, %v4346_v31  ;;  %v4459_v60 = vmul.f32 1.442695, %v4339_v16 }
 0x864   : > { %v4461_v35 = vmul.f32 1.442695, %v4340_v53  ;;  %v4276_v25 = vpop.xlane.xlu1 %4275  ;;  %v4267_v21 = vpop.xlane.xlu0 %4266 }
 0x865   : > { %6513 = vpow2.f32 %v4471_v9  ;;  %v4341_v33 = vsub.f32 %v9894_v8, %v4276_v25  ;;  %v4342_v2 = vsub.f32 %v9887_v3, %v4276_v25  ;;  %v4335_v29 = vsub.f32 %v9892_v7, %v4267_v21 }
 0x866   : > { %6515 = vpow2.f32 %v4473_v26  ;;  %v4336_v34 = vsub.f32 %v9883_v17, %v4267_v21 }
 0x867   : > { %6517 = vpow2.f32 %v4459_v60  ;;  %v4463_v46 = vmul.f32 1.442695, %v4341_v33  ;;  %v4465_v4 = vmul.f32 1.442695, %v4342_v2  ;;  %v4451_v22 = vmul.f32 1.442695, %v4335_v29 }
 0x868   : > { %6519 = vpow2.f32 %v4461_v35  ;;  %v4453_v36 = vmul.f32 1.442695, %v4336_v34  ;;  %v4270_v6 = vpop.xlane.xlu1 %4269  ;;  %v4261_v53 = vpop.xlane.xlu0 %4260 }
 0x869   : > { %6521 = vpow2.f32 %v4463_v46  ;;  %v4337_v58 = vsub.f32 %v9908_v47, %v4270_v6  ;;  %v4338_v8 = vsub.f32 %v9901_v11, %v4270_v6  ;;  %v4331_v3 = vsub.f32 %v9906_v1, %v4261_v53 }
 0x86a   : > { %6523 = vpow2.f32 %v4465_v4  ;;  %v4332_v7 = vsub.f32 %v9897_v48, %v4261_v53 }
 0x86b   : > { %6525 = vpow2.f32 %v4451_v22  ;;  %v4455_v17 = vmul.f32 1.442695, %v4337_v58  ;;  %v4457_v25 = vmul.f32 1.442695, %v4338_v8  ;;  %v4443_v31 = vmul.f32 1.442695, %v4331_v3 }
 0x86c   : > { %6527 = vpow2.f32 %v4453_v36  ;;  %v4445_v60 = vmul.f32 1.442695, %v4332_v7  ;;  %v4264_v26 = vpop.xlane.xlu1 %4263  ;;  %v4255_v20 = vpop.xlane.xlu0 %4254 }
 0x86d   : > { %6529 = vpow2.f32 %v4455_v17  ;;  %v4333_v45 = vsub.f32 %v9925_v61, %v4264_v26  ;;  %v4334_v47 = vsub.f32 %v9916_v63, %v4264_v26  ;;  %v4327_v11 = vsub.f32 %v9922_v37, %v4255_v20 }
 0x86e   : > { %v10145_v16 = vpop.eup %6509  ;;  %6531 = vpow2.f32 %v4457_v25  ;;  %v4328_v48 = vsub.f32 %v9911_v50, %v4255_v20 }
 0x86f   : > { %v10148_v1 = vpop.eup %6511  ;;  %6533 = vpow2.f32 %v4443_v31  ;;  %v4447_v9 = vmul.f32 1.442695, %v4333_v45  ;;  %v4449_v35 = vmul.f32 1.442695, %v4334_v47  ;;  %v4435_v21 = vmul.f32 1.442695, %v4327_v11 }
 0x870   : > { %6535 = vpow2.f32 %v4445_v60  ;;  %v4437_v33 = vmul.f32 1.442695, %v4328_v48  ;;  %v4258_v2 = vpop.xlane.xlu1 %4257  ;;  %v4249_v29 = vpop.xlane.xlu0 %4248  ;;  %v4565_v63 = vadd.f32 %v10148_v1, %v10145_v16 }
 0x871   : > { %6537 = vpow2.f32 %v4447_v9  ;;  %v4329_v37 = vsub.f32 %v9944_v43, %v4258_v2  ;;  %v4330_v61 = vsub.f32 %v9934_v38, %v4258_v2  ;;  %v4323_v50 = vsub.f32 %v9940_v24, %v4249_v29 }
 0x872   : > { %v10155_v34 = vpop.eup %6513  ;;  %6539 = vpow2.f32 %v4449_v35  ;;  %v4324_v46 = vsub.f32 %v9929_v12, %v4249_v29  ;;  %4566 = vadd.xlane.f32.xlu0 %v4565_v63 }
 0x873   : > { %v10158_v4 = vpop.eup %6515  ;;  %6541 = vpow2.f32 %v4435_v21  ;;  %v4439_v22 = vmul.f32 1.442695, %v4329_v37  ;;  %v4441_v36 = vmul.f32 1.442695, %v4330_v61  ;;  %v4427_v6 = vmul.f32 1.442695, %v4323_v50 }
 0x874   : > { %v10160_v53 = vpop.eup %6517  ;;  %6543 = vpow2.f32 %v4437_v33  ;;  %v4429_v43 = vmul.f32 1.442695, %v4324_v46  ;;  %v4252_v58 = vpop.xlane.xlu1 %4251  ;;  %v4568_v24 = vadd.f32 %v10158_v4, %v10155_v34 }
 0x875   : > { %v4243_v38 = vpop.xlane.xlu0 %4242  ;;  %v10164_v8 = vpop.eup %6519  ;;  %6545 = vpow2.f32 %v4439_v22  ;;  %v4325_v12 = vsub.f32 %v9964_v19, %v4252_v58  ;;  %v4326_v3 = vsub.f32 %v9954_v0, %v4252_v58 }
 0x876   : > { %v4319_v7 = vsub.f32 %v9960_v40, %v4243_v38  ;;  %v10169_v17 = vpop.eup %6521  ;;  %6547 = vpow2.f32 %v4441_v36  ;;  %v4320_v25 = vsub.f32 %v9948_v28, %v4243_v38  ;;  %4569 = vadd.xlane.f32.xlu1 %v4568_v24  ;;  %v4559_v31 = vadd.f32 %v10164_v8, %v10160_v53 }
 0x877   : > { %v10174_v60 = vpop.eup %6523  ;;  %6549 = vpow2.f32 %v4427_v6  ;;  %v4431_v26 = vmul.f32 1.442695, %v4325_v12  ;;  %v4433_v20 = vmul.f32 1.442695, %v4326_v3 }
 0x878   : > { %v4419_v45 = vmul.f32 1.442695, %v4319_v7  ;;  %v10176_v19 = vpop.eup %6525  ;;  %6551 = vpow2.f32 %v4429_v43  ;;  %v4421_v0 = vmul.f32 1.442695, %v4320_v25  ;;  %4560 = vadd.xlane.f32.xlu0 %v4559_v31  ;;  %v4246_v40 = vpop.xlane.xlu1 %4245  ;;  %v4562_v28 = vadd.f32 %v10174_v60, %v10169_v17 }
 0x879   : > { %v4237_v47 = vpop.xlane.xlu0 %4236  ;;  %v10180_v11 = vpop.eup %6527  ;;  %6553 = vpow2.f32 %v4431_v26  ;;  %v4321_v48 = vsub.f32 %v9984_v18, %v4246_v40  ;;  %v4322_v9 = vsub.f32 %v9974_v39, %v4246_v40 }
 0x87a   : > { %v4315_v35 = vsub.f32 %v9980_v55, %v4237_v47  ;;  %v10185_v21 = vpop.eup %6529  ;;  %6555 = vpow2.f32 %v4433_v20  ;;  %v4316_v33 = vsub.f32 %v9968_v42, %v4237_v47  ;;  %4563 = vadd.xlane.f32.xlu1 %v4562_v28  ;;  %v4553_v2 = vadd.f32 %v10180_v11, %v10176_v19 }
 0x87b   : > { %v10190_v29 = vpop.eup %6531  ;;  %6557 = vpow2.f32 %v4419_v45  ;;  %v4423_v63 = vmul.f32 1.442695, %v4321_v48  ;;  %v4425_v37 = vmul.f32 1.442695, %v4322_v9 }
 0x87c   : > { %v4411_v61 = vmul.f32 1.442695, %v4315_v35  ;;  %v10192_v18 = vpop.eup %6533  ;;  %6559 = vpow2.f32 %v4421_v0  ;;  %v4413_v39 = vmul.f32 1.442695, %v4316_v33  ;;  %4554 = vadd.xlane.f32.xlu0 %v4553_v2  ;;  %v4240_v55 = vpop.xlane.xlu1 %4239  ;;  %v4556_v50 = vadd.f32 %v10190_v29, %v10185_v21 }
 0x87d   : > { %v10196_v42 = vpop.eup %6535  ;;  %6561 = vpow2.f32 %v4423_v63  ;;  %v4317_v46 = vsub.f32 %v9996_v51, %v4240_v55  ;;  %v4318_v22 = vsub.f32 %v9990_v23, %v4240_v55 }
 0x87e   : > { %v10200_v36 = vpop.eup %6537  ;;  %6563 = vpow2.f32 %v4425_v37  ;;  %4557 = vadd.xlane.f32.xlu1 %v4556_v50  ;;  %v4547_v6 = vadd.f32 %v10196_v42, %v10192_v18  ;;  %v3905_v50 = vld [vmem:[%s6905_s22 + $0x58] sm:$0xf] }
 0x87f   : > { %v10204_v43 = vpop.eup %6539  ;;  %6565 = vpow2.f32 %v4411_v61  ;;  %v4415_v58 = vmul.f32 1.442695, %v4317_v46  ;;  %v4417_v38 = vmul.f32 1.442695, %v4318_v22  ;;  %v3907_v46 = vpack.c.bf16 %v3905_v50, %v3905_v50  ;;  %v4742_v22 = vld [vmem:[%s6905_s22 + $0x30] sm:$0xf0] }
 0x880   : > { %v10206_v24 = vpop.eup %6541  ;;  %6567 = vpow2.f32 %v4413_v39  ;;  %4548 = vadd.xlane.f32.xlu0 %v4547_v6  ;;  %v4550_v51 = vadd.f32 %v10204_v43, %v10200_v36  ;;  %v4743_v6 = vld [vmem:[%s6905_s22 + $0x38] sm:$0xf0] }
 0x881   : > { %v10210_v23 = vpop.eup %6543  ;;  %6569 = vpow2.f32 %v4415_v58  ;;  %4731 = vmatprep.mubr.bf16.mxu1 %v3907_v46  ;;  %v4744_v58 = vpack.c.bf16 %v4742_v22, %v4742_v22 }
 0x882   : > { %v10212_v12 = vpop.eup %6545  ;;  %6571 = vpow2.f32 %v4417_v38  ;;  %4551 = vadd.xlane.f32.xlu1 %v4550_v51  ;;  %v4541_v3 = vadd.f32 %v10210_v23, %v10206_v24  ;;  %v4745_v38 = vpack.c.bf16 %v4743_v6, %v4743_v6 }
 0x883   : > { %v10216_v7 = vpop.eup %6547  ;;  %v4752_v51 = vrot.slane %v4744_v58, 2 }
 0x884   : > { %v10218_v25 = vpop.eup %6549  ;;  %4542 = vadd.xlane.f32.xlu0 %v4541_v3  ;;  %v4544_v31 = vadd.f32 %v10216_v7, %v10212_v12 }
 0x885   : > { %v10222_v26 = vpop.eup %6551 }
 0x886   : > { %v10224_v20 = vpop.eup %6553  ;;  %4545 = vadd.xlane.f32.xlu1 %v4544_v31  ;;  %v4535_v45 = vadd.f32 %v10222_v26, %v10218_v25  ;;  %v4753_v31 = vrot.slane %v4745_v38, 2 }
 0x887   : > { %v10228_v0 = vpop.eup %6555 }
 0x888   : > { %v10230_v40 = vpop.eup %6557  ;;  %4536 = vadd.xlane.f32.xlu0 %v4535_v45  ;;  %v4538_v47 = vadd.f32 %v10228_v0, %v10224_v20 }
 0x889   : > { %v10234_v28 = vpop.eup %6559 }
 0x88a   : > { %v10236_v48 = vpop.eup %6561  ;;  %4539 = vadd.xlane.f32.xlu1 %v4538_v47  ;;  %v4529_v9 = vadd.f32 %v10234_v28, %v10230_v40 }
 0x88b   : > { %v10240_v35 = vpop.eup %6563 }
 0x88c   : > { %v10242_v33 = vpop.eup %6565  ;;  %4530 = vadd.xlane.f32.xlu0 %v4529_v9  ;;  %v4532_v2 = vadd.f32 %v10240_v35, %v10236_v48 }
 0x88d   : > { %v10246_v63 = vpop.eup %6567 }
 0x88e   : > { %v10248_v37 = vpop.eup %6569  ;;  %4533 = vadd.xlane.f32.xlu1 %v4532_v2  ;;  %v4523_v61 = vadd.f32 %v10246_v63, %v10242_v33 }
 0x88f   : > { %v10252_v39 = vpop.eup %6571 }
 0x890   : > { %4524 = vadd.xlane.f32.xlu0 %v4523_v61  ;;  %v4526_v55 = vadd.f32 %v10252_v39, %v10248_v37 }
 0x892   : > { %4527 = vadd.xlane.f32.xlu1 %v4526_v55 }
 0x8bb   : > { %v4519_v3 = vpop.xlane.xlu0 %4518 }
 0x8bc   : > { %6573 = vrcp.f32 %v4519_v3 }
 0x8bd   : > { %4756 = vxpose.xlu0.c.b16.start.end [1/1] (short) %v4752_v51, 128 }
 0x8bf   : > { %v4522_v45 = vpop.xlane.xlu1 %4521  ;;  %4772 = vxpose.xlu1.c.b16.start.end [1/1] (short) %v4753_v31, 128 }
 0x8c0   : > { %6575 = vrcp.f32 %v4522_v45 }
 0x8c1   : > { %v4513_v47 = vpop.xlane.xlu0 %4512 }
 0x8c2   : > { %6577 = vrcp.f32 %v4513_v47 }
 0x8c3   : > { %v4516_v9 = vpop.xlane.xlu1 %4515 }
 0x8c4   : > { %6579 = vrcp.f32 %v4516_v9 }
 0x8c5   : > { %v4507_v2 = vpop.xlane.xlu0 %4506 }
 0x8c6   : > { %6581 = vrcp.f32 %v4507_v2 }
 0x8c7   : > { %v4510_v61 = vpop.xlane.xlu1 %4509 }
 0x8c8   : > { %6583 = vrcp.f32 %v4510_v61 }
 0x8c9   : > { %v4501_v55 = vpop.xlane.xlu0 %4500  ;;  %v6574_v50 = vpop.eup %6573 }
 0x8ca   : > { %6585 = vrcp.f32 %v4501_v55  ;;  %v4632_v58 = vmul.f32 %v6574_v50, %v10020_v15  ;;  %v4631_v51 = vmul.f32 %v6574_v50, %v10017_v41 }
 0x8cb   : > { %v4504_v46 = vpop.xlane.xlu1 %4503 }
 0x8cc   : > { %6587 = vrcp.f32 %v4504_v46 }
 0x8cd   : > { %v6576_v22 = vpop.eup %6575  ;;  %v4495_v6 = vpop.xlane.xlu0 %4494 }
 0x8ce   : > { %6589 = vrcp.f32 %v4495_v6  ;;  %v4634_v38 = vmul.f32 %v6576_v22, %v10030_v52  ;;  %v4633_v3 = vmul.f32 %v6576_v22, %v10027_v30 }
 0x8cf   : > { %v6578_v31 = vpop.eup %6577  ;;  %v4498_v45 = vpop.xlane.xlu1 %4497 }
 0x8d0   : > { %6591 = vrcp.f32 %v4498_v45  ;;  %v4682_v47 = vpack.c.bf16 %v4634_v38, %v4632_v58  ;;  %v4681_v9 = vpack.c.bf16 %v4633_v3, %v4631_v51  ;;  %v4628_v55 = vmul.f32 %v6578_v31, %v10036_v10 }
 0x8d1   : > { %v6580_v2 = vpop.eup %6579  ;;  %v4489_v61 = vpop.xlane.xlu0 %4488  ;;  %v4627_v46 = vmul.f32 %v6578_v31, %v10032_v27 }
 0x8d2   : > { %6593 = vrcp.f32 %v4489_v61  ;;  %4699 = vmatprep.subr.bf16.mxu1 %v4682_v47  ;;  %v4630_v15 = vmul.f32 %v6580_v2, %v10046_v49  ;;  %v4629_v52 = vmul.f32 %v6580_v2, %v10041_v56 }
 0x8d3   : > { %v6582_v41 = vpop.eup %6581  ;;  %v4492_v50 = vpop.xlane.xlu1 %4491  ;;  %4700 = vmatpush1.bf16.msra.mxu1 %v4681_v9 }
 0x8d4   : > { %6595 = vrcp.f32 %v4492_v50  ;;  %v4680_v30 = vpack.c.bf16 %v4630_v15, %v4628_v55  ;;  %v4679_v22 = vpack.c.bf16 %v4629_v52, %v4627_v46  ;;  %v4624_v38 = vmul.f32 %v6582_v41, %v10052_v14  ;;  %v12030_v52 = vld [vmem:[#allocation15_spill] sm:$0xff] }
 0x8d5   : > { %v6584_v6 = vpop.eup %6583  ;;  %v4483_v58 = vpop.xlane.xlu0 %4482  ;;  %v4623_v49 = vmul.f32 %v6582_v41, %v10048_v5  ;;  %v12031_v41 = vld [vmem:[#allocation102_spill] sm:$0xff] }
 0x8d6   : > { %6597 = vrcp.f32 %v4483_v58  ;;  %4701 = vmatprep.subr.bf16.mxu1 %v4680_v30  ;;  %v4626_v10 = vmul.f32 %v6584_v6, %v10062_v44  ;;  %v4625_v27 = vmul.f32 %v6584_v6, %v10057_v32  ;;  %v12032_v30 = vld [vmem:[#allocation51_spill] sm:$0xff]  ;;  %v12033_v58 = vld [vmem:[#allocation45_spill] sm:$0xff] }
 0x8d7   : > { %v6586_v51 = vpop.eup %6585  ;;  %v4486_v56 = vpop.xlane.xlu1 %4485  ;;  %4702 = vmatpush1.bf16.msra.mxu1 %v4679_v22 }
 0x8d8   : > { %6599 = vrcp.f32 %v4486_v56  ;;  %v4678_v3 = vpack.c.bf16 %v4626_v10, %v4624_v38  ;;  %v4677_v31 = vpack.c.bf16 %v4625_v27, %v4623_v49  ;;  %v4620_v9 = vmul.f32 %v6586_v51, %v10068_v54  ;;  %v12034_v10 = vld [vmem:[#allocation120_spill] sm:$0xff]  ;;  %v12035_v27 = vld [vmem:[#allocation10_spill] sm:$0xff]  ;;  %v12036_v56 = vld [vmem:[#allocation47_spill] sm:$0xff] }
 0x8d9   : > { %v6588_v45 = vpop.eup %6587  ;;  %v4477_v47 = vpop.xlane.xlu0 %4476  ;;  %v4619_v44 = vmul.f32 %v6586_v51, %v10064_v57 }
 0x8da   : > { %6601 = vrcp.f32 %v4477_v47  ;;  %4703 = vmatprep.subr.bf16.mxu1 %v4678_v3  ;;  %v4622_v14 = vmul.f32 %v6588_v45, %v10076_v13  ;;  %v4621_v5 = vmul.f32 %v6588_v45, %v10072_v62 }
 0x8db   : > { %v6590_v2 = vpop.eup %6589  ;;  %v4480_v32 = vpop.xlane.xlu1 %4479  ;;  %4704 = vmatpush1.bf16.msra.mxu1 %v4677_v31 }
 0x8dc   : > { %6603 = vrcp.f32 %v4480_v32  ;;  %v4676_v61 = vpack.c.bf16 %v4622_v14, %v4620_v9  ;;  %v4675_v55 = vpack.c.bf16 %v4621_v5, %v4619_v44  ;;  %v4616_v46 = vmul.f32 %v6590_v2, %v10082_v59  ;;  %v12037_v9 = vld [vmem:[#allocation113_spill] sm:$0xff]  ;;  %v12038_v44 = vld [vmem:[#allocation46_spill] sm:$0xff] }
 0x8dd   : > { %v6592_v15 = vpop.eup %6591  ;;  %v4615_v50 = vmul.f32 %v6590_v2, %v12031_v41  ;;  %v12039_v2 = vld [vmem:[#allocation40_spill] sm:$0xff]  ;;  %v12041_v41 = vld [vmem:[#allocation14_spill] sm:$0xff] }
 0x8de   : > { %4705 = vmatprep.subr.bf16.mxu1 %v4676_v61  ;;  %v4618_v54 = vmul.f32 %v6592_v15, %v12030_v52  ;;  %v4617_v13 = vmul.f32 %v6592_v15, %v12032_v30  ;;  %v12040_v61 = vld [vmem:[#allocation28_spill] sm:$0xff]  ;;  %v12042_v30 = vld [vmem:[#allocation78_spill] sm:$0xff] }
 0x8df   : > { %v6594_v22 = vpop.eup %6593  ;;  %4706 = vmatpush1.bf16.msra.mxu1 %v4675_v55 }
 0x8e0   : > { %v4674_v57 = vpack.c.bf16 %v4618_v54, %v4616_v46  ;;  %v4673_v62 = vpack.c.bf16 %v4617_v13, %v4615_v50  ;;  %v4612_v38 = vmul.f32 %v6594_v22, %v12033_v58  ;;  %v4611_v51 = vmul.f32 %v6594_v22, %v12035_v27  ;;  %v12043_v22 = vld [vmem:[#allocation44_spill] sm:$0xff] }
 0x8e1   : > { %v6596_v6 = vpop.eup %6595 }
 0x8e2   : > { %4707 = vmatprep.subr.bf16.mxu1 %v4674_v57  ;;  %v4614_v49 = vmul.f32 %v6596_v6, %v12034_v10  ;;  %v4613_v59 = vmul.f32 %v6596_v6, %v12036_v56 }
 0x8e3   : > { %v6598_v3 = vpop.eup %6597  ;;  %4708 = vmatpush1.bf16.msra.mxu1 %v4673_v62  ;;  %v12044_v62 = vld [vmem:[#allocation117_spill] sm:$0xff] }
 0x8e4   : > { %v4672_v31 = vpack.c.bf16 %v4614_v49, %v4612_v38  ;;  %v4671_v45 = vpack.c.bf16 %v4613_v59, %v4611_v51  ;;  %v4608_v14 = vmul.f32 %v6598_v3, %v12037_v9  ;;  %v4607_v32 = vmul.f32 %v6598_v3, %v12039_v2 }
 0x8e5   : > { %v6600_v47 = vpop.eup %6599 }
 0x8e6   : > { %4709 = vmatprep.subr.bf16.mxu1 %v4672_v31  ;;  %v4610_v5 = vmul.f32 %v6600_v47, %v12038_v44  ;;  %v4609_v55 = vmul.f32 %v6600_v47, %v12040_v61 }
 0x8e7   : > { %v6602_v15 = vpop.eup %6601  ;;  %4710 = vmatpush1.bf16.msra.mxu1 %v4671_v45 }
 0x8e8   : > { %v4670_v46 = vpack.c.bf16 %v4610_v5, %v4608_v14  ;;  %v4669_v52 = vpack.c.bf16 %v4609_v55, %v4607_v32  ;;  %v4604_v50 = vmul.f32 %v6602_v15, %v12041_v41  ;;  %v4603_v57 = vmul.f32 %v6602_v15, %v12043_v22 }
 0x8e9   : > { %v6604_v54 = vpop.eup %6603 }
 0x8ea   : > { %4711 = vmatprep.subr.bf16.mxu1 %v4670_v46  ;;  %v4606_v13 = vmul.f32 %v6604_v54, %v12042_v30  ;;  %v4605_v6 = vmul.f32 %v6604_v54, %v12044_v62 }
 0x8eb   : > { %4712 = vmatpush1.bf16.msra.mxu1 %v4669_v52 }
 0x8ec   : > { %v4668_v58 = vpack.c.bf16 %v4606_v13, %v4604_v50  ;;  %v4667_v38 = vpack.c.bf16 %v4605_v6, %v4603_v57 }
 0x8ee   : > { %4713 = vmatprep.subr.bf16.mxu1 %v4668_v58 }
 0x8ef   : > { %4714 = vmatpush1.bf16.msra.mxu1 %v4667_v38 }
 0x8fb   : > { %v4567_v10 = vpop.xlane.xlu0 %4566 }
 0x8fc   : > { %6605 = vrcp.f32 %v4567_v10 }
 0x8ff   : > { %v4570_v49 = vpop.xlane.xlu1 %4569 }
 0x900   : > { %6607 = vrcp.f32 %v4570_v49 }
 0x901   : > { %v4561_v27 = vpop.xlane.xlu0 %4560 }
 0x902   : > { %6609 = vrcp.f32 %v4561_v27 }
 0x903   : > { %v4564_v51 = vpop.xlane.xlu1 %4563 }
 0x904   : > { %6611 = vrcp.f32 %v4564_v51 }
 0x905   : > { %v4555_v56 = vpop.xlane.xlu0 %4554 }
 0x906   : > { %6613 = vrcp.f32 %v4555_v56 }
 0x907   : > { %v4558_v59 = vpop.xlane.xlu1 %4557 }
 0x908   : > { %6615 = vrcp.f32 %v4558_v59 }
 0x909   : > { %v4549_v3 = vpop.xlane.xlu0 %4548  ;;  %v6606_v31 = vpop.eup %6605 }
 0x90a   : > { %6617 = vrcp.f32 %v4549_v3  ;;  %v4664_v14 = vmul.f32 %v6606_v31, %v10148_v1  ;;  %v4663_v5 = vmul.f32 %v6606_v31, %v10145_v16 }
 0x90b   : > { %v4552_v45 = vpop.xlane.xlu1 %4551 }
 0x90c   : > { %6619 = vrcp.f32 %v4552_v45 }
 0x90d   : > { %v6608_v47 = vpop.eup %6607  ;;  %v4543_v9 = vpop.xlane.xlu0 %4542 }
 0x90e   : > { %6621 = vrcp.f32 %v4543_v9  ;;  %v4666_v44 = vmul.f32 %v6608_v47, %v10158_v4  ;;  %v4665_v2 = vmul.f32 %v6608_v47, %v10155_v34 }
 0x90f   : > { %v6610_v32 = vpop.eup %6609  ;;  %v4546_v61 = vpop.xlane.xlu1 %4545 }
 0x910   : > { %6623 = vrcp.f32 %v4546_v61  ;;  %v4698_v55 = vpack.c.bf16 %v4666_v44, %v4664_v14  ;;  %v4697_v15 = vpack.c.bf16 %v4665_v2, %v4663_v5  ;;  %v4660_v54 = vmul.f32 %v6610_v32, %v10164_v8 }
 0x911   : > { %v6612_v46 = vpop.eup %6611  ;;  %v4537_v52 = vpop.xlane.xlu0 %4536  ;;  %v4659_v41 = vmul.f32 %v6610_v32, %v10160_v53 }
 0x912   : > { %6625 = vrcp.f32 %v4537_v52  ;;  %4715 = vmatprep.subr.bf16.mxu1 %v4698_v55  ;;  %v4662_v1 = vmul.f32 %v6612_v46, %v10174_v60  ;;  %v4661_v4 = vmul.f32 %v6612_v46, %v10169_v17 }
 0x913   : > { %v6614_v16 = vpop.eup %6613  ;;  %v4540_v50 = vpop.xlane.xlu1 %4539  ;;  %4716 = vmatpush2.bf16.msra.mxu1 %v4697_v15 }
 0x914   : > { %6627 = vrcp.f32 %v4540_v50  ;;  %v4696_v34 = vpack.c.bf16 %v4662_v1, %v4660_v54  ;;  %v4695_v30 = vpack.c.bf16 %v4661_v4, %v4659_v41  ;;  %v4656_v57 = vmul.f32 %v6614_v16, %v10180_v11  ;;  %v12045_v1 = vld [vmem:[#allocation7_spill] sm:$0xff]  ;;  %v12046_v41 = vld [vmem:[#allocation5_spill] sm:$0xff] }
 0x915   : > { %v6616_v13 = vpop.eup %6615  ;;  %v4531_v22 = vpop.xlane.xlu0 %4530  ;;  %v4655_v60 = vmul.f32 %v6614_v16, %v10176_v19  ;;  %v4837_v4 = vsel %vm319_vm0, %v12046_v41, 0 }
 0x916   : > { %6629 = vrcp.f32 %v4531_v22  ;;  %4717 = vmatprep.subr.bf16.mxu1 %v4696_v34  ;;  %v4658_v8 = vmul.f32 %v6616_v13, %v10190_v29  ;;  %v4657_v53 = vmul.f32 %v6616_v13, %v10185_v21 }
 0x917   : > { %v6618_v62 = vpop.eup %6617  ;;  %v4534_v17 = vpop.xlane.xlu1 %4533  ;;  %4718 = vmatpush2.bf16.msra.mxu1 %v4695_v30 }
 0x918   : > { %6631 = vrcp.f32 %v4534_v17  ;;  %v4694_v6 = vpack.c.bf16 %v4658_v8, %v4656_v57  ;;  %v4693_v58 = vpack.c.bf16 %v4657_v53, %v4655_v60  ;;  %v4652_v49 = vmul.f32 %v6618_v62, %v10196_v42  ;;  %v10347_v57 = vpop.f32.mrf.mxu0 }
 0x919   : > { %v6620_v38 = vpop.eup %6619  ;;  %v4525_v10 = vpop.xlane.xlu0 %4524  ;;  %v4651_v29 = vmul.f32 %v6618_v62, %v10192_v18  ;;  %12048 = vst [vmem:[#allocation27_spill] sm:$0xff] %v10347_v57 }
 0x91a   : > { %6633 = vrcp.f32 %v4525_v10  ;;  %4719 = vmatprep.subr.bf16.mxu1 %v4694_v6  ;;  %v4654_v11 = vmul.f32 %v6620_v38, %v10204_v43  ;;  %v4653_v19 = vmul.f32 %v6620_v38, %v10200_v36  ;;  %v10349_v60 = vpop.f32.mrf.mxu0 }
 0x91b   : > { %v6622_v27 = vpop.eup %6621  ;;  %v4528_v21 = vpop.xlane.xlu1 %4527  ;;  %4720 = vmatpush2.bf16.msra.mxu1 %v4693_v58 }
 0x91c   : > { %6635 = vrcp.f32 %v4528_v21  ;;  %v4692_v51 = vpack.c.bf16 %v4654_v11, %v4652_v49  ;;  %v4691_v56 = vpack.c.bf16 %v4653_v19, %v4651_v29  ;;  %v4648_v3 = vmul.f32 %v6622_v27, %v10210_v23  ;;  %v10353_v53 = vpop.f32.mrf.mxu0 }
 0x91d   : > { %v6624_v59 = vpop.eup %6623  ;;  %v4647_v31 = vmul.f32 %v6622_v27, %v10206_v24  ;;  %12049 = vst [vmem:[#allocation16_spill] sm:$0xff] %v10353_v53 }
 0x91e   : > { %4721 = vmatprep.subr.bf16.mxu1 %v4692_v51  ;;  %v4650_v42 = vmul.f32 %v6624_v59, %v10216_v7  ;;  %v4649_v43 = vmul.f32 %v6624_v59, %v10212_v12  ;;  %v10355_v17 = vpop.f32.mrf.mxu0 }
 0x91f   : > { %v6626_v45 = vpop.eup %6625  ;;  %4722 = vmatpush2.bf16.msra.mxu1 %v4691_v56  ;;  %12050 = vst [vmem:[#allocation35_spill] sm:$0xff] %v10355_v17 }
 0x920   : > { %v4690_v18 = vpack.c.bf16 %v4650_v42, %v4648_v3  ;;  %v4689_v36 = vpack.c.bf16 %v4649_v43, %v4647_v31  ;;  %v4644_v9 = vmul.f32 %v6626_v45, %v10222_v26  ;;  %v4643_v44 = vmul.f32 %v6626_v45, %v10218_v25  ;;  %v10359_v6 = vpop.f32.mrf.mxu0 }
 0x921   : > { %v6628_v47 = vpop.eup %6627  ;;  %v4780_v22 = vpop.trf.xlu1 }
 0x922   : > { %4723 = vmatprep.subr.bf16.mxu1 %v4690_v18  ;;  %v4646_v14 = vmul.f32 %v6628_v47, %v10228_v0  ;;  %v4645_v23 = vmul.f32 %v6628_v47, %v10224_v20  ;;  %v10361_v38 = vpop.f32.mrf.mxu0 }
 0x923   : > { %v6630_v5 = vpop.eup %6629  ;;  %4724 = vmatpush2.bf16.msra.mxu1 %v4689_v36 }
 0x924   : > { %v4688_v7 = vpack.c.bf16 %v4646_v14, %v4644_v9  ;;  %v4687_v24 = vpack.c.bf16 %v4645_v23, %v4643_v44  ;;  %v4640_v12 = vmul.f32 %v6630_v5, %v10234_v28  ;;  %v4639_v61 = vmul.f32 %v6630_v5, %v10230_v40  ;;  %v10365_v10 = vpop.f32.mrf.mxu0 }
 0x925   : > { %v6632_v2 = vpop.eup %6631  ;;  %v4781_v8 = vpop.trf.xlu1  ;;  %12051 = vst [vmem:[#allocation92_spill] sm:$0xff] %v10365_v10 }
 0x926   : > { %4725 = vmatprep.subr.bf16.mxu1 %v4688_v7  ;;  %v4642_v32 = vmul.f32 %v6632_v2, %v10240_v35  ;;  %v4641_v26 = vmul.f32 %v6632_v2, %v10236_v48  ;;  %v3904_v35 = vld [vmem:[%s6905_s22 + $0x50] sm:$0xf]  ;;  %v10367_v11 = vpop.f32.mrf.mxu0 }
 0x927   : > { %v6634_v0 = vpop.eup %6633  ;;  %4726 = vmatpush2.bf16.msra.mxu1 %v4687_v24  ;;  %v3906_v48 = vpack.c.bf16 %v3904_v35, %v3904_v35 }
 0x928   : > { %v4686_v25 = vpack.c.bf16 %v4642_v32, %v4640_v12  ;;  %v4685_v55 = vpack.c.bf16 %v4641_v26, %v4639_v61  ;;  %v4636_v15 = vmul.f32 %v6634_v0, %v10246_v63  ;;  %v4635_v52 = vmul.f32 %v6634_v0, %v10242_v33  ;;  %v4764_v33 = vpop.trf.xlu0  ;;  %v10371_v29 = vpop.f32.mrf.mxu0 }
 0x929   : > { %v6636_v20 = vpop.eup %6635  ;;  %v12047_v63 = vmov 0   ;;  %v4782_v62 = vpop.trf.xlu1 }
 0x92a   : > { %4727 = vmatprep.subr.bf16.mxu1 %v4686_v25  ;;  %v4638_v46 = vmul.f32 %v6636_v20, %v10252_v39  ;;  %v4637_v28 = vmul.f32 %v6636_v20, %v10248_v37  ;;  %v10373_v27 = vpop.f32.mrf.mxu0 }
 0x92b   : > { %4728 = vmatpush2.bf16.msra.mxu1 %v4685_v55 }
 0x92c   : > { %v4684_v54 = vpack.c.bf16 %v4638_v46, %v4636_v15  ;;  %v4683_v40 = vpack.c.bf16 %v4637_v28, %v4635_v52  ;;  %v4765_v37 = vpop.trf.xlu0  ;;  %v10377_v21 = vpop.f32.mrf.mxu0 }
 0x92d   : > { %v4783_v58 = vpop.trf.xlu1 }
 0x92e   : > { %4729 = vmatprep.subr.bf16.mxu1 %v4684_v54  ;;  %v10379_v56 = vpop.f32.mrf.mxu0 }
 0x92f   : > { %4730 = vmatpush2.bf16.msra.mxu1 %v4683_v40 }
 0x930   : > { %5796 = vmatprep.subr.msk.bf16.mxu1 %vm319_vm0, %v12045_v1  ;;  %v4766_v39 = vpop.trf.xlu0  ;;  %v10383_v59 = vpop.f32.mrf.mxu0 }
 0x931   : > { %v4784_v49 = vpop.trf.xlu1 }
 0x932   : > { %4732 = vmatmul.mubr.bf16.vlgmr.msra.gmra.mxu1 %v3906_v48  ;;  %v10385_v42 = vpop.f32.mrf.mxu0 }
 0x933   : > { %4857 = vmatpush1.bf16.msra.mxu1 %v4837_v4  ;;  %4874 = vmatprep.mubr.bf16.mxu1 %v12047_v63 }
 0x934   : > { %v4767_v16 = vpop.trf.xlu0  ;;  %v10388_v31 = vpop.f32.mrf.mxu0 }
 0x935   : > { %v4785_v19 = vpop.trf.xlu1 }
 0x936   : > { %v10390_v43 = vpop.f32.mrf.mxu0 }
 0x938   : > { %v4768_v50 = vpop.trf.xlu0  ;;  %v10392_v45 = vpop.f32.mrf.mxu0 }
 0x939   : > { %v4786_v51 = vpop.trf.xlu1 }
 0x93a   : > { %5797 = vmatmul.mubr.msk.bf16.vlgmr.msra.gmra.mxu1 %vm270_vm1, %v4764_v33  ;;  %v10394_v18 = vpop.f32.mrf.mxu0 }
 0x93b   : > { %4884 = vmatprep.mubr.bf16.mxu1 %v12047_v63 }
 0x93c   : > { %v4769_v34 = vpop.trf.xlu0  ;;  %v10396_v36 = vpop.f32.mrf.mxu0 }
 0x93d   : > { %v4787_v3 = vpop.trf.xlu1 }
 0x93e   : > { %v10398_v47 = vpop.f32.mrf.mxu0 }
 0x940   : > { %v4770_v30 = vpop.trf.xlu0  ;;  %v10400_v9 = vpop.f32.mrf.mxu0 }
 0x942   : > { %5798 = vmatmul.mubr.msk.bf16.gmra.mxu1 %vm270_vm1, %v4765_v37  ;;  %v10402_v14 = vpop.f32.mrf.mxu0 }
 0x943   : > { %4894 = vmatprep.mubr.bf16.mxu1 %v12047_v63 }
 0x944   : > { %v4771_v13 = vpop.trf.xlu0  ;;  %v10404_v44 = vpop.f32.mrf.mxu0 }
 0x946   : > { %v10406_v23 = vpop.f32.mrf.mxu0 }
 0x948   : > { %v10408_v5 = vpop.f32.mrf.mxu0 }
 0x94a   : > { %5799 = vmatmul.mubr.msk.bf16.gmra.mxu1 %vm270_vm1, %v4766_v39  ;;  %v2101_v7 = vpop.f32.mrf.mxu0 }
 0x94b   : > { %4904 = vmatprep.mubr.bf16.mxu1 %v12047_v63 }
 0x94c   : > { %v10410_v24 = vpop.f32.mrf.mxu0 }
 0x94e   : > { %v10412_v2 = vpop.f32.mrf.mxu0 }
 0x950   : > { %v2109_v12 = vpop.f32.mrf.mxu0 }
 0x952   : > { %5800 = vmatmul.mubr.msk.bf16.gmra.mxu1 %vm270_vm1, %v4767_v16  ;;  %v2111_v32 = vpop.f32.mrf.mxu0 }
 0x953   : > { %4914 = vmatprep.mubr.bf16.mxu1 %v12047_v63 }
 0x954   : > { %v2113_v26 = vpop.f32.mrf.mxu0 }
 0x956   : > { %v2115_v55 = vpop.f32.mrf.mxu0 }
 0x958   : > { %v10418_v46 = vpop.f32.mrf.mxu0 }
 0x959   : > { %12053 = vst [vmem:[#allocation59_spill] sm:$0xff] %v10418_v46 }
 0x95a   : > { %5801 = vmatmul.mubr.msk.bf16.gmra.mxu1 %vm270_vm1, %v4768_v50  ;;  %v10424_v35 = vpop.f32.mrf.mxu0 }
 0x95b   : > { %4924 = vmatprep.mubr.bf16.mxu1 %v12047_v63  ;;  %12055 = vst [vmem:[#allocation21_spill] sm:$0xff] %v10424_v35 }
 0x95c   : > { %v10430_v48 = vpop.f32.mrf.mxu0 }
 0x95d   : > { %12057 = vst [vmem:[#allocation20_spill] sm:$0xff] %v10430_v48 }
 0x95e   : > { %v10436_v4 = vpop.f32.mrf.mxu0 }
 0x95f   : > { %12059 = vst [vmem:[#allocation106_spill] sm:$0xff] %v10436_v4 }
 0x960   : > { %v10442_v37 = vpop.f32.mrf.mxu0 }
 0x961   : > { %12060 = vst [vmem:[#allocation87_spill] sm:$0xff] %v10442_v37 }
 0x962   : > { %5802 = vmatmul.mubr.msk.bf16.gmra.mxu1 %vm270_vm1, %v4769_v34  ;;  %v10448_v50 = vpop.f32.mrf.mxu0 }
 0x963   : > { %4934 = vmatprep.mubr.bf16.mxu1 %v12047_v63  ;;  %12061 = vst [vmem:[#allocation24_spill] sm:$0xff] %v10448_v50 }
 0x96a   : > { %5803 = vmatmul.mubr.msk.bf16.gmra.mxu1 %vm270_vm1, %v4770_v30 }
 0x96b   : > { %4944 = vmatprep.mubr.bf16.mxu1 %v12047_v63 }
 0x972   : > { %5804 = vmatmul.mubr.msk.bf16.gmra.mxu1 %vm270_vm1, %v4771_v13  ;;  %v10454_v13 = vpop.f32.mrf.mxu0 }
 0x973   : > { %4954 = vmatprep.mubr.bf16.mxu1 %v12047_v63  ;;  %12062 = vst [vmem:[#allocation80_spill] sm:$0xff] %v10454_v13 }
 0x97a   : > { %5805 = vmatmul.mubr.msk.bf16.gmra.mxu1 %vm270_vm1, %v4780_v22 }
 0x97b   : > { %4964 = vmatprep.mubr.bf16.mxu1 %v12047_v63 }
 0x982   : > { %5806 = vmatmul.mubr.msk.bf16.gmra.mxu1 %vm270_vm1, %v4781_v8 }
 0x983   : > { %4974 = vmatprep.mubr.bf16.mxu1 %v12047_v63 }
 0x98a   : > { %5807 = vmatmul.mubr.msk.bf16.gmra.mxu1 %vm270_vm1, %v4782_v62  ;;  %v10458_v62 = vpop.f32.mrf.mxu0 }
 0x98b   : > { %4984 = vmatprep.mubr.bf16.mxu1 %v12047_v63  ;;  %12063 = vst [vmem:[#allocation110_spill] sm:$0xff] %v10458_v62 }
 0x992   : > { %5808 = vmatmul.mubr.msk.bf16.gmra.mxu1 %vm270_vm1, %v4783_v58 }
 0x993   : > { %4994 = vmatprep.mubr.bf16.mxu1 %v12047_v63 }
 0x99a   : > { %5809 = vmatmul.mubr.msk.bf16.gmra.mxu1 %vm270_vm1, %v4784_v49 }
 0x99b   : > { %5004 = vmatprep.mubr.bf16.mxu1 %v12047_v63 }
 0x9a2   : > { %5810 = vmatmul.mubr.msk.bf16.gmra.mxu1 %vm270_vm1, %v4785_v19  ;;  %v10462_v19 = vpop.f32.mrf.mxu0 }
 0x9a3   : > { %5014 = vmatprep.mubr.bf16.mxu1 %v12047_v63  ;;  %12064 = vst [vmem:[#allocation82_spill] sm:$0xff] %v10462_v19 }
 0x9aa   : > { %5811 = vmatmul.mubr.msk.bf16.gmra.mxu1 %vm270_vm1, %v4786_v51 }
 0x9ab   : > { %5024 = vmatprep.mubr.bf16.mxu1 %v12047_v63 }
 0x9b2   : > { %5812 = vmatmul.mubr.msk.bf16.gmra.mxu1 %vm270_vm1, %v4787_v3 }
 0x9f2   : > { %v4733_v61 = vpop.f32.mrf.mxu1 }
 0x9f3   : > { %4740 = vst [vmem:[%s8912_s13 + $0x10] sm:$0xf] %v4733_v61  ;;  %v10464_v61 = vpop.f32.mrf.mxu0 }
 0x9f4   : > { %v4735_v0 = vpop.f32.mrf.mxu1  ;;  %12065 = vst [vmem:[#allocation22_spill] sm:$0xff] %v10464_v61 }
 0x9f5   : > { %4741 = vst [vmem:[%s8912_s13 + $0x18] sm:$0xf] %v4735_v0 }
 0x9f6   : > { %v4737_v25 = vpop.f32.mrf.mxu1 }
 0x9f8   : > { %v4738_v20 = vpop.f32.mrf.mxu1 }
 0x9f9   : > { %v10466_v20 = vpop.f32.mrf.mxu0 }
 0x9fa   : > { %v10416_v15 = vpop.f32.mrf.mxu1  ;;  %12066 = vst [vmem:[#allocation19_spill] sm:$0xff] %v10466_v20 }
 0x9fb   : > { %12052 = vst [vmem:[#allocation97_spill] sm:$0xff] %v10416_v15  ;;  %v10468_v13 = vpop.f32.mrf.mxu0 }
 0x9fc   : > { %v10420_v52 = vpop.f32.mrf.mxu1  ;;  %12067 = vst [vmem:[#allocation25_spill] sm:$0xff] %v10468_v13 }
 0x9fd   : > { %v10470_v62 = vpop.f32.mrf.mxu0 }
 0x9fe   : > { %v10422_v28 = vpop.f32.mrf.mxu1  ;;  %12068 = vst [vmem:[#allocation109_spill] sm:$0xff] %v10470_v62 }
 0x9ff   : > { %12054 = vst [vmem:[#allocation95_spill] sm:$0xff] %v10422_v28  ;;  %v10472_v28 = vpop.f32.mrf.mxu0 }
 0xa00   : > { %v10426_v54 = vpop.f32.mrf.mxu1  ;;  %12069 = vst [vmem:[#allocation23_spill] sm:$0xff] %v10472_v28 }
 0xa01   : > { %12056 = vst [vmem:[#allocation88_spill] sm:$0xff] %v10426_v54  ;;  %v10474_v54 = vpop.f32.mrf.mxu0 }
 0xa02   : > { %v10428_v40 = vpop.f32.mrf.mxu1  ;;  %12070 = vst [vmem:[#allocation111_spill] sm:$0xff] %v10474_v54 }
 0xa03   : > { %v10484_v62 = vpop.f32.mrf.mxu0 }
 0xa04   : > { %v10432_v1 = vpop.f32.mrf.mxu1 }
 0xa06   : > { %v10434_v41 = vpop.f32.mrf.mxu1 }
 0xa07   : > { %12058 = vst [vmem:[#allocation60_spill] sm:$0xff] %v10434_v41 }
 0xa08   : > { %v10438_v63 = vpop.f32.mrf.mxu1 }
 0xa0a   : > { %v10440_v33 = vpop.f32.mrf.mxu1 }
 0xa0c   : > { %v10444_v39 = vpop.f32.mrf.mxu1 }
 0xa0e   : > { %v10446_v16 = vpop.f32.mrf.mxu1 }
 0xa10   : > { %v10450_v34 = vpop.f32.mrf.mxu1 }
 0xa12   : > { %v10452_v30 = vpop.f32.mrf.mxu1 }
 0xa14   : > { %v4908_v22 = vpop.f32.mrf.mxu1 }
 0xa16   : > { %v10456_v8 = vpop.f32.mrf.mxu1 }
 0xa18   : > { %v10460_v58 = vpop.f32.mrf.mxu1 }
 0xa1a   : > { %v4916_v49 = vpop.f32.mrf.mxu1 }
 0xa1c   : > { %v4918_v51 = vpop.f32.mrf.mxu1 }
 0xa1e   : > { %v4920_v3 = vpop.f32.mrf.mxu1 }
 0xa20   : > { %v4922_v0 = vpop.f32.mrf.mxu1 }
 0xa22   : > { %v4926_v25 = vpop.f32.mrf.mxu1 }
 0xa24   : > { %v4928_v48 = vpop.f32.mrf.mxu1 }
 0xa26   : > { %v4930_v4 = vpop.f32.mrf.mxu1 }
 0xa28   : > { %v4932_v46 = vpop.f32.mrf.mxu1 }
 0xa2a   : > { %v4936_v35 = vpop.f32.mrf.mxu1 }
 0xa2b   : > { %v10487_v28 = vadd.f32 %v4936_v35, %v10408_v5  ;;  %v10505_v35 = vpop.f32.mrf.mxu0 }
 0xa2c   : > { %v4938_v37 = vpop.f32.mrf.mxu1 }
 0xa2d   : > { %v10480_v10 = vadd.f32 %v4938_v37, %v2101_v7  ;;  %v10527_v37 = vpop.f32.mrf.mxu0 }
 0xa2e   : > { %v4940_v50 = vpop.f32.mrf.mxu1 }
 0xa2f   : > { %v5071_v7 = vmax.f32 %v10487_v28, %v10480_v10 }
 0xa30   : > { %v4942_v19 = vpop.f32.mrf.mxu1 }
 0xa32   : > { %v4946_v53 = vpop.f32.mrf.mxu1 }
 0xa33   : > { %v10476_v17 = vadd.f32 %v4946_v53, %v2109_v12  ;;  %v10496_v12 = vadd.f32 %v4928_v48, %v10402_v14 }
 0xa34   : > { %v4948_v61 = vpop.f32.mrf.mxu1 }
 0xa35   : > { %v10478_v20 = vadd.f32 %v4948_v61, %v2111_v32  ;;  %12071 = vst [vmem:[#allocation48_spill] sm:$0xff] %v10496_v12  ;;  %v10501_v32 = vadd.f32 %v4942_v19, %v10412_v2  ;;  %v10518_v2 = vadd.f32 %v4918_v51, %v10394_v18  ;;  %v10545_v19 = vadd.f32 %v4922_v0, %v10398_v47 }
 0xa36   : > { %v4950_v41 = vpop.f32.mrf.mxu1  ;;  %v10564_v47 = vadd.f32 %v10444_v39, %v10373_v27  ;;  %v10570_v61 = vadd.f32 %v10460_v58, %v10390_v43  ;;  %v10584_v27 = vadd.f32 %v10456_v8, %v10388_v31  ;;  %v10590_v43 = vadd.f32 %v10432_v1, %v10361_v38 }
 0xa37   : > { %v5077_v13 = vmax.f32 %v10476_v17, %v10478_v20  ;;  %v10489_v57 = vadd.f32 %v4950_v41, %v2113_v26  ;;  %12072 = vst [vmem:[#allocation49_spill] sm:$0xff] %v10501_v32  ;;  %12074 = vst [vmem:[#allocation17_spill] sm:$0xff] %v10518_v2  ;;  %v10523_v41 = vadd.f32 %v4932_v46, %v10406_v23 }
 0xa38   : > { %v4952_v15 = vpop.f32.mrf.mxu1  ;;  %v10540_v23 = vadd.f32 %v4908_v22, %v10385_v42  ;;  %12079 = vst [vmem:[#allocation63_spill] sm:$0xff] %v10545_v19  ;;  %v10558_v42 = vadd.f32 %v4920_v3, %v10396_v36  ;;  %12082 = vst [vmem:[#allocation67_spill] sm:$0xff] %v10564_v47  ;;  %v10580_v3 = vadd.f32 %v10440_v33, %v10371_v29 }
 0xa39   : > { %v10491_v54 = vadd.f32 %v4952_v15, %v2115_v55  ;;  %5078 = vmax.xlane.f32.xlu0 %v5077_v13  ;;  %v10510_v55 = vadd.f32 %v4926_v25, %v10400_v9  ;;  %v10513_v15 = vadd.f32 %v4940_v50, %v10410_v24  ;;  %12075 = vst [vmem:[#allocation53_spill] sm:$0xff] %v10523_v41  ;;  %12083 = vst [vmem:[#allocation71_spill] sm:$0xff] %v10570_v61 }
 0xa3a   : > { %v10493_v53 = vpop.f32.mrf.mxu1  ;;  %v10532_v50 = vadd.f32 %v4916_v49, %v10392_v45  ;;  %v10535_v13 = vadd.f32 %v4930_v4, %v10404_v44  ;;  %12078 = vst [vmem:[#allocation55_spill] sm:$0xff] %v10540_v23  ;;  %v10549_v49 = vpop.f32.mrf.mxu0  ;;  %v10555_v4 = vadd.f32 %v10452_v30, %v10383_v59  ;;  %12081 = vst [vmem:[#allocation65_spill] sm:$0xff] %v10558_v42 }
 0xa3b   : > { %v5080_v5 = vmax.f32 %v10489_v57, %v10491_v54  ;;  %12073 = vst [vmem:[#allocation58_spill] sm:$0xff] %v10510_v55  ;;  %v5065_v48 = vmax.f32 %v10510_v55, %v10496_v12  ;;  %v5074_v9 = vmax.f32 %v10513_v15, %v10501_v32  ;;  %v5062_v59 = vmax.f32 %v10558_v42, %v10545_v19 }
 0xa3c   : > { %v10507_v26 = vpop.f32.mrf.mxu1  ;;  %12076 = vst [vmem:[#allocation96_spill] sm:$0xff] %v10532_v50  ;;  %12077 = vst [vmem:[#allocation68_spill] sm:$0xff] %v10535_v13  ;;  %v5059_v46 = vmax.f32 %v10532_v50, %v10518_v2  ;;  %v5068_v45 = vmax.f32 %v10535_v13, %v10523_v41  ;;  %v5053_v51 = vmax.f32 %v10555_v4, %v10540_v23  ;;  %v10574_v36 = vpop.f32.mrf.mxu0 }
 0xa3d   : > { %5081 = vmax.xlane.f32.xlu1 %v5080_v5  ;;  %5072 = vmax.xlane.f32.xlu0 %v5071_v7  ;;  %12080 = vst [vmem:[#allocation57_spill] sm:$0xff] %v10555_v4  ;;  %12084 = vst [vmem:[#allocation75_spill] sm:$0xff] %v10580_v3  ;;  %v5047_v58 = vmax.f32 %v10580_v3, %v10564_v47  ;;  %v10596_v0 = vadd.f32 %v10450_v34, %v10379_v56  ;;  %v12093_v7 = vld [vmem:[#allocation97_spill] sm:$0xff] }
 0xa3e   : > { %v10515_v14 = vpop.f32.mrf.mxu1  ;;  %12085 = vst [vmem:[#allocation76_spill] sm:$0xff] %v10584_v27  ;;  %12086 = vst [vmem:[#allocation73_spill] sm:$0xff] %v10590_v43  ;;  %v5056_v29 = vmax.f32 %v10584_v27, %v10570_v61  ;;  %v10600_v31 = vpop.f32.mrf.mxu0  ;;  %v10606_v8 = vadd.f32 %v10428_v40, %v10359_v6  ;;  %v10610_v38 = vadd.f32 %v10446_v16, %v10377_v21  ;;  %v12092_v16 = vld [vmem:[#allocation27_spill] sm:$0xff] }
 0xa3f   : > { %12087 = vst [vmem:[#allocation86_spill] sm:$0xff] %v10596_v0  ;;  %v10616_v56 = vadd.f32 %v10420_v52, %v10349_v60  ;;  %v10622_v25 = vadd.f32 %v10438_v63, %v10367_v11  ;;  %v10630_v5 = vadd.f32 %v12093_v7, %v12092_v16  ;;  %v12096_v60 = vld [vmem:[#allocation60_spill] sm:$0xff]  ;;  %v12098_v63 = vld [vmem:[#allocation35_spill] sm:$0xff] }
 0xa40   : > { %v10529_v24 = vpop.f32.mrf.mxu1  ;;  %12088 = vst [vmem:[#allocation83_spill] sm:$0xff] %v10606_v8  ;;  %12089 = vst [vmem:[#allocation81_spill] sm:$0xff] %v10610_v38  ;;  %v5041_v34 = vmax.f32 %v10606_v8, %v10590_v43  ;;  %v5050_v6 = vmax.f32 %v10610_v38, %v10596_v0  ;;  %v2171_v21 = vpop.f32.mrf.mxu0  ;;  %v12102_v16 = vld [vmem:[#allocation95_spill] sm:$0xff] }
 0xa41   : > { %5075 = vmax.xlane.f32.xlu1 %v5074_v9  ;;  %5066 = vmax.xlane.f32.xlu0 %v5065_v48  ;;  %12090 = vst [vmem:[#allocation85_spill] sm:$0xff] %v10616_v56  ;;  %12091 = vst [vmem:[#allocation94_spill] sm:$0xff] %v10622_v25  ;;  %v12095_v48 = vld [vmem:[#allocation92_spill] sm:$0xff]  ;;  %v5035_v11 = vmax.f32 %v10630_v5, %v10616_v56 }
 0xa42   : > { %v10537_v18 = vpop.f32.mrf.mxu1  ;;  %12094 = vst [vmem:[#allocation91_spill] sm:$0xff] %v10630_v5  ;;  %v10634_v52 = vadd.f32 %v12096_v60, %v12095_v48 }
 0xa44   : > { %v10551_v44 = vpop.f32.mrf.mxu1  ;;  %12097 = vst [vmem:[#allocation89_spill] sm:$0xff] %v10634_v52 }
 0xa45   : > { %5069 = vmax.xlane.f32.xlu1 %v5068_v45  ;;  %5060 = vmax.xlane.f32.xlu0 %v5059_v46  ;;  %v12099_v46 = vld [vmem:[#allocation88_spill] sm:$0xff] }
 0xa46   : > { %v10560_v22 = vpop.f32.mrf.mxu1  ;;  %v10642_v45 = vadd.f32 %v12099_v46, %v12098_v63 }
 0xa48   : > { %v10576_v30 = vpop.f32.mrf.mxu1  ;;  %12100 = vst [vmem:[#allocation93_spill] sm:$0xff] %v10642_v45 }
 0xa49   : > { %5063 = vmax.xlane.f32.xlu1 %v5062_v59  ;;  %5054 = vmax.xlane.f32.xlu0 %v5053_v51  ;;  %v5044_v51 = vmax.f32 %v10634_v52, %v10622_v25  ;;  %v2173_v59 = vpop.f32.mrf.mxu0 }
 0xa4a   : > { %v10586_v39 = vpop.f32.mrf.mxu1 }
 0xa4b   : > { %v2175_v48 = vpop.f32.mrf.mxu0 }
 0xa4c   : > { %v10602_v33 = vpop.f32.mrf.mxu1 }
 0xa4d   : > { %5057 = vmax.xlane.f32.xlu1 %v5056_v29  ;;  %5048 = vmax.xlane.f32.xlu0 %v5047_v58  ;;  %v12101_v29 = vld [vmem:[#allocation16_spill] sm:$0xff]  ;;  %v2179_v46 = vpop.f32.mrf.mxu0 }
 0xa4e   : > { %v10612_v1 = vpop.f32.mrf.mxu1  ;;  %v10648_v7 = vadd.f32 %v12102_v16, %v12101_v29 }
 0xa4f   : > { %v2181_v25 = vpop.f32.mrf.mxu0 }
 0xa50   : > { %v10626_v40 = vpop.f32.mrf.mxu1  ;;  %12103 = vst [vmem:[#allocation77_spill] sm:$0xff] %v10648_v7 }
 0xa51   : > { %5051 = vmax.xlane.f32.xlu1 %v5050_v6  ;;  %5042 = vmax.xlane.f32.xlu0 %v5041_v34  ;;  %v5038_v6 = vmax.f32 %v10648_v7, %v10642_v45  ;;  %v2183_v8 = vpop.f32.mrf.mxu0 }
 0xa52   : > { %v10636_v9 = vpop.f32.mrf.mxu1 }
 0xa54   : > { %v4988_v58 = vpop.f32.mrf.mxu1 }
 0xa55   : > { %5045 = vmax.xlane.f32.xlu1 %v5044_v51  ;;  %5036 = vmax.xlane.f32.xlu0 %v5035_v11  ;;  %v2185_v51 = vpop.f32.mrf.mxu0 }
 0xa56   : > { %v10650_v34 = vpop.f32.mrf.mxu1 }
 0xa57   : > { %v2189_v38 = vpop.f32.mrf.mxu0 }
 0xa58   : > { %v4992_v60 = vpop.f32.mrf.mxu1 }
 0xa59   : > { %5039 = vmax.xlane.f32.xlu1 %v5038_v6  ;;  %v2191_v45 = vpop.f32.mrf.mxu0 }
 0xa5a   : > { %v4996_v63 = vpop.f32.mrf.mxu1 }
 0xa5b   : > { %v2193_v6 = vpop.f32.mrf.mxu0 }
 0xa5c   : > { %v4998_v56 = vpop.f32.mrf.mxu1 }
 0xa5d   : > { %v2195_v50 = vpop.f32.mrf.mxu0 }
 0xa5e   : > { %v5000_v5 = vpop.f32.mrf.mxu1 }
 0xa60   : > { %v5002_v52 = vpop.f32.mrf.mxu1 }
 0xa62   : > { %v5006_v43 = vpop.f32.mrf.mxu1 }
 0xa64   : > { %v5008_v29 = vpop.f32.mrf.mxu1 }
 0xa65   : > { %v10668_v32 = vadd.f32 %v5008_v29, %v2171_v21  ;;  %v12105_v21 = vld [vmem:[#allocation109_spill] sm:$0xff]  ;;  %v12111_v29 = vld [vmem:[#allocation87_spill] sm:$0xff] }
 0xa66   : > { %v5010_v16 = vpop.f32.mrf.mxu1 }
 0xa68   : > { %v5012_v11 = vpop.f32.mrf.mxu1 }
 0xa6a   : > { %v5016_v0 = vpop.f32.mrf.mxu1 }
 0xa6b   : > { %v10662_v13 = vadd.f32 %v5016_v0, %v2179_v46 }
 0xa6c   : > { %v5018_v47 = vpop.f32.mrf.mxu1 }
 0xa6d   : > { %v10658_v42 = vadd.f32 %v5018_v47, %v2181_v25  ;;  %v10691_v25 = vadd.f32 %v4996_v63, %v10505_v35  ;;  %v10707_v35 = vadd.f32 %v10636_v9, %v12105_v21  ;;  %v12107_v9 = vld [vmem:[#allocation82_spill] sm:$0xff] }
 0xa6e   : > { %v5020_v3 = vpop.f32.mrf.mxu1 }
 0xa6f   : > { %v10679_v0 = vadd.f32 %v5020_v3, %v2183_v8  ;;  %v12104_v3 = vld [vmem:[#allocation23_spill] sm:$0xff]  ;;  %v10701_v8 = vadd.f32 %v5002_v52, %v10574_v36  ;;  %v10719_v52 = vadd.f32 %v4992_v60, %v10484_v62  ;;  %v12110_v60 = vld [vmem:[#allocation25_spill] sm:$0xff] }
 0xa70   : > { %v5022_v7 = vpop.f32.mrf.mxu1  ;;  %v10739_v46 = vadd.f32 %v10626_v40, %v12110_v60 }
 0xa72   : > { %v5026_v61 = vpop.f32.mrf.mxu1 }
 0xa73   : > { %v10654_v23 = vadd.f32 %v5026_v61, %v2189_v38  ;;  %v5119_v61 = vmax.f32 %v10662_v13, %v10658_v42  ;;  %v10677_v38 = vadd.f32 %v5006_v43, %v10600_v31  ;;  %v10693_v43 = vadd.f32 %v5010_v16, %v2173_v59  ;;  %v12106_v59 = vld [vmem:[#allocation22_spill] sm:$0xff]  ;;  %v12112_v16 = vld [vmem:[#allocation19_spill] sm:$0xff] }
 0xa74   : > { %v5028_v27 = vpop.f32.mrf.mxu1  ;;  %v10696_v31 = vadd.f32 %v4988_v58, %v12104_v3  ;;  %v10714_v58 = vadd.f32 %v10602_v33, %v12106_v59  ;;  %v12109_v33 = vld [vmem:[#allocation24_spill] sm:$0xff]  ;;  %v12117_v3 = vld [vmem:[#allocation106_spill] sm:$0xff] }
 0xa75   : > { %v10656_v4 = vadd.f32 %v5028_v27, %v2191_v45  ;;  %v10672_v27 = vadd.f32 %v5022_v7, %v2185_v51  ;;  %v10710_v45 = vadd.f32 %v5000_v5, %v10549_v49  ;;  %v12108_v49 = vld [vmem:[#allocation111_spill] sm:$0xff]  ;;  %v10733_v63 = vadd.f32 %v10551_v44, %v12109_v33  ;;  %v12113_v44 = vld [vmem:[#allocation21_spill] sm:$0xff] }
 0xa76   : > { %v5030_v19 = vpop.f32.mrf.mxu1  ;;  %v5101_v36 = vmax.f32 %v10707_v35, %v10696_v31  ;;  %v10729_v5 = vadd.f32 %v10650_v34, %v12108_v49  ;;  %v10745_v34 = vadd.f32 %v10537_v18, %v12111_v29  ;;  %v10749_v51 = vadd.f32 %v10612_v1, %v12112_v16 }
 0xa77   : > { %v5125_v2 = vmax.f32 %v10654_v23, %v10656_v4  ;;  %v10664_v12 = vadd.f32 %v5030_v19, %v2193_v6  ;;  %v5122_v19 = vmax.f32 %v10679_v0, %v10672_v27  ;;  %v5110_v7 = vmax.f32 %v10710_v45, %v10701_v8  ;;  %v12114_v6 = vld [vmem:[#allocation110_spill] sm:$0xff] }
 0xa78   : > { %v5032_v41 = vpop.f32.mrf.mxu1  ;;  %v5089_v40 = vmax.f32 %v10745_v34, %v10733_v63  ;;  %v5098_v18 = vmax.f32 %v10749_v51, %v10739_v46 }
 0xa79   : > { %v10666_v55 = vadd.f32 %v5032_v41, %v2195_v50  ;;  %5126 = vmax.xlane.f32.xlu0 %v5125_v2  ;;  %v10682_v41 = vadd.f32 %v4998_v56, %v10527_v37  ;;  %v5113_v2 = vmax.f32 %v10677_v38, %v10668_v32  ;;  %v10686_v50 = vadd.f32 %v5012_v11, %v2175_v48 }
 0xa7a   : > { %v10725_v48 = vadd.f32 %v10586_v39, %v12107_v9  ;;  %v5104_v39 = vmax.f32 %v10729_v5, %v10719_v52  ;;  %v10753_v11 = vadd.f32 %v10507_v26, %v12113_v44 }
 0xa7b   : > { %v5128_v47 = vmax.f32 %v10664_v12, %v10666_v55  ;;  %v5107_v37 = vmax.f32 %v10691_v25, %v10682_v41  ;;  %v5116_v56 = vmax.f32 %v10693_v43, %v10686_v50 }
 0xa7c   : > { %v5095_v62 = vmax.f32 %v10725_v48, %v10714_v58 }
 0xa7d   : > { %5129 = vmax.xlane.f32.xlu1 %v5128_v47  ;;  %5120 = vmax.xlane.f32.xlu0 %v5119_v61  ;;  %v10759_v61 = vadd.f32 %v10576_v30, %v12114_v6  ;;  %v12115_v47 = vld [vmem:[#allocation59_spill] sm:$0xff]  ;;  %v10775_v30 = vadd.f32 %v10529_v24, %v12117_v3  ;;  %v12119_v6 = vld [vmem:[#allocation49_spill] sm:$0xff] }
 0xa7e   : > { %v10765_v1 = vadd.f32 %v10493_v53, %v12115_v47  ;;  %v12120_v47 = vld [vmem:[#allocation58_spill] sm:$0xff] }
 0xa80   : > { %v5083_v26 = vmax.f32 %v10765_v1, %v10753_v11 }
 0xa81   : > { %5123 = vmax.xlane.f32.xlu1 %v5122_v19  ;;  %5114 = vmax.xlane.f32.xlu0 %v5113_v2  ;;  %v12116_v2 = vld [vmem:[#allocation80_spill] sm:$0xff] }
 0xa82   : > { %v10769_v19 = vadd.f32 %v10560_v22, %v12116_v2 }
 0xa85   : > { %5117 = vmax.xlane.f32.xlu1 %v5116_v56  ;;  %5108 = vmax.xlane.f32.xlu0 %v5107_v37  ;;  %v5092_v37 = vmax.f32 %v10769_v19, %v10759_v61  ;;  %v12118_v56 = vld [vmem:[#allocation20_spill] sm:$0xff] }
 0xa86   : > { %v10781_v53 = vadd.f32 %v10515_v14, %v12118_v56 }
 0xa88   : > { %v5086_v22 = vmax.f32 %v10781_v53, %v10775_v30 }
 0xa89   : > { %5111 = vmax.xlane.f32.xlu1 %v5110_v7  ;;  %5102 = vmax.xlane.f32.xlu0 %v5101_v36 }
 0xa8d   : > { %5105 = vmax.xlane.f32.xlu1 %v5104_v39  ;;  %5096 = vmax.xlane.f32.xlu0 %v5095_v62 }
 0xa91   : > { %5099 = vmax.xlane.f32.xlu1 %v5098_v18  ;;  %5090 = vmax.xlane.f32.xlu0 %v5089_v40 }
 0xa95   : > { %5093 = vmax.xlane.f32.xlu1 %v5092_v37  ;;  %5084 = vmax.xlane.f32.xlu0 %v5083_v26 }
 0xa99   : > { %5087 = vmax.xlane.f32.xlu1 %v5086_v22  ;;  %v12122_v22 = vld [vmem:[#allocation68_spill] sm:$0xff] }
 0xac2   : > { %v5079_v21 = vpop.xlane.xlu0 %5078 }
 0xac3   : > { %v5159_v59 = vsub.f32 %v10476_v17, %v5079_v21  ;;  %v5160_v36 = vsub.f32 %v10478_v20, %v5079_v21 }
 0xac5   : > { %v5251_v24 = vmul.f32 1.442695, %v5159_v59  ;;  %v5253_v7 = vmul.f32 1.442695, %v5160_v36  ;;  %v12123_v59 = vld [vmem:[#allocation53_spill] sm:$0xff]  ;;  %v12124_v36 = vld [vmem:[#allocation96_spill] sm:$0xff] }
 0xac6   : > { %v5082_v9 = vpop.xlane.xlu1 %5081  ;;  %v5073_v49 = vpop.xlane.xlu0 %5072 }
 0xac7   : > { %6637 = vpow2.f32 %v5251_v24  ;;  %v5161_v33 = vsub.f32 %v10489_v57, %v5082_v9  ;;  %v5162_v14 = vsub.f32 %v10491_v54, %v5082_v9  ;;  %v5155_v62 = vsub.f32 %v10487_v28, %v5073_v49  ;;  %v12121_v54 = vld [vmem:[#allocation48_spill] sm:$0xff] }
 0xac8   : > { %6639 = vpow2.f32 %v5253_v7  ;;  %v5156_v60 = vsub.f32 %v10480_v10, %v5073_v49  ;;  %v12125_v7 = vld [vmem:[#allocation17_spill] sm:$0xff] }
 0xac9   : > { %v5255_v39 = vmul.f32 1.442695, %v5161_v33  ;;  %v5257_v29 = vmul.f32 1.442695, %v5162_v14  ;;  %v5243_v16 = vmul.f32 1.442695, %v5155_v62 }
 0xaca   : > { %v5245_v17 = vmul.f32 1.442695, %v5156_v60  ;;  %v5076_v44 = vpop.xlane.xlu1 %5075  ;;  %v5067_v20 = vpop.xlane.xlu0 %5066 }
 0xacb   : > { %6641 = vpow2.f32 %v5255_v39  ;;  %v5157_v40 = vsub.f32 %v10513_v15, %v5076_v44  ;;  %v5158_v18 = vsub.f32 %v12119_v6, %v5076_v44  ;;  %v5151_v57 = vsub.f32 %v12120_v47, %v5067_v20 }
 0xacc   : > { %6643 = vpow2.f32 %v5257_v29  ;;  %v5152_v2 = vsub.f32 %v12121_v54, %v5067_v20  ;;  %v12126_v29 = vld [vmem:[#allocation65_spill] sm:$0xff] }
 0xacd   : > { %6645 = vpow2.f32 %v5243_v16  ;;  %v5247_v28 = vmul.f32 1.442695, %v5157_v40  ;;  %v5249_v26 = vmul.f32 1.442695, %v5158_v18  ;;  %v5235_v10 = vmul.f32 1.442695, %v5151_v57 }
 0xace   : > { %6647 = vpow2.f32 %v5245_v17  ;;  %v5237_v3 = vmul.f32 1.442695, %v5152_v2  ;;  %v5070_v37 = vpop.xlane.xlu1 %5069  ;;  %v5061_v56 = vpop.xlane.xlu0 %5060  ;;  %v12127_v17 = vld [vmem:[#allocation63_spill] sm:$0xff]  ;;  %v12128_v20 = vld [vmem:[#allocation57_spill] sm:$0xff] }
 0xacf   : > { %6649 = vpow2.f32 %v5247_v28  ;;  %v5153_v21 = vsub.f32 %v12122_v22, %v5070_v37  ;;  %v5154_v15 = vsub.f32 %v12123_v59, %v5070_v37  ;;  %v5147_v24 = vsub.f32 %v12124_v36, %v5061_v56  ;;  %v12129_v18 = vld [vmem:[#allocation55_spill] sm:$0xff] }
 0xad0   : > { %6651 = vpow2.f32 %v5249_v26  ;;  %v5148_v9 = vsub.f32 %v12125_v7, %v5061_v56  ;;  %v12130_v56 = vld [vmem:[#allocation76_spill] sm:$0xff]  ;;  %v12133_v7 = vld [vmem:[#allocation67_spill] sm:$0xff] }
 0xad1   : > { %6653 = vpow2.f32 %v5235_v10  ;;  %v5239_v49 = vmul.f32 1.442695, %v5153_v21  ;;  %v5241_v33 = vmul.f32 1.442695, %v5154_v15  ;;  %v5227_v14 = vmul.f32 1.442695, %v5147_v24 }
 0xad2   : > { %6655 = vpow2.f32 %v5237_v3  ;;  %v5229_v62 = vmul.f32 1.442695, %v5148_v9  ;;  %v5064_v60 = vpop.xlane.xlu1 %5063  ;;  %v5055_v39 = vpop.xlane.xlu0 %5054  ;;  %v12131_v21 = vld [vmem:[#allocation71_spill] sm:$0xff] }
 0xad3   : > { %6657 = vpow2.f32 %v5239_v49  ;;  %v5149_v16 = vsub.f32 %v12126_v29, %v5064_v60  ;;  %v5150_v44 = vsub.f32 %v12127_v17, %v5064_v60  ;;  %v5143_v40 = vsub.f32 %v12128_v20, %v5055_v39  ;;  %v12132_v15 = vld [vmem:[#allocation75_spill] sm:$0xff]  ;;  %v12134_v20 = vld [vmem:[#allocation81_spill] sm:$0xff] }
 0xad4   : > { %v10802_v6 = vpop.eup %6637  ;;  %6659 = vpow2.f32 %v5241_v33  ;;  %v5144_v47 = vsub.f32 %v12129_v18, %v5055_v39  ;;  %v12135_v18 = vld [vmem:[#allocation86_spill] sm:$0xff] }
 0xad5   : > { %v10805_v57 = vpop.eup %6639  ;;  %6661 = vpow2.f32 %v5227_v14  ;;  %v5231_v54 = vmul.f32 1.442695, %v5149_v16  ;;  %v5233_v2 = vmul.f32 1.442695, %v5150_v44  ;;  %v5219_v28 = vmul.f32 1.442695, %v5143_v40 }
 0xad6   : > { %6663 = vpow2.f32 %v5229_v62  ;;  %v5221_v26 = vmul.f32 1.442695, %v5144_v47  ;;  %v5058_v10 = vpop.xlane.xlu1 %5057  ;;  %v5049_v3 = vpop.xlane.xlu0 %5048  ;;  %v5365_v37 = vadd.f32 %v10805_v57, %v10802_v6 }
 0xad7   : > { %6665 = vpow2.f32 %v5231_v54  ;;  %v5145_v22 = vsub.f32 %v12130_v56, %v5058_v10  ;;  %v5146_v59 = vsub.f32 %v12131_v21, %v5058_v10  ;;  %v5139_v36 = vsub.f32 %v12132_v15, %v5049_v3  ;;  %v12136_v54 = vld [vmem:[#allocation83_spill] sm:$0xff]  ;;  %v12137_v10 = vld [vmem:[#allocation73_spill] sm:$0xff] }
 0xad8   : > { %v10812_v24 = vpop.eup %6641  ;;  %6667 = vpow2.f32 %v5233_v2  ;;  %v5140_v9 = vsub.f32 %v12133_v7, %v5049_v3  ;;  %5366 = vadd.xlane.f32.xlu0 %v5365_v37 }
 0xad9   : > { %v10815_v49 = vpop.eup %6643  ;;  %6669 = vpow2.f32 %v5219_v28  ;;  %v5223_v33 = vmul.f32 1.442695, %v5145_v22  ;;  %v5225_v14 = vmul.f32 1.442695, %v5146_v59  ;;  %v5211_v62 = vmul.f32 1.442695, %v5139_v36 }
 0xada   : > { %v10817_v60 = vpop.eup %6645  ;;  %6671 = vpow2.f32 %v5221_v26  ;;  %v5213_v39 = vmul.f32 1.442695, %v5140_v9  ;;  %v5052_v29 = vpop.xlane.xlu1 %5051  ;;  %v5368_v17 = vadd.f32 %v10815_v49, %v10812_v24 }
 0xadb   : > { %v5043_v16 = vpop.xlane.xlu0 %5042  ;;  %v10821_v44 = vpop.eup %6647  ;;  %6673 = vpow2.f32 %v5223_v33  ;;  %v5141_v40 = vsub.f32 %v12134_v20, %v5052_v29  ;;  %v5142_v47 = vsub.f32 %v12135_v18, %v5052_v29 }
 0xadc   : > { %v5135_v2 = vsub.f32 %v12136_v54, %v5043_v16  ;;  %v10826_v28 = vpop.eup %6649  ;;  %6675 = vpow2.f32 %v5225_v14  ;;  %v5136_v26 = vsub.f32 %v12137_v10, %v5043_v16  ;;  %5369 = vadd.xlane.f32.xlu1 %v5368_v17  ;;  %v5359_v3 = vadd.f32 %v10821_v44, %v10817_v60  ;;  %v12138_v14 = vld [vmem:[#allocation89_spill] sm:$0xff]  ;;  %v12139_v16 = vld [vmem:[#allocation94_spill] sm:$0xff]  ;;  %v12140_v17 = vld [vmem:[#allocation91_spill] sm:$0xff] }
 0xadd   : > { %v10831_v37 = vpop.eup %6651  ;;  %6677 = vpow2.f32 %v5211_v62  ;;  %v5215_v56 = vmul.f32 1.442695, %v5141_v40  ;;  %v5217_v22 = vmul.f32 1.442695, %v5142_v47 }
 0xade   : > { %v5203_v21 = vmul.f32 1.442695, %v5135_v2  ;;  %v10833_v59 = vpop.eup %6653  ;;  %6679 = vpow2.f32 %v5213_v39  ;;  %v5205_v15 = vmul.f32 1.442695, %v5136_v26  ;;  %5360 = vadd.xlane.f32.xlu0 %v5359_v3  ;;  %v5046_v36 = vpop.xlane.xlu1 %5045  ;;  %v5362_v9 = vadd.f32 %v10831_v37, %v10826_v28  ;;  %v12141_v39 = vld [vmem:[#allocation85_spill] sm:$0xff] }
 0xadf   : > { %v5037_v7 = vpop.xlane.xlu0 %5036  ;;  %v10837_v33 = vpop.eup %6655  ;;  %6681 = vpow2.f32 %v5215_v56  ;;  %v5137_v29 = vsub.f32 %v12138_v14, %v5046_v36  ;;  %v5138_v62 = vsub.f32 %v12139_v16, %v5046_v36  ;;  %v12143_v16 = vld [vmem:[#allocation93_spill] sm:$0xff] }
 0xae0   : > { %v5131_v20 = vsub.f32 %v12140_v17, %v5037_v7  ;;  %v10842_v40 = vpop.eup %6657  ;;  %6683 = vpow2.f32 %v5217_v22  ;;  %v5132_v18 = vsub.f32 %v12141_v39, %v5037_v7  ;;  %5363 = vadd.xlane.f32.xlu1 %v5362_v9  ;;  %v5353_v47 = vadd.f32 %v10837_v33, %v10833_v59  ;;  %v12142_v9 = vld [vmem:[#allocation77_spill] sm:$0xff] }
 0xae1   : > { %v10847_v54 = vpop.eup %6659  ;;  %6685 = vpow2.f32 %v5203_v21  ;;  %v5207_v2 = vmul.f32 1.442695, %v5137_v29  ;;  %v5209_v10 = vmul.f32 1.442695, %v5138_v62 }
 0xae2   : > { %v5195_v26 = vmul.f32 1.442695, %v5131_v20  ;;  %v10849_v3 = vpop.eup %6661  ;;  %6687 = vpow2.f32 %v5205_v15  ;;  %v5197_v56 = vmul.f32 1.442695, %v5132_v18  ;;  %5354 = vadd.xlane.f32.xlu0 %v5353_v47  ;;  %v5040_v36 = vpop.xlane.xlu1 %5039  ;;  %v5356_v22 = vadd.f32 %v10847_v54, %v10842_v40 }
 0xae3   : > { %v10853_v7 = vpop.eup %6663  ;;  %6689 = vpow2.f32 %v5207_v2  ;;  %v5133_v14 = vsub.f32 %v12142_v9, %v5040_v36  ;;  %v5134_v17 = vsub.f32 %v12143_v16, %v5040_v36 }
 0xae4   : > { %v10857_v21 = vpop.eup %6665  ;;  %6691 = vpow2.f32 %v5209_v10  ;;  %5357 = vadd.xlane.f32.xlu1 %v5356_v22  ;;  %v5347_v15 = vadd.f32 %v10853_v7, %v10849_v3 }
 0xae5   : > { %v10861_v29 = vpop.eup %6667  ;;  %6693 = vpow2.f32 %v5195_v26  ;;  %v5199_v62 = vmul.f32 1.442695, %v5133_v14  ;;  %v5201_v20 = vmul.f32 1.442695, %v5134_v17 }
 0xae6   : > { %v10863_v39 = vpop.eup %6669  ;;  %6695 = vpow2.f32 %v5197_v56  ;;  %5348 = vadd.xlane.f32.xlu0 %v5347_v15  ;;  %v5350_v18 = vadd.f32 %v10861_v29, %v10857_v21 }
 0xae7   : > { %12144 = vst [vmem:[#allocation99_spill] sm:$0xff] %v10863_v39  ;;  %v10867_v47 = vpop.eup %6671  ;;  %6697 = vpow2.f32 %v5199_v62 }
 0xae8   : > { %v10869_v2 = vpop.eup %6673  ;;  %6699 = vpow2.f32 %v5201_v20  ;;  %5351 = vadd.xlane.f32.xlu1 %v5350_v18  ;;  %v5341_v10 = vadd.f32 %v10867_v47, %v10863_v39 }
 0xae9   : > { %12145 = vst [vmem:[#allocation90_spill] sm:$0xff] %v10869_v2  ;;  %v10873_v26 = vpop.eup %6675 }
 0xaea   : > { %12146 = vst [vmem:[#allocation34_spill] sm:$0xff] %v10873_v26  ;;  %v10875_v36 = vpop.eup %6677  ;;  %5342 = vadd.xlane.f32.xlu0 %v5341_v10  ;;  %v5344_v56 = vadd.f32 %v10873_v26, %v10869_v2 }
 0xaeb   : > { %12147 = vst [vmem:[#allocation32_spill] sm:$0xff] %v10875_v36  ;;  %v10879_v22 = vpop.eup %6679 }
 0xaec   : > { %12148 = vst [vmem:[#allocation6_spill] sm:$0xff] %v10879_v22  ;;  %v10881_v9 = vpop.eup %6681  ;;  %5345 = vadd.xlane.f32.xlu1 %v5344_v56  ;;  %v5335_v14 = vadd.f32 %v10879_v22, %v10875_v36 }
 0xaed   : > { %12149 = vst [vmem:[#allocation4_spill] sm:$0xff] %v10881_v9  ;;  %v10885_v16 = vpop.eup %6683 }
 0xaee   : > { %12150 = vst [vmem:[#allocation98_spill] sm:$0xff] %v10885_v16  ;;  %v10887_v17 = vpop.eup %6685  ;;  %5336 = vadd.xlane.f32.xlu0 %v5335_v14  ;;  %v5338_v15 = vadd.f32 %v10885_v16, %v10881_v9 }
 0xaef   : > { %12151 = vst [vmem:[#allocation103_spill] sm:$0xff] %v10887_v17  ;;  %v10891_v62 = vpop.eup %6687 }
 0xaf0   : > { %12152 = vst [vmem:[#allocation127_spill] sm:$0xff] %v10891_v62  ;;  %v10893_v20 = vpop.eup %6689  ;;  %5339 = vadd.xlane.f32.xlu1 %v5338_v15  ;;  %v5329_v18 = vadd.f32 %v10891_v62, %v10887_v17 }
 0xaf1   : > { %12153 = vst [vmem:[#allocation105_spill] sm:$0xff] %v10893_v20  ;;  %v10897_v10 = vpop.eup %6691 }
 0xaf2   : > { %12154 = vst [vmem:[#allocation104_spill] sm:$0xff] %v10897_v10  ;;  %v10899_v56 = vpop.eup %6693  ;;  %5330 = vadd.xlane.f32.xlu0 %v5329_v18  ;;  %v5332_v36 = vadd.f32 %v10897_v10, %v10893_v20 }
 0xaf3   : > { %12155 = vst [vmem:[#allocation18_spill] sm:$0xff] %v10899_v56  ;;  %v10903_v14 = vpop.eup %6695 }
 0xaf4   : > { %12156 = vst [vmem:[#allocation123_spill] sm:$0xff] %v10903_v14  ;;  %v10905_v22 = vpop.eup %6697  ;;  %5333 = vadd.xlane.f32.xlu1 %v5332_v36  ;;  %v5323_v9 = vadd.f32 %v10903_v14, %v10899_v56 }
 0xaf5   : > { %12157 = vst [vmem:[#allocation126_spill] sm:$0xff] %v10905_v22  ;;  %v10909_v15 = vpop.eup %6699 }
 0xaf6   : > { %12158 = vst [vmem:[#allocation125_spill] sm:$0xff] %v10909_v15  ;;  %5324 = vadd.xlane.f32.xlu0 %v5323_v9  ;;  %v5326_v17 = vadd.f32 %v10909_v15, %v10905_v22 }
 0xaf8   : > { %5327 = vadd.xlane.f32.xlu1 %v5326_v17 }
 0xb02   : > { %v5127_v62 = vpop.xlane.xlu0 %5126 }
 0xb03   : > { %v5191_v18 = vsub.f32 %v10654_v23, %v5127_v62  ;;  %v5192_v20 = vsub.f32 %v10656_v4, %v5127_v62 }
 0xb05   : > { %v5315_v10 = vmul.f32 1.442695, %v5191_v18  ;;  %v5317_v16 = vmul.f32 1.442695, %v5192_v20 }
 0xb06   : > { %v5130_v2 = vpop.xlane.xlu1 %5129  ;;  %v5121_v39 = vpop.xlane.xlu0 %5120 }
 0xb07   : > { %6701 = vpow2.f32 %v5315_v10  ;;  %v5193_v36 = vsub.f32 %v10664_v12, %v5130_v2  ;;  %v5194_v56 = vsub.f32 %v10666_v55, %v5130_v2  ;;  %v5187_v9 = vsub.f32 %v10662_v13, %v5121_v39 }
 0xb08   : > { %6703 = vpow2.f32 %v5317_v16  ;;  %v5188_v22 = vsub.f32 %v10658_v42, %v5121_v39 }
 0xb09   : > { %v5319_v17 = vmul.f32 1.442695, %v5193_v36  ;;  %v5321_v15 = vmul.f32 1.442695, %v5194_v56  ;;  %v5307_v14 = vmul.f32 1.442695, %v5187_v9 }
 0xb0a   : > { %v5309_v23 = vmul.f32 1.442695, %v5188_v22  ;;  %v5124_v26 = vpop.xlane.xlu1 %5123  ;;  %v5115_v4 = vpop.xlane.xlu0 %5114 }
 0xb0b   : > { %6705 = vpow2.f32 %v5319_v17  ;;  %v5189_v62 = vsub.f32 %v10679_v0, %v5124_v26  ;;  %v5190_v20 = vsub.f32 %v10672_v27, %v5124_v26  ;;  %v5183_v12 = vsub.f32 %v10677_v38, %v5115_v4 }
 0xb0c   : > { %6707 = vpow2.f32 %v5321_v15  ;;  %v5184_v55 = vsub.f32 %v10668_v32, %v5115_v4 }
 0xb0d   : > { %6709 = vpow2.f32 %v5307_v14  ;;  %v5311_v13 = vmul.f32 1.442695, %v5189_v62  ;;  %v5313_v2 = vmul.f32 1.442695, %v5190_v20  ;;  %v5299_v42 = vmul.f32 1.442695, %v5183_v12 }
 0xb0e   : > { %6711 = vpow2.f32 %v5309_v23  ;;  %v5301_v39 = vmul.f32 1.442695, %v5184_v55  ;;  %v5118_v16 = vpop.xlane.xlu1 %5117  ;;  %v5109_v22 = vpop.xlane.xlu0 %5108 }
 0xb0f   : > { %6713 = vpow2.f32 %v5311_v13  ;;  %v5185_v10 = vsub.f32 %v10693_v43, %v5118_v16  ;;  %v5186_v0 = vsub.f32 %v10686_v50, %v5118_v16  ;;  %v5179_v27 = vsub.f32 %v10691_v25, %v5109_v22 }
 0xb10   : > { %6715 = vpow2.f32 %v5313_v2  ;;  %v5180_v38 = vsub.f32 %v10682_v41, %v5109_v22 }
 0xb11   : > { %6717 = vpow2.f32 %v5299_v42  ;;  %v5303_v32 = vmul.f32 1.442695, %v5185_v10  ;;  %v5305_v26 = vmul.f32 1.442695, %v5186_v0  ;;  %v5291_v56 = vmul.f32 1.442695, %v5179_v27 }
 0xb12   : > { %6719 = vpow2.f32 %v5301_v39  ;;  %v5293_v14 = vmul.f32 1.442695, %v5180_v38  ;;  %v5112_v15 = vpop.xlane.xlu1 %5111  ;;  %v5103_v18 = vpop.xlane.xlu0 %5102 }
 0xb13   : > { %6721 = vpow2.f32 %v5303_v32  ;;  %v5181_v36 = vsub.f32 %v10710_v45, %v5112_v15  ;;  %v5182_v43 = vsub.f32 %v10701_v8, %v5112_v15  ;;  %v5175_v50 = vsub.f32 %v10707_v35, %v5103_v18 }
 0xb14   : > { %v10930_v9 = vpop.eup %6701  ;;  %6723 = vpow2.f32 %v5305_v26  ;;  %v5176_v41 = vsub.f32 %v10696_v31, %v5103_v18 }
 0xb15   : > { %v10933_v25 = vpop.eup %6703  ;;  %6725 = vpow2.f32 %v5291_v56  ;;  %v5295_v17 = vmul.f32 1.442695, %v5181_v36  ;;  %v5297_v23 = vmul.f32 1.442695, %v5182_v43  ;;  %v5283_v4 = vmul.f32 1.442695, %v5175_v50 }
 0xb16   : > { %6727 = vpow2.f32 %v5293_v14  ;;  %v5285_v62 = vmul.f32 1.442695, %v5176_v41  ;;  %v5106_v20 = vpop.xlane.xlu1 %5105  ;;  %v5097_v12 = vpop.xlane.xlu0 %5096  ;;  %v5413_v8 = vadd.f32 %v10933_v25, %v10930_v9 }
 0xb17   : > { %6729 = vpow2.f32 %v5295_v17  ;;  %v5177_v35 = vsub.f32 %v10729_v5, %v5106_v20  ;;  %v5178_v45 = vsub.f32 %v10719_v52, %v5106_v20  ;;  %v5171_v31 = vsub.f32 %v10725_v48, %v5097_v12 }
 0xb18   : > { %v10940_v55 = vpop.eup %6705  ;;  %6731 = vpow2.f32 %v5297_v23  ;;  %v5172_v13 = vsub.f32 %v10714_v58, %v5097_v12  ;;  %5414 = vadd.xlane.f32.xlu0 %v5413_v8 }
 0xb19   : > { %v10943_v2 = vpop.eup %6707  ;;  %6733 = vpow2.f32 %v5283_v4  ;;  %v5287_v42 = vmul.f32 1.442695, %v5177_v35  ;;  %v5289_v39 = vmul.f32 1.442695, %v5178_v45  ;;  %v5275_v16 = vmul.f32 1.442695, %v5171_v31 }
 0xb1a   : > { %v10945_v22 = vpop.eup %6709  ;;  %6735 = vpow2.f32 %v5285_v62  ;;  %v5277_v5 = vmul.f32 1.442695, %v5172_v13  ;;  %v5100_v10 = vpop.xlane.xlu1 %5099  ;;  %v5416_v48 = vadd.f32 %v10943_v2, %v10940_v55 }
 0xb1b   : > { %v5091_v52 = vpop.xlane.xlu0 %5090  ;;  %v10949_v0 = vpop.eup %6711  ;;  %6737 = vpow2.f32 %v5287_v42  ;;  %v5173_v58 = vsub.f32 %v10749_v51, %v5100_v10  ;;  %v5174_v27 = vsub.f32 %v10739_v46, %v5100_v10 }
 0xb1c   : > { %v5167_v38 = vsub.f32 %v10745_v34, %v5091_v52  ;;  %v10954_v32 = vpop.eup %6713  ;;  %6739 = vpow2.f32 %v5289_v39  ;;  %v5168_v26 = vsub.f32 %v10733_v63, %v5091_v52  ;;  %5417 = vadd.xlane.f32.xlu1 %v5416_v48  ;;  %v5407_v56 = vadd.f32 %v10949_v0, %v10945_v22 }
 0xb1d   : > { %v10959_v14 = vpop.eup %6715  ;;  %6741 = vpow2.f32 %v5275_v16  ;;  %v5279_v15 = vmul.f32 1.442695, %v5173_v58  ;;  %v5281_v18 = vmul.f32 1.442695, %v5174_v27 }
 0xb1e   : > { %v5267_v36 = vmul.f32 1.442695, %v5167_v38  ;;  %v10961_v51 = vpop.eup %6717  ;;  %6743 = vpow2.f32 %v5277_v5  ;;  %v5269_v46 = vmul.f32 1.442695, %v5168_v26  ;;  %5408 = vadd.xlane.f32.xlu0 %v5407_v56  ;;  %v5094_v34 = vpop.xlane.xlu1 %5093  ;;  %v5410_v63 = vadd.f32 %v10959_v14, %v10954_v32 }
 0xb1f   : > { %v5085_v43 = vpop.xlane.xlu0 %5084  ;;  %v10965_v50 = vpop.eup %6719  ;;  %6745 = vpow2.f32 %v5279_v15  ;;  %v5169_v41 = vsub.f32 %v10769_v19, %v5094_v34  ;;  %v5170_v17 = vsub.f32 %v10759_v61, %v5094_v34 }
 0xb20   : > { %v5163_v23 = vsub.f32 %v10765_v1, %v5085_v43  ;;  %v10970_v4 = vpop.eup %6721  ;;  %6747 = vpow2.f32 %v5281_v18  ;;  %v5164_v62 = vsub.f32 %v10753_v11, %v5085_v43  ;;  %5411 = vadd.xlane.f32.xlu1 %v5410_v63  ;;  %v5401_v20 = vadd.f32 %v10965_v50, %v10961_v51 }
 0xb21   : > { %v10975_v12 = vpop.eup %6723  ;;  %6749 = vpow2.f32 %v5267_v36  ;;  %v5271_v8 = vmul.f32 1.442695, %v5169_v41  ;;  %v5273_v35 = vmul.f32 1.442695, %v5170_v17 }
 0xb22   : > { %v5259_v45 = vmul.f32 1.442695, %v5163_v23  ;;  %v10977_v19 = vpop.eup %6725  ;;  %6751 = vpow2.f32 %v5269_v46  ;;  %v5261_v61 = vmul.f32 1.442695, %v5164_v62  ;;  %5402 = vadd.xlane.f32.xlu0 %v5401_v20  ;;  %v5088_v1 = vpop.xlane.xlu1 %5087  ;;  %v5404_v31 = vadd.f32 %v10975_v12, %v10970_v4 }
 0xb23   : > { %v10981_v11 = vpop.eup %6727  ;;  %6753 = vpow2.f32 %v5271_v8  ;;  %v5165_v13 = vsub.f32 %v10781_v53, %v5088_v1  ;;  %v5166_v42 = vsub.f32 %v10775_v30, %v5088_v1 }
 0xb24   : > { %v10985_v39 = vpop.eup %6729  ;;  %6755 = vpow2.f32 %v5273_v35  ;;  %5405 = vadd.xlane.f32.xlu1 %v5404_v31  ;;  %v5395_v16 = vadd.f32 %v10981_v11, %v10977_v19  ;;  %v4747_v31 = vld [vmem:[%s6905_s22 + $0x58] sm:$0xf0] }
 0xb25   : > { %v10989_v5 = vpop.eup %6731  ;;  %6757 = vpow2.f32 %v5259_v45  ;;  %v5263_v10 = vmul.f32 1.442695, %v5165_v13  ;;  %v5265_v52 = vmul.f32 1.442695, %v5166_v42  ;;  %v4749_v13 = vpack.c.bf16 %v4747_v31, %v4747_v31 }
 0xb26   : > { %v10991_v48 = vpop.eup %6733  ;;  %6759 = vpow2.f32 %v5261_v61  ;;  %5396 = vadd.xlane.f32.xlu0 %v5395_v16  ;;  %v5398_v53 = vadd.f32 %v10989_v5, %v10985_v39 }
 0xb27   : > { %v10995_v30 = vpop.eup %6735  ;;  %6761 = vpow2.f32 %v5263_v10  ;;  %v5550_v42 = vrot.slane %v4749_v13, 2 }
 0xb28   : > { %v10997_v58 = vpop.eup %6737  ;;  %6763 = vpow2.f32 %v5265_v52  ;;  %5399 = vadd.xlane.f32.xlu1 %v5398_v53  ;;  %v5389_v27 = vadd.f32 %v10995_v30, %v10991_v48 }
 0xb29   : > { %v11001_v38 = vpop.eup %6739  ;;  %5585 = vmatprep.mubr.bf16.mxu0 %v5550_v42 }
 0xb2a   : > { %v11003_v26 = vpop.eup %6741  ;;  %5390 = vadd.xlane.f32.xlu0 %v5389_v27  ;;  %v5392_v56 = vadd.f32 %v11001_v38, %v10997_v58 }
 0xb2b   : > { %v11007_v15 = vpop.eup %6743 }
 0xb2c   : > { %v11009_v18 = vpop.eup %6745  ;;  %5393 = vadd.xlane.f32.xlu1 %v5392_v56  ;;  %v5383_v36 = vadd.f32 %v11007_v15, %v11003_v26 }
 0xb2d   : > { %v11013_v46 = vpop.eup %6747 }
 0xb2e   : > { %v11015_v34 = vpop.eup %6749  ;;  %5384 = vadd.xlane.f32.xlu0 %v5383_v36  ;;  %v5386_v43 = vadd.f32 %v11013_v46, %v11009_v18 }
 0xb2f   : > { %v11019_v63 = vpop.eup %6751 }
 0xb30   : > { %v11021_v41 = vpop.eup %6753  ;;  %5387 = vadd.xlane.f32.xlu1 %v5386_v43  ;;  %v5377_v17 = vadd.f32 %v11019_v63, %v11015_v34 }
 0xb31   : > { %v11025_v23 = vpop.eup %6755 }
 0xb32   : > { %v11027_v62 = vpop.eup %6757  ;;  %5378 = vadd.xlane.f32.xlu0 %v5377_v17  ;;  %v5380_v20 = vadd.f32 %v11025_v23, %v11021_v41 }
 0xb33   : > { %v11031_v8 = vpop.eup %6759 }
 0xb34   : > { %v11033_v35 = vpop.eup %6761  ;;  %5381 = vadd.xlane.f32.xlu1 %v5380_v20  ;;  %v5371_v45 = vadd.f32 %v11031_v8, %v11027_v62 }
 0xb35   : > { %v11037_v61 = vpop.eup %6763 }
 0xb36   : > { %5372 = vadd.xlane.f32.xlu0 %v5371_v45  ;;  %v5374_v1 = vadd.f32 %v11037_v61, %v11033_v35 }
 0xb38   : > { %5375 = vadd.xlane.f32.xlu1 %v5374_v1 }
 0xb61   : > { %v5367_v16 = vpop.xlane.xlu0 %5366 }
 0xb62   : > { %6765 = vrcp.f32 %v5367_v16 }
 0xb65   : > { %v5370_v10 = vpop.xlane.xlu1 %5369 }
 0xb66   : > { %6767 = vrcp.f32 %v5370_v10 }
 0xb67   : > { %v5361_v52 = vpop.xlane.xlu0 %5360 }
 0xb68   : > { %6769 = vrcp.f32 %v5361_v52 }
 0xb69   : > { %v5364_v53 = vpop.xlane.xlu1 %5363 }
 0xb6a   : > { %6771 = vrcp.f32 %v5364_v53 }
 0xb6b   : > { %v5355_v27 = vpop.xlane.xlu0 %5354 }
 0xb6c   : > { %6773 = vrcp.f32 %v5355_v27 }
 0xb6d   : > { %v5358_v56 = vpop.xlane.xlu1 %5357 }
 0xb6e   : > { %6775 = vrcp.f32 %v5358_v56 }
 0xb6f   : > { %v5349_v36 = vpop.xlane.xlu0 %5348  ;;  %v6766_v43 = vpop.eup %6765 }
 0xb70   : > { %6777 = vrcp.f32 %v5349_v36  ;;  %v5480_v1 = vmul.f32 %v6766_v43, %v10805_v57  ;;  %v5479_v13 = vmul.f32 %v6766_v43, %v10802_v6 }
 0xb71   : > { %v5352_v17 = vpop.xlane.xlu1 %5351 }
 0xb72   : > { %6779 = vrcp.f32 %v5352_v17 }
 0xb73   : > { %v6768_v20 = vpop.eup %6767  ;;  %v5343_v45 = vpop.xlane.xlu0 %5342 }
 0xb74   : > { %6781 = vrcp.f32 %v5343_v45  ;;  %v5482_v31 = vmul.f32 %v6768_v20, %v10815_v49  ;;  %v5481_v42 = vmul.f32 %v6768_v20, %v10812_v24 }
 0xb75   : > { %v6770_v16 = vpop.eup %6769  ;;  %v5346_v10 = vpop.xlane.xlu1 %5345 }
 0xb76   : > { %6783 = vrcp.f32 %v5346_v10  ;;  %v5530_v52 = vpack.c.bf16 %v5482_v31, %v5480_v1  ;;  %v5529_v53 = vpack.c.bf16 %v5481_v42, %v5479_v13  ;;  %v5476_v36 = vmul.f32 %v6770_v16, %v10821_v44 }
 0xb77   : > { %v6772_v27 = vpop.eup %6771  ;;  %v5337_v56 = vpop.xlane.xlu0 %5336  ;;  %v5475_v17 = vmul.f32 %v6770_v16, %v10817_v60 }
 0xb78   : > { %6785 = vrcp.f32 %v5337_v56  ;;  %5553 = vmatprep.subr.bf16.mxu0 %v5530_v52  ;;  %v5478_v57 = vmul.f32 %v6772_v27, %v10831_v37  ;;  %v5477_v49 = vmul.f32 %v6772_v27, %v10826_v28 }
 0xb79   : > { %v6774_v6 = vpop.eup %6773  ;;  %v5340_v43 = vpop.xlane.xlu1 %5339  ;;  %5554 = vmatpush1.bf16.msra.mxu0 %v5529_v53 }
 0xb7a   : > { %6787 = vrcp.f32 %v5340_v43  ;;  %v5528_v24 = vpack.c.bf16 %v5478_v57, %v5476_v36  ;;  %v5527_v20 = vpack.c.bf16 %v5477_v49, %v5475_v17  ;;  %v5472_v31 = vmul.f32 %v6774_v6, %v10837_v33  ;;  %v12159_v49 = vld [vmem:[#allocation34_spill] sm:$0xff] }
 0xb7b   : > { %v6776_v45 = vpop.eup %6775  ;;  %v5331_v1 = vpop.xlane.xlu0 %5330  ;;  %v5471_v37 = vmul.f32 %v6774_v6, %v10833_v59  ;;  %v12160_v6 = vld [vmem:[#allocation99_spill] sm:$0xff] }
 0xb7c   : > { %6789 = vrcp.f32 %v5331_v1  ;;  %5555 = vmatprep.subr.bf16.mxu0 %v5528_v24  ;;  %v5474_v44 = vmul.f32 %v6776_v45, %v10847_v54  ;;  %v5473_v60 = vmul.f32 %v6776_v45, %v10842_v40  ;;  %v12161_v24 = vld [vmem:[#allocation90_spill] sm:$0xff] }
 0xb7d   : > { %v6778_v13 = vpop.eup %6777  ;;  %v5334_v28 = vpop.xlane.xlu1 %5333  ;;  %5556 = vmatpush1.bf16.msra.mxu0 %v5527_v20  ;;  %v12162_v1 = vld [vmem:[#allocation6_spill] sm:$0xff] }
 0xb7e   : > { %6791 = vrcp.f32 %v5334_v28  ;;  %v5526_v42 = vpack.c.bf16 %v5474_v44, %v5472_v31  ;;  %v5525_v16 = vpack.c.bf16 %v5473_v60, %v5471_v37  ;;  %v5468_v53 = vmul.f32 %v6778_v13, %v10853_v7  ;;  %v12163_v44 = vld [vmem:[#allocation98_spill] sm:$0xff]  ;;  %v12164_v60 = vld [vmem:[#allocation32_spill] sm:$0xff] }
 0xb7f   : > { %v6780_v10 = vpop.eup %6779  ;;  %v5325_v52 = vpop.xlane.xlu0 %5324  ;;  %v5467_v54 = vmul.f32 %v6778_v13, %v10849_v3  ;;  %v12165_v28 = vld [vmem:[#allocation4_spill] sm:$0xff] }
 0xb80   : > { %6793 = vrcp.f32 %v5325_v52  ;;  %5557 = vmatprep.subr.bf16.mxu0 %v5526_v42  ;;  %v5470_v33 = vmul.f32 %v6780_v10, %v10861_v29  ;;  %v5469_v59 = vmul.f32 %v6780_v10, %v10857_v21 }
 0xb81   : > { %v6782_v27 = vpop.eup %6781  ;;  %v5328_v40 = vpop.xlane.xlu1 %5327  ;;  %5558 = vmatpush1.bf16.msra.mxu0 %v5525_v16 }
 0xb82   : > { %6795 = vrcp.f32 %v5328_v40  ;;  %v5524_v56 = vpack.c.bf16 %v5470_v33, %v5468_v53  ;;  %v5523_v36 = vpack.c.bf16 %v5469_v59, %v5467_v54  ;;  %v5464_v17 = vmul.f32 %v6782_v27, %v10867_v47  ;;  %v12166_v53 = vld [vmem:[#allocation127_spill] sm:$0xff]  ;;  %v12167_v54 = vld [vmem:[#allocation104_spill] sm:$0xff] }
 0xb83   : > { %v6784_v57 = vpop.eup %6783  ;;  %v5463_v43 = vmul.f32 %v6782_v27, %v12160_v6  ;;  %v12168_v27 = vld [vmem:[#allocation103_spill] sm:$0xff] }
 0xb84   : > { %5559 = vmatprep.subr.bf16.mxu0 %v5524_v56  ;;  %v5466_v7 = vmul.f32 %v6784_v57, %v12159_v49  ;;  %v5465_v29 = vmul.f32 %v6784_v57, %v12161_v24  ;;  %v12169_v56 = vld [vmem:[#allocation105_spill] sm:$0xff]  ;;  %v12170_v6 = vld [vmem:[#allocation123_spill] sm:$0xff] }
 0xb85   : > { %v6786_v20 = vpop.eup %6785  ;;  %5560 = vmatpush1.bf16.msra.mxu0 %v5523_v36  ;;  %v12171_v24 = vld [vmem:[#allocation125_spill] sm:$0xff] }
 0xb86   : > { %v5522_v3 = vpack.c.bf16 %v5466_v7, %v5464_v17  ;;  %v5521_v21 = vpack.c.bf16 %v5465_v29, %v5463_v43  ;;  %v5460_v31 = vmul.f32 %v6786_v20, %v12162_v1  ;;  %v5459_v13 = vmul.f32 %v6786_v20, %v12164_v60  ;;  %v12172_v20 = vld [vmem:[#allocation18_spill] sm:$0xff] }
 0xb87   : > { %v6788_v45 = vpop.eup %6787 }
 0xb88   : > { %5561 = vmatprep.subr.bf16.mxu0 %v5522_v3  ;;  %v5462_v37 = vmul.f32 %v6788_v45, %v12163_v44  ;;  %v5461_v47 = vmul.f32 %v6788_v45, %v12165_v28 }
 0xb89   : > { %v6790_v42 = vpop.eup %6789  ;;  %5562 = vmatpush1.bf16.msra.mxu0 %v5521_v21  ;;  %v12173_v21 = vld [vmem:[#allocation126_spill] sm:$0xff] }
 0xb8a   : > { %v5520_v16 = vpack.c.bf16 %v5462_v37, %v5460_v31  ;;  %v5519_v10 = vpack.c.bf16 %v5461_v47, %v5459_v13  ;;  %v5456_v33 = vmul.f32 %v6790_v42, %v12166_v53  ;;  %v5455_v40 = vmul.f32 %v6790_v42, %v12168_v27 }
 0xb8b   : > { %v6792_v52 = vpop.eup %6791 }
 0xb8c   : > { %5563 = vmatprep.subr.bf16.mxu0 %v5520_v16  ;;  %v5458_v59 = vmul.f32 %v6792_v52, %v12167_v54  ;;  %v5457_v36 = vmul.f32 %v6792_v52, %v12169_v56 }
 0xb8d   : > { %v6794_v57 = vpop.eup %6793  ;;  %5564 = vmatpush1.bf16.msra.mxu0 %v5519_v10 }
 0xb8e   : > { %v5518_v17 = vpack.c.bf16 %v5458_v59, %v5456_v33  ;;  %v5517_v49 = vpack.c.bf16 %v5457_v36, %v5455_v40  ;;  %v5452_v43 = vmul.f32 %v6794_v57, %v12170_v6  ;;  %v5451_v3 = vmul.f32 %v6794_v57, %v12172_v20 }
 0xb8f   : > { %v6796_v7 = vpop.eup %6795 }
 0xb90   : > { %5565 = vmatprep.subr.bf16.mxu0 %v5518_v17  ;;  %v5454_v29 = vmul.f32 %v6796_v7, %v12171_v24  ;;  %v5453_v45 = vmul.f32 %v6796_v7, %v12173_v21 }
 0xb91   : > { %5566 = vmatpush1.bf16.msra.mxu0 %v5517_v49 }
 0xb92   : > { %v5516_v1 = vpack.c.bf16 %v5454_v29, %v5452_v43  ;;  %v5515_v31 = vpack.c.bf16 %v5453_v45, %v5451_v3 }
 0xb94   : > { %5567 = vmatprep.subr.bf16.mxu0 %v5516_v1 }
 0xb95   : > { %5568 = vmatpush1.bf16.msra.mxu0 %v5515_v31 }
 0xba1   : > { %v5415_v44 = vpop.xlane.xlu0 %5414 }
 0xba2   : > { %6797 = vrcp.f32 %v5415_v44 }
 0xba5   : > { %v5418_v37 = vpop.xlane.xlu1 %5417 }
 0xba6   : > { %6799 = vrcp.f32 %v5418_v37 }
 0xba7   : > { %v5409_v60 = vpop.xlane.xlu0 %5408 }
 0xba8   : > { %6801 = vrcp.f32 %v5409_v60 }
 0xba9   : > { %v5412_v13 = vpop.xlane.xlu1 %5411 }
 0xbaa   : > { %6803 = vrcp.f32 %v5412_v13 }
 0xbab   : > { %v5403_v28 = vpop.xlane.xlu0 %5402 }
 0xbac   : > { %6805 = vrcp.f32 %v5403_v28 }
 0xbad   : > { %v5406_v47 = vpop.xlane.xlu1 %5405 }
 0xbae   : > { %6807 = vrcp.f32 %v5406_v47 }
 0xbaf   : > { %v5397_v42 = vpop.xlane.xlu0 %5396  ;;  %v6798_v16 = vpop.eup %6797 }
 0xbb0   : > { %6809 = vrcp.f32 %v5397_v42  ;;  %v5512_v33 = vmul.f32 %v6798_v16, %v10933_v25  ;;  %v5511_v59 = vmul.f32 %v6798_v16, %v10930_v9 }
 0xbb1   : > { %v5400_v10 = vpop.xlane.xlu1 %5399 }
 0xbb2   : > { %6811 = vrcp.f32 %v5400_v10 }
 0xbb3   : > { %v6800_v52 = vpop.eup %6799  ;;  %v5391_v53 = vpop.xlane.xlu0 %5390 }
 0xbb4   : > { %6813 = vrcp.f32 %v5391_v53  ;;  %v5514_v54 = vmul.f32 %v6800_v52, %v10943_v2  ;;  %v5513_v27 = vmul.f32 %v6800_v52, %v10940_v55 }
 0xbb5   : > { %v6802_v40 = vpop.eup %6801  ;;  %v5394_v56 = vpop.xlane.xlu1 %5393 }
 0xbb6   : > { %6815 = vrcp.f32 %v5394_v56  ;;  %v5546_v36 = vpack.c.bf16 %v5514_v54, %v5512_v33  ;;  %v5545_v57 = vpack.c.bf16 %v5513_v27, %v5511_v59  ;;  %v5508_v7 = vmul.f32 %v6802_v40, %v10949_v0 }
 0xbb7   : > { %v6804_v17 = vpop.eup %6803  ;;  %v5385_v49 = vpop.xlane.xlu0 %5384  ;;  %v5507_v6 = vmul.f32 %v6802_v40, %v10945_v22 }
 0xbb8   : > { %6817 = vrcp.f32 %v5385_v49  ;;  %5569 = vmatprep.subr.bf16.mxu0 %v5546_v36  ;;  %v5510_v25 = vmul.f32 %v6804_v17, %v10959_v14  ;;  %v5509_v2 = vmul.f32 %v6804_v17, %v10954_v32  ;;  %v4746_v36 = vld [vmem:[%s6905_s22 + $0x50] sm:$0xf0] }
 0xbb9   : > { %v6806_v9 = vpop.eup %6805  ;;  %v5388_v43 = vpop.xlane.xlu1 %5387  ;;  %5570 = vmatpush2.bf16.msra.mxu0 %v5545_v57  ;;  %v4748_v17 = vpack.c.bf16 %v4746_v36, %v4746_v36 }
 0xbba   : > { %6819 = vrcp.f32 %v5388_v43  ;;  %v5544_v55 = vpack.c.bf16 %v5510_v25, %v5508_v7  ;;  %v5543_v24 = vpack.c.bf16 %v5509_v2, %v5507_v6  ;;  %v5504_v3 = vmul.f32 %v6806_v9, %v10965_v50 }
 0xbbb   : > { %v6808_v29 = vpop.eup %6807  ;;  %v5379_v20 = vpop.xlane.xlu0 %5378  ;;  %v5503_v14 = vmul.f32 %v6806_v9, %v10961_v51  ;;  %v5549_v25 = vrot.slane %v4748_v17, 2 }
 0xbbc   : > { %6821 = vrcp.f32 %v5379_v20  ;;  %5571 = vmatprep.subr.bf16.mxu0 %v5544_v55  ;;  %v5506_v0 = vmul.f32 %v6808_v29, %v10975_v12  ;;  %v5505_v22 = vmul.f32 %v6808_v29, %v10970_v4 }
 0xbbd   : > { %v6810_v21 = vpop.eup %6809  ;;  %v5382_v32 = vpop.xlane.xlu1 %5381  ;;  %5572 = vmatpush2.bf16.msra.mxu0 %v5543_v24 }
 0xbbe   : > { %6823 = vrcp.f32 %v5382_v32  ;;  %v5542_v45 = vpack.c.bf16 %v5506_v0, %v5504_v3  ;;  %v5541_v1 = vpack.c.bf16 %v5505_v22, %v5503_v14  ;;  %v5500_v37 = vmul.f32 %v6810_v21, %v10981_v11 }
 0xbbf   : > { %v6812_v31 = vpop.eup %6811  ;;  %v5373_v44 = vpop.xlane.xlu0 %5372  ;;  %v5499_v12 = vmul.f32 %v6810_v21, %v10977_v19 }
 0xbc0   : > { %6825 = vrcp.f32 %v5373_v44  ;;  %5573 = vmatprep.subr.bf16.mxu0 %v5542_v45  ;;  %v5502_v50 = vmul.f32 %v6812_v31, %v10989_v5  ;;  %v5501_v51 = vmul.f32 %v6812_v31, %v10985_v39 }
 0xbc1   : > { %v6814_v60 = vpop.eup %6813  ;;  %v5376_v4 = vpop.xlane.xlu1 %5375  ;;  %5574 = vmatpush2.bf16.msra.mxu0 %v5541_v1 }
 0xbc2   : > { %6827 = vrcp.f32 %v5376_v4  ;;  %v5540_v13 = vpack.c.bf16 %v5502_v50, %v5500_v37  ;;  %v5539_v28 = vpack.c.bf16 %v5501_v51, %v5499_v12  ;;  %v5496_v42 = vmul.f32 %v6814_v60, %v10995_v30 }
 0xbc3   : > { %v6816_v47 = vpop.eup %6815  ;;  %v5495_v16 = vmul.f32 %v6814_v60, %v10991_v48 }
 0xbc4   : > { %5575 = vmatprep.subr.bf16.mxu0 %v5540_v13  ;;  %v5498_v11 = vmul.f32 %v6816_v47, %v11001_v38  ;;  %v5497_v5 = vmul.f32 %v6816_v47, %v10997_v58 }
 0xbc5   : > { %v6818_v10 = vpop.eup %6817  ;;  %5576 = vmatpush2.bf16.msra.mxu0 %v5539_v28 }
 0xbc6   : > { %v5538_v19 = vpack.c.bf16 %v5498_v11, %v5496_v42  ;;  %v5537_v39 = vpack.c.bf16 %v5497_v5, %v5495_v16  ;;  %v5492_v53 = vmul.f32 %v6818_v10, %v11007_v15  ;;  %v5491_v54 = vmul.f32 %v6818_v10, %v11003_v26 }
 0xbc7   : > { %v6820_v52 = vpop.eup %6819 }
 0xbc8   : > { %5577 = vmatprep.subr.bf16.mxu0 %v5538_v19  ;;  %v5494_v33 = vmul.f32 %v6820_v52, %v11013_v46  ;;  %v5493_v30 = vmul.f32 %v6820_v52, %v11009_v18 }
 0xbc9   : > { %v6822_v38 = vpop.eup %6821  ;;  %5578 = vmatpush2.bf16.msra.mxu0 %v5537_v39 }
 0xbca   : > { %v5536_v48 = vpack.c.bf16 %v5494_v33, %v5492_v53  ;;  %v5535_v59 = vpack.c.bf16 %v5493_v30, %v5491_v54  ;;  %v5488_v27 = vmul.f32 %v6822_v38, %v11019_v63  ;;  %v5487_v56 = vmul.f32 %v6822_v38, %v11015_v34 }
 0xbcb   : > { %v6824_v58 = vpop.eup %6823 }
 0xbcc   : > { %5579 = vmatprep.subr.bf16.mxu0 %v5536_v48  ;;  %v5490_v40 = vmul.f32 %v6824_v58, %v11025_v23  ;;  %v5489_v15 = vmul.f32 %v6824_v58, %v11021_v41 }
 0xbcd   : > { %v6826_v46 = vpop.eup %6825  ;;  %5580 = vmatpush2.bf16.msra.mxu0 %v5535_v59 }
 0xbce   : > { %v5534_v26 = vpack.c.bf16 %v5490_v40, %v5488_v27  ;;  %v5533_v57 = vpack.c.bf16 %v5489_v15, %v5487_v56  ;;  %v5484_v49 = vmul.f32 %v6826_v46, %v11031_v8  ;;  %v5483_v63 = vmul.f32 %v6826_v46, %v11027_v62 }
 0xbcf   : > { %v6828_v18 = vpop.eup %6827 }
 0xbd0   : > { %5581 = vmatprep.subr.bf16.mxu0 %v5534_v26  ;;  %v5486_v7 = vmul.f32 %v6828_v18, %v11037_v61  ;;  %v5485_v34 = vmul.f32 %v6828_v18, %v11033_v35 }
 0xbd1   : > { %5582 = vmatpush2.bf16.msra.mxu0 %v5533_v57 }
 0xbd2   : > { %v5532_v41 = vpack.c.bf16 %v5486_v7, %v5484_v49  ;;  %v5531_v23 = vpack.c.bf16 %v5485_v34, %v5483_v63 }
 0xbd4   : > { %5583 = vmatprep.subr.bf16.mxu0 %v5532_v41 }
 0xbd5   : > { %5584 = vmatpush2.bf16.msra.mxu0 %v5531_v23 }
 0xbd8   : > { %5586 = vmatmul.mubr.bf16.vlgmr.msra.gmra.mxu0 %v5549_v25 }
 0xc98   : > { %v5587_v6 = vpop.f32.mrf.mxu0 }
 0xc99   : > { %v5596_v2 = vrot.slane %v5587_v6, 4 }
 0xc9a   : > { %v5589_v9 = vpop.f32.mrf.mxu0 }
 0xc9b   : > { %5600 = vst [vmem:[%s8912_s13 + $0x10] sm:$0xf0] %v5596_v2  ;;  %v5597_v43 = vrot.slane %v5589_v9, 4 }
 0xc9c   : > { %v5591_v8 = vpop.f32.mrf.mxu0 }
 0xc9d   : > { %5601 = vst [vmem:[%s8912_s13 + $0x18] sm:$0xf0] %v5597_v43 }
 0xc9e   : > { %v5592_v61 = vpop.f32.mrf.mxu0 }
 0xc9f PF: > { %s14_s15 = sadd.s32 1, %s6851_s15  }
 0xca0   : > { %p11_p4 = scmp.ge.s32.totalorder %s14_s15, 4  }
 0xca2   :  { %13 = sbr.rel (!%p11_p4) target bundleno = 1 (0x1), region = 66 }

</bundles_post_ra>
